<compile_context>
chip_gen: v6e
topology: v6e:2x2x1
jax: 0.10.0
libtpu: 0.0.40
codegen_flags: <defaults>
</compile_context>

<pallas_src>
import functools

import jax
import jax.numpy as jnp
from jax.experimental import pallas as pl
from jax.experimental.pallas import tpu as pltpu


_TAPS = tuple((dh, dw) for dh in range(3) for dw in range(3))


def _row_tile(total, target=512):
    """Largest divisor of `total` that is <= target and a multiple of 8
    (falls back to the full extent)."""
    for d in range(min(total, target), 0, -1):
        if total % d == 0 and (d % 8 == 0 or d == total):
            return d
    return total


# ----------------------------------------------------------------------------
# Fused kernel: backbone (conv3x3 -> LeakyReLU -> conv3x3) once per image,
# projection heads per (H*W) row tile.
# ----------------------------------------------------------------------------
def _controlnet_kernel(xp_ref, w1_ref, b1_ref, w2_ref, b2_ref,
                       pw1_ref, pw2_ref, *refs,
                       H, W, c_in, n_proj, tq, negative_slope):
    # xp_ref : (1, H+2, W+2, c_in)        bf16  zero-padded NHWC image
    # w1_ref : (9, c_in, 4*c_in)          bf16  per-tap conv1 weight
    # b1_ref : (1, 4*c_in)                f32
    # w2_ref : (9, 4*c_in, c_in)          bf16  per-tap conv2 weight
    # b2_ref : (1, c_in)                  f32
    # pw1_ref: (c_in, n_proj*c_in)        bf16  all heads' 1x1 proj #1 fused
    # pw2_ref: (n_proj, c_in, c_proj)     bf16  1x1 proj #2 (zero-init in module)
    out_refs = refs[:n_proj]              # each block (1, tq, c_proj)
    h1pad_ref, h2_ref = refs[n_proj:]     # VMEM scratch (persist across tiles)
    c4 = 4 * c_in
    ns = negative_slope
    Wp = W + 16                           # padded width; interior at cols [8, 8+W)

    def lrelu(v):
        return jnp.where(v >= 0, v, ns * v)

    # ---------------- backbone: once per image (row tile 0) -----------------
    @pl.when(pl.program_id(1) == 0)
    def _backbone():
        zdt = h1pad_ref.dtype
        # Zero only the halo strips (interior is fully overwritten below).
        # Column strips are 8-wide, sublane-aligned slabs -> unmasked stores.
        h1pad_ref[0:1, :, :] = jnp.zeros((1, Wp, c4), zdt)
        h1pad_ref[H + 1:H + 2, :, :] = jnp.zeros((1, Wp, c4), zdt)
        h1pad_ref[1:H + 1, 0:8, :] = jnp.zeros((H, 8, c4), zdt)
        h1pad_ref[1:H + 1, 8 + W:Wp, :] = jnp.zeros((H, 8, c4), zdt)

        # conv1 (3x3, pad=1): 9 shifted-window matmuls, f32 accumulation.
        acc1 = jnp.zeros((H * W, c4), jnp.float32)
        for k, (dh, dw) in enumerate(_TAPS):
            xt = xp_ref[0, dh:dh + H, dw:dw + W, :].reshape(H * W, c_in)
            acc1 = acc1 + jnp.dot(xt, w1_ref[k],
                                  preferred_element_type=jnp.float32)
        h1 = lrelu(acc1 + b1_ref[...])                      # (H*W, 4*c_in) f32
        # Store bf16 into the sublane-aligned interior (column offset 8).
        h1pad_ref[1:H + 1, 8:8 + W, :] = h1.reshape(H, W, c4).astype(zdt)

        # conv2 (3x3, pad=1): same shifted-accumulate on the padded
        # intermediate; reads start at column 7+dw (dw=1 is aligned).
        acc2 = jnp.zeros((H * W, c_in), jnp.float32)
        for k, (dh, dw) in enumerate(_TAPS):
            ht = h1pad_ref[dh:dh + H, 7 + dw:7 + dw + W, :].reshape(H * W, c4)
            acc2 = acc2 + jnp.dot(ht, w2_ref[k],
                                  preferred_element_type=jnp.float32)
        h2_ref[...] = (acc2 + b2_ref[...]).astype(h2_ref.dtype)  # backbone out

    # ---------------- projection heads: per row tile -------------------------
    row0 = pl.multiple_of(pl.program_id(1) * tq, tq)
    h2t = h2_ref[pl.ds(row0, tq), :]                        # (tq, c_in) bf16
    # All heads' first 1x1 convs fused into a single MXU push.
    t1 = lrelu(jnp.dot(h2t, pw1_ref[...],
                       preferred_element_type=jnp.float32))  # (tq, n_proj*c_in)
    for p in range(n_proj):
        tp = t1[:, p * c_in:(p + 1) * c_in].astype(pw2_ref.dtype)
        o = jnp.dot(tp, pw2_ref[p], preferred_element_type=jnp.float32)
        out_refs[p][0] = o.astype(out_refs[p].dtype)         # lane-dense store


# ----------------------------------------------------------------------------
# Parameters (matching the PyTorch module's 'simple' bottleneck structure)
# ----------------------------------------------------------------------------
def init_params(key, c_in, c_proj, proj_blocks):
    c4 = 4 * c_in
    n_proj = len(proj_blocks)
    k1, k2, k3, k4, k5 = jax.random.split(key, 5)
    s1 = 1.0 / jnp.sqrt(9.0 * c_in)
    s2 = 1.0 / jnp.sqrt(9.0 * c4)
    return {
        # 3x3 conv weights stored per-tap as (9, Cin, Cout); tap index
        # k = dh*3 + dw, i.e. torch_w.permute(2, 3, 1, 0).reshape(9, Cin, Cout)
        "bb_w1": jax.random.normal(k1, (9, c_in, c4), jnp.float32) * s1,
        "bb_b1": jax.random.normal(k2, (c4,), jnp.float32) * s1,
        "bb_w2": jax.random.normal(k3, (9, c4, c_in), jnp.float32) * s2,
        "bb_b2": jax.random.normal(k4, (c_in,), jnp.float32) * s2,
        # projection heads stacked on a leading axis; proj_w1[p][ci, co] =
        # torch_pw1[co, ci, 0, 0]; last 1x1 conv zero-init (nn.init.constant_).
        "proj_w1": jax.random.normal(k5, (n_proj, c_in, c_in), jnp.float32)
                   / jnp.sqrt(float(c_in)),
        "proj_w2": jnp.zeros((n_proj, c_in, c_proj), jnp.float32),
    }


# ----------------------------------------------------------------------------
# Forward (public interface NCHW, like PyTorch)
# ----------------------------------------------------------------------------
def controlnet_forward(params, x_nchw, proj_blocks, out_dtype=jnp.bfloat16):
    N, c_in, H, W = x_nchw.shape
    c4 = 4 * c_in
    n_proj = len(proj_blocks)
    c_proj = params["proj_w2"].shape[-1]
    cdt = jnp.bfloat16
    hw = H * W
    tq = _row_tile(hw)                 # projection/output row tile (target 512)
    n_tiles = hw // tq

    # NCHW -> NHWC, pad the 3x3 halo, cast to bf16 (cheap XLA layout ops).
    x = jnp.transpose(x_nchw, (0, 2, 3, 1))
    xp = jnp.pad(x, ((0, 0), (1, 1), (1, 1), (0, 0))).astype(cdt)

    w1 = params["bb_w1"].astype(cdt)                                # (9, c_in, c4)
    b1 = params["bb_b1"].reshape(1, c4).astype(jnp.float32)
    w2 = params["bb_w2"].astype(cdt)                                # (9, c4, c_in)
    b2 = params["bb_b2"].reshape(1, c_in).astype(jnp.float32)
    # Concatenate all heads' first 1x1 conv along the output axis -> one matmul.
    pw1cat = jnp.transpose(params["proj_w1"], (1, 0, 2)) \
                .reshape(c_in, n_proj * c_in).astype(cdt)
    pw2 = params["proj_w2"].astype(cdt)                             # (n_proj, c_in, c_proj)

    kern = functools.partial(_controlnet_kernel, H=H, W=W, c_in=c_in,
                             n_proj=n_proj, tq=tq, negative_slope=0.2)

    out_shapes = tuple(jax.ShapeDtypeStruct((N, hw, c_proj), out_dtype)
                       for _ in range(n_proj))
    out_specs = tuple(pl.BlockSpec((1, tq, c_proj), lambda n, t: (n, t, 0))
                      for _ in range(n_proj))

    outs = pl.pallas_call(
        kern,
        out_shape=out_shapes,
        grid=(N, n_tiles),
        in_specs=[
            pl.BlockSpec((1, H + 2, W + 2, c_in), lambda n, t: (n, 0, 0, 0)),
            pl.BlockSpec((9, c_in, c4), lambda n, t: (0, 0, 0)),
            pl.BlockSpec((1, c4), lambda n, t: (0, 0)),
            pl.BlockSpec((9, c4, c_in), lambda n, t: (0, 0, 0)),
            pl.BlockSpec((1, c_in), lambda n, t: (0, 0)),
            pl.BlockSpec((c_in, n_proj * c_in), lambda n, t: (0, 0)),
            pl.BlockSpec((n_proj, c_in, c_proj), lambda n, t: (0, 0, 0)),
        ],
        out_specs=out_specs,
        scratch_shapes=[
            # zero-padded conv1 output, bf16, interior starts at column 8
            pltpu.VMEM((H + 2, W + 16, c4), cdt),
            # backbone output, bf16, persists across row tiles of one image
            pltpu.VMEM((hw, c_in), cdt),
        ],
        compiler_params=pltpu.CompilerParams(
            # batch axis across TensorCores; row tiles sequential (scratch reuse)
            dimension_semantics=("parallel", "arbitrary"),
            # working set is ~16 MiB at real shapes (H=W=64, c_proj=2048,
            # n_proj=3, tq=512, bf16 everywhere) -> safe on v7x's 64 MiB VMEM.
            vmem_limit_bytes=32 * 1024 * 1024),
    )(xp, w1, b1, w2, b2, pw1cat, pw2)

    # Scatter results to their proj_blocks slots, reshape flat -> NCHW.
    proj_outputs = [None for _ in range(max(proj_blocks) + 1)]
    for i, idx in enumerate(proj_blocks):
        o = outs[i].reshape(N, H, W, c_proj)
        proj_outputs[idx] = jnp.transpose(o, (0, 3, 1, 2))
    return proj_outputs


# ----------------------------------------------------------------------------
# Pure-JAX reference with the same bf16 cast points (for a tolerance check).
# ----------------------------------------------------------------------------
def _ref_forward(params, x_nchw, proj_blocks, out_dtype=jnp.bfloat16):
    N, c_in, H, W = x_nchw.shape
    c4 = 4 * c_in
    cdt = jnp.bfloat16
    ns = 0.2
    lrelu = lambda v: jnp.where(v >= 0, v, ns * v)

    x = jnp.transpose(x_nchw, (0, 2, 3, 1))
    xp = jnp.pad(x, ((0, 0), (1, 1), (1, 1), (0, 0))).astype(cdt)
    w1 = params["bb_w1"].astype(cdt)
    w2 = params["bb_w2"].astype(cdt)
    b1 = params["bb_b1"].astype(jnp.float32)
    b2 = params["bb_b2"].astype(jnp.float32)
    pw1 = params["proj_w1"].astype(cdt)
    pw2 = params["proj_w2"].astype(cdt)

    acc1 = jnp.zeros((N, H, W, c4), jnp.float32)
    for k, (dh, dw) in enumerate(_TAPS):
        acc1 = acc1 + jnp.einsum('nhwc,cd->nhwd', xp[:, dh:dh + H, dw:dw + W, :],
                                 w1[k], preferred_element_type=jnp.float32)
    h1 = lrelu(acc1 + b1).astype(cdt)
    h1p = jnp.pad(h1, ((0, 0), (1, 1), (1, 1), (0, 0)))
    acc2 = jnp.zeros((N, H, W, c_in), jnp.float32)
    for k, (dh, dw) in enumerate(_TAPS):
        acc2 = acc2 + jnp.einsum('nhwc,cd->nhwd', h1p[:, dh:dh + H, dw:dw + W, :],
                                 w2[k], preferred_element_type=jnp.float32)
    h2 = (acc2 + b2).astype(cdt)

    outs = [None for _ in range(max(proj_blocks) + 1)]
    for i, idx in enumerate(proj_blocks):
        t = lrelu(jnp.einsum('nhwc,cd->nhwd', h2, pw1[i],
                             preferred_element_type=jnp.float32)).astype(cdt)
        o = jnp.einsum('nhwc,cd->nhwd', t, pw2[i],
                       preferred_element_type=jnp.float32).astype(out_dtype)
        outs[idx] = jnp.transpose(o, (0, 3, 1, 2))
    return outs


if __name__ == "__main__":
    # small, forward-consistent shapes
    N, C_IN, H, W = 2, 4, 16, 16
    C_PROJ = 32
    PROJ_BLOCKS = [0, 2]

    key = jax.random.PRNGKey(0)
    kx, kp, kz = jax.random.split(key, 3)
    x = jax.random.normal(kx, (N, C_IN, H, W), jnp.float32)
    params = init_params(kp, C_IN, C_PROJ, PROJ_BLOCKS)
    # The module zero-inits the last projection conv (outputs would be all
    # zeros); use small random weights here so the numerical check is
    # meaningful. Forward semantics are unchanged.
    params = dict(params)
    params["proj_w2"] = 0.05 * jax.random.normal(
        kz, params["proj_w2"].shape, jnp.float32)

    outs = controlnet_forward(params, x, PROJ_BLOCKS)
    refs = _ref_forward(params, x, PROJ_BLOCKS)

    for o, r in zip(outs, refs):
        if o is None:
            assert r is None
            continue
        jax.block_until_ready(o)
        assert o.shape == (N, C_PROJ, H, W), o.shape
        of = o.astype(jnp.float32)
        rf = r.astype(jnp.float32)
        err = float(jnp.max(jnp.abs(of - rf)))
        scale = float(jnp.max(jnp.abs(rf))) + 1e-6
        # bf16 activations / f32 accumulation in both paths -> tight agreement
        assert err <= 1e-2 + 2e-2 * scale, (err, scale)
    assert outs[1] is None
    print("KERNEL_OK")
</pallas_src>

<mosaic_0001>
module attributes {stable_mosaic.version = 11 : i64} {
  func.func @_controlnet_kernel(%arg0: i32, %arg1: i32, %arg2: memref<1x18x18x4xbf16, #tpu.memory_space<vmem>>, %arg3: memref<9x4x16xbf16, #tpu.memory_space<vmem>>, %arg4: memref<1x16xf32, #tpu.memory_space<vmem>>, %arg5: memref<9x16x4xbf16, #tpu.memory_space<vmem>>, %arg6: memref<1x4xf32, #tpu.memory_space<vmem>>, %arg7: memref<4x8xbf16, #tpu.memory_space<vmem>>, %arg8: memref<2x4x32xbf16, #tpu.memory_space<vmem>>, %arg9: memref<1x256x32xbf16, #tpu.memory_space<vmem>>, %arg10: memref<1x256x32xbf16, #tpu.memory_space<vmem>>, %arg11: memref<18x32x16xbf16, #tpu.memory_space<vmem>>, %arg12: memref<256x4xbf16, #tpu.memory_space<vmem>>) attributes {dimension_semantics = [#tpu.dimension_semantics<parallel>, #tpu.dimension_semantics<arbitrary>], iteration_bounds = array<i64: 2, 1>, scalar_prefetch = 0 : i64, scratch_operands = 2 : i64, tpu.core_type = #tpu.core_type<tc>, window_params = [{transform_indices = @transform_0, window_bounds = array<i64: 1, 18, 18, 4>}, {pipeline_mode = #tpu.pipeline_mode<synchronous>, transform_indices = @transform_1, window_bounds = array<i64: 9, 4, 16>}, {pipeline_mode = #tpu.pipeline_mode<synchronous>, transform_indices = @transform_2, window_bounds = array<i64: 1, 16>}, {pipeline_mode = #tpu.pipeline_mode<synchronous>, transform_indices = @transform_3, window_bounds = array<i64: 9, 16, 4>}, {pipeline_mode = #tpu.pipeline_mode<synchronous>, transform_indices = @transform_4, window_bounds = array<i64: 1, 4>}, {pipeline_mode = #tpu.pipeline_mode<synchronous>, transform_indices = @transform_5, window_bounds = array<i64: 4, 8>}, {pipeline_mode = #tpu.pipeline_mode<synchronous>, transform_indices = @transform_6, window_bounds = array<i64: 2, 4, 32>}, {transform_indices = @transform_7, window_bounds = array<i64: 1, 256, 32>}, {transform_indices = @transform_8, window_bounds = array<i64: 1, 256, 32>}]} {
    %c0_i32 = arith.constant 0 : i32
    %0 = arith.cmpi eq, %arg1, %c0_i32 : i32
    %1 = arith.extui %0 : i1 to i32
    %c0_i32_0 = arith.constant 0 : i32
    %2 = arith.cmpi ne, %1, %c0_i32_0 : i32
    scf.if %2 {
      %cst_18 = arith.constant 0.000000e+00 : bf16
      %32 = vector.broadcast %cst_18 : bf16 to vector<1x32x16xbf16>
      %c0_19 = arith.constant 0 : index
      %c0_20 = arith.constant 0 : index
      %c0_21 = arith.constant 0 : index
      %33 = vector.load %arg11[%c0_19, %c0_20, %c0_21] : memref<18x32x16xbf16, #tpu.memory_space<vmem>>, vector<1x32x16xbf16>
      tpu.vector_store %arg11[%c0_19, %c0_20, %c0_21], %32 {strides = array<i32>} : memref<18x32x16xbf16, #tpu.memory_space<vmem>>, vector<1x32x16xbf16>,
      %cst_22 = arith.constant 0.000000e+00 : bf16
      %34 = vector.broadcast %cst_22 : bf16 to vector<1x32x16xbf16>
      %c17 = arith.constant 17 : index
      %c0_23 = arith.constant 0 : index
      %c0_24 = arith.constant 0 : index
      %35 = vector.load %arg11[%c17, %c0_23, %c0_24] : memref<18x32x16xbf16, #tpu.memory_space<vmem>>, vector<1x32x16xbf16>
      tpu.vector_store %arg11[%c17, %c0_23, %c0_24], %34 {strides = array<i32>} : memref<18x32x16xbf16, #tpu.memory_space<vmem>>, vector<1x32x16xbf16>,
      %cst_25 = arith.constant 0.000000e+00 : bf16
      %36 = vector.broadcast %cst_25 : bf16 to vector<16x8x16xbf16>
      %c1_26 = arith.constant 1 : index
      %c0_27 = arith.constant 0 : index
      %c0_28 = arith.constant 0 : index
      %37 = vector.load %arg11[%c1_26, %c0_27, %c0_28] : memref<18x32x16xbf16, #tpu.memory_space<vmem>>, vector<16x8x16xbf16>
      tpu.vector_store %arg11[%c1_26, %c0_27, %c0_28], %36 {strides = array<i32>} : memref<18x32x16xbf16, #tpu.memory_space<vmem>>, vector<16x8x16xbf16>,
      %cst_29 = arith.constant 0.000000e+00 : bf16
      %38 = vector.broadcast %cst_29 : bf16 to vector<16x8x16xbf16>
      %c1_30 = arith.constant 1 : index
      %c24 = arith.constant 24 : index
      %c0_31 = arith.constant 0 : index
      %39 = vector.load %arg11[%c1_30, %c24, %c0_31] : memref<18x32x16xbf16, #tpu.memory_space<vmem>>, vector<16x8x16xbf16>
      tpu.vector_store %arg11[%c1_30, %c24, %c0_31], %38 {strides = array<i32>} : memref<18x32x16xbf16, #tpu.memory_space<vmem>>, vector<16x8x16xbf16>,
      %cst_32 = arith.constant 0.000000e+00 : f32
      %40 = vector.broadcast %cst_32 : f32 to vector<256x16xf32>
      %c0_33 = arith.constant 0 : index
      %c0_34 = arith.constant 0 : index
      %c0_35 = arith.constant 0 : index
      %c0_36 = arith.constant 0 : index
      %41 = vector.load %arg2[%c0_33, %c0_34, %c0_35, %c0_36] : memref<1x18x18x4xbf16, #tpu.memory_space<vmem>>, vector<1x16x16x4xbf16>
      %42 = vector.shape_cast %41 : vector<1x16x16x4xbf16> to vector<16x16x4xbf16>
      %43 = vector.shape_cast %42 : vector<16x16x4xbf16> to vector<256x4xbf16>
      %c0_37 = arith.constant 0 : index
      %c0_38 = arith.constant 0 : index
      %c0_39 = arith.constant 0 : index
      %44 = vector.load %arg3[%c0_37, %c0_38, %c0_39] : memref<9x4x16xbf16, #tpu.memory_space<vmem>>, vector<1x4x16xbf16>
      %45 = vector.shape_cast %44 : vector<1x4x16xbf16> to vector<4x16xbf16>
      %cst_40 = arith.constant dense<0.000000e+00> : vector<256x16xf32>
      %46 = tpu.matmul %43, %45, %cst_40 {dimension_numbers = #tpu.dot_dimension_numbers<[1], [0], [0], [1], [0, 0, 1, 1], [], []>} : vector<256x4xbf16>, vector<4x16xbf16>, vector<256x16xf32> -> vector<256x16xf32>
      %47 = arith.addf %40, %46 : vector<256x16xf32>
      %c0_41 = arith.constant 0 : index
      %c0_42 = arith.constant 0 : index
      %c1_43 = arith.constant 1 : index
      %c0_44 = arith.constant 0 : index
      %48 = vector.load %arg2[%c0_41, %c0_42, %c1_43, %c0_44] : memref<1x18x18x4xbf16, #tpu.memory_space<vmem>>, vector<1x16x16x4xbf16>
      %49 = vector.shape_cast %48 : vector<1x16x16x4xbf16> to vector<16x16x4xbf16>
      %50 = vector.shape_cast %49 : vector<16x16x4xbf16> to vector<256x4xbf16>
      %c1_45 = arith.constant 1 : index
      %c0_46 = arith.constant 0 : index
      %c0_47 = arith.constant 0 : index
      %51 = vector.load %arg3[%c1_45, %c0_46, %c0_47] : memref<9x4x16xbf16, #tpu.memory_space<vmem>>, vector<1x4x16xbf16>
      %52 = vector.shape_cast %51 : vector<1x4x16xbf16> to vector<4x16xbf16>
      %cst_48 = arith.constant dense<0.000000e+00> : vector<256x16xf32>
      %53 = tpu.matmul %50, %52, %cst_48 {dimension_numbers = #tpu.dot_dimension_numbers<[1], [0], [0], [1], [0, 0, 1, 1], [], []>} : vector<256x4xbf16>, vector<4x16xbf16>, vector<256x16xf32> -> vector<256x16xf32>
      %54 = arith.addf %47, %53 : vector<256x16xf32>
      %c0_49 = arith.constant 0 : index
      %c0_50 = arith.constant 0 : index
      %c2 = arith.constant 2 : index
      %c0_51 = arith.constant 0 : index
      %55 = vector.load %arg2[%c0_49, %c0_50, %c2, %c0_51] : memref<1x18x18x4xbf16, #tpu.memory_space<vmem>>, vector<1x16x16x4xbf16>
      %56 = vector.shape_cast %55 : vector<1x16x16x4xbf16> to vector<16x16x4xbf16>
      %57 = vector.shape_cast %56 : vector<16x16x4xbf16> to vector<256x4xbf16>
      %c2_52 = arith.constant 2 : index
      %c0_53 = arith.constant 0 : index
      %c0_54 = arith.constant 0 : index
      %58 = vector.load %arg3[%c2_52, %c0_53, %c0_54] : memref<9x4x16xbf16, #tpu.memory_space<vmem>>, vector<1x4x16xbf16>
      %59 = vector.shape_cast %58 : vector<1x4x16xbf16> to vector<4x16xbf16>
      %cst_55 = arith.constant dense<0.000000e+00> : vector<256x16xf32>
      %60 = tpu.matmul %57, %59, %cst_55 {dimension_numbers = #tpu.dot_dimension_numbers<[1], [0], [0], [1], [0, 0, 1, 1], [], []>} : vector<256x4xbf16>, vector<4x16xbf16>, vector<256x16xf32> -> vector<256x16xf32>
      %61 = arith.addf %54, %60 : vector<256x16xf32>
      %c0_56 = arith.constant 0 : index
      %c1_57 = arith.constant 1 : index
      %c0_58 = arith.constant 0 : index
      %c0_59 = arith.constant 0 : index
      %62 = vector.load %arg2[%c0_56, %c1_57, %c0_58, %c0_59] : memref<1x18x18x4xbf16, #tpu.memory_space<vmem>>, vector<1x16x16x4xbf16>
      %63 = vector.shape_cast %62 : vector<1x16x16x4xbf16> to vector<16x16x4xbf16>
      %64 = vector.shape_cast %63 : vector<16x16x4xbf16> to vector<256x4xbf16>
      %c3 = arith.constant 3 : index
      %c0_60 = arith.constant 0 : index
      %c0_61 = arith.constant 0 : index
      %65 = vector.load %arg3[%c3, %c0_60, %c0_61] : memref<9x4x16xbf16, #tpu.memory_space<vmem>>, vector<1x4x16xbf16>
      %66 = vector.shape_cast %65 : vector<1x4x16xbf16> to vector<4x16xbf16>
      %cst_62 = arith.constant dense<0.000000e+00> : vector<256x16xf32>
      %67 = tpu.matmul %64, %66, %cst_62 {dimension_numbers = #tpu.dot_dimension_numbers<[1], [0], [0], [1], [0, 0, 1, 1], [], []>} : vector<256x4xbf16>, vector<4x16xbf16>, vector<256x16xf32> -> vector<256x16xf32>
      %68 = arith.addf %61, %67 : vector<256x16xf32>
      %c0_63 = arith.constant 0 : index
      %c1_64 = arith.constant 1 : index
      %c1_65 = arith.constant 1 : index
      %c0_66 = arith.constant 0 : index
      %69 = vector.load %arg2[%c0_63, %c1_64, %c1_65, %c0_66] : memref<1x18x18x4xbf16, #tpu.memory_space<vmem>>, vector<1x16x16x4xbf16>
      %70 = vector.shape_cast %69 : vector<1x16x16x4xbf16> to vector<16x16x4xbf16>
      %71 = vector.shape_cast %70 : vector<16x16x4xbf16> to vector<256x4xbf16>
      %c4 = arith.constant 4 : index
      %c0_67 = arith.constant 0 : index
      %c0_68 = arith.constant 0 : index
      %72 = vector.load %arg3[%c4, %c0_67, %c0_68] : memref<9x4x16xbf16, #tpu.memory_space<vmem>>, vector<1x4x16xbf16>
      %73 = vector.shape_cast %72 : vector<1x4x16xbf16> to vector<4x16xbf16>
      %cst_69 = arith.constant dense<0.000000e+00> : vector<256x16xf32>
      %74 = tpu.matmul %71, %73, %cst_69 {dimension_numbers = #tpu.dot_dimension_numbers<[1], [0], [0], [1], [0, 0, 1, 1], [], []>} : vector<256x4xbf16>, vector<4x16xbf16>, vector<256x16xf32> -> vector<256x16xf32>
      %75 = arith.addf %68, %74 : vector<256x16xf32>
      %c0_70 = arith.constant 0 : index
      %c1_71 = arith.constant 1 : index
      %c2_72 = arith.constant 2 : index
      %c0_73 = arith.constant 0 : index
      %76 = vector.load %arg2[%c0_70, %c1_71, %c2_72, %c0_73] : memref<1x18x18x4xbf16, #tpu.memory_space<vmem>>, vector<1x16x16x4xbf16>
      %77 = vector.shape_cast %76 : vector<1x16x16x4xbf16> to vector<16x16x4xbf16>
      %78 = vector.shape_cast %77 : vector<16x16x4xbf16> to vector<256x4xbf16>
      %c5 = arith.constant 5 : index
      %c0_74 = arith.constant 0 : index
      %c0_75 = arith.constant 0 : index
      %79 = vector.load %arg3[%c5, %c0_74, %c0_75] : memref<9x4x16xbf16, #tpu.memory_space<vmem>>, vector<1x4x16xbf16>
      %80 = vector.shape_cast %79 : vector<1x4x16xbf16> to vector<4x16xbf16>
      %cst_76 = arith.constant dense<0.000000e+00> : vector<256x16xf32>
      %81 = tpu.matmul %78, %80, %cst_76 {dimension_numbers = #tpu.dot_dimension_numbers<[1], [0], [0], [1], [0, 0, 1, 1], [], []>} : vector<256x4xbf16>, vector<4x16xbf16>, vector<256x16xf32> -> vector<256x16xf32>
      %82 = arith.addf %75, %81 : vector<256x16xf32>
      %c0_77 = arith.constant 0 : index
      %c2_78 = arith.constant 2 : index
      %c0_79 = arith.constant 0 : index
      %c0_80 = arith.constant 0 : index
      %83 = vector.load %arg2[%c0_77, %c2_78, %c0_79, %c0_80] : memref<1x18x18x4xbf16, #tpu.memory_space<vmem>>, vector<1x16x16x4xbf16>
      %84 = vector.shape_cast %83 : vector<1x16x16x4xbf16> to vector<16x16x4xbf16>
      %85 = vector.shape_cast %84 : vector<16x16x4xbf16> to vector<256x4xbf16>
      %c6 = arith.constant 6 : index
      %c0_81 = arith.constant 0 : index
      %c0_82 = arith.constant 0 : index
      %86 = vector.load %arg3[%c6, %c0_81, %c0_82] : memref<9x4x16xbf16, #tpu.memory_space<vmem>>, vector<1x4x16xbf16>
      %87 = vector.shape_cast %86 : vector<1x4x16xbf16> to vector<4x16xbf16>
      %cst_83 = arith.constant dense<0.000000e+00> : vector<256x16xf32>
      %88 = tpu.matmul %85, %87, %cst_83 {dimension_numbers = #tpu.dot_dimension_numbers<[1], [0], [0], [1], [0, 0, 1, 1], [], []>} : vector<256x4xbf16>, vector<4x16xbf16>, vector<256x16xf32> -> vector<256x16xf32>
      %89 = arith.addf %82, %88 : vector<256x16xf32>
      %c0_84 = arith.constant 0 : index
      %c2_85 = arith.constant 2 : index
      %c1_86 = arith.constant 1 : index
      %c0_87 = arith.constant 0 : index
      %90 = vector.load %arg2[%c0_84, %c2_85, %c1_86, %c0_87] : memref<1x18x18x4xbf16, #tpu.memory_space<vmem>>, vector<1x16x16x4xbf16>
      %91 = vector.shape_cast %90 : vector<1x16x16x4xbf16> to vector<16x16x4xbf16>
      %92 = vector.shape_cast %91 : vector<16x16x4xbf16> to vector<256x4xbf16>
      %c7 = arith.constant 7 : index
      %c0_88 = arith.constant 0 : index
      %c0_89 = arith.constant 0 : index
      %93 = vector.load %arg3[%c7, %c0_88, %c0_89] : memref<9x4x16xbf16, #tpu.memory_space<vmem>>, vector<1x4x16xbf16>
      %94 = vector.shape_cast %93 : vector<1x4x16xbf16> to vector<4x16xbf16>
      %cst_90 = arith.constant dense<0.000000e+00> : vector<256x16xf32>
      %95 = tpu.matmul %92, %94, %cst_90 {dimension_numbers = #tpu.dot_dimension_numbers<[1], [0], [0], [1], [0, 0, 1, 1], [], []>} : vector<256x4xbf16>, vector<4x16xbf16>, vector<256x16xf32> -> vector<256x16xf32>
      %96 = arith.addf %89, %95 : vector<256x16xf32>
      %c0_91 = arith.constant 0 : index
      %c2_92 = arith.constant 2 : index
      %c2_93 = arith.constant 2 : index
      %c0_94 = arith.constant 0 : index
      %97 = vector.load %arg2[%c0_91, %c2_92, %c2_93, %c0_94] : memref<1x18x18x4xbf16, #tpu.memory_space<vmem>>, vector<1x16x16x4xbf16>
      %98 = vector.shape_cast %97 : vector<1x16x16x4xbf16> to vector<16x16x4xbf16>
      %99 = vector.shape_cast %98 : vector<16x16x4xbf16> to vector<256x4xbf16>
      %c8 = arith.constant 8 : index
      %c0_95 = arith.constant 0 : index
      %c0_96 = arith.constant 0 : index
      %100 = vector.load %arg3[%c8, %c0_95, %c0_96] : memref<9x4x16xbf16, #tpu.memory_space<vmem>>, vector<1x4x16xbf16>
      %101 = vector.shape_cast %100 : vector<1x4x16xbf16> to vector<4x16xbf16>
      %cst_97 = arith.constant dense<0.000000e+00> : vector<256x16xf32>
      %102 = tpu.matmul %99, %101, %cst_97 {dimension_numbers = #tpu.dot_dimension_numbers<[1], [0], [0], [1], [0, 0, 1, 1], [], []>} : vector<256x4xbf16>, vector<4x16xbf16>, vector<256x16xf32> -> vector<256x16xf32>
      %103 = arith.addf %96, %102 : vector<256x16xf32>
      %c0_98 = arith.constant 0 : index
      %c0_99 = arith.constant 0 : index
      %104 = vector.load %arg4[%c0_98, %c0_99] : memref<1x16xf32, #tpu.memory_space<vmem>>, vector<1x16xf32>
      %105 = vector.broadcast %104 : vector<1x16xf32> to vector<256x16xf32>
      %106 = arith.addf %103, %105 : vector<256x16xf32>
      %cst_100 = arith.constant 0.000000e+00 : f32
      %107 = vector.broadcast %cst_100 : f32 to vector<256x16xf32>
      %108 = arith.cmpf oge, %106, %107 : vector<256x16xf32>
      %cst_101 = arith.constant 2.000000e-01 : f32
      %109 = vector.broadcast %cst_101 : f32 to vector<256x16xf32>
      %110 = arith.mulf %109, %106 : vector<256x16xf32>
      %111 = arith.select %108, %106, %110 : vector<256x16xi1>, vector<256x16xf32>
      %112 = vector.shape_cast %111 : vector<256x16xf32> to vector<16x16x16xf32>
      %113 = arith.truncf %112 : vector<16x16x16xf32> to vector<16x16x16xbf16>
      %c1_102 = arith.constant 1 : index
      %c8_103 = arith.constant 8 : index
      %c0_104 = arith.constant 0 : index
      %114 = vector.load %arg11[%c1_102, %c8_103, %c0_104] : memref<18x32x16xbf16, #tpu.memory_space<vmem>>, vector<16x16x16xbf16>
      tpu.vector_store %arg11[%c1_102, %c8_103, %c0_104], %113 {strides = array<i32>} : memref<18x32x16xbf16, #tpu.memory_space<vmem>>, vector<16x16x16xbf16>,
      %cst_105 = arith.constant 0.000000e+00 : f32
      %115 = vector.broadcast %cst_105 : f32 to vector<256x4xf32>
      %c0_106 = arith.constant 0 : index
      %c7_107 = arith.constant 7 : index
      %c0_108 = arith.constant 0 : index
      %116 = vector.load %arg11[%c0_106, %c7_107, %c0_108] : memref<18x32x16xbf16, #tpu.memory_space<vmem>>, vector<16x16x16xbf16>
      %117 = vector.shape_cast %116 : vector<16x16x16xbf16> to vector<256x16xbf16>
      %c0_109 = arith.constant 0 : index
      %c0_110 = arith.constant 0 : index
      %c0_111 = arith.constant 0 : index
      %118 = vector.load %arg5[%c0_109, %c0_110, %c0_111] : memref<9x16x4xbf16, #tpu.memory_space<vmem>>, vector<1x16x4xbf16>
      %119 = vector.shape_cast %118 : vector<1x16x4xbf16> to vector<16x4xbf16>
      %cst_112 = arith.constant dense<0.000000e+00> : vector<256x4xf32>
      %120 = tpu.matmul %117, %119, %cst_112 {dimension_numbers = #tpu.dot_dimension_numbers<[1], [0], [0], [1], [0, 0, 1, 1], [], []>} : vector<256x16xbf16>, vector<16x4xbf16>, vector<256x4xf32> -> vector<256x4xf32>
      %121 = arith.addf %115, %120 : vector<256x4xf32>
      %c0_113 = arith.constant 0 : index
      %c8_114 = arith.constant 8 : index
      %c0_115 = arith.constant 0 : index
      %122 = vector.load %arg11[%c0_113, %c8_114, %c0_115] : memref<18x32x16xbf16, #tpu.memory_space<vmem>>, vector<16x16x16xbf16>
      %123 = vector.shape_cast %122 : vector<16x16x16xbf16> to vector<256x16xbf16>
      %c1_116 = arith.constant 1 : index
      %c0_117 = arith.constant 0 : index
      %c0_118 = arith.constant 0 : index
      %124 = vector.load %arg5[%c1_116, %c0_117, %c0_118] : memref<9x16x4xbf16, #tpu.memory_space<vmem>>, vector<1x16x4xbf16>
      %125 = vector.shape_cast %124 : vector<1x16x4xbf16> to vector<16x4xbf16>
      %cst_119 = arith.constant dense<0.000000e+00> : vector<256x4xf32>
      %126 = tpu.matmul %123, %125, %cst_119 {dimension_numbers = #tpu.dot_dimension_numbers<[1], [0], [0], [1], [0, 0, 1, 1], [], []>} : vector<256x16xbf16>, vector<16x4xbf16>, vector<256x4xf32> -> vector<256x4xf32>
      %127 = arith.addf %121, %126 : vector<256x4xf32>
      %c0_120 = arith.constant 0 : index
      %c9 = arith.constant 9 : index
      %c0_121 = arith.constant 0 : index
      %128 = vector.load %arg11[%c0_120, %c9, %c0_121] : memref<18x32x16xbf16, #tpu.memory_space<vmem>>, vector<16x16x16xbf16>
      %129 = vector.shape_cast %128 : vector<16x16x16xbf16> to vector<256x16xbf16>
      %c2_122 = arith.constant 2 : index
      %c0_123 = arith.constant 0 : index
      %c0_124 = arith.constant 0 : index
      %130 = vector.load %arg5[%c2_122, %c0_123, %c0_124] : memref<9x16x4xbf16, #tpu.memory_space<vmem>>, vector<1x16x4xbf16>
      %131 = vector.shape_cast %130 : vector<1x16x4xbf16> to vector<16x4xbf16>
      %cst_125 = arith.constant dense<0.000000e+00> : vector<256x4xf32>
      %132 = tpu.matmul %129, %131, %cst_125 {dimension_numbers = #tpu.dot_dimension_numbers<[1], [0], [0], [1], [0, 0, 1, 1], [], []>} : vector<256x16xbf16>, vector<16x4xbf16>, vector<256x4xf32> -> vector<256x4xf32>
      %133 = arith.addf %127, %132 : vector<256x4xf32>
      %c1_126 = arith.constant 1 : index
      %c7_127 = arith.constant 7 : index
      %c0_128 = arith.constant 0 : index
      %134 = vector.load %arg11[%c1_126, %c7_127, %c0_128] : memref<18x32x16xbf16, #tpu.memory_space<vmem>>, vector<16x16x16xbf16>
      %135 = vector.shape_cast %134 : vector<16x16x16xbf16> to vector<256x16xbf16>
      %c3_129 = arith.constant 3 : index
      %c0_130 = arith.constant 0 : index
      %c0_131 = arith.constant 0 : index
      %136 = vector.load %arg5[%c3_129, %c0_130, %c0_131] : memref<9x16x4xbf16, #tpu.memory_space<vmem>>, vector<1x16x4xbf16>
      %137 = vector.shape_cast %136 : vector<1x16x4xbf16> to vector<16x4xbf16>
      %cst_132 = arith.constant dense<0.000000e+00> : vector<256x4xf32>
      %138 = tpu.matmul %135, %137, %cst_132 {dimension_numbers = #tpu.dot_dimension_numbers<[1], [0], [0], [1], [0, 0, 1, 1], [], []>} : vector<256x16xbf16>, vector<16x4xbf16>, vector<256x4xf32> -> vector<256x4xf32>
      %139 = arith.addf %133, %138 : vector<256x4xf32>
      %c1_133 = arith.constant 1 : index
      %c8_134 = arith.constant 8 : index
      %c0_135 = arith.constant 0 : index
      %140 = vector.load %arg11[%c1_133, %c8_134, %c0_135] : memref<18x32x16xbf16, #tpu.memory_space<vmem>>, vector<16x16x16xbf16>
      %141 = vector.shape_cast %140 : vector<16x16x16xbf16> to vector<256x16xbf16>
      %c4_136 = arith.constant 4 : index
      %c0_137 = arith.constant 0 : index
      %c0_138 = arith.constant 0 : index
      %142 = vector.load %arg5[%c4_136, %c0_137, %c0_138] : memref<9x16x4xbf16, #tpu.memory_space<vmem>>, vector<1x16x4xbf16>
      %143 = vector.shape_cast %142 : vector<1x16x4xbf16> to vector<16x4xbf16>
      %cst_139 = arith.constant dense<0.000000e+00> : vector<256x4xf32>
      %144 = tpu.matmul %141, %143, %cst_139 {dimension_numbers = #tpu.dot_dimension_numbers<[1], [0], [0], [1], [0, 0, 1, 1], [], []>} : vector<256x16xbf16>, vector<16x4xbf16>, vector<256x4xf32> -> vector<256x4xf32>
      %145 = arith.addf %139, %144 : vector<256x4xf32>
      %c1_140 = arith.constant 1 : index
      %c9_141 = arith.constant 9 : index
      %c0_142 = arith.constant 0 : index
      %146 = vector.load %arg11[%c1_140, %c9_141, %c0_142] : memref<18x32x16xbf16, #tpu.memory_space<vmem>>, vector<16x16x16xbf16>
      %147 = vector.shape_cast %146 : vector<16x16x16xbf16> to vector<256x16xbf16>
      %c5_143 = arith.constant 5 : index
      %c0_144 = arith.constant 0 : index
      %c0_145 = arith.constant 0 : index
      %148 = vector.load %arg5[%c5_143, %c0_144, %c0_145] : memref<9x16x4xbf16, #tpu.memory_space<vmem>>, vector<1x16x4xbf16>
      %149 = vector.shape_cast %148 : vector<1x16x4xbf16> to vector<16x4xbf16>
      %cst_146 = arith.constant dense<0.000000e+00> : vector<256x4xf32>
      %150 = tpu.matmul %147, %149, %cst_146 {dimension_numbers = #tpu.dot_dimension_numbers<[1], [0], [0], [1], [0, 0, 1, 1], [], []>} : vector<256x16xbf16>, vector<16x4xbf16>, vector<256x4xf32> -> vector<256x4xf32>
      %151 = arith.addf %145, %150 : vector<256x4xf32>
      %c2_147 = arith.constant 2 : index
      %c7_148 = arith.constant 7 : index
      %c0_149 = arith.constant 0 : index
      %152 = vector.load %arg11[%c2_147, %c7_148, %c0_149] : memref<18x32x16xbf16, #tpu.memory_space<vmem>>, vector<16x16x16xbf16>
      %153 = vector.shape_cast %152 : vector<16x16x16xbf16> to vector<256x16xbf16>
      %c6_150 = arith.constant 6 : index
      %c0_151 = arith.constant 0 : index
      %c0_152 = arith.constant 0 : index
      %154 = vector.load %arg5[%c6_150, %c0_151, %c0_152] : memref<9x16x4xbf16, #tpu.memory_space<vmem>>, vector<1x16x4xbf16>
      %155 = vector.shape_cast %154 : vector<1x16x4xbf16> to vector<16x4xbf16>
      %cst_153 = arith.constant dense<0.000000e+00> : vector<256x4xf32>
      %156 = tpu.matmul %153, %155, %cst_153 {dimension_numbers = #tpu.dot_dimension_numbers<[1], [0], [0], [1], [0, 0, 1, 1], [], []>} : vector<256x16xbf16>, vector<16x4xbf16>, vector<256x4xf32> -> vector<256x4xf32>
      %157 = arith.addf %151, %156 : vector<256x4xf32>
      %c2_154 = arith.constant 2 : index
      %c8_155 = arith.constant 8 : index
      %c0_156 = arith.constant 0 : index
      %158 = vector.load %arg11[%c2_154, %c8_155, %c0_156] : memref<18x32x16xbf16, #tpu.memory_space<vmem>>, vector<16x16x16xbf16>
      %159 = vector.shape_cast %158 : vector<16x16x16xbf16> to vector<256x16xbf16>
      %c7_157 = arith.constant 7 : index
      %c0_158 = arith.constant 0 : index
      %c0_159 = arith.constant 0 : index
      %160 = vector.load %arg5[%c7_157, %c0_158, %c0_159] : memref<9x16x4xbf16, #tpu.memory_space<vmem>>, vector<1x16x4xbf16>
      %161 = vector.shape_cast %160 : vector<1x16x4xbf16> to vector<16x4xbf16>
      %cst_160 = arith.constant dense<0.000000e+00> : vector<256x4xf32>
      %162 = tpu.matmul %159, %161, %cst_160 {dimension_numbers = #tpu.dot_dimension_numbers<[1], [0], [0], [1], [0, 0, 1, 1], [], []>} : vector<256x16xbf16>, vector<16x4xbf16>, vector<256x4xf32> -> vector<256x4xf32>
      %163 = arith.addf %157, %162 : vector<256x4xf32>
      %c2_161 = arith.constant 2 : index
      %c9_162 = arith.constant 9 : index
      %c0_163 = arith.constant 0 : index
      %164 = vector.load %arg11[%c2_161, %c9_162, %c0_163] : memref<18x32x16xbf16, #tpu.memory_space<vmem>>, vector<16x16x16xbf16>
      %165 = vector.shape_cast %164 : vector<16x16x16xbf16> to vector<256x16xbf16>
      %c8_164 = arith.constant 8 : index
      %c0_165 = arith.constant 0 : index
      %c0_166 = arith.constant 0 : index
      %166 = vector.load %arg5[%c8_164, %c0_165, %c0_166] : memref<9x16x4xbf16, #tpu.memory_space<vmem>>, vector<1x16x4xbf16>
      %167 = vector.shape_cast %166 : vector<1x16x4xbf16> to vector<16x4xbf16>
      %cst_167 = arith.constant dense<0.000000e+00> : vector<256x4xf32>
      %168 = tpu.matmul %165, %167, %cst_167 {dimension_numbers = #tpu.dot_dimension_numbers<[1], [0], [0], [1], [0, 0, 1, 1], [], []>} : vector<256x16xbf16>, vector<16x4xbf16>, vector<256x4xf32> -> vector<256x4xf32>
      %169 = arith.addf %163, %168 : vector<256x4xf32>
      %c0_168 = arith.constant 0 : index
      %c0_169 = arith.constant 0 : index
      %170 = vector.load %arg6[%c0_168, %c0_169] : memref<1x4xf32, #tpu.memory_space<vmem>>, vector<1x4xf32>
      %171 = vector.broadcast %170 : vector<1x4xf32> to vector<256x4xf32>
      %172 = arith.addf %169, %171 : vector<256x4xf32>
      %173 = arith.truncf %172 : vector<256x4xf32> to vector<256x4xbf16>
      %c0_170 = arith.constant 0 : index
      %c0_171 = arith.constant 0 : index
      %174 = vector.load %arg12[%c0_170, %c0_171] : memref<256x4xbf16, #tpu.memory_space<vmem>>, vector<256x4xbf16>
      tpu.vector_store %arg12[%c0_170, %c0_171], %173 {strides = array<i32>} : memref<256x4xbf16, #tpu.memory_space<vmem>>, vector<256x4xbf16>,
    } else {
    }
    %c256_i32 = arith.constant 256 : i32
    %3 = arith.muli %arg1, %c256_i32 : i32
    %4 = tpu.assume_multiple %3, 256 : i32
    %5 = arith.index_cast %4 : i32 to index
    %c0 = arith.constant 0 : index
    %6 = vector.load %arg12[%5, %c0] : memref<256x4xbf16, #tpu.memory_space<vmem>>, vector<256x4xbf16>
    %c0_1 = arith.constant 0 : index
    %c0_2 = arith.constant 0 : index
    %7 = vector.load %arg7[%c0_1, %c0_2] : memref<4x8xbf16, #tpu.memory_space<vmem>>, vector<4x8xbf16>
    %cst = arith.constant dense<0.000000e+00> : vector<256x8xf32>
    %8 = tpu.matmul %6, %7, %cst {dimension_numbers = #tpu.dot_dimension_numbers<[1], [0], [0], [1], [0, 0, 1, 1], [], []>} : vector<256x4xbf16>, vector<4x8xbf16>, vector<256x8xf32> -> vector<256x8xf32>
    %cst_3 = arith.constant 0.000000e+00 : f32
    %9 = vector.broadcast %cst_3 : f32 to vector<256x8xf32>
    %10 = arith.cmpf oge, %8, %9 : vector<256x8xf32>
    %cst_4 = arith.constant 2.000000e-01 : f32
    %11 = vector.broadcast %cst_4 : f32 to vector<256x8xf32>
    %12 = arith.mulf %11, %8 : vector<256x8xf32>
    %13 = arith.select %10, %8, %12 : vector<256x8xi1>, vector<256x8xf32>
    %14 = vector.extract_strided_slice %13 {offsets = [0, 0], sizes = [256, 4], strides = [1, 1]} : vector<256x8xf32> to vector<256x4xf32>
    %15 = arith.truncf %14 : vector<256x4xf32> to vector<256x4xbf16>
    %c0_5 = arith.constant 0 : index
    %c0_6 = arith.constant 0 : index
    %c0_7 = arith.constant 0 : index
    %16 = vector.load %arg8[%c0_5, %c0_6, %c0_7] : memref<2x4x32xbf16, #tpu.memory_space<vmem>>, vector<1x4x32xbf16>
    %17 = vector.shape_cast %16 : vector<1x4x32xbf16> to vector<4x32xbf16>
    %cst_8 = arith.constant dense<0.000000e+00> : vector<256x32xf32>
    %18 = tpu.matmul %15, %17, %cst_8 {dimension_numbers = #tpu.dot_dimension_numbers<[1], [0], [0], [1], [0, 0, 1, 1], [], []>} : vector<256x4xbf16>, vector<4x32xbf16>, vector<256x32xf32> -> vector<256x32xf32>
    %19 = arith.truncf %18 : vector<256x32xf32> to vector<256x32xbf16>
    %c0_9 = arith.constant 0 : index
    %c0_10 = arith.constant 0 : index
    %c0_11 = arith.constant 0 : index
    %20 = vector.load %arg9[%c0_9, %c0_10, %c0_11] : memref<1x256x32xbf16, #tpu.memory_space<vmem>>, vector<1x256x32xbf16>
    %21 = vector.shape_cast %20 : vector<1x256x32xbf16> to vector<256x32xbf16>
    %22 = vector.shape_cast %19 : vector<256x32xbf16> to vector<1x256x32xbf16>
    tpu.vector_store %arg9[%c0_9, %c0_10, %c0_11], %22 {strides = array<i32>} : memref<1x256x32xbf16, #tpu.memory_space<vmem>>, vector<1x256x32xbf16>,
    %23 = vector.extract_strided_slice %13 {offsets = [0, 4], sizes = [256, 4], strides = [1, 1]} : vector<256x8xf32> to vector<256x4xf32>
    %24 = arith.truncf %23 : vector<256x4xf32> to vector<256x4xbf16>
    %c1 = arith.constant 1 : index
    %c0_12 = arith.constant 0 : index
    %c0_13 = arith.constant 0 : index
    %25 = vector.load %arg8[%c1, %c0_12, %c0_13] : memref<2x4x32xbf16, #tpu.memory_space<vmem>>, vector<1x4x32xbf16>
    %26 = vector.shape_cast %25 : vector<1x4x32xbf16> to vector<4x32xbf16>
    %cst_14 = arith.constant dense<0.000000e+00> : vector<256x32xf32>
    %27 = tpu.matmul %24, %26, %cst_14 {dimension_numbers = #tpu.dot_dimension_numbers<[1], [0], [0], [1], [0, 0, 1, 1], [], []>} : vector<256x4xbf16>, vector<4x32xbf16>, vector<256x32xf32> -> vector<256x32xf32>
    %28 = arith.truncf %27 : vector<256x32xf32> to vector<256x32xbf16>
    %c0_15 = arith.constant 0 : index
    %c0_16 = arith.constant 0 : index
    %c0_17 = arith.constant 0 : index
    %29 = vector.load %arg10[%c0_15, %c0_16, %c0_17] : memref<1x256x32xbf16, #tpu.memory_space<vmem>>, vector<1x256x32xbf16>
    %30 = vector.shape_cast %29 : vector<1x256x32xbf16> to vector<256x32xbf16>
    %31 = vector.shape_cast %28 : vector<256x32xbf16> to vector<1x256x32xbf16>
    tpu.vector_store %arg10[%c0_15, %c0_16, %c0_17], %31 {strides = array<i32>} : memref<1x256x32xbf16, #tpu.memory_space<vmem>>, vector<1x256x32xbf16>,
    return
  }
  func.func @transform_0(%arg0: i32, %arg1: i32) -> (i32, i32, i32, i32) {
    %c0_i32 = arith.constant 0 : i32
    %c0_i32_0 = arith.constant 0 : i32
    %c0_i32_1 = arith.constant 0 : i32
    %c0_i32_2 = arith.constant 0 : i32
    return %arg0, %c0_i32, %c0_i32_0, %c0_i32_1 : i32, i32, i32, i32
  }
  func.func @transform_1(%arg0: i32, %arg1: i32) -> (i32, i32, i32) {
    %c0_i32 = arith.constant 0 : i32
    %c0_i32_0 = arith.constant 0 : i32
    %c0_i32_1 = arith.constant 0 : i32
    %c0_i32_2 = arith.constant 0 : i32
    return %c0_i32, %c0_i32_0, %c0_i32_1 : i32, i32, i32
  }
  func.func @transform_2(%arg0: i32, %arg1: i32) -> (i32, i32) {
    %c0_i32 = arith.constant 0 : i32
    %c0_i32_0 = arith.constant 0 : i32
    %c0_i32_1 = arith.constant 0 : i32
    return %c0_i32, %c0_i32_0 : i32, i32
  }
  func.func @transform_3(%arg0: i32, %arg1: i32) -> (i32, i32, i32) {
    %c0_i32 = arith.constant 0 : i32
    %c0_i32_0 = arith.constant 0 : i32
    %c0_i32_1 = arith.constant 0 : i32
    %c0_i32_2 = arith.constant 0 : i32
    return %c0_i32, %c0_i32_0, %c0_i32_1 : i32, i32, i32
  }
  func.func @transform_4(%arg0: i32, %arg1: i32) -> (i32, i32) {
    %c0_i32 = arith.constant 0 : i32
    %c0_i32_0 = arith.constant 0 : i32
    %c0_i32_1 = arith.constant 0 : i32
    return %c0_i32, %c0_i32_0 : i32, i32
  }
  func.func @transform_5(%arg0: i32, %arg1: i32) -> (i32, i32) {
    %c0_i32 = arith.constant 0 : i32
    %c0_i32_0 = arith.constant 0 : i32
    %c0_i32_1 = arith.constant 0 : i32
    return %c0_i32, %c0_i32_0 : i32, i32
  }
  func.func @transform_6(%arg0: i32, %arg1: i32) -> (i32, i32, i32) {
    %c0_i32 = arith.constant 0 : i32
    %c0_i32_0 = arith.constant 0 : i32
    %c0_i32_1 = arith.constant 0 : i32
    %c0_i32_2 = arith.constant 0 : i32
    return %c0_i32, %c0_i32_0, %c0_i32_1 : i32, i32, i32
  }
  func.func @transform_7(%arg0: i32, %arg1: i32) -> (i32, i32, i32) {
    %c0_i32 = arith.constant 0 : i32
    %c0_i32_0 = arith.constant 0 : i32
    return %arg0, %arg1, %c0_i32 : i32, i32, i32
  }
  func.func @transform_8(%arg0: i32, %arg1: i32) -> (i32, i32, i32) {
    %c0_i32 = arith.constant 0 : i32
    %c0_i32_0 = arith.constant 0 : i32
    return %arg0, %arg1, %c0_i32 : i32, i32, i32
  }
}

</mosaic_0001>

<bundles_post_ra>
// kernel: tpu_custom_call.1
= control target key start
LH: loop header
LB: loop body
LE: loop exit
PB: predicated region body
PF: predicated region fallthrough
CT: control target
= control target key end

     0   :  { %s14592_s27 = smov 0   ;;  %s14594_s28 = smov 0   ;;  %s19561_s0 = inlined_call_operand.vmem [shape: bf16[2,18,18,4], index: 0, kind: input, shape index: {}]   ;;  %s19562_s1 = inlined_call_operand.vmem [shape: bf16[9,4,16], index: 1, kind: input, shape index: {}]   ;;  %s19563_s2 = inlined_call_operand.vmem [shape: f32[1,16], index: 2, kind: input, shape index: {}]   ;;  %s19564_s3 = inlined_call_operand.vmem [shape: bf16[9,16,4], index: 3, kind: input, shape index: {}]   ;;  %s19565_s4 = inlined_call_operand.vmem [shape: f32[1,4], index: 4, kind: input, shape index: {}]   ;;  %s19566_s5 = inlined_call_operand.vmem [shape: bf16[4,8], index: 5, kind: input, shape index: {}]   ;;  %s19567_s6 = inlined_call_operand.vmem [shape: bf16[2,4,32], index: 6, kind: input, shape index: {}]   ;;  %s19568_s7 = inlined_call_operand.vmem [shape: bf16[2,256,32], index: 7, kind: output, shape index: {0}]   ;;  %s19569_s8 = inlined_call_operand.vmem [shape: bf16[2,256,32], index: 8, kind: output, shape index: {1}]  }
   0x1   :  { %s14596_s29 = smov 0  }
   0x2 LB: > { %s31_s30 = sadd.s32 1, %s14539_s28  ;;  %p12046_p0 = scmp.ge.s32.totalorder %s14543_s29, 1  ;;  %s14543_s29 = sphi %s14596_s29, %s19_s29   ;;  %s14539_s28 = sphi %s14594_s28, %s20030_s28   ;;  %s14535_s27 = sphi %s14592_s27, %s20029_s27  }
   0x3   : > { %p33_p1 = scmp.ge.s32.totalorder %s31_s30, 2  ;;  %p281_p2 = scmp.lt.s32.totalorder %s14543_s29, 3 }
   0x5   : > { %s20032_s30 = smov (%p33_p1, %s31_s30), 0  ;;  %p282_p3 = pnand %p12046_p0, %p281_p2 }
   0x7   : > { %285 = sbr.rel (%p282_p3) target bundleno = 1674 (0x68a), region = 48 }
   0xc   : > { %v12052_v0 = vld [vmem:[%s19562_s1 + $0x2] sm:$0x3]  ;;  %vm936_vm0 = vcmask 1041408   ;;  %p328_p4 = scmp.lt.s32.totalorder %s14535_s27, 1  ;;  %v433_v2 = vld [vmem:[%s19562_s1] sm:$0x3] }
   0xd   : > { %14350 = vmatprep.subr.msk.bf16.mxu1 %vm936_vm0, %v12052_v0  ;;  %14349 = vmatprep.subr.msk.bf16.mxu0 %vm936_vm0, %v12052_v0  ;;  %v938_v1 = vsel %vm936_vm0, %v12052_v0, 0  ;;  %v12133_v3 = vld [vmem:[%s19562_s1 + $0x4] sm:$0x3]  ;;  %vm450_vm1 = vsmask.f32 3328  ;;  %v14628_v4 = vsel %vm936_vm0, %v433_v2, 0 }
   0xe   : > { %14348 = vmatpush3.bf16.msra.mxu1 %v938_v1  ;;  %13634 = vmatpush3.bf16.msra.mxu0 %v938_v1  ;;  %s20034_s27 = smov (!%p328_p4, %s14535_s27), 1  ;;  %vm451_vm2 = vsmask.f32 7440  ;;  %vm887_vm3 = vcmask 31744   ;;  %v14659_v16 = vsel %vm936_vm0, %v12133_v3, 0  ;;  %v19609_v31 = vmov 0 }
   0xf   : > { %14351 = vmatprep.subr.msk.bf16.mxu1 %vm936_vm0, %v433_v2  ;;  %14352 = vmatprep.subr.msk.bf16.mxu0 %vm936_vm0, %v12133_v3  ;;  %s14362_s15 = smul.u32 216, %s20034_s27  ;;  %vm14674_vm4 = vmor %vm450_vm1, %vm451_vm2  ;;  %vm1441_vm5 = vcmask 1042432   ;;  %vm1442_vm6 = vcmask 1046532   ;;  %vm358_vm8 = vcmask 125952   ;;  %vm5749_vm9 = vcmask 130048   ;;  %s14546_s25 = smov 124  }
  0x10   : > { %v19610_v31 = vsel %vm14674_vm4, 4294967295, %v19609_v31  ;;  %vm14960_vm7 = vmor %vm1441_vm5, %vm1442_vm6  ;;  %vm5303_vm10 = vsmask.f32 256  ;;  %vm5304_vm11 = vsmask.f32 4368  ;;  %s13146_s26 = sshll.u32 %s20034_s27, 7 }
  0x11   : > { %s14633_s18 = scalar_lea.vmem %s19561_s0, %s14362_s15  ;;  %19611 = vst [vmem:[#allocation4_spill] sm:$0xff] %v19610_v31  ;;  %vm16975_vm12 = vmor %vm5303_vm10, %vm5304_vm11  ;;  %s19415_s11 = scalar_lea.vmem %s19568_s7, %s13146_s26 }
  0x12   : > { %v14636_v5 = vld [vmem:[%s14633_s18] sm:$0xf]  ;;  %v14639_v6 = vld [vmem:[%s14633_s18 + $0x4] sm:$0xf]  ;;  %v14642_v7 = vld [vmem:[%s14633_s18 + $0x8] sm:$0x1]  ;;  %s19486_s14 = scalar_lea.vmem %s19569_s8, %s13146_s26 }
  0x13   : > { %v454_v8 = vshrl.u32 %v14636_v5, 16  ;;  %v457_v9 = vshll.u32 %v14636_v5, 16  ;;  %v463_v10 = vshll.u32 %v14639_v6, 16  ;;  %v467_v11 = vshrl.u32 %v14639_v6, 16  ;;  %v14649_v12 = vld [vmem:[%s14633_s18 + $0x60] sm:$0xf] }
  0x14   : > { %v473_v13 = vshll.u32 %v14642_v7, 16  ;;  %v14653_v14 = vld [vmem:[%s14633_s18 + $0x64] sm:$0xf]  ;;  %v14656_v15 = vld [vmem:[%s14633_s18 + $0x68] sm:$0x1]  ;;  %v646_v22 = vshrl.u32 %v14649_v12, 16 }
  0x15   : > { %v456_v17 = vrot.slane %v454_v8, 4  ;;  %v459_v18 = vrot.slane %v457_v9, 5  ;;  %v465_v19 = vrot.slane %v463_v10, 5  ;;  %v469_v20 = vrot.slane %v467_v11, 4  ;;  %v14667_v29 = vld [vmem:[%s14633_s18 + $0xc] sm:$0xf] }
  0x16   : > { %v475_v21 = vrot.slane %v473_v13, 5  ;;  %v649_v23 = vshll.u32 %v14649_v12, 16  ;;  %v655_v24 = vshll.u32 %v14653_v14, 16  ;;  %v659_v27 = vshrl.u32 %v14653_v14, 16  ;;  %v14670_v30 = vld [vmem:[%s14633_s18 + $0x10] sm:$0xf] }
  0x17   : > { %v460_v25 = vor.u32 %v459_v18, %v456_v17  ;;  %v470_v26 = vor.u32 %v469_v20, %v465_v19  ;;  %v665_v28 = vshll.u32 %v14656_v15, 16  ;;  %v648_v33 = vrot.slane %v646_v22, 4  ;;  %v14680_v41 = vld [vmem:[%s14633_s18 + $0x14] sm:$0x1]  ;;  %v14691_v53 = vld [vmem:[%s14633_s18 + $0x6c] sm:$0xf] }
  0x18   : > { %v651_v34 = vrot.slane %v649_v23, 5  ;;  %v657_v35 = vrot.slane %v655_v24, 5  ;;  %v661_v38 = vrot.slane %v659_v27, 4  ;;  %v478_v42 = vshrl.u32 %v14667_v29, 16  ;;  %v14695_v58 = vld [vmem:[%s14633_s18 + $0x70] sm:$0xf] }
  0x19   : > { %v461_v36 = vrot.slane %v460_v25, 4  ;;  %v471_v37 = vrot.slane %v470_v26, 4  ;;  %v667_v39 = vrot.slane %v665_v28, 5  ;;  %v481_v43 = vshll.u32 %v14667_v29, 16  ;;  %v14703_v63 = vld [vmem:[%s14633_s18 + $0x74] sm:$0x1] }
  0x1a   : > { %v652_v40 = vor.u32 %v651_v34, %v648_v33  ;;  %v487_v44 = vshll.u32 %v14670_v30, 16  ;;  %v662_v47 = vor.u32 %v661_v38, %v657_v35  ;;  %v491_v48 = vshrl.u32 %v14670_v30, 16  ;;  %v14709_v8 = vld [vmem:[%s14633_s18 + $0x18] sm:$0xf]  ;;  %v14722_v25 = vld [vmem:[%s14633_s18 + $0x20] sm:$0x1] }
  0x1b   : > { %v466_v45 = vsel %vm14674_vm4, %v461_v36, %v465_v19  ;;  %v476_v46 = vsel %vm14674_vm4, %v471_v37, %v475_v21  ;;  %v480_v51 = vrot.slane %v478_v42, 4  ;;  %v483_v52 = vrot.slane %v481_v43, 5  ;;  %v14716_v21 = vld [vmem:[%s14633_s18 + $0x1c] sm:$0xf] }
  0x1c   : > { %v12053_v49 = vcombine.low %v466_v45, %v476_v46  ;;  %v653_v50 = vrot.slane %v652_v40, 4  ;;  %v663_v54 = vrot.slane %v662_v47, 4  ;;  %v489_v55 = vrot.slane %v487_v44, 5  ;;  %v14735_v40 = vld [vmem:[%s19562_s1 + $0x8] sm:$0x3] }
  0x1d   : > { %v493_v56 = vrot.slane %v491_v48, 4  ;;  %v497_v57 = vshll.u32 %v14680_v41, 16  ;;  %v484_v60 = vor.u32 %v483_v52, %v480_v51  ;;  %v670_v3 = vshrl.u32 %v14691_v53, 16  ;;  %v14740_v46 = vld [vmem:[%s14633_s18 + $0x7c] sm:$0xf] }
  0x1e   : > { %13635 = vmatprep.mubr.msk.bf16.mxu0 %vm887_vm3, %v12053_v49  ;;  %v658_v59 = vsel %vm14674_vm4, %v653_v50, %v657_v35  ;;  %v668_v0 = vsel %vm14674_vm4, %v663_v54, %v667_v39  ;;  %v673_v11 = vshll.u32 %v14691_v53, 16  ;;  %v679_v13 = vshll.u32 %v14695_v58, 16  ;;  %v14729_v35 = vld [vmem:[%s14633_s18 + $0x78] sm:$0xf] }
  0x1f   : > { %v494_v1 = vor.u32 %v493_v56, %v489_v55  ;;  %v499_v2 = vrot.slane %v497_v57, 5  ;;  %v12061_v9 = vcombine.low %v658_v59, %v668_v0  ;;  %v485_v10 = vrot.slane %v484_v60, 4  ;;  %v14747_v56 = vld [vmem:[%s14633_s18 + $0x80] sm:$0x1] }
  0x20   : > { %v672_v18 = vrot.slane %v670_v3, 4  ;;  %v683_v19 = vshrl.u32 %v14695_v58, 16  ;;  %v689_v20 = vshll.u32 %v14703_v63, 16  ;;  %v675_v23 = vrot.slane %v673_v11, 5  ;;  %19612 = vst [vmem:[#allocation5_spill] sm:$0xff] %v14747_v56 }
  0x21   : > { %v495_v17 = vrot.slane %v494_v1, 4  ;;  %13651 = vmatprep.mubr.msk.bf16.mxu1 %vm887_vm3, %v12061_v9  ;;  %v490_v22 = vsel %vm14674_vm4, %v485_v10, %v489_v55  ;;  %v681_v24 = vrot.slane %v679_v13, 5  ;;  %v502_v26 = vshrl.u32 %v14709_v8, 16  ;;  %v14753_v1 = vld [vmem:[%s14633_s18 + $0x24] sm:$0xf] }
  0x22   : > { %v685_v28 = vrot.slane %v683_v19, 4  ;;  %v691_v33 = vrot.slane %v689_v20, 5  ;;  %v505_v34 = vshll.u32 %v14709_v8, 16  ;;  %v676_v37 = vor.u32 %v675_v23, %v672_v18  ;;  %v14761_v10 = vld [vmem:[%s14633_s18 + $0x28] sm:$0xf] }
  0x23   : > { %v500_v27 = vsel %vm14674_vm4, %v495_v17, %v499_v2  ;;  %v504_v38 = vrot.slane %v502_v26, 4  ;;  %v511_v39 = vshll.u32 %v14716_v21, 16  ;;  %v515_v44 = vshrl.u32 %v14716_v21, 16  ;;  %v14767_v19 = vld [vmem:[%s19562_s1 + $0x6] sm:$0x3] }
  0x24   : > { %v12054_v36 = vcombine.low %v490_v22, %v500_v27  ;;  %v686_v42 = vor.u32 %v685_v28, %v681_v24  ;;  %v507_v43 = vrot.slane %v505_v34, 5  ;;  %v521_v45 = vshll.u32 %v14722_v25, 16 }
  0x25   : > { %v677_v47 = vrot.slane %v676_v37, 4  ;;  %v513_v48 = vrot.slane %v511_v39, 5  ;;  %v694_v49 = vshrl.u32 %v14729_v35, 16  ;;  %v697_v50 = vshll.u32 %v14729_v35, 16 }
  0x26   : > { %13636 = vmatmul.mubr.msk.bf16.vlgmr.msra.gmra.mxu0 %vm887_vm3, %v12054_v36  ;;  %v687_v51 = vrot.slane %v686_v42, 4  ;;  %v508_v52 = vor.u32 %v507_v43, %v504_v38  ;;  %v517_v54 = vrot.slane %v515_v44, 4  ;;  %v523_v55 = vrot.slane %v521_v45, 5  ;;  %v14779_v36 = vld [vmem:[%s14633_s18 + $0x84] sm:$0xf] }
  0x27   : > { %13702 = vmatpush3.bf16.msra.mxu0 %v14659_v16  ;;  %v682_v57 = vsel %vm14674_vm4, %v677_v47, %v681_v24  ;;  %v696_v59 = vrot.slane %v694_v49, 4  ;;  %v699_v60 = vrot.slane %v697_v50, 5  ;;  %v703_v0 = vshll.u32 %v14740_v46, 16  ;;  %v14772_v24 = vld [vmem:[%s14633_s18 + $0x2c] sm:$0x1] }
  0x28   : > { %14354 = vmatprep.subr.msk.bf16.mxu0 %vm936_vm0, %v14735_v40  ;;  %v692_v16 = vsel %vm14674_vm4, %v687_v51, %v691_v33  ;;  %v509_v2 = vrot.slane %v508_v52, 4  ;;  %v518_v3 = vor.u32 %v517_v54, %v513_v48  ;;  %v707_v9 = vshrl.u32 %v14740_v46, 16  ;;  %v14786_v43 = vld [vmem:[%s14633_s18 + $0x88] sm:$0xf]  ;;  %v14794_v51 = vld [vmem:[%s14633_s18 + $0x8c] sm:$0x1] }
  0x29   : > { %v12062_v11 = vcombine.low %v682_v57, %v692_v16  ;;  %v700_v13 = vor.u32 %v699_v60, %v696_v59  ;;  %v705_v17 = vrot.slane %v703_v0, 5  ;;  %v713_v18 = vshll.u32 %v14747_v56, 16  ;;  %19613 = vst [vmem:[#allocation6_spill] sm:$0xff] %v14794_v51  ;;  %v14802_v60 = vld [vmem:[%s14633_s18 + $0x30] sm:$0xf] }
  0x2a   : > { %v514_v20 = vsel %vm14674_vm4, %v509_v2, %v513_v48  ;;  %v519_v22 = vrot.slane %v518_v3, 4  ;;  %v709_v23 = vrot.slane %v707_v9, 4  ;;  %v526_v26 = vshrl.u32 %v14753_v1, 16  ;;  %v14807_v9 = vld [vmem:[%s14633_s18 + $0x34] sm:$0xf] }
  0x2b   : > { %13652 = vmatmul.mubr.msk.bf16.vlgmr.msra.gmra.mxu1 %vm887_vm3, %v12062_v11  ;;  %v701_v27 = vrot.slane %v700_v13, 4  ;;  %v715_v28 = vrot.slane %v713_v18, 5  ;;  %v529_v33 = vshll.u32 %v14753_v1, 16  ;;  %v535_v34 = vshll.u32 %v14761_v10, 16 }
  0x2c   : > { %13668 = vmatpush3.bf16.msra.mxu1 %v14628_v4  ;;  %v524_v37 = vsel %vm14674_vm4, %v519_v22, %v523_v55  ;;  %v710_v38 = vor.u32 %v709_v23, %v705_v17  ;;  %v528_v39 = vrot.slane %v526_v26, 4  ;;  %v539_v42 = vshrl.u32 %v14761_v10, 16 }
  0x2d   : > { %v12055_v44 = vcombine.low %v514_v20, %v524_v37  ;;  %v706_v45 = vsel %vm14674_vm4, %v701_v27, %v705_v17  ;;  %v531_v47 = vrot.slane %v529_v33, 5  ;;  %v537_v48 = vrot.slane %v535_v34, 5  ;;  %14353 = vmatprep.subr.msk.bf16.mxu1 %vm936_vm0, %v14767_v19  ;;  %v14815_v33 = vld [vmem:[%s14633_s18 + $0x38] sm:$0x1] }
  0x2e   : > { %v711_v4 = vrot.slane %v710_v38, 4  ;;  %v541_v49 = vrot.slane %v539_v42, 4  ;;  %v545_v50 = vshll.u32 %v14772_v24, 16  ;;  %v718_v52 = vshrl.u32 %v14779_v36, 16  ;;  %v14820_v38 = vld [vmem:[%s14633_s18 + $0x90] sm:$0xf] }
  0x2f   : > { %13639 = vmatprep.mubr.msk.bf16.mxu0 %vm887_vm3, %v12055_v44  ;;  %v532_v54 = vor.u32 %v531_v47, %v528_v39  ;;  %v721_v55 = vshll.u32 %v14779_v36, 16  ;;  %v727_v57 = vshll.u32 %v14786_v43, 16  ;;  %v731_v59 = vshrl.u32 %v14786_v43, 16  ;;  %19614 = vst [vmem:[#allocation7_spill] sm:$0xff] %v14820_v38  ;;  %v14825_v47 = vld [vmem:[%s14633_s18 + $0x94] sm:$0xf] }
  0x30   : > { %v716_v0 = vsel %vm14674_vm4, %v711_v4, %v715_v28  ;;  %v542_v16 = vor.u32 %v541_v49, %v537_v48  ;;  %v547_v2 = vrot.slane %v545_v50, 5  ;;  %v720_v3 = vrot.slane %v718_v52, 4  ;;  %19615 = vst [vmem:[#allocation8_spill] sm:$0xff] %v14825_v47 }
  0x31   : > { %v12063_v11 = vcombine.low %v706_v45, %v716_v0  ;;  %v533_v13 = vrot.slane %v532_v54, 4  ;;  %v723_v17 = vrot.slane %v721_v55, 5  ;;  %v729_v18 = vrot.slane %v727_v57, 5 }
  0x32   : > { %v543_v20 = vrot.slane %v542_v16, 4  ;;  %v733_v22 = vrot.slane %v731_v59, 4  ;;  %v737_v23 = vshll.u32 %v14794_v51, 16  ;;  %v550_v26 = vshrl.u32 %v14802_v60, 16  ;;  %v14834_v16 = vld [vmem:[%s14633_s18 + $0x98] sm:$0x1] }
  0x33   : > { %13655 = vmatprep.mubr.msk.bf16.mxu1 %vm887_vm3, %v12063_v11  ;;  %v538_v27 = vsel %vm14674_vm4, %v533_v13, %v537_v48  ;;  %v724_v28 = vor.u32 %v723_v17, %v720_v3  ;;  %v553_v34 = vshll.u32 %v14802_v60, 16  ;;  %v559_v37 = vshll.u32 %v14807_v9, 16  ;;  %19616 = vst [vmem:[#allocation9_spill] sm:$0xff] %v14834_v16  ;;  %v14839_v11 = vld [vmem:[%s14633_s18 + $0x3c] sm:$0xf] }
  0x34   : > { %v548_v39 = vsel %vm14674_vm4, %v543_v20, %v547_v2  ;;  %v734_v42 = vor.u32 %v733_v22, %v729_v18  ;;  %v739_v44 = vrot.slane %v737_v23, 5  ;;  %v552_v45 = vrot.slane %v550_v26, 4  ;;  %v14844_v23 = vld [vmem:[%s14633_s18 + $0x40] sm:$0xf]  ;;  %v1394_v51 = vld [vmem:[%s14633_s18 + $0xc] sm:$0xe] }
  0x35   : > { %v12056_v48 = vcombine.low %v538_v27, %v548_v39  ;;  %v725_v4 = vrot.slane %v724_v28, 4  ;;  %v555_v49 = vrot.slane %v553_v34, 5  ;;  %v561_v50 = vrot.slane %v559_v37, 5 }
  0x36   : > { %v735_v52 = vrot.slane %v734_v42, 4  ;;  %v563_v54 = vshrl.u32 %v14807_v9, 16  ;;  %v569_v55 = vshll.u32 %v14815_v33, 16  ;;  %v742_v57 = vshrl.u32 %v14820_v38, 16 }
  0x37   : > { %13640 = vmatmul.mubr.msk.bf16.gmra.mxu0 %vm887_vm3, %v12056_v48  ;;  %v730_v59 = vsel %vm14674_vm4, %v725_v4, %v729_v18  ;;  %v556_v0 = vor.u32 %v555_v49, %v552_v45  ;;  %v745_v2 = vshll.u32 %v14820_v38, 16  ;;  %v751_v3 = vshll.u32 %v14825_v47, 16  ;;  %v14853_v48 = vld [vmem:[%s14633_s18 + $0x44] sm:$0x1] }
  0x38   : > { %v740_v13 = vsel %vm14674_vm4, %v735_v52, %v739_v44  ;;  %v565_v17 = vrot.slane %v563_v54, 4  ;;  %v571_v20 = vrot.slane %v569_v55, 5  ;;  %v744_v22 = vrot.slane %v742_v57, 4  ;;  %v14858_v52 = vld [vmem:[%s14633_s18 + $0x9c] sm:$0xf] }
  0x39   : > { %v12064_v18 = vcombine.low %v730_v59, %v740_v13  ;;  %v557_v26 = vrot.slane %v556_v0, 4  ;;  %v747_v27 = vrot.slane %v745_v2, 5  ;;  %v753_v28 = vrot.slane %v751_v3, 5  ;;  %19617 = vst [vmem:[#allocation10_spill] sm:$0xff] %v14858_v52  ;;  %v14862_v13 = vld [vmem:[%s14633_s18 + $0xa0] sm:$0xf] }
  0x3a   : > { %v566_v34 = vor.u32 %v565_v17, %v561_v50  ;;  %v755_v37 = vshrl.u32 %v14825_v47, 16  ;;  %v761_v39 = vshll.u32 %v14834_v16, 16  ;;  %v574_v42 = vshrl.u32 %v14839_v11, 16  ;;  %19618 = vst [vmem:[#allocation11_spill] sm:$0xff] %v14862_v13 }
  0x3b   : > { %13656 = vmatmul.mubr.msk.bf16.gmra.mxu1 %vm887_vm3, %v12064_v18  ;;  %v562_v44 = vsel %vm14674_vm4, %v557_v26, %v561_v50  ;;  %v748_v45 = vor.u32 %v747_v27, %v744_v22  ;;  %v577_v4 = vshll.u32 %v14839_v11, 16  ;;  %v583_v49 = vshll.u32 %v14844_v23, 16  ;;  %v14868_v26 = vld [vmem:[%s14633_s18 + $0xa4] sm:$0x1] }
  0x3c   : > { %v567_v54 = vrot.slane %v566_v34, 4  ;;  %v757_v55 = vrot.slane %v755_v37, 4  ;;  %v763_v57 = vrot.slane %v761_v39, 5  ;;  %v576_v59 = vrot.slane %v574_v42, 4  ;;  %19619 = vst [vmem:[#allocation12_spill] sm:$0xff] %v14868_v26 }
  0x3d   : > { %v749_v0 = vrot.slane %v748_v45, 4  ;;  %v579_v2 = vrot.slane %v577_v4, 5  ;;  %v585_v3 = vrot.slane %v583_v49, 5  ;;  %v587_v50 = vshrl.u32 %v14844_v23, 16  ;;  %v14872_v34 = vld [vmem:[%s14633_s18 + $0x48] sm:$0xf] }
  0x3e   : > { %v572_v17 = vsel %vm14674_vm4, %v567_v54, %v571_v20  ;;  %v758_v22 = vor.u32 %v757_v55, %v753_v28  ;;  %v593_v18 = vshll.u32 %v14853_v48, 16  ;;  %v766_v27 = vshrl.u32 %v14858_v52, 16 }
  0x3f   : > { %v12057_v37 = vcombine.low %v562_v44, %v572_v17  ;;  %v754_v39 = vsel %vm14674_vm4, %v749_v0, %v753_v28  ;;  %v580_v42 = vor.u32 %v579_v2, %v576_v59  ;;  %v589_v45 = vrot.slane %v587_v50, 4  ;;  %v14881_v17 = vld [vmem:[%s14633_s18 + $0x4c] sm:$0xf]  ;;  %v14887_v2 = vld [vmem:[%s14633_s18 + $0x50] sm:$0x1] }
  0x40   : > { %v759_v4 = vrot.slane %v758_v22, 4  ;;  %v595_v49 = vrot.slane %v593_v18, 5  ;;  %v768_v20 = vrot.slane %v766_v27, 4  ;;  %v769_v54 = vshll.u32 %v14858_v52, 16 }
  0x41   : > { %13643 = vmatprep.mubr.msk.bf16.mxu0 %vm887_vm3, %v12057_v37  ;;  %v581_v55 = vrot.slane %v580_v42, 4  ;;  %v590_v62 = vor.u32 %v589_v45, %v585_v3  ;;  %v775_v32 = vshll.u32 %v14862_v13, 16  ;;  %v779_v44 = vshrl.u32 %v14862_v13, 16  ;;  %v14893_v42 = vld [vmem:[%s14633_s18 + $0xa8] sm:$0xf] }
  0x42   : > { %v764_v28 = vsel %vm14674_vm4, %v759_v4, %v763_v57  ;;  %v771_v59 = vrot.slane %v769_v54, 5  ;;  %v785_v0 = vshll.u32 %v14868_v26, 16  ;;  %v598_v50 = vshrl.u32 %v14872_v34, 16  ;;  %19620 = vst [vmem:[#allocation13_spill] sm:$0xff] %v14893_v42 }
  0x43   : > { %v12065_v22 = vcombine.low %v754_v39, %v764_v28  ;;  %v586_v18 = vsel %vm14674_vm4, %v581_v55, %v585_v3  ;;  %v591_v27 = vrot.slane %v590_v62, 4  ;;  %v777_v37 = vrot.slane %v775_v32, 5 }
  0x44   : > { %v772_v45 = vor.u32 %v771_v59, %v768_v20  ;;  %v781_v61 = vrot.slane %v779_v44, 4  ;;  %v787_v57 = vrot.slane %v785_v0, 5  ;;  %v600_v4 = vrot.slane %v598_v50, 4  ;;  %v14903_v44 = vld [vmem:[%s14633_s18 + $0xac] sm:$0xf] }
  0x45   : > { %13659 = vmatprep.mubr.msk.bf16.mxu1 %vm887_vm3, %v12065_v22  ;;  %v596_v54 = vsel %vm14674_vm4, %v591_v27, %v595_v49  ;;  %v601_v39 = vshll.u32 %v14872_v34, 16  ;;  %v607_v28 = vshll.u32 %v14881_v17, 16  ;;  %v611_v62 = vshrl.u32 %v14881_v17, 16  ;;  %19621 = vst [vmem:[#allocation14_spill] sm:$0xff] %v14903_v44  ;;  %v14906_v22 = vld [vmem:[%s14633_s18 + $0xb0] sm:$0x1] }
  0x46   : > { %v12058_v3 = vcombine.low %v586_v18, %v596_v54  ;;  %v773_v32 = vrot.slane %v772_v45, 4  ;;  %v782_v55 = vor.u32 %v781_v61, %v777_v37  ;;  %v617_v20 = vshll.u32 %v14887_v2, 16  ;;  %19622 = vst [vmem:[#allocation15_spill] sm:$0xff] %v14906_v22 }
  0x47   : > { %v603_v59 = vrot.slane %v601_v39, 5  ;;  %v609_v0 = vrot.slane %v607_v28, 5  ;;  %v613_v50 = vrot.slane %v611_v62, 4  ;;  %v790_v49 = vshrl.u32 %v14893_v42, 16  ;;  %v14915_v62 = vld [vmem:[%s14633_s18 + $0x54] sm:$0xf] }
  0x48   : > { %13644 = vmatmul.mubr.msk.bf16.gmra.mxu0 %vm887_vm3, %v12058_v3  ;;  %v778_v18 = vsel %vm14674_vm4, %v773_v32, %v777_v37  ;;  %v783_v27 = vrot.slane %v782_v55, 4  ;;  %v619_v61 = vrot.slane %v617_v20, 5  ;;  %v793_v45 = vshll.u32 %v14893_v42, 16  ;;  %v14922_v55 = vld [vmem:[%s14633_s18 + $0x58] sm:$0xf] }
  0x49   : > { %v604_v54 = vor.u32 %v603_v59, %v600_v4  ;;  %v614_v56 = vor.u32 %v613_v50, %v609_v0  ;;  %v792_v39 = vrot.slane %v790_v49, 4  ;;  %v799_v28 = vshll.u32 %v14903_v44, 16  ;;  %v14925_v49 = vld [vmem:[%s14633_s18 + $0x5c] sm:$0x1] }
  0x4a   : > { %v788_v3 = vsel %vm14674_vm4, %v783_v27, %v787_v57  ;;  %v795_v26 = vrot.slane %v793_v45, 5  ;;  %v803_v37 = vshrl.u32 %v14903_v44, 16  ;;  %v809_v32 = vshll.u32 %v14906_v22, 16  ;;  %v1393_v22 = vld [vmem:[%s14633_s18] sm:$0xe] }
  0x4b   : > { %v12066_v4 = vcombine.low %v778_v18, %v788_v3  ;;  %v605_v20 = vrot.slane %v604_v54, 4  ;;  %v615_v59 = vrot.slane %v614_v56, 4  ;;  %v801_v50 = vrot.slane %v799_v28, 5  ;;  %v14936_v54 = vld [vmem:[%s14633_s18 + $0xb4] sm:$0xf] }
  0x4c   : > { %v796_v42 = vor.u32 %v795_v26, %v792_v39  ;;  %v805_v52 = vrot.slane %v803_v37, 4  ;;  %v811_v13 = vrot.slane %v809_v32, 5  ;;  %v622_v57 = vshrl.u32 %v14915_v62, 16  ;;  %19623 = vst [vmem:[#allocation16_spill] sm:$0xff] %v14936_v54  ;;  %v14939_v37 = vld [vmem:[%s14633_s18 + $0xb8] sm:$0xf] }
  0x4d   : > { %13660 = vmatmul.mubr.msk.bf16.gmra.mxu1 %vm887_vm3, %v12066_v4  ;;  %v610_v27 = vsel %vm14674_vm4, %v605_v20, %v609_v0  ;;  %v620_v18 = vsel %vm14674_vm4, %v615_v59, %v619_v61  ;;  %v625_v56 = vshll.u32 %v14915_v62, 16  ;;  %v631_v45 = vshll.u32 %v14922_v55, 16  ;;  %v14944_v61 = vld [vmem:[%s14633_s18 + $0xbc] sm:$0x1] }
  0x4e   : > { %v12059_v26 = vcombine.low %v610_v27, %v620_v18  ;;  %v797_v39 = vrot.slane %v796_v42, 4  ;;  %v806_v28 = vor.u32 %v805_v52, %v801_v50  ;;  %v624_v3 = vrot.slane %v622_v57, 4 }
  0x4f   : > { %v627_v32 = vrot.slane %v625_v56, 5  ;;  %v633_v4 = vrot.slane %v631_v45, 5  ;;  %v635_v0 = vshrl.u32 %v14922_v55, 16  ;;  %v641_v20 = vshll.u32 %v14925_v49, 16 }
  0x50   : > { %13647 = vmatprep.mubr.msk.bf16.mxu0 %vm887_vm3, %v12059_v26  ;;  %v802_v59 = vsel %vm14674_vm4, %v797_v39, %v801_v50  ;;  %v807_v27 = vrot.slane %v806_v28, 4  ;;  %v814_v52 = vshrl.u32 %v14936_v54, 16  ;;  %v817_v42 = vshll.u32 %v14936_v54, 16 }
  0x51   : > { %v628_v57 = vor.u32 %v627_v32, %v624_v3  ;;  %v637_v18 = vrot.slane %v635_v0, 4  ;;  %v643_v56 = vrot.slane %v641_v20, 5  ;;  %v823_v45 = vshll.u32 %v14939_v37, 16 }
  0x52   : > { %v812_v44 = vsel %vm14674_vm4, %v807_v27, %v811_v13  ;;  %v816_v16 = vrot.slane %v814_v52, 4  ;;  %v819_v26 = vrot.slane %v817_v42, 5  ;;  %v827_v38 = vshrl.u32 %v14939_v37, 16 }
  0x53   : > { %v12067_v50 = vcombine.low %v802_v59, %v812_v44  ;;  %v629_v39 = vrot.slane %v628_v57, 4  ;;  %v638_v28 = vor.u32 %v637_v18, %v633_v4  ;;  %v825_v47 = vrot.slane %v823_v45, 5  ;;  %v1395_v57 = vld [vmem:[%s14633_s18 + $0x18] sm:$0xe] }
  0x54   : > { %v820_v54 = vor.u32 %v819_v26, %v816_v16  ;;  %v829_v3 = vrot.slane %v827_v38, 4  ;;  %v833_v32 = vshll.u32 %v14944_v61, 16  ;;  %v12117_v13 = vrot.slane %v1393_v22, 9 }
  0x55   : > { %13663 = vmatprep.mubr.msk.bf16.mxu1 %vm887_vm3, %v12067_v50  ;;  %v634_v44 = vsel %vm14674_vm4, %v629_v39, %v633_v4  ;;  %v639_v20 = vrot.slane %v638_v28, 4  ;;  %v1446_v59 = vrot.slane %v14639_v6, 5  ;;  %v12086_v38 = vcombine.low %v14667_v29, %v14670_v30 }
  0x56   : > { %v821_v16 = vrot.slane %v820_v54, 4  ;;  %v830_v27 = vor.u32 %v829_v3, %v825_v47  ;;  %v835_v52 = vrot.slane %v833_v32, 5  ;;  %v12118_v42 = vrot.slane %v1394_v51, 9 }
  0x57   : > { %v644_v18 = vsel %vm14674_vm4, %v639_v20, %v643_v56  ;;  %v1447_v22 = vsel %vm14960_vm7, %v12117_v13, %v1446_v59  ;;  %v1448_v45 = vrot.slane %v1446_v59, 4  ;;  %v19626_v4 = vrot.slane %v14670_v30, 5 }
  0x58   : > { %v12060_v50 = vcombine.low %v634_v44, %v644_v18  ;;  %v826_v54 = vsel %vm14674_vm4, %v821_v16, %v825_v47  ;;  %v831_v39 = vrot.slane %v830_v27, 4  ;;  %v12085_v51 = vcombine.low %v14636_v5, %v14639_v6  ;;  %v1396_v27 = vld [vmem:[%s14633_s18 + $0x24] sm:$0xe] }
  0x59   : > { %v1455_v26 = vrot.slane %v19626_v4, 4  ;;  %v19627_v28 = vrot.slane %v14642_v7, 5  ;;  %v19628_v3 = vmov %v19626_v4  ;;  %v12087_v13 = vcombine.low %v14709_v8, %v14716_v21  ;;  %v1398_v4 = vld [vmem:[%s14633_s18 + $0x3c] sm:$0xe] }
  0x5a   : > { %v1454_v32 = vsel %vm14960_vm7, %v12118_v42, %v19628_v3  ;;  %v12119_v44 = vrot.slane %v1395_v57, 9  ;;  %13648 = vmatmul.mubr.msk.bf16.gmra.mxu0 %vm887_vm3, %v12060_v50  ;;  %v836_v47 = vsel %vm14674_vm4, %v831_v39, %v835_v52  ;;  %v19629_v6 = vrot.slane %v14680_v41, 5  ;;  %v1397_v42 = vld [vmem:[%s14633_s18 + $0x30] sm:$0xe]  ;;  %v1399_v39 = vld [vmem:[%s14633_s18 + $0x48] sm:$0xe] }
  0x5b   : > { %v1450_v56 = vsel %vm14960_vm7, %v1448_v45, %v19627_v28  ;;  %v1460_v20 = vrot.slane %v14716_v21, 5  ;;  %v12068_v59 = vcombine.low %v826_v54, %v836_v47  ;;  %v1463_v16 = vrot.slane %v14722_v25, 5  ;;  %v1400_v47 = vld [vmem:[%s14633_s18 + $0x54] sm:$0xe]  ;;  %v15255_v21 = vld [vmem:[%s14633_s18 + $0x2c] sm:$0x1] }
  0x5c   : > { %v12134_v5 = vcombine.low %v1447_v22, %v1450_v56  ;;  %v1457_v7 = vsel %vm14960_vm7, %v1455_v26, %v19629_v6  ;;  %v2014_v52 = vsel %vm936_vm0, %v14767_v19, 0  ;;  %v1467_v18 = vrot.slane %v14761_v10, 5 }
  0x5d   : > { %v1461_v41 = vsel %vm14960_vm7, %v12119_v44, %v1460_v20  ;;  %v1462_v57 = vrot.slane %v1460_v20, 4  ;;  %13664 = vmatmul.mubr.msk.bf16.gmra.mxu1 %vm887_vm3, %v12068_v59  ;;  %v12135_v22 = vcombine.low %v1454_v32, %v1457_v7  ;;  %v2740_v25 = vsel %vm936_vm0, %v14735_v40, 0 }
  0x5e   : > { %13703 = vmatprep.mubr.msk.bf16.mxu0 %vm887_vm3, %v12134_v5  ;;  %v1474_v45 = vrot.slane %v14807_v9, 5  ;;  %13669 = vmatprep.mubr.msk.bf16.mxu1 %vm887_vm3, %v12085_v51  ;;  %v12120_v26 = vrot.slane %v1396_v27, 9  ;;  %v1470_v50 = vrot.slane %v14772_v24, 5  ;;  %v12121_v54 = vrot.slane %v1397_v42, 9  ;;  %v15027_v24 = vld [vmem:[%s19562_s1 + $0xc] sm:$0x3] }
  0x5f   : > { %v1464_v19 = vsel %vm14960_vm7, %v1462_v57, %v1463_v16  ;;  %v1469_v56 = vrot.slane %v1467_v18, 4  ;;  %v1477_v32 = vrot.slane %v14815_v33, 5  ;;  %v12122_v44 = vrot.slane %v1398_v4, 9 }
  0x60   : > { %v12136_v28 = vcombine.low %v1461_v41, %v1464_v19  ;;  %v1476_v3 = vrot.slane %v1474_v45, 4  ;;  %v1481_v40 = vrot.slane %v14844_v23, 5  ;;  %v1505_v5 = vrot.slane %v14656_v15, 5 }
  0x61   : > { %v1484_v51 = vrot.slane %v14853_v48, 5  ;;  %v12123_v6 = vrot.slane %v1399_v39, 9  ;;  %v1488_v7 = vrot.slane %v14881_v17, 5  ;;  %v12088_v33 = vcombine.low %v14753_v1, %v14761_v10  ;;  %v1401_v1 = vld [vmem:[%s14633_s18 + $0x60] sm:$0xe] }
  0x62   : > { %13704 = vmatmul.mubr.msk.bf16.vlgmr.msra.gmra.mxu0 %vm887_vm3, %v12135_v22  ;;  %v1468_v20 = vsel %vm14960_vm7, %v12120_v26, %v1467_v18  ;;  %v1483_v59 = vrot.slane %v1481_v40, 4  ;;  %v1491_v16 = vrot.slane %v14887_v2, 5  ;;  %v1471_v48 = vsel %vm14960_vm7, %v1469_v56, %v1470_v50  ;;  %v15055_v22 = vld [vmem:[%s19562_s1 + $0xa] sm:$0x3]  ;;  %v15080_v50 = vld [vmem:[%s14633_s18 + $0x6c] sm:$0xe] }
  0x63   : > { %13770 = vmatpush3.bf16.msra.mxu0 %v2740_v25  ;;  %13707 = vmatprep.mubr.msk.bf16.mxu0 %vm887_vm3, %v12136_v28  ;;  %v1475_v27 = vsel %vm14960_vm7, %v12121_v54, %v1474_v45  ;;  %v1478_v42 = vsel %vm14960_vm7, %v1476_v3, %v1477_v32  ;;  %v1490_v41 = vrot.slane %v1488_v7, 4  ;;  %v15045_v10 = vsel %vm14960_vm7, %v12122_v44, %v1481_v40  ;;  %v1404_v39 = vld [vmem:[%s14633_s18 + $0x84] sm:$0xe]  ;;  %v15109_v44 = vld [vmem:[%s14633_s18 + $0x78] sm:$0xe] }
  0x64   : > { %v15049_v2 = vsel %vm14960_vm7, %v12123_v6, %v1488_v7  ;;  %v12124_v57 = vrot.slane %v1400_v47, 9  ;;  %v1495_v18 = vrot.slane %v14922_v55, 5  ;;  %14356 = vmatprep.subr.msk.bf16.mxu0 %vm936_vm0, %v15027_v24  ;;  %v15065_v25 = vsel %vm14960_vm7, %v1483_v59, %v1484_v51  ;;  %v1405_v40 = vld [vmem:[%s14633_s18 + $0x90] sm:$0xe] }
  0x65   : > { %13670 = vmatmul.mubr.msk.bf16.vlgmr.msra.gmra.mxu1 %vm887_vm3, %v12086_v38  ;;  %v15069_v45 = vsel %vm14960_vm7, %v1490_v41, %v1491_v16  ;;  %v1498_v4 = vrot.slane %v14925_v49, 5  ;;  %v1502_v19 = vrot.slane %v14653_v14, 5  ;;  %v12137_v29 = vcombine.low %v1468_v20, %v1471_v48  ;;  %v19630_v48 = vld [vmem:[#allocation6_spill] sm:$0xff] }
  0x66   : > { %13736 = vmatpush3.bf16.msra.mxu1 %v2014_v52  ;;  %13673 = vmatprep.mubr.msk.bf16.mxu1 %vm887_vm3, %v12087_v13  ;;  %v12089_v30 = vcombine.low %v14802_v60, %v14807_v9  ;;  %v1497_v38 = vrot.slane %v1495_v18, 4  ;;  %v12125_v26 = vrot.slane %v1401_v1, 9  ;;  %v12138_v49 = vcombine.low %v1475_v27, %v1478_v42  ;;  %v1406_v42 = vld [vmem:[%s14633_s18 + $0x9c] sm:$0xe] }
  0x67   : > { %v12090_v52 = vcombine.low %v14839_v11, %v14844_v23  ;;  %v12091_v8 = vcombine.low %v14872_v34, %v14881_v17  ;;  %14355 = vmatprep.subr.msk.bf16.mxu1 %vm936_vm0, %v15055_v22  ;;  %v12139_v60 = vcombine.low %v15045_v10, %v15065_v25  ;;  %v12140_v9 = vcombine.low %v15049_v2, %v15069_v45  ;;  %v19631_v10 = vld [vmem:[#allocation8_spill] sm:$0xff]  ;;  %v19632_v2 = vld [vmem:[#allocation7_spill] sm:$0xff] }
  0x68   : > { %v1504_v54 = vrot.slane %v1502_v19, 4  ;;  %v15099_v28 = vsel %vm14960_vm7, %v12124_v57, %v1495_v18  ;;  %v15103_v56 = vsel %vm14960_vm7, %v1497_v38, %v1498_v4  ;;  %v12126_v32 = vrot.slane %v15080_v50, 9  ;;  %v1407_v18 = vld [vmem:[%s14633_s18 + $0xa8] sm:$0xe]  ;;  %v19634_v38 = vld [vmem:[#allocation11_spill] sm:$0xff] }
  0x69   : > { %v15115_v47 = vsel %vm14960_vm7, %v12125_v26, %v1502_v19  ;;  %v1509_v51 = vrot.slane %v14695_v58, 5  ;;  %v1512_v6 = vrot.slane %v14703_v63, 5  ;;  %v12128_v59 = vrot.slane %v1404_v39, 9  ;;  %v19633_v19 = vld [vmem:[#allocation9_spill] sm:$0xff]  ;;  %v19635_v26 = vld [vmem:[#allocation10_spill] sm:$0xff] }
  0x6a   : > { %13708 = vmatmul.mubr.msk.bf16.gmra.mxu0 %vm887_vm3, %v12137_v29  ;;  %v1523_v16 = vrot.slane %v14786_v43, 5  ;;  %v1526_v27 = vrot.slane %v19630_v48, 5  ;;  %v12141_v41 = vcombine.low %v15099_v28, %v15103_v56  ;;  %v15133_v63 = vsel %vm14960_vm7, %v1504_v54, %v1505_v5  ;;  %v19637_v48 = vld [vmem:[#allocation14_spill] sm:$0xff]  ;;  %v12231_v57 = vld [vmem:[%s14633_s18 + $0xc] sm:$0xf] }
  0x6b   : > { %13711 = vmatprep.mubr.msk.bf16.mxu0 %vm887_vm3, %v12138_v49  ;;  %v12127_v1 = vrot.slane %v15109_v44, 9  ;;  %v12129_v4 = vrot.slane %v1405_v40, 9  ;;  %v1530_v15 = vrot.slane %v19631_v10, 5  ;;  %v1511_v5 = vrot.slane %v1509_v51, 4 }
  0x6c   : > { %v15142_v25 = vsel %vm14960_vm7, %v12128_v59, %v1523_v16  ;;  %v1525_v45 = vrot.slane %v1523_v16, 4  ;;  %v1533_v29 = vrot.slane %v19633_v19, 5  ;;  %v12130_v49 = vrot.slane %v1406_v42, 9  ;;  %v19636_v59 = vld [vmem:[#allocation12_spill] sm:$0xff]  ;;  %v19638_v42 = vld [vmem:[#allocation13_spill] sm:$0xff] }
  0x6d   : > { %13674 = vmatmul.mubr.msk.bf16.gmra.mxu1 %vm887_vm3, %v12088_v33  ;;  %v1516_v33 = vrot.slane %v14740_v46, 5  ;;  %v15156_v39 = vsel %vm14960_vm7, %v12129_v4, %v1530_v15  ;;  %v1532_v44 = vrot.slane %v1530_v15, 4  ;;  %v1537_v40 = vrot.slane %v19634_v38, 5  ;;  %v19639_v15 = vld [vmem:[#allocation15_spill] sm:$0xff] }
  0x6e   : > { %13677 = vmatprep.mubr.msk.bf16.mxu1 %vm887_vm3, %v12089_v30  ;;  %v15152_v54 = vsel %vm14960_vm7, %v1525_v45, %v1526_v27  ;;  %v1540_v16 = vrot.slane %v19636_v59, 5  ;;  %v12131_v45 = vrot.slane %v1407_v18, 9  ;;  %v1544_v4 = vrot.slane %v19637_v48, 5 }
  0x6f   : > { %v15166_v27 = vsel %vm14960_vm7, %v1532_v44, %v1533_v29  ;;  %v1547_v50 = vrot.slane %v19639_v15, 5  ;;  %v15176_v19 = vsel %vm14960_vm7, %v12130_v49, %v1537_v40  ;;  %v1539_v7 = vrot.slane %v1537_v40, 4  ;;  %v19640_v29 = vld [vmem:[#allocation16_spill] sm:$0xff]  ;;  %v19641_v15 = vld [vmem:[#allocation5_spill] sm:$0xff]  ;;  %v15191_v49 = vld [vmem:[%s14633_s18 + $0x10] sm:$0xf] }
  0x70   : > { %v15183_v18 = vsel %vm14960_vm7, %v12126_v32, %v1509_v51  ;;  %v15188_v59 = vsel %vm14960_vm7, %v12131_v45, %v1544_v4  ;;  %v1546_v30 = vrot.slane %v1544_v4, 4  ;;  %v12234_v40 = vld [vmem:[%s14633_s18 + $0x18] sm:$0xf]  ;;  %v1518_v20 = vrot.slane %v1516_v33, 4 }
  0x71   : > { %v2258_v44 = vshrl.u32 %v12231_v57, 16  ;;  %v2261_v32 = vshll.u32 %v12231_v57, 16  ;;  %v12142_v51 = vcombine.low %v15115_v47, %v15133_v63  ;;  %v15206_v45 = vsel %vm14960_vm7, %v1511_v5, %v1512_v6  ;;  %v1408_v57 = vld [vmem:[%s14633_s18 + $0xb4] sm:$0xe]  ;;  %v15227_v47 = vld [vmem:[%s14633_s18 + $0x14] sm:$0x1] }
  0x72   : > { %13712 = vmatmul.mubr.msk.bf16.gmra.mxu0 %vm887_vm3, %v12139_v60  ;;  %v1519_v60 = vrot.slane %v19641_v15, 5  ;;  %v15221_v11 = vsel %vm14960_vm7, %v12127_v1, %v1516_v33  ;;  %v2267_v6 = vshll.u32 %v15191_v49, 16  ;;  %v12235_v63 = vld [vmem:[%s14633_s18 + $0x1c] sm:$0xf]  ;;  %v2271_v17 = vshrl.u32 %v15191_v49, 16 }
  0x73   : > { %13715 = vmatprep.mubr.msk.bf16.mxu0 %vm887_vm3, %v12140_v9  ;;  %v15196_v9 = vsel %vm14960_vm7, %v1539_v7, %v1540_v16  ;;  %v15212_v7 = vsel %vm14960_vm7, %v1546_v30, %v1547_v50  ;;  %v2260_v5 = vrot.slane %v2258_v44, 4  ;;  %v2263_v34 = vrot.slane %v2261_v32, 5  ;;  %v12237_v15 = vld [vmem:[%s14633_s18 + $0x24] sm:$0xf]  ;;  %v15240_v44 = vld [vmem:[%s14633_s18 + $0x28] sm:$0xf] }
  0x74   : > { %v2282_v50 = vshrl.u32 %v12234_v40, 16  ;;  %v1520_v1 = vsel %vm14960_vm7, %v1518_v20, %v1519_v60  ;;  %v12132_v33 = vrot.slane %v1408_v57, 9  ;;  %v15235_v30 = vrot.slane %v2267_v6, 5 }
  0x75   : > { %13678 = vmatmul.mubr.msk.bf16.gmra.mxu1 %vm887_vm3, %v12090_v52  ;;  %v1551_v52 = vrot.slane %v14939_v37, 5  ;;  %v2285_v16 = vshll.u32 %v12234_v40, 16  ;;  %v1554_v23 = vrot.slane %v14944_v61, 5  ;;  %v2273_v4 = vrot.slane %v2271_v17, 4 }
  0x76   : > { %13681 = vmatprep.mubr.msk.bf16.mxu1 %vm887_vm3, %v12091_v8  ;;  %v12236_v8 = vld [vmem:[%s14633_s18 + $0x20] sm:$0x1]  ;;  %v2284_v3 = vrot.slane %v2282_v50, 4  ;;  %v2291_v13 = vshll.u32 %v12235_v63, 16  ;;  %v2277_v20 = vshll.u32 %v15227_v47, 16  ;;  %v2295_v57 = vshrl.u32 %v12235_v63, 16 }
  0x77   : > { %v1553_v32 = vrot.slane %v1551_v52, 4  ;;  %v2287_v60 = vrot.slane %v2285_v16, 5  ;;  %v12143_v61 = vcombine.low %v15183_v18, %v15206_v45  ;;  %v12144_v40 = vcombine.low %v15221_v11, %v1520_v1 }
  0x78   : > { %v2264_v6 = vor.u32 %v2263_v34, %v2260_v5  ;;  %v15251_v17 = vrot.slane %v2291_v13, 5  ;;  %v2274_v28 = vor.u32 %v2273_v4, %v15235_v30  ;;  %v2301_v50 = vshll.u32 %v12236_v8, 16  ;;  %v15278_v5 = vld [vmem:[%s14633_s18 + $0x34] sm:$0xf] }
  0x79   : > { %v2288_v56 = vor.u32 %v2287_v60, %v2284_v3  ;;  %v15263_v18 = vsel %vm14960_vm7, %v12132_v33, %v1551_v52  ;;  %v2306_v13 = vshrl.u32 %v12237_v15, 16  ;;  %v2309_v45 = vshll.u32 %v12237_v15, 16  ;;  %v12240_v52 = vld [vmem:[%s14633_s18 + $0x30] sm:$0xf] }
  0x7a   : > { %13716 = vmatmul.mubr.msk.bf16.gmra.mxu0 %vm887_vm3, %v12141_v41  ;;  %v2297_v41 = vrot.slane %v2295_v57, 4  ;;  %v2315_v11 = vshll.u32 %v15240_v44, 16  ;;  %v19643_v3 = vcombine.low %v14649_v12, %v14653_v14  ;;  %v15272_v4 = vsel %vm14960_vm7, %v1553_v32, %v1554_v23 }
  0x7b   : > { %13719 = vmatprep.mubr.msk.bf16.mxu0 %vm887_vm3, %v12142_v51  ;;  %v19642_v51 = vcombine.low %v14915_v62, %v14922_v55  ;;  %v2279_v62 = vrot.slane %v2277_v20, 5  ;;  %v2319_v63 = vshrl.u32 %v15240_v44, 16  ;;  %v2265_v34 = vrot.slane %v2264_v6, 4 }
  0x7c   : > { %v2298_v55 = vor.u32 %v2297_v41, %v15251_v17  ;;  %v2308_v8 = vrot.slane %v2306_v13, 4  ;;  %v2311_v1 = vrot.slane %v2309_v45, 5  ;;  %v15280_v33 = vrot.slane %v2315_v11, 5  ;;  %v15286_v41 = vld [vmem:[%s14633_s18 + $0x38] sm:$0x1] }
  0x7d   : > { %13682 = vmatmul.mubr.msk.bf16.gmra.mxu1 %vm887_vm3, %v19642_v51  ;;  %v2275_v12 = vrot.slane %v2274_v28, 4  ;;  %v2289_v14 = vrot.slane %v2288_v56, 4  ;;  %v2303_v16 = vrot.slane %v2301_v50, 5  ;;  %v2321_v23 = vrot.slane %v2319_v63, 4  ;;  %v12243_v13 = vld [vmem:[%s14633_s18 + $0x3c] sm:$0xf] }
  0x7e   : > { %13685 = vmatprep.mubr.msk.bf16.mxu1 %vm887_vm3, %v19643_v3  ;;  %v2299_v15 = vrot.slane %v2298_v55, 4  ;;  %v2325_v32 = vshll.u32 %v15255_v21, 16  ;;  %v2330_v20 = vshrl.u32 %v12240_v52, 16  ;;  %v2333_v60 = vshll.u32 %v12240_v52, 16 }
  0x7f   : > { %v2312_v57 = vor.u32 %v2311_v1, %v2308_v8  ;;  %v2322_v6 = vor.u32 %v2321_v23, %v15280_v33  ;;  %v2339_v28 = vshll.u32 %v15278_v5, 16  ;;  %v2343_v56 = vshrl.u32 %v15278_v5, 16  ;;  %v12246_v8 = vld [vmem:[%s14633_s18 + $0x48] sm:$0xf]  ;;  %v15313_v1 = vld [vmem:[%s14633_s18 + $0x4c] sm:$0xf] }
  0x80   : > { %v2332_v50 = vrot.slane %v2330_v20, 4  ;;  %v2335_v51 = vrot.slane %v2333_v60, 5  ;;  %v19644_v3 = vcombine.low %v14691_v53, %v14695_v58  ;;  %v12149_v55 = vcombine.low %v15263_v18, %v15272_v4 }
  0x81   : > { %v15292_v45 = vrot.slane %v2339_v28, 5  ;;  %v2345_v11 = vrot.slane %v2343_v56, 4  ;;  %v2280_v63 = vsel %vm14674_vm4, %v2275_v12, %v2279_v62  ;;  %v2294_v52 = vsel %vm14674_vm4, %v2289_v14, %v15251_v17 }
  0x82   : > { %13720 = vmatmul.mubr.msk.bf16.gmra.mxu0 %vm887_vm3, %v12143_v61  ;;  %v15295_v61 = vld [vmem:[%s14633_s18 + $0x40] sm:$0xf]  ;;  %v19645_v53 = vcombine.low %v14729_v35, %v14740_v46  ;;  %v2304_v58 = vsel %vm14674_vm4, %v2299_v15, %v2303_v16  ;;  %v2313_v23 = vrot.slane %v2312_v57, 4  ;;  %v2336_v20 = vor.u32 %v2335_v51, %v2332_v50  ;;  %v15347_v50 = vld [vmem:[%s14633_s18 + $0x44] sm:$0x1] }
  0x83   : > { %13723 = vmatprep.mubr.msk.bf16.mxu0 %vm887_vm3, %v12144_v40  ;;  %v2270_v40 = vsel %vm14674_vm4, %v2265_v34, %v15235_v30  ;;  %v2323_v30 = vrot.slane %v2322_v6, 4  ;;  %v2327_v34 = vrot.slane %v2325_v32, 5  ;;  %v2349_v62 = vshll.u32 %v15286_v41, 16  ;;  %v12249_v51 = vld [vmem:[%s14633_s18 + $0x54] sm:$0xf] }
  0x84   : > { %v2354_v12 = vshrl.u32 %v12243_v13, 16  ;;  %v2357_v17 = vshll.u32 %v12243_v13, 16  ;;  %v15324_v14 = vsel %vm936_vm0, %v15055_v22, 0  ;;  %v2346_v35 = vor.u32 %v2345_v11, %v15292_v45 }
  0x85   : > { %13686 = vmatmul.mubr.msk.bf16.gmra.mxu1 %vm887_vm3, %v19644_v3  ;;  %v2363_v46 = vshll.u32 %v15295_v61, 16  ;;  %v2367_v16 = vshrl.u32 %v15295_v61, 16  ;;  %v15329_v15 = vcombine.low %v2270_v40, %v2280_v63  ;;  %v15333_v32 = vsel %vm936_vm0, %v15027_v24, 0  ;;  %v15356_v40 = vld [vmem:[%s14633_s18 + $0x58] sm:$0xf] }
  0x86   : > { %13689 = vmatprep.mubr.msk.bf16.mxu1 %vm887_vm3, %v19645_v53  ;;  %v2378_v60 = vshrl.u32 %v12246_v8, 16  ;;  %v2381_v57 = vshll.u32 %v12246_v8, 16  ;;  %v19646_v6 = vcombine.low %v15142_v25, %v15152_v54  ;;  %v15339_v22 = vcombine.low %v2294_v52, %v2304_v58  ;;  %v15361_v8 = vld [vmem:[%s14633_s18 + $0x50] sm:$0x1] }
  0x87   : > { %v2318_v28 = vsel %vm14674_vm4, %v2313_v23, %v15280_v33  ;;  %v2328_v56 = vsel %vm14674_vm4, %v2323_v30, %v2327_v34  ;;  %v2387_v24 = vshll.u32 %v15313_v1, 16  ;;  %v19647_v25 = vcombine.low %v15156_v39, %v15166_v27  ;;  %v12252_v34 = vld [vmem:[%s14633_s18 + $0x60] sm:$0xf] }
  0x88   : > { %v2337_v54 = vrot.slane %v2336_v20, 4  ;;  %v2351_v13 = vrot.slane %v2349_v62, 5  ;;  %v2356_v11 = vrot.slane %v2354_v12, 4  ;;  %v2359_v3 = vrot.slane %v2357_v17, 5 }
  0x89   : > { %v2347_v33 = vrot.slane %v2346_v35, 4  ;;  %v15358_v63 = vrot.slane %v2363_v46, 5  ;;  %v2369_v52 = vrot.slane %v2367_v16, 4  ;;  %v2391_v53 = vshrl.u32 %v15313_v1, 16  ;;  %v15378_v35 = vld [vmem:[%s14633_s18 + $0x5c] sm:$0x1] }
  0x8a   : > { %13724 = vmatmul.mubr.msk.bf16.gmra.mxu0 %vm887_vm3, %v19646_v6  ;;  %v19648_v39 = vcombine.low %v14779_v36, %v14786_v43  ;;  %v2380_v27 = vrot.slane %v2378_v60, 4  ;;  %v2383_v58 = vrot.slane %v2381_v57, 5  ;;  %v2402_v23 = vshrl.u32 %v12249_v51, 16 }
  0x8b   : > { %13727 = vmatprep.mubr.msk.bf16.mxu0 %vm887_vm3, %v19647_v25  ;;  %v2405_v30 = vshll.u32 %v12249_v51, 16  ;;  %v19649_v20 = vcombine.low %v19632_v2, %v19631_v10  ;;  %v15373_v62 = vcombine.low %v2318_v28, %v2328_v56  ;;  %v15375_v12 = vrot.slane %v2387_v24, 5  ;;  %v15391_v28 = vld [vmem:[%s14633_s18 + $0x64] sm:$0xf] }
  0x8c   : > { %v2393_v17 = vrot.slane %v2391_v53, 4  ;;  %v2411_v36 = vshll.u32 %v15356_v40, 16  ;;  %v2373_v43 = vshll.u32 %v15347_v50, 16  ;;  %v2404_v46 = vrot.slane %v2402_v23, 4 }
  0x8d   : > { %13690 = vmatmul.mubr.msk.bf16.gmra.mxu1 %vm887_vm3, %v19648_v39  ;;  %v2407_v16 = vrot.slane %v2405_v30, 5  ;;  %v2415_v60 = vshrl.u32 %v15356_v40, 16  ;;  %v2342_v10 = vsel %vm14674_vm4, %v2337_v54, %v15292_v45  ;;  %v2352_v2 = vsel %vm14674_vm4, %v2347_v33, %v2351_v13  ;;  %v15413_v30 = vld [vmem:[%s14633_s18 + $0x68] sm:$0x1] }
  0x8e   : > { %13693 = vmatprep.mubr.msk.bf16.mxu1 %vm887_vm3, %v19649_v20  ;;  %v2360_v57 = vor.u32 %v2359_v3, %v2356_v11  ;;  %v15388_v6 = vrot.slane %v2411_v36, 5  ;;  %v2370_v56 = vor.u32 %v2369_v52, %v15358_v63  ;;  %v2384_v24 = vor.u32 %v2383_v58, %v2380_v27  ;;  %v12255_v3 = vld [vmem:[%s14633_s18 + $0x6c] sm:$0xf]  ;;  %v15410_v27 = vld [vmem:[%s14633_s18 + $0x70] sm:$0xf] }
  0x8f   : > { %v2397_v51 = vshll.u32 %v15361_v8, 16  ;;  %v2417_v25 = vrot.slane %v2415_v60, 4  ;;  %v19650_v53 = vcombine.low %v15176_v19, %v15196_v9  ;;  %v2394_v45 = vor.u32 %v2393_v17, %v15375_v12 }
  0x90   : > { %v2408_v54 = vor.u32 %v2407_v16, %v2404_v46  ;;  %v2426_v13 = vshrl.u32 %v12252_v34, 16  ;;  %v2429_v11 = vshll.u32 %v12252_v34, 16  ;;  %v19651_v33 = vcombine.low %v15188_v59, %v15212_v7  ;;  %v12258_v16 = vld [vmem:[%s14633_s18 + $0x78] sm:$0xf] }
  0x91   : > { %v2418_v52 = vor.u32 %v2417_v25, %v15388_v6  ;;  %v2421_v39 = vshll.u32 %v15378_v35, 16  ;;  %v2435_v19 = vshll.u32 %v15391_v28, 16  ;;  %v2439_v9 = vshrl.u32 %v15391_v28, 16 }
  0x92   : > { %13728 = vmatmul.mubr.msk.bf16.gmra.mxu0 %vm887_vm3, %v19650_v53  ;;  %v2361_v58 = vrot.slane %v2360_v57, 4  ;;  %v2375_v23 = vrot.slane %v2373_v43, 5  ;;  %v2428_v34 = vrot.slane %v2426_v13, 4  ;;  %v2431_v20 = vrot.slane %v2429_v11, 5 }
  0x93   : > { %13731 = vmatprep.mubr.msk.bf16.mxu0 %vm887_vm3, %v19651_v33  ;;  %v19652_v59 = vcombine.low %v19635_v26, %v19634_v38  ;;  %v15419_v7 = vcombine.low %v2342_v10, %v2352_v2  ;;  %v2371_v17 = vrot.slane %v2370_v56, 4  ;;  %v2385_v36 = vrot.slane %v2384_v24, 4  ;;  %v15429_v2 = vld [vmem:[%s14633_s18 + $0x7c] sm:$0xf] }
  0x94   : > { %v15421_v46 = vrot.slane %v2435_v19, 5  ;;  %v19653_v43 = vcombine.low %v19638_v42, %v19637_v48  ;;  %v2395_v60 = vrot.slane %v2394_v45, 4  ;;  %v2399_v57 = vrot.slane %v2397_v51, 5  ;;  %19654 = vst [vmem:[#allocation6_spill] sm:$0xff] %v15429_v2  ;;  %v12261_v19 = vld [vmem:[%s14633_s18 + $0x84] sm:$0xf] }
  0x95   : > { %13694 = vmatmul.mubr.msk.bf16.gmra.mxu1 %vm887_vm3, %v19652_v59  ;;  %v2409_v25 = vrot.slane %v2408_v54, 4  ;;  %v2441_v38 = vrot.slane %v2439_v9, 4  ;;  %v2419_v26 = vrot.slane %v2418_v52, 4  ;;  %v2423_v53 = vrot.slane %v2421_v39, 5 }
  0x96   : > { %13697 = vmatprep.mubr.msk.bf16.mxu1 %vm887_vm3, %v19653_v43  ;;  %v2432_v13 = vor.u32 %v2431_v20, %v2428_v34  ;;  %v2450_v10 = vshrl.u32 %v12255_v3, 16  ;;  %v2366_v56 = vsel %vm14674_vm4, %v2361_v58, %v15358_v63  ;;  %v2453_v24 = vshll.u32 %v12255_v3, 16  ;;  %v14405_v63 = vld [vmem:[%s14633_s18 + $0xc] sm:$0xff]   ;;  %v15463_v34 = vld [vmem:[%s14633_s18 + $0x88] sm:$0xf] }
  0x97   : > { %v2459_v48 = vshll.u32 %v15410_v27, 16  ;;  %v2463_v42 = vshrl.u32 %v15410_v27, 16  ;;  %v2376_v51 = vsel %vm14674_vm4, %v2371_v17, %v2375_v23  ;;  %v2390_v45 = vsel %vm14674_vm4, %v2385_v36, %v15375_v12  ;;  %19655 = vst [vmem:[#allocation8_spill] sm:$0xff] %v15463_v34  ;;  %v15472_v36 = vld [vmem:[%s14633_s18 + $0x74] sm:$0x1] }
  0x98   : > { %v2442_v54 = vor.u32 %v2441_v38, %v15421_v46  ;;  %v2445_v11 = vshll.u32 %v15413_v30, 16  ;;  %v2400_v3 = vsel %vm14674_vm4, %v2395_v60, %v2399_v57  ;;  %v2414_v33 = vsel %vm14674_vm4, %v2409_v25, %v15388_v6  ;;  %19657 = vst [vmem:[#allocation7_spill] sm:$0xff] %v15472_v36  ;;  %v15476_v43 = vld [vmem:[%s14633_s18 + $0x80] sm:$0x1] }
  0x99   : > { %v2474_v52 = vshrl.u32 %v12258_v16, 16  ;;  %v2477_v12 = vshll.u32 %v12258_v16, 16  ;;  %v2424_v18 = vsel %vm14674_vm4, %v2419_v26, %v2423_v53  ;;  %v2433_v4 = vrot.slane %v2432_v13, 4  ;;  %19658 = vst [vmem:[#allocation9_spill] sm:$0xff] %v15476_v43  ;;  %v15485_v26 = vld [vmem:[%s14633_s18 + $0x8c] sm:$0x1] }
  0x9a   : > { %13732 = vmatmul.mubr.msk.bf16.gmra.mxu0 %vm887_vm3, %v12149_v55  ;;  %v2452_v55 = vrot.slane %v2450_v10, 4  ;;  %v2483_v39 = vshll.u32 %v15429_v2, 16  ;;  %v2455_v9 = vrot.slane %v2453_v24, 5  ;;  %v15459_v58 = vrot.slane %v2459_v48, 5  ;;  %19659 = vst [vmem:[#allocation11_spill] sm:$0xff] %v15485_v26  ;;  %v14406_v10 = vld [vmem:[%s14633_s18 + $0x18] sm:$0xff]  }
  0x9b   : > { %13771 = vmatprep.mubr.msk.bf16.mxu0 %vm887_vm3, %v15329_v15  ;;  %v2465_v23 = vrot.slane %v2463_v42, 4  ;;  %v2487_v6 = vshrl.u32 %v15429_v2, 16  ;;  %v19656_v15 = vcombine.low %v19640_v29, %v14939_v37  ;;  %v15469_v20 = vcombine.low %v2366_v56, %v2376_v51  ;;  %v12264_v51 = vld [vmem:[%s14633_s18 + $0x90] sm:$0xf] }
  0x9c   : > { %v2443_v59 = vrot.slane %v2442_v54, 4  ;;  %v2447_v17 = vrot.slane %v2445_v11, 5  ;;  %v2476_v16 = vrot.slane %v2474_v52, 4  ;;  %v2479_v60 = vrot.slane %v2477_v12, 5 }
  0x9d   : > { %13698 = vmatmul.mubr.msk.bf16.gmra.mxu1 %vm887_vm3, %v19656_v15  ;;  %v15478_v57 = vrot.slane %v2483_v39, 5  ;;  %v2489_v37 = vrot.slane %v2487_v6, 4  ;;  %v2498_v29 = vshrl.u32 %v12261_v19, 16  ;;  %v15480_v25 = vcombine.low %v2390_v45, %v2400_v3  ;;  %v15496_v45 = vld [vmem:[%s14633_s18 + $0x94] sm:$0xf] }
  0x9e   : > { %13737 = vmatprep.mubr.msk.bf16.mxu1 %vm887_vm3, %v14405_v63  ;;  %v15482_v38 = vcombine.low %v2414_v33, %v2424_v18  ;;  %v2501_v53 = vshll.u32 %v12261_v19, 16  ;;  %v2507_v13 = vshll.u32 %v15463_v34, 16  ;;  %v2438_v56 = vsel %vm14674_vm4, %v2433_v4, %v15421_v46  ;;  %19660 = vst [vmem:[#allocation10_spill] sm:$0xff] %v15496_v45  ;;  %v15504_v33 = vld [vmem:[%s19562_s1 + $0x10] sm:$0x3]  ;;  %v14407_v46 = vld [vmem:[%s14633_s18 + $0x24] sm:$0xff]  }
  0x9f   : > { %v2456_v24 = vor.u32 %v2455_v9, %v2452_v55  ;;  %v2466_v48 = vor.u32 %v2465_v23, %v15459_v58  ;;  %v2469_v42 = vshll.u32 %v15472_v36, 16  ;;  %v2500_v54 = vrot.slane %v2498_v29, 4  ;;  %19661 = vst [vmem:[#allocation12_spill] sm:$0xff] %v15504_v33  ;;  %v12267_v55 = vld [vmem:[%s14633_s18 + $0x9c] sm:$0xf] }
  0xa0   : > { %v2503_v11 = vrot.slane %v2501_v53, 5  ;;  %v15498_v63 = vrot.slane %v2507_v13, 5  ;;  %v2511_v3 = vshrl.u32 %v15463_v34, 16  ;;  %v2448_v52 = vsel %vm14674_vm4, %v2443_v59, %v2447_v17 }
  0xa1   : > { %v2480_v12 = vor.u32 %v2479_v60, %v2476_v16  ;;  %v2490_v18 = vor.u32 %v2489_v37, %v15478_v57  ;;  %v2493_v4 = vshll.u32 %v15476_v43, 16  ;;  %v2522_v9 = vshrl.u32 %v12264_v51, 16  ;;  %v15538_v37 = vld [vmem:[%s14633_s18 + $0xa0] sm:$0xf] }
  0xa2   : > { %13772 = vmatmul.mubr.msk.bf16.vlgmr.msra.gmra.mxu0 %vm887_vm3, %v15339_v22  ;;  %v2504_v39 = vor.u32 %v2503_v11, %v2500_v54  ;;  %v2513_v19 = vrot.slane %v2511_v3, 4  ;;  %v2525_v22 = vshll.u32 %v12264_v51, 16  ;;  %v15517_v23 = vrot.slane %v2456_v24, 4  ;;  %19663 = vst [vmem:[#allocation13_spill] sm:$0xff] %v15538_v37 }
  0xa3   : > { %13838 = vmatpush3.bf16.msra.mxu0 %v15333_v32  ;;  %13775 = vmatprep.mubr.msk.bf16.mxu0 %vm887_vm3, %v15373_v62  ;;  %v15519_v6 = vrot.slane %v2469_v42, 5  ;;  %v2517_v15 = vshll.u32 %v15485_v26, 16  ;;  %v2531_v59 = vshll.u32 %v15496_v45, 16  ;;  %v15526_v32 = vld [vmem:[%s19562_s1 + $0xe] sm:$0x3]  ;;  %v15531_v62 = vcombine.low %v2438_v56, %v2448_v52 }
  0xa4   : > { %19662 = vst [vmem:[#allocation14_spill] sm:$0xff] %v15526_v32  ;;  %14358 = vmatprep.subr.msk.bf16.mxu0 %vm936_vm0, %v15504_v33  ;;  %v15533_v17 = vrot.slane %v2466_v48, 4  ;;  %v2514_v16 = vor.u32 %v2513_v19, %v15498_v63  ;;  %v2535_v60 = vshrl.u32 %v15496_v45, 16  ;;  %v15542_v29 = vrot.slane %v2480_v12, 4  ;;  %v15551_v56 = vld [vmem:[%s14633_s18 + $0x98] sm:$0x1] }
  0xa5   : > { %13738 = vmatmul.mubr.msk.bf16.vlgmr.msra.gmra.mxu1 %vm887_vm3, %v14406_v10  ;;  %v15544_v53 = vrot.slane %v2490_v18, 4  ;;  %v15546_v13 = vrot.slane %v2493_v4, 5  ;;  %v15548_v10 = vrot.slane %v2504_v39, 4  ;;  %19664 = vst [vmem:[#allocation15_spill] sm:$0xff] %v15551_v56  ;;  %v2524_v24 = vrot.slane %v2522_v9, 4  ;;  %v14409_v19 = vld [vmem:[%s14633_s18 + $0x3c] sm:$0xff]  }
  0xa6   : > { %13804 = vmatpush3.bf16.msra.mxu1 %v15324_v14  ;;  %13741 = vmatprep.mubr.msk.bf16.mxu1 %vm887_vm3, %v14407_v46  ;;  %v2527_v48 = vrot.slane %v2525_v22, 5  ;;  %v2546_v42 = vshrl.u32 %v12267_v55, 16  ;;  %v2549_v51 = vshll.u32 %v12267_v55, 16  ;;  %v14408_v14 = vld [vmem:[%s14633_s18 + $0x30] sm:$0xff]   ;;  %v15560_v11 = vrot.slane %v2517_v15, 5 }
  0xa7   : > { %14357 = vmatprep.subr.msk.bf16.mxu1 %vm936_vm0, %v15526_v32  ;;  %v15562_v3 = vrot.slane %v2531_v59, 5  ;;  %v2555_v46 = vshll.u32 %v15538_v37, 16  ;;  %v12270_v52 = vld [vmem:[%s14633_s18 + $0xa8] sm:$0xf]  ;;  %v15566_v12 = vrot.slane %v2514_v16, 4  ;;  %v2537_v18 = vrot.slane %v2535_v60, 4 }
  0xa8   : > { %v2541_v4 = vshll.u32 %v15551_v56, 16  ;;  %v2559_v55 = vshrl.u32 %v15538_v37, 16  ;;  %v15571_v39 = vld [vmem:[%s14633_s18 + $0xac] sm:$0xf]  ;;  %v15593_v59 = vld [vmem:[%s14633_s18 + $0xa4] sm:$0x1]  ;;  %v2528_v16 = vor.u32 %v2527_v48, %v2524_v24 }
  0xa9   : > { %19665 = vst [vmem:[#allocation16_spill] sm:$0xff] %v15571_v39  ;;  %19666 = vst [vmem:[#allocation5_spill] sm:$0xff] %v15593_v59  ;;  %v2548_v60 = vrot.slane %v2546_v42, 4  ;;  %v2551_v54 = vrot.slane %v2549_v51, 5  ;;  %v15598_v22 = vld [vmem:[%s14633_s18 + $0xb0] sm:$0x1]  ;;  %v2538_v24 = vor.u32 %v2537_v18, %v15562_v3 }
  0xaa   : > { %13776 = vmatmul.mubr.msk.bf16.gmra.mxu0 %vm887_vm3, %v15419_v7  ;;  %19667 = vst [vmem:[#allocation17_spill] sm:$0xff] %v15598_v22  ;;  %v2570_v9 = vshrl.u32 %v12270_v52, 16  ;;  %v15600_v32 = vrot.slane %v2555_v46, 5  ;;  %v2561_v15 = vrot.slane %v2559_v55, 4  ;;  %v2573_v33 = vshll.u32 %v12270_v52, 16 }
  0xab   : > { %13779 = vmatprep.mubr.msk.bf16.mxu0 %vm887_vm3, %v15469_v20  ;;  %v2579_v37 = vshll.u32 %v15571_v39, 16  ;;  %v12273_v7 = vld [vmem:[%s14633_s18 + $0xb4] sm:$0xf]  ;;  %v2520_v20 = vsel %vm14674_vm4, %v15566_v12, %v15560_v11  ;;  %v15610_v48 = vrot.slane %v2541_v4, 5  ;;  %v15613_v51 = vld [vmem:[%s14633_s18 + $0xb8] sm:$0xf]  ;;  %v2552_v12 = vor.u32 %v2551_v54, %v2548_v60 }
  0xac   : > { %v2572_v42 = vrot.slane %v2570_v9, 4  ;;  %19668 = vst [vmem:[#allocation18_spill] sm:$0xff] %v15613_v51  ;;  %v2565_v46 = vshll.u32 %v15593_v59, 16  ;;  %v2575_v52 = vrot.slane %v2573_v33, 5  ;;  %v2583_v55 = vshrl.u32 %v15571_v39, 16  ;;  %v14410_v59 = vld [vmem:[%s14633_s18 + $0x48] sm:$0xff]  }
  0xad   : > { %13742 = vmatmul.mubr.msk.bf16.gmra.mxu1 %vm887_vm3, %v14408_v14  ;;  %v15617_v14 = vrot.slane %v2579_v37, 5  ;;  %v15620_v11 = vrot.slane %v2528_v16, 4  ;;  %v15623_v18 = vld [vmem:[%s14633_s18 + $0xbc] sm:$0x1]  ;;  %v2594_v4 = vshrl.u32 %v12273_v7, 16  ;;  %v2597_v9 = vshll.u32 %v12273_v7, 16 }
  0xae   : > { %13745 = vmatprep.mubr.msk.bf16.mxu1 %vm887_vm3, %v14409_v19  ;;  %v2562_v56 = vor.u32 %v2561_v15, %v15600_v32  ;;  %v2585_v45 = vrot.slane %v2583_v55, 4  ;;  %v2589_v19 = vshll.u32 %v15598_v22, 16  ;;  %v2603_v33 = vshll.u32 %v15613_v51, 16  ;;  %v12276_v37 = vld [vmem:[%s14633_s18 + $0xc0] sm:$0xf]  ;;  %v14411_v7 = vld [vmem:[%s14633_s18 + $0x54] sm:$0xff]  }
  0xaf   : > { %v2576_v26 = vor.u32 %v2575_v52, %v2572_v42  ;;  %v2596_v39 = vrot.slane %v2594_v4, 4  ;;  %v2599_v34 = vrot.slane %v2597_v9, 5  ;;  %v2607_v16 = vshrl.u32 %v15613_v51, 16  ;;  %v15632_v54 = vld [vmem:[%s14633_s18 + $0xc4] sm:$0xf] }
  0xb0   : > { %v2539_v60 = vrot.slane %v2538_v24, 4  ;;  %v2567_v15 = vrot.slane %v2565_v46, 5  ;;  %v2586_v55 = vor.u32 %v2585_v45, %v15617_v14  ;;  %v2605_v22 = vrot.slane %v2603_v33, 5  ;;  %v15644_v45 = vld [vmem:[%s14633_s18 + $0xc8] sm:$0x1] }
  0xb1   : > { %v2600_v42 = vor.u32 %v2599_v34, %v2596_v39  ;;  %v2609_v52 = vrot.slane %v2607_v16, 4  ;;  %v2613_v4 = vshll.u32 %v15623_v18, 16  ;;  %v2618_v9 = vshrl.u32 %v12276_v37, 16 }
  0xb2   : > { %13780 = vmatmul.mubr.msk.bf16.gmra.mxu0 %vm887_vm3, %v15480_v25  ;;  %v2553_v51 = vrot.slane %v2552_v12, 4  ;;  %v2563_v43 = vrot.slane %v2562_v56, 4  ;;  %v2621_v2 = vshll.u32 %v12276_v37, 16  ;;  %v2627_v25 = vshll.u32 %v15632_v54, 16 }
  0xb3   : > { %13783 = vmatprep.mubr.msk.bf16.mxu0 %vm887_vm3, %v15482_v38  ;;  %v2577_v24 = vrot.slane %v2576_v26, 4  ;;  %v2591_v46 = vrot.slane %v2589_v19, 5  ;;  %v2610_v36 = vor.u32 %v2609_v52, %v2605_v22  ;;  %v2620_v33 = vrot.slane %v2618_v9, 4  ;;  %v12316_v9 = vld [vmem:[%s14633_s18 + $0x3c] sm:$0xe] }
  0xb4   : > { %v2587_v34 = vrot.slane %v2586_v55, 4  ;;  %v2623_v38 = vrot.slane %v2621_v2, 5  ;;  %v15647_v39 = vrot.slane %v2627_v25, 5  ;;  %v2631_v56 = vshrl.u32 %v15632_v54, 16 }
  0xb5   : > { %13746 = vmatmul.mubr.msk.bf16.gmra.mxu1 %vm887_vm3, %v14410_v59  ;;  %v19669_v26 = vsel %vm14674_vm4, %v15533_v17, %v15519_v6  ;;  %v19670_v59 = vsel %vm14674_vm4, %v15517_v23, %v15459_v58  ;;  %v2601_v19 = vrot.slane %v2600_v42, 4  ;;  %v2611_v37 = vrot.slane %v2610_v36, 4  ;;  %v14412_v23 = vld [vmem:[%s14633_s18 + $0x60] sm:$0xff]  }
  0xb6   : > { %13749 = vmatprep.mubr.msk.bf16.mxu1 %vm887_vm3, %v14411_v7  ;;  %v12288_v12 = vcombine.low %v19670_v59, %v19669_v26  ;;  %v2615_v2 = vrot.slane %v2613_v4, 5  ;;  %v19671_v16 = vsel %vm14674_vm4, %v15544_v53, %v15546_v13  ;;  %v19672_v6 = vsel %vm14674_vm4, %v15542_v29, %v15478_v57  ;;  %v12314_v13 = vld [vmem:[%s14633_s18 + $0x24] sm:$0xe] }
  0xb7   : > { %v12289_v17 = vcombine.low %v19672_v6, %v19671_v16  ;;  %v2624_v7 = vor.u32 %v2623_v38, %v2620_v33  ;;  %v2633_v55 = vrot.slane %v2631_v56, 4  ;;  %v2637_v58 = vshll.u32 %v15644_v45, 16  ;;  %v12317_v33 = vld [vmem:[%s14633_s18 + $0x48] sm:$0xe]  ;;  %v12318_v6 = vld [vmem:[%s14633_s18 + $0x54] sm:$0xe] }
  0xb8   : > { %v19673_v36 = vsel %vm14674_vm4, %v15548_v10, %v15498_v63  ;;  %v2534_v53 = vsel %vm14674_vm4, %v15620_v11, %v15562_v3  ;;  %v2544_v57 = vsel %vm14674_vm4, %v2539_v60, %v15610_v48  ;;  %v2558_v29 = vsel %vm14674_vm4, %v2553_v51, %v15600_v32  ;;  %v14413_v63 = vld [vmem:[%s14633_s18 + $0x6c] sm:$0xff]  }
  0xb9   : > { %v12290_v42 = vcombine.low %v19673_v36, %v2520_v20  ;;  %v2568_v10 = vsel %vm14674_vm4, %v2563_v43, %v2567_v15  ;;  %v2582_v3 = vsel %vm14674_vm4, %v2577_v24, %v15617_v14  ;;  %v2592_v20 = vsel %vm14674_vm4, %v2587_v34, %v2591_v46  ;;  %v15700_v11 = vld [vmem:[%s14633_s18 + $0xc] sm:$0xe]  ;;  %v12315_v14 = vld [vmem:[%s14633_s18 + $0x30] sm:$0xe] }
  0xba   : > { %13784 = vmatmul.mubr.msk.bf16.gmra.mxu0 %vm887_vm3, %v15531_v62  ;;  %v2634_v48 = vor.u32 %v2633_v55, %v15647_v39  ;;  %v2606_v32 = vsel %vm14674_vm4, %v2601_v19, %v2605_v22  ;;  %v2616_v43 = vsel %vm14674_vm4, %v2611_v37, %v2615_v2  ;;  %v15707_v62 = vrot.slane %v2624_v7, 4  ;;  %v14414_v7 = vld [vmem:[%s14633_s18 + $0x78] sm:$0xff]  }
  0xbb   : > { %13787 = vmatprep.mubr.msk.bf16.mxu0 %vm887_vm3, %v12288_v12  ;;  %v3001_v51 = vrot.slane %v15191_v49, 5  ;;  %v15711_v60 = vcombine.low %v2534_v53, %v2544_v57  ;;  %v15715_v52 = vrot.slane %v2637_v58, 5  ;;  %v12330_v4 = vrot.slane %v12314_v13, 9  ;;  %v14415_v53 = vld [vmem:[%s14633_s18 + $0x84] sm:$0xff]   ;;  %v12319_v13 = vld [vmem:[%s14633_s18 + $0x60] sm:$0xe] }
  0xbc   : > { %v15713_v15 = vrot.slane %v2634_v48, 4  ;;  %v15719_v25 = vcombine.low %v2558_v29, %v2568_v10  ;;  %v15721_v22 = vcombine.low %v2582_v3, %v2592_v20  ;;  %v12328_v24 = vrot.slane %v15700_v11, 9  ;;  %v14421_v49 = vld [vmem:[%s14633_s18 + $0x18] sm:$0xff]  }
  0xbd   : > { %13750 = vmatmul.mubr.msk.bf16.gmra.mxu1 %vm887_vm3, %v14412_v23  ;;  %v3015_v46 = vrot.slane %v15240_v44, 5  ;;  %v15727_v34 = vcombine.low %v2606_v32, %v2616_v43  ;;  %v3004_v38 = vrot.slane %v15227_v47, 5  ;;  %v3018_v56 = vrot.slane %v15255_v21, 5 }
  0xbe   : > { %13753 = vmatprep.mubr.msk.bf16.mxu1 %vm887_vm3, %v14413_v63  ;;  %v12331_v26 = vrot.slane %v12315_v14, 9  ;;  %v2630_v59 = vsel %vm14674_vm4, %v15707_v62, %v15647_v39  ;;  %v15737_v44 = vrot.slane %v3001_v51, 4  ;;  %v2640_v21 = vsel %vm14674_vm4, %v15713_v15, %v15715_v52  ;;  %v12321_v14 = vld [vmem:[%s14633_s18 + $0x78] sm:$0xe]  ;;  %v14420_v52 = vld [vmem:[%s14633_s18 + $0xc0] sm:$0xff]  }
  0xbf   : > { %v15741_v12 = vsel %vm14960_vm7, %v12330_v4, %v3015_v46  ;;  %v3017_v19 = vrot.slane %v3015_v46, 4  ;;  %v3022_v37 = vrot.slane %v15278_v5, 5  ;;  %v3025_v2 = vrot.slane %v15286_v41, 5 }
  0xc0   : > { %v12332_v16 = vrot.slane %v12316_v9, 9  ;;  %v3029_v58 = vrot.slane %v15295_v61, 5  ;;  %v3032_v23 = vrot.slane %v15347_v50, 5  ;;  %v12333_v36 = vrot.slane %v12317_v33, 9 }
  0xc1   : > { %v15753_v55 = vsel %vm14960_vm7, %v3017_v19, %v3018_v56  ;;  %v15763_v41 = vsel %vm14960_vm7, %v12331_v26, %v3022_v37  ;;  %v3024_v57 = vrot.slane %v3022_v37, 4  ;;  %v3036_v29 = vrot.slane %v15313_v1, 5  ;;  %v12322_v19 = vld [vmem:[%s14633_s18 + $0x84] sm:$0xe] }
  0xc2   : > { %13788 = vmatmul.mubr.msk.bf16.gmra.mxu0 %vm887_vm3, %v12289_v17  ;;  %v12347_v5 = vcombine.low %v15741_v12, %v15753_v55  ;;  %v15770_v61 = vsel %vm14960_vm7, %v12332_v16, %v3029_v58  ;;  %v3031_v50 = vrot.slane %v3029_v58, 4  ;;  %v3039_v17 = vrot.slane %v15361_v8, 5  ;;  %v19674_v16 = vld [vmem:[#allocation7_spill] sm:$0xff]  ;;  %v14416_v58 = vld [vmem:[%s14633_s18 + $0x90] sm:$0xff]  }
  0xc3   : > { %13791 = vmatprep.mubr.msk.bf16.mxu0 %vm887_vm3, %v12290_v42  ;;  %v12334_v63 = vrot.slane %v12318_v6, 9  ;;  %v15775_v10 = vsel %vm14960_vm7, %v3024_v57, %v3025_v2  ;;  %v15779_v3 = vsel %vm14960_vm7, %v12333_v36, %v3036_v29  ;;  %v3038_v1 = vrot.slane %v3036_v29, 4  ;;  %v12320_v42 = vld [vmem:[%s14633_s18 + $0x6c] sm:$0xe]  ;;  %v19675_v36 = vld [vmem:[#allocation6_spill] sm:$0xff] }
  0xc4   : > { %v3043_v20 = vrot.slane %v15356_v40, 5  ;;  %v12348_v48 = vcombine.low %v15763_v41, %v15775_v10  ;;  %v15788_v8 = vsel %vm14960_vm7, %v3031_v50, %v3032_v23  ;;  %v3046_v32 = vrot.slane %v15378_v35, 5  ;;  %v12323_v57 = vld [vmem:[%s14633_s18 + $0x90] sm:$0xe]  ;;  %v19676_v50 = vld [vmem:[#allocation9_spill] sm:$0xff] }
  0xc5   : > { %13754 = vmatmul.mubr.msk.bf16.gmra.mxu1 %vm887_vm3, %v14414_v7  ;;  %v12335_v43 = vrot.slane %v12319_v13, 9  ;;  %v12349_v40 = vcombine.low %v15770_v61, %v15788_v8  ;;  %v15797_v4 = vsel %vm14960_vm7, %v3038_v1, %v3039_v17  ;;  %v3050_v33 = vrot.slane %v15391_v28, 5 }
  0xc6   : > { %13757 = vmatprep.mubr.msk.bf16.mxu1 %vm887_vm3, %v14415_v53  ;;  %v15801_v9 = vsel %vm14960_vm7, %v12334_v63, %v3043_v20  ;;  %v3045_v46 = vrot.slane %v3043_v20, 4  ;;  %v12350_v35 = vcombine.low %v15779_v3, %v15797_v4  ;;  %v3053_v56 = vrot.slane %v15413_v30, 5  ;;  %v12454_v3 = vld [vmem:[%s14633_s18 + $0x48] sm:$0xf]  ;;  %v16087_v4 = vld [vmem:[%s14633_s18 + $0x4c] sm:$0xf] }
  0xc7   : > { %v12336_v26 = vrot.slane %v12320_v42, 9  ;;  %v3057_v2 = vrot.slane %v15410_v27, 5  ;;  %v3060_v6 = vrot.slane %v19674_v16, 5  ;;  %v12337_v7 = vrot.slane %v12321_v14, 9  ;;  %v14417_v27 = vld [vmem:[%s14633_s18 + $0x9c] sm:$0xff]   ;;  %v19685_v14 = vld [vmem:[#allocation18_spill] sm:$0xff] }
  0xc8   : > { %v15810_v37 = vsel %vm14960_vm7, %v3045_v46, %v3046_v32  ;;  %v15819_v28 = vsel %vm14960_vm7, %v12335_v43, %v3050_v33  ;;  %v3052_v30 = vrot.slane %v3050_v33, 4  ;;  %v3064_v53 = vrot.slane %v19675_v36, 5  ;;  %v19677_v42 = vld [vmem:[#allocation8_spill] sm:$0xff]  ;;  %v12324_v43 = vld [vmem:[%s14633_s18 + $0x9c] sm:$0xe] }
  0xc9   : > { %v12351_v23 = vcombine.low %v15801_v9, %v15810_v37  ;;  %v15828_v29 = vsel %vm14960_vm7, %v12336_v26, %v3057_v2  ;;  %v3059_v13 = vrot.slane %v3057_v2, 4  ;;  %v3067_v17 = vrot.slane %v19676_v50, 5  ;;  %v12325_v26 = vld [vmem:[%s14633_s18 + $0xa8] sm:$0xe]  ;;  %v19680_v36 = vld [vmem:[#allocation15_spill] sm:$0xff] }
  0xca   : > { %13792 = vmatmul.mubr.msk.bf16.gmra.mxu0 %vm887_vm3, %v15711_v60  ;;  %v12338_v63 = vrot.slane %v12322_v19, 9  ;;  %v15835_v1 = vsel %vm14960_vm7, %v3052_v30, %v3053_v56  ;;  %v15839_v60 = vsel %vm14960_vm7, %v12337_v7, %v3064_v53  ;;  %v3066_v20 = vrot.slane %v3064_v53, 4  ;;  %v12327_v7 = vld [vmem:[%s14633_s18 + $0xc0] sm:$0xe]  ;;  %v14418_v19 = vld [vmem:[%s14633_s18 + $0xa8] sm:$0xff]  }
  0xcb   : > { %13795 = vmatprep.mubr.msk.bf16.mxu0 %vm887_vm3, %v15719_v25  ;;  %v3071_v32 = vrot.slane %v19677_v42, 5  ;;  %v15847_v46 = vsel %vm14960_vm7, %v3059_v13, %v3060_v6  ;;  %v19678_v25 = vld [vmem:[#allocation11_spill] sm:$0xff]  ;;  %v12339_v56 = vrot.slane %v12323_v57, 9  ;;  %v3081_v53 = vrot.slane %v19680_v36, 5  ;;  %v12326_v13 = vld [vmem:[%s14633_s18 + $0xb4] sm:$0xe] }
  0xcc   : > { %v3074_v33 = vrot.slane %v19678_v25, 5  ;;  %v15856_v2 = vsel %vm14960_vm7, %v3066_v20, %v3067_v17  ;;  %v12340_v57 = vrot.slane %v12324_v43, 9  ;;  %v19681_v17 = vld [vmem:[#allocation13_spill] sm:$0xff]  ;;  %v19683_v43 = vld [vmem:[#allocation16_spill] sm:$0xff]  ;;  %v3005_v39 = vsel %vm14960_vm7, %v15737_v44, %v3004_v38 }
  0xcd   : > { %13758 = vmatmul.mubr.msk.bf16.gmra.mxu1 %vm887_vm3, %v14416_v58  ;;  %v15860_v16 = vsel %vm14960_vm7, %v12338_v63, %v3071_v32  ;;  %v3073_v6 = vrot.slane %v3071_v32, 4  ;;  %v19679_v58 = vld [vmem:[#allocation10_spill] sm:$0xff]  ;;  %v3085_v63 = vrot.slane %v19681_v17, 5  ;;  %v19682_v20 = vld [vmem:[#allocation5_spill] sm:$0xff]  ;;  %v12341_v32 = vrot.slane %v12325_v26, 9 }
  0xce   : > { %13761 = vmatprep.mubr.msk.bf16.mxu1 %vm887_vm3, %v14417_v27  ;;  %v3078_v30 = vrot.slane %v19679_v58, 5  ;;  %v3088_v42 = vrot.slane %v19682_v20, 5  ;;  %v3092_v36 = vrot.slane %v19683_v43, 5  ;;  %v19684_v17 = vld [vmem:[#allocation17_spill] sm:$0xff]  ;;  %v12342_v26 = vrot.slane %v12326_v13, 9  ;;  %v14419_v27 = vld [vmem:[%s14633_s18 + $0xb4] sm:$0xff]  }
  0xcf   : > { %v15870_v50 = vsel %vm14960_vm7, %v3073_v6, %v3074_v33  ;;  %v15885_v33 = vsel %vm14960_vm7, %v12340_v57, %v3085_v63  ;;  %v3087_v6 = vrot.slane %v3085_v63, 4  ;;  %v3095_v20 = vrot.slane %v19684_v17, 5  ;;  %v14511_v44 = vld [vmem:[%s14633_s18 + $0x20] sm:$0x1] }
  0xd0   : > { %v15878_v25 = vsel %vm14960_vm7, %v12339_v56, %v3078_v30  ;;  %v3080_v58 = vrot.slane %v3078_v30, 4  ;;  %v15897_v30 = vsel %vm14960_vm7, %v12341_v32, %v3092_v36  ;;  %v3094_v43 = vrot.slane %v3092_v36, 4 }
  0xd1   : > { %v3099_v57 = vrot.slane %v19685_v14, 5  ;;  %v12343_v63 = vrot.slane %v12327_v7, 9  ;;  %v3106_v7 = vrot.slane %v15632_v54, 5  ;;  %v3002_v54 = vsel %vm14960_vm7, %v12328_v24, %v3001_v51 }
  0xd2   : > { %13796 = vmatmul.mubr.msk.bf16.gmra.mxu0 %vm887_vm3, %v15721_v22  ;;  %v15893_v56 = vsel %vm14960_vm7, %v3080_v58, %v3081_v53  ;;  %v15906_v22 = vsel %vm14960_vm7, %v3087_v6, %v3088_v42  ;;  %v3102_v53 = vrot.slane %v15623_v18, 5  ;;  %v15913_v14 = vsel %vm14960_vm7, %v3094_v43, %v3095_v20  ;;  %v14423_v43 = vld [vmem:[%s14633_s18 + $0x30] sm:$0xff]  }
  0xd3   : > { %13799 = vmatprep.mubr.msk.bf16.mxu0 %vm887_vm3, %v15727_v34  ;;  %v15917_v34 = vsel %vm14960_vm7, %v12342_v26, %v3099_v57  ;;  %v3101_v58 = vrot.slane %v3099_v57, 4  ;;  %v3109_v42 = vrot.slane %v15644_v45, 5  ;;  %v12313_v45 = vld [vmem:[%s14633_s18 + $0x18] sm:$0xe]  ;;  %v15957_v62 = vsel %vm14960_vm7, %v12343_v63, %v3106_v7  ;;  %v14422_v26 = vld [vmem:[%s14633_s18 + $0x24] sm:$0xff]  }
  0xd4   : > { %v3108_v51 = vrot.slane %v3106_v7, 4  ;;  %v12329_v24 = vrot.slane %v12313_v45, 9  ;;  %v12345_v38 = vcombine.low %v3002_v54, %v3005_v39  ;;  %v19686_v57 = vld [vmem:[#allocation12_spill] sm:$0xff]  ;;  %v12442_v63 = vld [vmem:[%s14633_s18 + $0x18] sm:$0xf] }
  0xd5   : > { %13762 = vmatmul.mubr.msk.bf16.gmra.mxu1 %vm887_vm3, %v14418_v19  ;;  %v12295_v19 = vcombine.low %v2630_v59, %v2640_v21  ;;  %v15945_v15 = vsel %vm14960_vm7, %v3101_v58, %v3102_v53  ;;  %v3011_v21 = vrot.slane %v14511_v44, 5  ;;  %v4765_v53 = vsel %vm936_vm0, %v19686_v57, 0  ;;  %v12443_v7 = vld [vmem:[%s14633_s18 + $0x1c] sm:$0xf]  ;;  %v14425_v44 = vld [vmem:[%s14633_s18 + $0x48] sm:$0xff]  }
  0xd6   : > { %13765 = vmatprep.mubr.msk.bf16.mxu1 %vm887_vm3, %v14419_v27  ;;  %v14510_v27 = vld [vmem:[%s14633_s18 + $0x1c] sm:$0xf]  ;;  %v15962_v47 = vsel %vm14960_vm7, %v3108_v51, %v3109_v42  ;;  %v12445_v42 = vld [vmem:[%s14633_s18 + $0x24] sm:$0xf]  ;;  %v3813_v45 = vshrl.u32 %v12442_v63, 16  ;;  %v3822_v39 = vshll.u32 %v12443_v7, 16 }
  0xd7   : > { %v3008_v36 = vrot.slane %v14510_v27, 5  ;;  %v3816_v27 = vshll.u32 %v12442_v63, 16  ;;  %v3837_v51 = vshrl.u32 %v12445_v42, 16  ;;  %v12523_v57 = vld [vmem:[%s14633_s18 + $0x18] sm:$0xe] }
  0xd8   : > { %v16003_v63 = vld [vmem:[%s14633_s18 + $0x2c] sm:$0x1] }
  0xd9   : > { %v3010_v59 = vrot.slane %v3008_v36, 4  ;;  %v3009_v17 = vsel %vm14960_vm7, %v12329_v24, %v3008_v36  ;;  %v15987_v36 = vld [vmem:[%s14633_s18 + $0x28] sm:$0xf]  ;;  %v14424_v24 = vld [vmem:[%s14633_s18 + $0x3c] sm:$0xff]   ;;  %v3839_v12 = vrot.slane %v3837_v51, 4 }
  0xda   : > { %13800 = vmatmul.mubr.msk.bf16.gmra.mxu0 %vm887_vm3, %v12295_v19  ;;  %v19687_v19 = vld [vmem:[#allocation14_spill] sm:$0xff] }
  0xdb   : > { %13839 = vmatprep.mubr.msk.bf16.mxu0 %vm887_vm3, %v14421_v49  ;;  %v3012_v20 = vsel %vm14960_vm7, %v3010_v59, %v3011_v21  ;;  %v4295_v54 = vsel %vm936_vm0, %v19687_v19, 0  ;;  %v3826_v49 = vshrl.u32 %v12443_v7, 16  ;;  %v3850_v59 = vshrl.u32 %v15987_v36, 16  ;;  %v12444_v21 = vld [vmem:[%s14633_s18 + $0x20] sm:$0x1] }
  0xdc   : > { %v12346_v58 = vcombine.low %v3009_v17, %v3012_v20  ;;  %v3815_v17 = vrot.slane %v3813_v45, 4  ;;  %v3818_v20 = vrot.slane %v3816_v27, 5  ;;  %v12448_v19 = vld [vmem:[%s14633_s18 + $0x30] sm:$0xf]  ;;  %v3832_v45 = vshll.u32 %v12444_v21, 16 }
  0xdd   : > { %13766 = vmatmul.mubr.msk.bf16.gmra.mxu1 %vm887_vm3, %v14420_v52  ;;  %v3840_v52 = vshll.u32 %v12445_v42, 16  ;;  %v3852_v42 = vrot.slane %v3850_v59, 4  ;;  %v12539_v27 = vrot.slane %v12523_v57, 9  ;;  %v4559_v51 = vrot.slane %v12444_v21, 5  ;;  %v12524_v59 = vld [vmem:[%s14633_s18 + $0x24] sm:$0xe] }
  0xde   : > { %13805 = vmatprep.mubr.msk.bf16.mxu1 %vm887_vm3, %v12345_v38  ;;  %v3846_v38 = vshll.u32 %v15987_v36, 16  ;;  %v14426_v21 = vld [vmem:[%s14633_s18 + $0x54] sm:$0xff]   ;;  %v3864_v10 = vshll.u32 %v12448_v19, 16  ;;  %v14427_v57 = vld [vmem:[%s14633_s18 + $0x60] sm:$0xff]  }
  0xdf   : > { %v3842_v55 = vrot.slane %v3840_v52, 5  ;;  %v3856_v52 = vshll.u32 %v16003_v63, 16 }
  0xe2   : > { %13840 = vmatmul.mubr.msk.bf16.vlgmr.msra.gmra.mxu0 %vm887_vm3, %v14422_v26  ;;  %v15999_v26 = vrot.slane %v3822_v39, 5 }
  0xe3   : > { %13906 = vmatpush3.bf16.msra.mxu0 %v4765_v53  ;;  %13843 = vmatprep.mubr.msk.bf16.mxu0 %vm887_vm3, %v14423_v43  ;;  %v3828_v43 = vrot.slane %v3826_v49, 4  ;;  %v4556_v53 = vrot.slane %v12443_v7, 5  ;;  %v16013_v7 = vld [vmem:[%s14633_s18 + $0x34] sm:$0xf] }
  0xe5   : > { %13806 = vmatmul.mubr.msk.bf16.vlgmr.msra.gmra.mxu1 %vm887_vm3, %v12346_v58  ;;  %v16008_v58 = vrot.slane %v3846_v38, 5  ;;  %v3829_v39 = vor.u32 %v3828_v43, %v15999_v26  ;;  %v4558_v49 = vrot.slane %v4556_v53, 4  ;;  %v3843_v38 = vor.u32 %v3842_v55, %v3839_v12 }
  0xe6   : > { %13872 = vmatpush3.bf16.msra.mxu1 %v4295_v54  ;;  %13809 = vmatprep.mubr.msk.bf16.mxu1 %vm887_vm3, %v12347_v5  ;;  %v16006_v5 = vpop.f32.mrf.mxu0  ;;  %v3819_v54 = vor.u32 %v3818_v20, %v3815_v17  ;;  %v3861_v17 = vshrl.u32 %v12448_v19, 16  ;;  %v3874_v43 = vshrl.u32 %v16013_v7, 16  ;;  %v16038_v61 = vsel %vm14960_vm7, %v12539_v27, %v4556_v53  ;;  %v12451_v19 = vld [vmem:[%s14633_s18 + $0x3c] sm:$0xf] }
  0xe7   : > { %v3853_v41 = vor.u32 %v3852_v42, %v16008_v58  ;;  %v3830_v8 = vrot.slane %v3829_v39, 4  ;;  %v3858_v55 = vrot.slane %v3856_v52, 5  ;;  %v12540_v42 = vrot.slane %v12524_v59, 9  ;;  %v16052_v39 = vld [vmem:[%s14633_s18 + $0x38] sm:$0x1] }
  0xe8   : > { %v16030_v20 = vpop.f32.mrf.mxu0  ;;  %v3820_v12 = vrot.slane %v3819_v54, 4  ;;  %v3844_v11 = vrot.slane %v3843_v38, 4  ;;  %v4566_v54 = vrot.slane %v16003_v63, 5  ;;  %v3876_v52 = vrot.slane %v3874_v43, 4 }
  0xe9   : > { %v3854_v27 = vrot.slane %v3853_v41, 4  ;;  %v3885_v38 = vshrl.u32 %v12451_v19, 16  ;;  %v3888_v59 = vshll.u32 %v12451_v19, 16  ;;  %v16065_v41 = vld [vmem:[%s14633_s18 + $0x40] sm:$0xf] }
  0xea   : > { %13844 = vmatmul.mubr.msk.bf16.gmra.mxu0 %vm887_vm3, %v14424_v24  ;;  %v16049_v53 = vpop.f32.mrf.mxu0  ;;  %v3825_v63 = vsel %vm14674_vm4, %v3820_v12, %v15999_v26  ;;  %v3849_v26 = vsel %vm14674_vm4, %v3844_v11, %v16008_v58  ;;  %v12525_v12 = vld [vmem:[%s14633_s18 + $0x30] sm:$0xe]  ;;  %v3894_v9 = vshll.u32 %v16065_v41, 16  ;;  %v3898_v37 = vshrl.u32 %v16065_v41, 16 }
  0xeb   : > { %13847 = vmatprep.mubr.msk.bf16.mxu0 %vm887_vm3, %v14425_v44  ;;  %v16021_v24 = vpop.f32.mrf.mxu1  ;;  %v4563_v44 = vrot.slane %v15987_v36, 5  ;;  %v3834_v36 = vrot.slane %v3832_v45, 5  ;;  %v3863_v45 = vrot.slane %v3861_v17, 4  ;;  %v3859_v58 = vsel %vm14674_vm4, %v3854_v27, %v3858_v55 }
  0xec   : > { %19688 = vst [vmem:[#allocation7_spill] sm:$0xff] %v16021_v24  ;;  %v16094_v11 = vpop.f32.mrf.mxu0  ;;  %v3890_v19 = vrot.slane %v3888_v59, 5  ;;  %v3922_v55 = vshrl.u32 %v16087_v4, 16 }
  0xed   : > { %13810 = vmatmul.mubr.msk.bf16.gmra.mxu1 %vm887_vm3, %v12348_v48  ;;  %v3870_v48 = vshll.u32 %v16013_v7, 16  ;;  %v16045_v6 = vpop.f32.mrf.mxu1  ;;  %v4565_v18 = vrot.slane %v4563_v44, 4  ;;  %v3835_v17 = vsel %vm14674_vm4, %v3830_v8, %v3834_v36  ;;  %v4570_v36 = vrot.slane %v16013_v7, 5  ;;  %v14429_v8 = vld [vmem:[%s14633_s18 + $0x78] sm:$0xff]  }
  0xee   : > { %13813 = vmatprep.mubr.msk.bf16.mxu1 %vm887_vm3, %v12349_v40  ;;  %v16042_v40 = vsel %vm14960_vm7, %v4558_v49, %v4559_v51  ;;  %19689 = vst [vmem:[#allocation6_spill] sm:$0xff] %v16045_v6  ;;  %v3866_v49 = vrot.slane %v3864_v10, 5  ;;  %v16108_v27 = vcombine.low %v3825_v63, %v3835_v17  ;;  %v16110_v7 = vcombine.low %v3849_v26, %v3859_v58  ;;  %v16124_v17 = vld [vmem:[%s14633_s18 + $0x58] sm:$0xf]  ;;  %v16130_v58 = vld [vmem:[%s14633_s18 + $0x44] sm:$0x1] }
  0xef   : > { %v16054_v51 = vrot.slane %v3870_v48, 5  ;;  %v16071_v10 = vpop.f32.mrf.mxu1  ;;  %v16078_v48 = vsel %vm14960_vm7, %v12540_v42, %v4563_v44  ;;  %v16082_v43 = vsel %vm14960_vm7, %v4565_v18, %v4566_v54  ;;  %v3887_v42 = vrot.slane %v3885_v38, 4  ;;  %v12457_v38 = vld [vmem:[%s14633_s18 + $0x54] sm:$0xf] }
  0xf0   : > { %19690 = vst [vmem:[#allocation9_spill] sm:$0xff] %v16071_v10  ;;  %v3867_v44 = vor.u32 %v3866_v49, %v3863_v45  ;;  %v3912_v54 = vshll.u32 %v12454_v3, 16  ;;  %v4572_v13 = vrot.slane %v4570_v36, 4  ;;  %v4573_v63 = vrot.slane %v16052_v39, 5  ;;  %v12526_v49 = vld [vmem:[%s14633_s18 + $0x3c] sm:$0xe] }
  0xf1   : > { %v3877_v18 = vor.u32 %v3876_v52, %v16054_v51  ;;  %v16106_v45 = vpop.f32.mrf.mxu1  ;;  %v12541_v52 = vrot.slane %v12525_v12, 9  ;;  %v3891_v12 = vor.u32 %v3890_v19, %v3887_v42  ;;  %v19693_v6 = vcombine.low %v15819_v28, %v15835_v1 }
  0xf2   : > { %13848 = vmatmul.mubr.msk.bf16.gmra.mxu0 %vm887_vm3, %v14426_v21  ;;  %v3918_v21 = vshll.u32 %v16087_v4, 16  ;;  %19691 = vst [vmem:[#allocation8_spill] sm:$0xff] %v16106_v45  ;;  %v3914_v45 = vrot.slane %v3912_v54, 5  ;;  %v3933_v42 = vshrl.u32 %v12457_v38, 16  ;;  %v3936_v19 = vshll.u32 %v12457_v38, 16 }
  0xf3   : > { %13851 = vmatprep.mubr.msk.bf16.mxu0 %vm887_vm3, %v14427_v57  ;;  %v3880_v57 = vshll.u32 %v16052_v39, 16  ;;  %v16127_v26 = vrot.slane %v3877_v18, 4  ;;  %v3924_v39 = vrot.slane %v3922_v55, 4  ;;  %v16165_v54 = vsel %vm14960_vm7, %v4572_v13, %v4573_v63 }
  0xf4   : > { %v16135_v10 = vrot.slane %v3918_v21, 5  ;;  %v19695_v21 = vcombine.low %v15828_v29, %v15847_v46  ;;  %v4577_v29 = vrot.slane %v16065_v41, 5  ;;  %v14431_v46 = vld [vmem:[%s14633_s18 + $0x90] sm:$0xff]   ;;  %v12542_v1 = vrot.slane %v12526_v49, 9  ;;  %v12460_v41 = vld [vmem:[%s14633_s18 + $0x60] sm:$0xf] }
  0xf5   : > { %13814 = vmatmul.mubr.msk.bf16.gmra.mxu1 %vm887_vm3, %v12350_v35  ;;  %v14428_v35 = vld [vmem:[%s14633_s18 + $0x6c] sm:$0xff]   ;;  %v16120_v32 = vrot.slane %v3880_v57, 5  ;;  %v3935_v24 = vrot.slane %v3933_v42, 4 }
  0xf6   : > { %13817 = vmatprep.mubr.msk.bf16.mxu1 %vm887_vm3, %v12351_v23  ;;  %v3909_v23 = vshrl.u32 %v12454_v3, 16  ;;  %v16118_v3 = vrot.slane %v3867_v44, 4  ;;  %v3900_v44 = vrot.slane %v3898_v37, 4  ;;  %v3946_v37 = vshrl.u32 %v16124_v17, 16 }
  0xf7   : > { %v16116_v59 = vpop.f32.mrf.mxu0  ;;  %v3925_v13 = vor.u32 %v3924_v39, %v16135_v10  ;;  %v4584_v39 = vrot.slane %v16087_v4, 5  ;;  %v19699_v4 = vcombine.low %v15839_v60, %v15856_v2  ;;  %v19701_v60 = vcombine.low %v15860_v16, %v15870_v50  ;;  %v14432_v2 = vld [vmem:[%s14633_s18 + $0x9c] sm:$0xff]  }
  0xf8   : > { %19692 = vst [vmem:[#allocation11_spill] sm:$0xff] %v16116_v59  ;;  %v3911_v57 = vrot.slane %v3909_v23, 4  ;;  %v14430_v23 = vld [vmem:[%s14633_s18 + $0x84] sm:$0xff]   ;;  %v16192_v59 = vld [vmem:[%s14633_s18 + $0x5c] sm:$0x1]  ;;  %v4591_v16 = vrot.slane %v16124_v17, 5 }
  0xf9   : > { %v16153_v28 = vpop.f32.mrf.mxu0 }
  0xfa   : > { %13852 = vmatmul.mubr.msk.bf16.gmra.mxu0 %vm887_vm3, %v14428_v35  ;;  %v16132_v35 = vrot.slane %v3894_v9, 5  ;;  %v3942_v9 = vshll.u32 %v16124_v17, 16  ;;  %19696 = vst [vmem:[#allocation15_spill] sm:$0xff] %v16153_v28  ;;  %v3938_v28 = vrot.slane %v3936_v19, 5 }
  0xfb   : > { %13855 = vmatprep.mubr.msk.bf16.mxu0 %vm887_vm3, %v14429_v8  ;;  %v16141_v18 = vpop.f32.mrf.mxu1  ;;  %v16144_v8 = vld [vmem:[%s14633_s18 + $0x50] sm:$0x1]  ;;  %v16185_v49 = vpop.f32.mrf.mxu0 }
  0xfc   : > { %19694 = vst [vmem:[#allocation10_spill] sm:$0xff] %v16141_v18  ;;  %v3901_v38 = vor.u32 %v3900_v44, %v16132_v35  ;;  %v16175_v18 = vrot.slane %v3891_v12, 4  ;;  %v16182_v55 = vrot.slane %v3942_v9, 5  ;;  %v3948_v44 = vrot.slane %v3946_v37, 4  ;;  %19698 = vst [vmem:[#allocation5_spill] sm:$0xff] %v16185_v49 }
  0xfd   : > { %13818 = vmatmul.mubr.msk.bf16.gmra.mxu1 %vm887_vm3, %v19693_v6  ;;  %v16161_v6 = vsel %vm14960_vm7, %v12541_v52, %v4570_v36  ;;  %v3915_v36 = vor.u32 %v3914_v45, %v3911_v57  ;;  %v3928_v52 = vshll.u32 %v16144_v8, 16  ;;  %v16180_v63 = vpop.f32.mrf.mxu1  ;;  %v4579_v12 = vrot.slane %v4577_v29, 4  ;;  %v12527_v9 = vld [vmem:[%s14633_s18 + $0x48] sm:$0xe] }
  0xfe   : > { %13821 = vmatprep.mubr.msk.bf16.mxu1 %vm887_vm3, %v19695_v21  ;;  %v3904_v21 = vshll.u32 %v16130_v58, 16  ;;  %19697 = vst [vmem:[#allocation13_spill] sm:$0xff] %v16180_v63  ;;  %v4580_v57 = vrot.slane %v16130_v58, 5  ;;  %v3902_v42 = vrot.slane %v3901_v38, 4  ;;  %v3957_v37 = vshrl.u32 %v12460_v41, 16 }
  0xff   : > { %v16198_v63 = vsel %vm14960_vm7, %v12542_v1, %v4577_v29  ;;  %v3916_v45 = vrot.slane %v3915_v36, 4  ;;  %v3926_v49 = vrot.slane %v3925_v13, 4  ;;  %v3930_v58 = vrot.slane %v3928_v52, 5  ;;  %v16213_v36 = vld [vmem:[%s14633_s18 + $0x64] sm:$0xf]  ;;  %v16220_v13 = vpop.f32.mrf.mxu0 }
 0x100   : > { %v3906_v19 = vrot.slane %v3904_v21, 5  ;;  %v3897_v38 = vsel %vm14674_vm4, %v16175_v18, %v16132_v35  ;;  %v3939_v21 = vor.u32 %v3938_v28, %v3935_v24  ;;  %v3949_v1 = vor.u32 %v3948_v44, %v16182_v55  ;;  %19702 = vst [vmem:[#allocation17_spill] sm:$0xff] %v16220_v13  ;;  %v12528_v28 = vld [vmem:[%s14633_s18 + $0x54] sm:$0xe]  ;;  %v14436_v13 = vld [vmem:[%s14633_s18 + $0xcc] sm:$0xff]  }
 0x101   : > { %v3952_v29 = vshll.u32 %v16192_v59, 16  ;;  %v16224_v52 = vsel %vm14960_vm7, %v4579_v12, %v4580_v57  ;;  %v12543_v35 = vrot.slane %v12527_v9, 9  ;;  %v4586_v24 = vrot.slane %v4584_v39, 4 }
 0x102   : > { %13856 = vmatmul.mubr.msk.bf16.gmra.mxu0 %vm887_vm3, %v14430_v23  ;;  %v3960_v23 = vshll.u32 %v12460_v41, 16  ;;  %v4587_v18 = vrot.slane %v16144_v8, 5  ;;  %v14433_v41 = vld [vmem:[%s14633_s18 + $0xa8] sm:$0xff]   ;;  %v3907_v44 = vsel %vm14674_vm4, %v3902_v42, %v3906_v19  ;;  %v3959_v50 = vrot.slane %v3957_v37, 4 }
 0x103   : > { %13859 = vmatprep.mubr.msk.bf16.mxu0 %vm887_vm3, %v14431_v46  ;;  %v16204_v46 = vpop.f32.mrf.mxu1  ;;  %v3931_v12 = vsel %vm14674_vm4, %v3926_v49, %v3930_v58  ;;  %v3966_v57 = vshll.u32 %v16213_v36, 16  ;;  %v3970_v8 = vshrl.u32 %v16213_v36, 16  ;;  %v3950_v42 = vrot.slane %v3949_v1, 4  ;;  %v16242_v37 = vld [vmem:[%s14633_s18 + $0x68] sm:$0x1] }
 0x104   : > { %19700 = vst [vmem:[#allocation16_spill] sm:$0xff] %v16204_v46  ;;  %v3940_v46 = vrot.slane %v3939_v21, 4  ;;  %v3954_v17 = vrot.slane %v3952_v29, 5  ;;  %v12544_v19 = vrot.slane %v12528_v28, 9  ;;  %v19705_v49 = vsel %vm14674_vm4, %v16127_v26, %v16120_v32  ;;  %v12463_v29 = vld [vmem:[%s14633_s18 + $0x6c] sm:$0xf] }
 0x105   : > { %13822 = vmatmul.mubr.msk.bf16.gmra.mxu1 %vm887_vm3, %v19699_v4  ;;  %v3962_v4 = vrot.slane %v3960_v23, 5  ;;  %v16239_v9 = vpop.f32.mrf.mxu1  ;;  %v16263_v21 = vsel %vm14960_vm7, %v12543_v35, %v4584_v39  ;;  %v16267_v1 = vsel %vm14960_vm7, %v4586_v24, %v4587_v18  ;;  %v16270_v32 = vcombine.low %v3897_v38, %v3907_v44  ;;  %v12529_v18 = vld [vmem:[%s14633_s18 + $0x60] sm:$0xe]  ;;  %v12469_v44 = vld [vmem:[%s14633_s18 + $0x84] sm:$0xf] }
 0x106   : > { %13825 = vmatprep.mubr.msk.bf16.mxu1 %vm887_vm3, %v19701_v60  ;;  %v3921_v60 = vsel %vm14674_vm4, %v3916_v45, %v16135_v10  ;;  %19703 = vst [vmem:[#allocation18_spill] sm:$0xff] %v16239_v9  ;;  %v19706_v45 = vsel %vm14674_vm4, %v16118_v3, %v16054_v51  ;;  %v4593_v51 = vrot.slane %v4591_v16, 4  ;;  %v4594_v3 = vrot.slane %v16192_v59, 5 }
 0x107   : > { %v16257_v23 = vcombine.low %v19706_v45, %v19705_v49  ;;  %19707 = vst [vmem:[#allocation14_spill] sm:$0xff] %v16270_v32  ;;  %v3963_v26 = vor.u32 %v3962_v4, %v3959_v50  ;;  %v16277_v28 = vcombine.low %v3921_v60, %v3931_v12  ;;  %v16279_v39 = vrot.slane %v3966_v57, 5 }
 0x108   : > { %v16245_v10 = vpop.f32.mrf.mxu0  ;;  %v16281_v35 = vrot.slane %v3970_v8, 4  ;;  %v3976_v24 = vshll.u32 %v16242_v37, 16  ;;  %v19709_v38 = vcombine.low %v15878_v25, %v15893_v56  ;;  %v3945_v50 = vsel %vm14674_vm4, %v3940_v46, %v16182_v55  ;;  %v12466_v25 = vld [vmem:[%s14633_s18 + $0x78] sm:$0xf] }
 0x109   : > { %19704 = vst [vmem:[#allocation12_spill] sm:$0xff] %v16245_v10  ;;  %19708 = vst [vmem:[#allocation19_spill] sm:$0xff] %v16277_v28  ;;  %v3955_v4 = vsel %vm14674_vm4, %v3950_v42, %v3954_v17  ;;  %v16301_v60 = vsel %vm14960_vm7, %v12544_v19, %v4591_v16  ;;  %v19711_v56 = vcombine.low %v15885_v33, %v15906_v22  ;;  %v3981_v57 = vshrl.u32 %v12463_v29, 16  ;;  %v16313_v42 = vld [vmem:[%s14633_s18 + $0x7c] sm:$0xf]  ;;  %v14435_v16 = vld [vmem:[%s14633_s18 + $0xc0] sm:$0xff]  }
 0x10a   : > { %13860 = vmatmul.mubr.msk.bf16.gmra.mxu0 %vm887_vm3, %v14432_v2  ;;  %v16275_v2 = vld [vmem:[%s14633_s18 + $0x70] sm:$0xf]  ;;  %v16308_v12 = vpop.f32.mrf.mxu0  ;;  %v3984_v8 = vshll.u32 %v12463_v29, 16  ;;  %v16318_v17 = vsel %vm14960_vm7, %v4593_v51, %v4594_v3  ;;  %v16320_v33 = vrot.slane %v3963_v26, 4  ;;  %v12545_v22 = vrot.slane %v12529_v18, 9 }
 0x10b   : > { %13863 = vmatprep.mubr.msk.bf16.mxu0 %vm887_vm3, %v14433_v41  ;;  %v14434_v41 = vld [vmem:[%s14633_s18 + $0xb4] sm:$0xff]   ;;  %19712 = vst [vmem:[#allocation21_spill] sm:$0xff] %v16308_v12  ;;  %v3990_v55 = vshll.u32 %v16275_v2, 16  ;;  %v3994_v46 = vshrl.u32 %v16275_v2, 16  ;;  %v4598_v19 = vrot.slane %v16213_v36, 5  ;;  %v16323_v49 = vcombine.low %v3945_v50, %v3955_v4 }
 0x10c   : > { %v3973_v45 = vor.u32 %v16281_v35, %v16279_v39  ;;  %v16327_v29 = vrot.slane %v3976_v24, 5  ;;  %v4005_v51 = vshrl.u32 %v12466_v25, 16  ;;  %v4008_v3 = vshll.u32 %v12466_v25, 16  ;;  %v16339_v18 = vld [vmem:[%s14633_s18 + $0x88] sm:$0xf]  ;;  %v16342_v35 = vpop.f32.mrf.mxu0 }
 0x10d   : > { %13826 = vmatmul.mubr.msk.bf16.gmra.mxu1 %vm887_vm3, %v19709_v38  ;;  %v16289_v59 = vpop.f32.mrf.mxu1  ;;  %19713 = vst [vmem:[#allocation22_spill] sm:$0xff] %v16323_v49  ;;  %v4601_v38 = vrot.slane %v16242_v37, 5  ;;  %v4014_v36 = vshll.u32 %v16313_v42, 16  ;;  %v4018_v26 = vshrl.u32 %v16313_v42, 16  ;;  %19715 = vst [vmem:[#allocation24_spill] sm:$0xff] %v16342_v35  ;;  %v3983_v37 = vrot.slane %v3981_v57, 4 }
 0x10e   : > { %19710 = vst [vmem:[#allocation20_spill] sm:$0xff] %v16289_v59  ;;  %13829 = vmatprep.mubr.msk.bf16.mxu1 %vm887_vm3, %v19711_v56  ;;  %v16331_v56 = vld [vmem:[%s14633_s18 + $0x74] sm:$0x1]  ;;  %v3986_v24 = vrot.slane %v3984_v8, 5  ;;  %v16344_v50 = vrot.slane %v3990_v55, 5  ;;  %v3996_v4 = vrot.slane %v3994_v46, 4  ;;  %v16353_v9 = vsel %vm14960_vm7, %v12545_v22, %v4598_v19  ;;  %v16372_v49 = vpop.f32.mrf.mxu0 }
 0x10f   : > { %v16334_v58 = vpop.f32.mrf.mxu1  ;;  %v16357_v57 = vld [vmem:[%s14633_s18 + $0x80] sm:$0x1]  ;;  %v16360_v8 = vld [vmem:[%s14633_s18 + $0x6c] sm:$0xe]  ;;  %v4029_v55 = vshrl.u32 %v12469_v44, 16  ;;  %v4032_v46 = vshll.u32 %v12469_v44, 16  ;;  %v19716_v25 = vcombine.low %v15897_v30, %v15913_v14  ;;  %v19719_v44 = vcombine.low %v15917_v34, %v15945_v15 }
 0x110   : > { %19714 = vst [vmem:[#allocation23_spill] sm:$0xff] %v16334_v58  ;;  %v4600_v58 = vrot.slane %v4598_v19, 4  ;;  %v4042_v59 = vshrl.u32 %v16339_v18, 16  ;;  %v4007_v19 = vrot.slane %v4005_v51, 4  ;;  %v4010_v35 = vrot.slane %v4008_v3, 5  ;;  %19718 = vst [vmem:[#allocation26_spill] sm:$0xff] %v16372_v49 }
 0x111   : > { %v16368_v22 = vpop.f32.mrf.mxu1  ;;  %v16370_v12 = vrot.slane %v4014_v36, 5  ;;  %v4020_v10 = vrot.slane %v4018_v26, 4  ;;  %v3987_v30 = vor.u32 %v3986_v24, %v3983_v37  ;;  %v3997_v14 = vor.u32 %v3996_v4, %v16344_v50  ;;  %v16391_v15 = vld [vmem:[%s14633_s18 + $0x8c] sm:$0x1]  ;;  %v12531_v37 = vld [vmem:[%s14633_s18 + $0x78] sm:$0xe] }
 0x112   : > { %13864 = vmatmul.mubr.msk.bf16.gmra.mxu0 %vm887_vm3, %v14434_v41  ;;  %v4000_v41 = vshll.u32 %v16331_v56, 16  ;;  %19717 = vst [vmem:[#allocation25_spill] sm:$0xff] %v16368_v22  ;;  %v4024_v51 = vshll.u32 %v16357_v57, 16  ;;  %v16382_v3 = vrot.slane %v3973_v45, 4  ;;  %v16386_v36 = vsel %vm14960_vm7, %v4600_v58, %v4601_v38 }
 0x113   : > { %13867 = vmatprep.mubr.msk.bf16.mxu0 %vm887_vm3, %v14435_v16  ;;  %v4038_v16 = vshll.u32 %v16339_v18, 16  ;;  %v12546_v26 = vrot.slane %v16360_v8, 9  ;;  %v4612_v34 = vrot.slane %v16313_v42, 5  ;;  %v4031_v24 = vrot.slane %v4029_v55, 4  ;;  %v16396_v22 = vpop.f32.mrf.mxu1  ;;  %v12472_v8 = vld [vmem:[%s14633_s18 + $0x90] sm:$0xf] }
 0x114   : > { %v4034_v4 = vrot.slane %v4032_v46, 5  ;;  %19720 = vst [vmem:[#allocation27_spill] sm:$0xff] %v16396_v22  ;;  %v4002_v45 = vrot.slane %v4000_v41, 5  ;;  %v4608_v49 = vrot.slane %v16331_v56, 5  ;;  %v4011_v58 = vor.u32 %v4010_v35, %v4007_v19 }
 0x115   : > { %13830 = vmatmul.mubr.msk.bf16.gmra.mxu1 %vm887_vm3, %v19716_v25  ;;  %v4605_v25 = vrot.slane %v16275_v2, 5  ;;  %v16394_v2 = vrot.slane %v4038_v16, 5  ;;  %v4021_v38 = vor.u32 %v4020_v10, %v16370_v12  ;;  %v3988_v42 = vrot.slane %v3987_v30, 4  ;;  %v16405_v16 = vld [vmem:[%s14633_s18 + $0x94] sm:$0xf] }
 0x116   : > { %13833 = vmatprep.mubr.msk.bf16.mxu1 %vm887_vm3, %v19719_v44  ;;  %v4044_v44 = vrot.slane %v4042_v59, 4  ;;  %v3998_v55 = vrot.slane %v3997_v14, 4  ;;  %v4026_v46 = vrot.slane %v4024_v51, 5  ;;  %v19721_v59 = vcombine.low %v16038_v61, %v16042_v40 }
 0x117   : > { %v4607_v32 = vrot.slane %v4605_v25, 4  ;;  %v12547_v56 = vrot.slane %v12531_v37, 9  ;;  %v4614_v35 = vrot.slane %v4612_v34, 4  ;;  %v4615_v10 = vrot.slane %v16357_v57, 5 }
 0x118   : > { %v4048_v41 = vshll.u32 %v16391_v15, 16  ;;  %v4045_v30 = vor.u32 %v4044_v44, %v16394_v2  ;;  %v4053_v14 = vshrl.u32 %v12472_v8, 16  ;;  %v4056_v51 = vshll.u32 %v12472_v8, 16 }
 0x119   : > { %v19723_v61 = vcombine.low %v15957_v62, %v15962_v47  ;;  %v4012_v40 = vrot.slane %v4011_v58, 4  ;;  %v4022_v37 = vrot.slane %v4021_v38, 4  ;;  %v4062_v57 = vshll.u32 %v16405_v16, 16 }
 0x11a   : > { %v16401_v28 = vpop.f32.mrf.mxu0  ;;  %13868 = vmatmul.mubr.msk.bf16.gmra.mxu0 %vm887_vm3, %v14436_v13  ;;  %v4035_v13 = vor.u32 %v4034_v4, %v4031_v24  ;;  %v3979_v24 = vsel %vm14674_vm4, %v16382_v3, %v16327_v29  ;;  %v3993_v62 = vsel %vm14674_vm4, %v3988_v42, %v16344_v50  ;;  %v16437_v47 = vsel %vm14960_vm7, %v12546_v26, %v4605_v25  ;;  %v12532_v25 = vld [vmem:[%s14633_s18 + $0x84] sm:$0xe] }
 0x11b   : > { %13907 = vmatprep.mubr.msk.bf16.mxu0 %vm887_vm3, %v19721_v59  ;;  %v4066_v59 = vshrl.u32 %v16405_v16, 16  ;;  %v16441_v4 = vsel %vm14960_vm7, %v4607_v32, %v4608_v49  ;;  %v16449_v29 = vsel %vm14960_vm7, %v12547_v56, %v4612_v34  ;;  %v16453_v50 = vsel %vm14960_vm7, %v4614_v35, %v4615_v10 }
 0x11c   : > { %v16413_v19 = vpop.f32.mrf.mxu0  ;;  %v4050_v3 = vrot.slane %v4048_v41, 5  ;;  %v4036_v32 = vrot.slane %v4035_v13, 4  ;;  %v4046_v49 = vrot.slane %v4045_v30, 4  ;;  %v4055_v58 = vrot.slane %v4053_v14, 4  ;;  %v16477_v13 = vld [vmem:[%s14633_s18 + $0x98] sm:$0x1] }
 0x11d   : > { %19722 = vst [vmem:[#allocation28_spill] sm:$0xff] %v16413_v19  ;;  %v16416_v22 = vpop.f32.mrf.mxu1  ;;  %13834 = vmatmul.mubr.msk.bf16.gmra.mxu1 %vm887_vm3, %v19723_v61  ;;  %v4058_v38 = vrot.slane %v4056_v51, 5  ;;  %v4017_v34 = vsel %vm14674_vm4, %v4012_v40, %v16370_v12  ;;  %v16465_v42 = vrot.slane %v4062_v57, 5  ;;  %v19724_v35 = vcombine.low %v16078_v48, %v16082_v43  ;;  %v12475_v30 = vld [vmem:[%s14633_s18 + $0x9c] sm:$0xf] }
 0x11e   : > { %v16424_v19 = vpop.f32.mrf.mxu0  ;;  %13873 = vmatprep.mubr.msk.bf16.mxu1 %vm887_vm3, %v16108_v27  ;;  %v4003_v27 = vsel %vm14674_vm4, %v3998_v55, %v4002_v45  ;;  %v4027_v45 = vsel %vm14674_vm4, %v4022_v37, %v4026_v46  ;;  %v4068_v55 = vrot.slane %v4066_v59, 4  ;;  %v12561_v10 = vcombine.low %v16301_v60, %v16318_v17  ;;  %v16508_v59 = vld [vmem:[%s14633_s18 + $0xa0] sm:$0xf] }
 0x11f   : > { %v16443_v44 = vpop.f32.mrf.mxu1  ;;  %v12562_v41 = vcombine.low %v16353_v9, %v16386_v36  ;;  %v12548_v12 = vrot.slane %v12532_v25, 9  ;;  %v4619_v46 = vrot.slane %v16339_v18, 5  ;;  %v19725_v48 = vcombine.low %v16161_v6, %v16165_v54  ;;  %v19734_v18 = vld [vmem:[#allocation5_spill] sm:$0xff] }
 0x120   : > { %v16456_v26 = vpop.f32.mrf.mxu0  ;;  %v19726_v43 = vsel %vm14674_vm4, %v16320_v33, %v16279_v39  ;;  %v16493_v61 = vcombine.low %v3993_v62, %v4003_v27  ;;  %v16499_v57 = vcombine.low %v4017_v34, %v4027_v45  ;;  %v4041_v6 = vsel %vm14674_vm4, %v4036_v32, %v16394_v2  ;;  %v12533_v33 = vld [vmem:[%s14633_s18 + $0x90] sm:$0xe] }
 0x121   : > { %v16458_v8 = vpop.f32.mrf.mxu1  ;;  %v16491_v51 = vcombine.low %v19726_v43, %v3979_v24  ;;  %v4051_v54 = vsel %vm14674_vm4, %v4046_v49, %v4050_v3  ;;  %v4059_v39 = vor.u32 %v4058_v38, %v4055_v58  ;;  %v4069_v62 = vor.u32 %v4068_v55, %v16465_v42 }
 0x122   : > { %v13705_v56 = vpop.f32.mrf.mxu0  ;;  %13908 = vmatmul.mubr.msk.bf16.vlgmr.msra.gmra.mxu0 %vm887_vm3, %v19724_v35  ;;  %v4072_v27 = vshll.u32 %v16477_v13, 16  ;;  %v4077_v25 = vshrl.u32 %v12475_v30, 16  ;;  %v4080_v34 = vshll.u32 %v12475_v30, 16  ;;  %v16519_v3 = vsel %vm14960_vm7, %v12548_v12, %v4619_v46 }
 0x123   : > { %v16480_v14 = vpop.f32.mrf.mxu1  ;;  %13911 = vmatprep.mubr.msk.bf16.mxu0 %vm887_vm3, %v19725_v48  ;;  %v4621_v32 = vrot.slane %v4619_v46, 4  ;;  %v4622_v49 = vrot.slane %v16391_v15, 5  ;;  %v12549_v58 = vrot.slane %v12533_v33, 9  ;;  %v4626_v38 = vrot.slane %v16405_v16, 5 }
 0x124   : > { %v1691_v37 = vpop.f32.mrf.mxu0  ;;  %v4086_v55 = vshll.u32 %v16508_v59, 16  ;;  %v4090_v35 = vshrl.u32 %v16508_v59, 16  ;;  %v16528_v48 = vcombine.low %v4041_v6, %v4051_v54  ;;  %v16530_v12 = vrot.slane %v4059_v39, 4  ;;  %v12478_v54 = vld [vmem:[%s14633_s18 + $0xa8] sm:$0xf] }
 0x125   : > { %v13671_v24 = vpop.f32.mrf.mxu1  ;;  %13874 = vmatmul.mubr.msk.bf16.vlgmr.msra.gmra.mxu1 %vm887_vm3, %v16110_v7  ;;  %v4070_v15 = vrot.slane %v4069_v62, 4  ;;  %v4074_v43 = vrot.slane %v4072_v27, 5  ;;  %v4079_v33 = vrot.slane %v4077_v25, 4  ;;  %v4082_v16 = vrot.slane %v4080_v34, 5  ;;  %v16556_v27 = vld [vmem:[%s14633_s18 + $0xac] sm:$0xf] }
 0x126   : > { %v1275_v45 = vadd.f32 %v13671_v24, %v16006_v5  ;;  %v13706_v2 = vpop.f32.mrf.mxu0  ;;  %13877 = vmatprep.mubr.msk.bf16.mxu1 %vm887_vm3, %v16257_v23  ;;  %v4629_v6 = vrot.slane %v16477_v13, 5  ;;  %v4092_v62 = vrot.slane %v4090_v35, 4  ;;  %v19731_v35 = vld [vmem:[#allocation11_spill] sm:$0xff] }
 0x127   : > { %v1266_v7 = vpop.f32.mrf.mxu1 }
 0x128   : > { %v16525_v5 = vadd.f32 %v13705_v56, %v1275_v45  ;;  %v1267_v23 = vadd.f32 %v1266_v7, %v16030_v20  ;;  %v1694_v30 = vpop.f32.mrf.mxu0  ;;  %v19727_v45 = vcombine.low %v16198_v63, %v16224_v52  ;;  %v16541_v20 = vsel %vm14960_vm7, %v4621_v32, %v4622_v49  ;;  %v12534_v32 = vld [vmem:[%s14633_s18 + $0x9c] sm:$0xe] }
 0x129   : > { %v13672_v46 = vpop.f32.mrf.mxu1  ;;  %v4628_v63 = vrot.slane %v4626_v38, 4  ;;  %v16553_v52 = vrot.slane %v4086_v55, 5  ;;  %v4633_v49 = vrot.slane %v16508_v59, 5  ;;  %v4110_v59 = vshll.u32 %v16556_v27, 16 }
 0x12a   : > { %v16532_v24 = vadd.f32 %v1691_v37, %v1267_v23  ;;  %v1278_v40 = vadd.f32 %v13672_v46, %v16049_v53  ;;  %v13709_v56 = vpop.f32.mrf.mxu0  ;;  %13912 = vmatmul.mubr.msk.bf16.gmra.mxu0 %vm887_vm3, %v19727_v45  ;;  %v19728_v37 = vcombine.low %v16263_v21, %v16267_v1  ;;  %v16551_v53 = vsel %vm14960_vm7, %v12549_v58, %v4626_v38  ;;  %v12477_v1 = vld [vmem:[%s14633_s18 + $0xa4] sm:$0x1]  ;;  %v19729_v58 = vld [vmem:[#allocation14_spill] sm:$0xff] }
 0x12b   : > { %v1269_v39 = vpop.f32.mrf.mxu1  ;;  %v4065_v21 = vsel %vm14674_vm4, %v16530_v12, %v16465_v42  ;;  %v4101_v38 = vshrl.u32 %v12478_v54, 16  ;;  %v19732_v42 = vld [vmem:[#allocation19_spill] sm:$0xff]  ;;  %v4114_v12 = vshrl.u32 %v16556_v27, 16 }
 0x12c   : > { %13915 = vmatprep.mubr.msk.bf16.mxu0 %vm887_vm3, %v19728_v37  ;;  %v16558_v25 = vadd.f32 %v13706_v2, %v1278_v40  ;;  %v1270_v13 = vadd.f32 %v1269_v39, %v16094_v11  ;;  %v1707_v34 = vpop.f32.mrf.mxu0  ;;  %v4075_v40 = vsel %vm14674_vm4, %v4070_v15, %v4074_v43  ;;  %v4083_v2 = vor.u32 %v4082_v16, %v4079_v33  ;;  %v19733_v16 = vld [vmem:[#allocation15_spill] sm:$0xff] }
 0x12d   : > { %v13675_v7 = vpop.f32.mrf.mxu1  ;;  %13878 = vmatmul.mubr.msk.bf16.gmra.mxu1 %vm887_vm3, %v19729_v58  ;;  %v4104_v11 = vshll.u32 %v12478_v54, 16  ;;  %v16581_v39 = vsel %vm14960_vm7, %v4628_v63, %v4629_v6  ;;  %v4093_v15 = vor.u32 %v4092_v62, %v16553_v52  ;;  %v4096_v43 = vshll.u32 %v12477_v1, 16 }
 0x12e   : > { %v16572_v55 = vadd.f32 %v1694_v30, %v1270_v13  ;;  %v1291_v23 = vadd.f32 %v13675_v7, %v19731_v35  ;;  %v13710_v46 = vpop.f32.mrf.mxu0  ;;  %13881 = vmatprep.mubr.msk.bf16.mxu1 %vm887_vm3, %v19732_v42  ;;  %v12550_v30 = vrot.slane %v12534_v32, 9  ;;  %v4635_v13 = vrot.slane %v4633_v49, 4 }
 0x12f   : > { %v1282_v45 = vpop.f32.mrf.mxu1  ;;  %v4636_v7 = vrot.slane %v12477_v1, 5  ;;  %v16589_v42 = vrot.slane %v4083_v2, 4  ;;  %v4103_v6 = vrot.slane %v4101_v38, 4  ;;  %v4106_v63 = vrot.slane %v4104_v11, 5  ;;  %v16599_v1 = vld [vmem:[%s14633_s18 + $0xb0] sm:$0x1] }
 0x130   : > { %19730 = vst [vmem:[#allocation14_spill] sm:$0xff] %v16572_v55  ;;  %v16584_v33 = vadd.f32 %v13709_v56, %v1291_v23  ;;  %v1283_v54 = vadd.f32 %v1282_v45, %v19733_v16  ;;  %v1710_v37 = vpop.f32.mrf.mxu0  ;;  %v16601_v23 = vrot.slane %v4110_v59, 5  ;;  %v4116_v2 = vrot.slane %v4114_v12, 4  ;;  %v19735_v11 = vld [vmem:[#allocation17_spill] sm:$0xff] }
 0x131   : > { %v13676_v58 = vpop.f32.mrf.mxu1  ;;  %v16611_v60 = vrot.slane %v4093_v15, 4  ;;  %v16613_v17 = vrot.slane %v4096_v43, 5  ;;  %v16621_v9 = vsel %vm14960_vm7, %v12550_v30, %v4633_v49  ;;  %v16625_v36 = vsel %vm14960_vm7, %v4635_v13, %v4636_v7  ;;  %v16637_v30 = vld [vmem:[%s14633_s18 + $0xb8] sm:$0xf] }
 0x132   : > { %v16591_v62 = vadd.f32 %v1707_v34, %v1283_v54  ;;  %v1294_v32 = vadd.f32 %v13676_v58, %v19734_v18  ;;  %v13713_v56 = vpop.f32.mrf.mxu0  ;;  %13916 = vmatmul.mubr.msk.bf16.gmra.mxu0 %vm887_vm3, %v12561_v10  ;;  %v16607_v34 = vcombine.low %v4065_v21, %v4075_v40  ;;  %v12535_v10 = vld [vmem:[%s14633_s18 + $0xa8] sm:$0xe]  ;;  %v19736_v40 = vld [vmem:[#allocation22_spill] sm:$0xff]  ;;  %v4107_v15 = vor.u32 %v4106_v63, %v4103_v6  ;;  %v19738_v54 = vld [vmem:[#allocation12_spill] sm:$0xff] }
 0x133   : > { %v1285_v45 = vpop.f32.mrf.mxu1  ;;  %13919 = vmatprep.mubr.msk.bf16.mxu0 %vm887_vm3, %v12562_v41  ;;  %v12481_v41 = vld [vmem:[%s14633_s18 + $0xb4] sm:$0xf]  ;;  %v4120_v43 = vshll.u32 %v16599_v1, 16  ;;  %v4640_v49 = vrot.slane %v16556_v27, 5  ;;  %v4117_v58 = vor.u32 %v4116_v2, %v16601_v23  ;;  %v4099_v27 = vsel %vm14674_vm4, %v16611_v60, %v16613_v17 }
 0x134   : > { %v16616_v38 = vadd.f32 %v13710_v46, %v1294_v32  ;;  %v1286_v59 = vadd.f32 %v1285_v45, %v19735_v11  ;;  %v1723_v12 = vpop.f32.mrf.mxu0  ;;  %v12551_v32 = vrot.slane %v12535_v10, 9  ;;  %v4125_v6 = vshrl.u32 %v12481_v41, 16 }
 0x135   : > { %v13679_v21 = vpop.f32.mrf.mxu1  ;;  %13882 = vmatmul.mubr.msk.bf16.gmra.mxu1 %vm887_vm3, %v19736_v40  ;;  %v4128_v63 = vshll.u32 %v12481_v41, 16  ;;  %v4134_v2 = vshll.u32 %v16637_v30, 16  ;;  %v4138_v10 = vshrl.u32 %v16637_v30, 16  ;;  %v12484_v40 = vld [vmem:[%s14633_s18 + $0xc0] sm:$0xf]  ;;  %v4108_v18 = vrot.slane %v4107_v15, 4 }
 0x136   : > { %v16639_v16 = vadd.f32 %v1710_v37, %v1286_v59  ;;  %v1307_v13 = vadd.f32 %v13679_v21, %v19738_v54  ;;  %v13714_v7 = vpop.f32.mrf.mxu0  ;;  %13885 = vmatprep.mubr.msk.bf16.mxu1 %vm887_vm3, %v16491_v51  ;;  %v19739_v59 = vld [vmem:[#allocation21_spill] sm:$0xff]  ;;  %v4122_v60 = vrot.slane %v4120_v43, 5  ;;  %v4642_v17 = vrot.slane %v4640_v49, 4  ;;  %v16670_v15 = vld [vmem:[%s14633_s18 + $0xc4] sm:$0xf] }
 0x137   : > { %v1298_v45 = vpop.f32.mrf.mxu1  ;;  %v4643_v37 = vrot.slane %v16599_v1, 5  ;;  %v16667_v46 = vsel %vm14960_vm7, %v12551_v32, %v4640_v49  ;;  %v19742_v1 = vcombine.low %v16449_v29, %v16453_v50  ;;  %v16682_v32 = vrot.slane %v4134_v2, 5 }
 0x138   : > { %19737 = vst [vmem:[#allocation11_spill] sm:$0xff] %v16639_v16  ;;  %v16651_v11 = vadd.f32 %v13713_v56, %v1307_v13  ;;  %v1299_v21 = vadd.f32 %v1298_v45, %v19739_v59  ;;  %v1726_v51 = vpop.f32.mrf.mxu0  ;;  %v19740_v56 = vld [vmem:[#allocation24_spill] sm:$0xff]  ;;  %v19741_v45 = vcombine.low %v16437_v47, %v16441_v4  ;;  %v4118_v59 = vrot.slane %v4117_v58, 4  ;;  %v19743_v58 = vld [vmem:[#allocation26_spill] sm:$0xff] }
 0x139   : > { %v13680_v54 = vpop.f32.mrf.mxu1  ;;  %v4149_v47 = vshrl.u32 %v12484_v40, 16  ;;  %v4152_v4 = vshll.u32 %v12484_v40, 16  ;;  %v4140_v16 = vrot.slane %v4138_v10, 4  ;;  %v4113_v29 = vsel %vm14674_vm4, %v4108_v18, %v16601_v23  ;;  %v12536_v40 = vld [vmem:[%s14633_s18 + $0xb4] sm:$0xe] }
 0x13a   : > { %v16658_v35 = vadd.f32 %v1723_v12, %v1299_v21  ;;  %v1310_v41 = vadd.f32 %v13680_v54, %v19740_v56  ;;  %v13717_v13 = vpop.f32.mrf.mxu0  ;;  %13920 = vmatmul.mubr.msk.bf16.gmra.mxu0 %vm887_vm3, %v19741_v45  ;;  %v16677_v12 = vld [vmem:[%s14633_s18 + $0xbc] sm:$0x1]  ;;  %v4127_v21 = vrot.slane %v4125_v6, 4  ;;  %v4130_v54 = vrot.slane %v4128_v63, 5 }
 0x13b   : > { %v1301_v43 = vpop.f32.mrf.mxu1  ;;  %13923 = vmatprep.mubr.msk.bf16.mxu0 %vm887_vm3, %v19742_v1  ;;  %v16691_v50 = vsel %vm14960_vm7, %v4642_v17, %v4643_v37  ;;  %v4162_v6 = vshrl.u32 %v16670_v15, 16  ;;  %v4144_v23 = vshll.u32 %v16677_v12, 16  ;;  %v4647_v17 = vrot.slane %v16637_v30, 5 }
 0x13c   : > { %v16679_v56 = vadd.f32 %v13714_v7, %v1310_v41  ;;  %v1302_v45 = vadd.f32 %v1301_v43, %v19743_v58  ;;  %v1739_v49 = vpop.f32.mrf.mxu0  ;;  %v4158_v7 = vshll.u32 %v16670_v15, 16  ;;  %v4131_v37 = vor.u32 %v4130_v54, %v4127_v21 }
 0x13d   : > { %v13683_v55 = vpop.f32.mrf.mxu1  ;;  %13886 = vmatmul.mubr.msk.bf16.gmra.mxu1 %vm887_vm3, %v16493_v61  ;;  %v4123_v61 = vsel %vm14674_vm4, %v4118_v59, %v4122_v60  ;;  %v4151_v41 = vrot.slane %v4149_v47, 4  ;;  %v4141_v59 = vor.u32 %v4140_v16, %v16682_v32  ;;  %v12568_v30 = vcombine.low %v16667_v46, %v16691_v50  ;;  %v12486_v46 = vld [vmem:[%s14633_s18 + $0xc8] sm:$0x1] }
 0x13e   : > { %v16695_v63 = vadd.f32 %v1726_v51, %v1302_v45  ;;  %v1323_v2 = vadd.f32 %v13683_v55, %v16401_v28  ;;  %v13718_v10 = vpop.f32.mrf.mxu0  ;;  %13889 = vmatprep.mubr.msk.bf16.mxu1 %vm887_vm3, %v16499_v57  ;;  %v4154_v51 = vrot.slane %v4152_v4, 5  ;;  %v19744_v28 = vld [vmem:[#allocation28_spill] sm:$0xff]  ;;  %v19745_v57 = vsel %vm14674_vm4, %v16589_v42, %v16553_v52  ;;  %v12487_v4 = vld [vmem:[%s14633_s18 + $0xcc] sm:$0xf] }
 0x13f   : > { %v1314_v18 = vpop.f32.mrf.mxu1  ;;  %v16713_v60 = vcombine.low %v19745_v57, %v4099_v27  ;;  %v16716_v54 = vcombine.low %v4113_v29, %v4123_v61  ;;  %v4164_v47 = vrot.slane %v4162_v6, 4  ;;  %v19746_v42 = vcombine.low %v16519_v3, %v16541_v20  ;;  %v14437_v29 = vld [vmem:[%s19564_s3 + $0x8] sm:$0xff]   ;;  %v16744_v6 = vld [vmem:[%s14633_s18 + $0xd0] sm:$0xf] }
 0x140   : > { %v16705_v43 = vadd.f32 %v13717_v13, %v1323_v2  ;;  %v1315_v55 = vadd.f32 %v1314_v18, %v19744_v28  ;;  %v1742_v1 = vpop.f32.mrf.mxu0  ;;  %v16720_v13 = vrot.slane %v4158_v7, 5  ;;  %v16730_v16 = vrot.slane %v4144_v23, 5  ;;  %13939 = vmatprep.subr.bf16.mxu1 %v14437_v29  ;;  %v19749_v28 = vld [vmem:[#allocation7_spill] sm:$0xff] }
 0x141   : > { %v13684_v21 = vpop.f32.mrf.mxu1  ;;  %v12552_v27 = vrot.slane %v12536_v40, 9  ;;  %v4649_v3 = vrot.slane %v4647_v17, 4  ;;  %v4650_v20 = vrot.slane %v16677_v12, 5  ;;  %v4155_v7 = vor.u32 %v4154_v51, %v4151_v41  ;;  %v12537_v40 = vld [vmem:[%s14633_s18 + $0xc0] sm:$0xe]  ;;  %13940 = vmatpush3.bf16.msra.mxu1 %v14437_v29 }
 0x142   : > { %v16723_v58 = vadd.f32 %v1739_v49, %v1315_v55  ;;  %v1326_v45 = vadd.f32 %v13684_v21, %v16424_v19  ;;  %v13721_v52 = vpop.f32.mrf.mxu0  ;;  %13924 = vmatmul.mubr.msk.bf16.gmra.mxu0 %vm887_vm3, %v19746_v42  ;;  %v19747_v49 = vcombine.low %v16551_v53, %v16581_v39  ;;  %v16740_v19 = vrot.slane %v4131_v37, 4 }
 0x143   : > { %v1317_v50 = vpop.f32.mrf.mxu1  ;;  %v16749_v18 = vrot.slane %v4141_v59, 4  ;;  %v4654_v53 = vrot.slane %v16670_v15, 5  ;;  %v4165_v12 = vor.u32 %v4164_v47, %v16720_v13  ;;  %v4168_v37 = vshll.u32 %v12486_v46, 16 }
 0x144   : > { %13927 = vmatprep.mubr.msk.bf16.mxu0 %vm887_vm3, %v19747_v49  ;;  %v16746_v2 = vadd.f32 %v13718_v10, %v1326_v45  ;;  %v1318_v61 = vadd.f32 %v1317_v50, %v16456_v26  ;;  %v1755_v23 = vpop.f32.mrf.mxu0  ;;  %v4173_v41 = vshrl.u32 %v12487_v4, 16  ;;  %v4176_v51 = vshll.u32 %v12487_v4, 16  ;;  %v19750_v45 = vld [vmem:[#allocation6_spill] sm:$0xff] }
 0x145   : > { %v13687_v39 = vpop.f32.mrf.mxu1  ;;  %13890 = vmatmul.mubr.msk.bf16.gmra.mxu1 %vm887_vm3, %v16528_v48  ;;  %v4182_v15 = vshll.u32 %v16744_v6, 16  ;;  %v4186_v57 = vshrl.u32 %v16744_v6, 16  ;;  %v4648_v48 = vsel %vm14960_vm7, %v12552_v27, %v4647_v17  ;;  %v4651_v21 = vsel %vm14960_vm7, %v4649_v3, %v4650_v20  ;;  %v19751_v27 = vld [vmem:[#allocation9_spill] sm:$0xff] }
 0x146   : > { %v16756_v10 = vadd.f32 %v1742_v1, %v1318_v61  ;;  %v1339_v26 = vadd.f32 %v13687_v39, %v19749_v28  ;;  %v13722_v55 = vpop.f32.mrf.mxu0  ;;  %13893 = vmatprep.mubr.msk.bf16.mxu1 %vm887_vm3, %v16607_v34  ;;  %v4156_v1 = vrot.slane %v4155_v7, 4  ;;  %v12553_v47 = vrot.slane %v12537_v40, 9 }
 0x147   : > { %v1330_v59 = vpop.f32.mrf.mxu1  ;;  %v4656_v34 = vrot.slane %v4654_v53, 4  ;;  %v4657_v49 = vrot.slane %v12486_v46, 5  ;;  %v4166_v29 = vrot.slane %v4165_v12, 4  ;;  %v4170_v39 = vrot.slane %v4168_v37, 5  ;;  %v12489_v46 = vld [vmem:[%s14633_s18 + $0xd4] sm:$0x1] }
 0x148   : > { %19748 = vst [vmem:[#allocation19_spill] sm:$0xff] %v16756_v10  ;;  %v16767_v4 = vadd.f32 %v13721_v52, %v1339_v26  ;;  %v1331_v42 = vadd.f32 %v1330_v59, %v19750_v45  ;;  %v16770_v50 = vpop.f32.mrf.mxu0  ;;  %v4175_v28 = vrot.slane %v4173_v41, 4  ;;  %v4178_v10 = vrot.slane %v4176_v51, 5  ;;  %v12538_v51 = vld [vmem:[%s14633_s18 + $0xcc] sm:$0xe] }
 0x149   : > { %v13688_v61 = vpop.f32.mrf.mxu1  ;;  %v19752_v52 = vcombine.low %v16621_v9, %v16625_v36  ;;  %v4184_v7 = vrot.slane %v4182_v15, 5  ;;  %v4188_v40 = vrot.slane %v4186_v57, 4  ;;  %v4661_v12 = vrot.slane %v16744_v6, 5 }
 0x14a   : > { %v16772_v17 = vadd.f32 %v1755_v23, %v1331_v42  ;;  %v1342_v3 = vadd.f32 %v13688_v61, %v19751_v27  ;;  %v13725_v20 = vpop.f32.mrf.mxu0  ;;  %v4137_v41 = vsel %vm14674_vm4, %v16740_v19, %v16682_v32  ;;  %v4655_v9 = vsel %vm14960_vm7, %v12553_v47, %v4654_v53  ;;  %v19753_v53 = vld [vmem:[#allocation10_spill] sm:$0xff] }
 0x14b   : > { %13928 = vmatmul.mubr.msk.bf16.gmra.mxu0 %vm887_vm3, %v19752_v52  ;;  %v16779_v26 = vpop.f32.mrf.mxu1  ;;  %v4658_v36 = vsel %vm14960_vm7, %v4656_v34, %v4657_v49  ;;  %v12569_v6 = vcombine.low %v4648_v48, %v4651_v21  ;;  %v4161_v32 = vsel %vm14674_vm4, %v4156_v1, %v16720_v13  ;;  %v4179_v19 = vor.u32 %v4178_v10, %v4175_v28  ;;  %v19754_v13 = vld [vmem:[#allocation13_spill] sm:$0xff] }
 0x14c   : > { %13931 = vmatprep.mubr.msk.bf16.mxu0 %vm887_vm3, %v12568_v30  ;;  %v16784_v37 = vadd.f32 %v13722_v55, %v1342_v3  ;;  %v1771_v23 = vpop.f32.mrf.mxu0  ;;  %v4147_v30 = vsel %vm14674_vm4, %v16749_v18, %v16730_v16  ;;  %v4189_v59 = vor.u32 %v4188_v40, %v4184_v7  ;;  %v4192_v47 = vshll.u32 %v12489_v46, 16 }
 0x14d   : > { %v13691_v15 = vpop.f32.mrf.mxu1  ;;  %13894 = vmatmul.mubr.msk.bf16.gmra.mxu1 %vm887_vm3, %v16713_v60  ;;  %v4171_v60 = vsel %vm14674_vm4, %v4166_v29, %v4170_v39  ;;  %v12570_v42 = vcombine.low %v4655_v9, %v4658_v36  ;;  %v12554_v16 = vrot.slane %v12538_v51, 9  ;;  %v4663_v18 = vrot.slane %v4661_v12, 4  ;;  %v19755_v29 = vld [vmem:[#allocation16_spill] sm:$0xff] }
 0x14e   : > { %v1355_v55 = vadd.f32 %v13691_v15, %v19753_v53  ;;  %v13726_v57 = vpop.f32.mrf.mxu0  ;;  %13897 = vmatprep.mubr.msk.bf16.mxu1 %vm887_vm3, %v16716_v54  ;;  %v4664_v48 = vrot.slane %v12489_v46, 5  ;;  %v12504_v49 = vcombine.low %v4137_v41, %v4147_v30  ;;  %v12505_v61 = vcombine.low %v4161_v32, %v4171_v60  ;;  %v19756_v36 = vld [vmem:[#allocation20_spill] sm:$0xff] }
 0x14f   : > { %v1346_v45 = vpop.f32.mrf.mxu1  ;;  %v4180_v54 = vrot.slane %v4179_v19, 4  ;;  %v4190_v3 = vrot.slane %v4189_v59, 4  ;;  %v4194_v52 = vrot.slane %v4192_v47, 5  ;;  %v19757_v19 = vld [vmem:[#allocation23_spill] sm:$0xff]  ;;  %v19758_v47 = vld [vmem:[#allocation25_spill] sm:$0xff] }
 0x150   : > { %v16809_v21 = vadd.f32 %v13725_v20, %v1355_v55  ;;  %v1347_v10 = vadd.f32 %v1346_v45, %v19754_v13  ;;  %v16812_v1 = vpop.f32.mrf.mxu0  ;;  %v4662_v20 = vsel %vm14960_vm7, %v12554_v16, %v4661_v12  ;;  %v4665_v46 = vsel %vm14960_vm7, %v4663_v18, %v4664_v48 }
 0x151   : > { %v13692_v34 = vpop.f32.mrf.mxu1  ;;  %v4185_v30 = vsel %vm14674_vm4, %v4180_v54, %v4184_v7  ;;  %v4195_v12 = vsel %vm14674_vm4, %v4190_v3, %v4194_v52 }
 0x152   : > { %v16814_v28 = vadd.f32 %v1771_v23, %v1347_v10  ;;  %v1358_v39 = vadd.f32 %v13692_v34, %v19755_v29  ;;  %v13729_v27 = vpop.f32.mrf.mxu0  ;;  %v12506_v60 = vcombine.low %v4185_v30, %v4195_v12 }
 0x153   : > { %13932 = vmatmul.mubr.msk.bf16.gmra.mxu0 %vm887_vm3, %v12569_v6  ;;  %v16818_v40 = vpop.f32.mrf.mxu1  ;;  %v12571_v6 = vcombine.low %v4662_v20, %v4665_v46 }
 0x154   : > { %13935 = vmatprep.mubr.msk.bf16.mxu0 %vm887_vm3, %v12570_v42  ;;  %v16825_v41 = vadd.f32 %v13726_v57, %v1358_v39  ;;  %v1787_v23 = vpop.f32.mrf.mxu0 }
 0x155   : > { %v13695_v9 = vpop.f32.mrf.mxu1  ;;  %13898 = vmatmul.mubr.msk.bf16.gmra.mxu1 %vm887_vm3, %v12504_v49 }
 0x156   : > { %v1371_v51 = vadd.f32 %v13695_v9, %v19756_v36  ;;  %v13730_v15 = vpop.f32.mrf.mxu0  ;;  %13901 = vmatprep.mubr.msk.bf16.mxu1 %vm887_vm3, %v12505_v61 }
 0x157   : > { %v1362_v0 = vpop.f32.mrf.mxu1 }
 0x158   : > { %v16834_v32 = vadd.f32 %v13729_v27, %v1371_v51  ;;  %v1363_v53 = vadd.f32 %v1362_v0, %v19757_v19  ;;  %v16837_v55 = vpop.f32.mrf.mxu0 }
 0x159   : > { %v13696_v57 = vpop.f32.mrf.mxu1 }
 0x15a   : > { %v16839_v59 = vadd.f32 %v1787_v23, %v1363_v53  ;;  %v1374_v45 = vadd.f32 %v13696_v57, %v19758_v47  ;;  %v13733_v42 = vpop.f32.mrf.mxu0 }
 0x15b   : > { %13936 = vmatmul.mubr.msk.bf16.gmra.mxu0 %vm887_vm3, %v12571_v6  ;;  %v16843_v7 = vpop.f32.mrf.mxu1 }
 0x15c   : > { %v16845_v16 = vadd.f32 %v13730_v15, %v1374_v45  ;;  %v1803_v18 = vpop.f32.mrf.mxu0 }
 0x15d   : > { %v13699_v48 = vpop.f32.mrf.mxu1  ;;  %13902 = vmatmul.mubr.msk.bf16.gmra.mxu1 %vm887_vm3, %v12506_v60 }
 0x15e   : > { %v1387_v13 = vadd.f32 %v13699_v48, %v16416_v22  ;;  %v13734_v10 = vpop.f32.mrf.mxu0 }
 0x15f   : > { %v1378_v34 = vpop.f32.mrf.mxu1 }
 0x160   : > { %v16849_v49 = vadd.f32 %v13733_v42, %v1387_v13  ;;  %v1379_v61 = vadd.f32 %v1378_v34, %v16443_v44  ;;  %v16852_v54 = vpop.f32.mrf.mxu0 }
 0x161   : > { %v13700_v29 = vpop.f32.mrf.mxu1 }
 0x162   : > { %v16854_v39 = vadd.f32 %v1803_v18, %v1379_v61  ;;  %v1390_v27 = vadd.f32 %v13700_v29, %v16458_v8  ;;  %v13773_v3 = vpop.f32.mrf.mxu0  ;;  %v14545_v29 = vmov 0  }
 0x163   : > { %v16857_v52 = vpop.f32.mrf.mxu1  ;;  %360 = vst.msk [vmem:[#allocation2 + $0x4] sm:$0xf] %vm358_vm8, %v14545_v29  ;;  %361 = vst.msk [vmem:[#allocation2 + $0x8] sm:$0xf] %vm358_vm8, %v14545_v29 }
 0x164   : > { %v16859_v20 = vadd.f32 %v13734_v10, %v1390_v27  ;;  %v2776_v46 = vpop.f32.mrf.mxu0  ;;  %359 = vst.msk [vmem:[#allocation2] sm:$0xf] %vm358_vm8, %v14545_v29  ;;  %362 = vst.msk [vmem:[#allocation2 + $0xc] sm:$0xf] %vm358_vm8, %v14545_v29 }
 0x165   : > { %v13739_v22 = vpop.f32.mrf.mxu1  ;;  %364 = vst.msk [vmem:[#allocation2 + $0x110] sm:$0xf] %vm358_vm8, %v14545_v29  ;;  %365 = vst.msk [vmem:[#allocation2 + $0x114] sm:$0xf] %vm358_vm8, %v14545_v29 }
 0x166   : > { %v2179_v23 = vadd.f32 %v13739_v22, %v16525_v5  ;;  %v13774_v9 = vpop.f32.mrf.mxu0  ;;  %366 = vst.msk [vmem:[#allocation2 + $0x118] sm:$0xf] %vm358_vm8, %v14545_v29  ;;  %367 = vst.msk [vmem:[#allocation2 + $0x11c] sm:$0xf] %vm358_vm8, %v14545_v29 }
 0x167   : > { %v2050_v36 = vpop.f32.mrf.mxu1  ;;  %369 = vst.msk [vmem:[#allocation2 + $0x10] sm:$0xf] %vm358_vm8, %v14545_v29  ;;  %370 = vst.msk [vmem:[#allocation2 + $0x20] sm:$0xf] %vm358_vm8, %v14545_v29 }
 0x168   : > { %v16862_v51 = vadd.f32 %v13773_v3, %v2179_v23  ;;  %v2177_v44 = vadd.f32 %v2050_v36, %v16532_v24  ;;  %v16865_v15 = vpop.f32.mrf.mxu0  ;;  %371 = vst.msk [vmem:[#allocation2 + $0x30] sm:$0xf] %vm358_vm8, %v14545_v29  ;;  %372 = vst.msk [vmem:[#allocation2 + $0x40] sm:$0xf] %vm358_vm8, %v14545_v29 }
 0x169   : > { %v13740_v30 = vpop.f32.mrf.mxu1  ;;  %373 = vst.msk [vmem:[#allocation2 + $0x50] sm:$0xf] %vm358_vm8, %v14545_v29  ;;  %374 = vst.msk [vmem:[#allocation2 + $0x60] sm:$0xf] %vm358_vm8, %v14545_v29 }
 0x16a   : > { %v16867_v12 = vadd.f32 %v2776_v46, %v2177_v44  ;;  %v2180_v8 = vadd.f32 %v13740_v30, %v16558_v25  ;;  %v13777_v6 = vpop.f32.mrf.mxu0  ;;  %375 = vst.msk [vmem:[#allocation2 + $0x70] sm:$0xf] %vm358_vm8, %v14545_v29  ;;  %376 = vst.msk [vmem:[#allocation2 + $0x80] sm:$0xf] %vm358_vm8, %v14545_v29 }
 0x16b   : > { %v16870_v0 = vpop.f32.mrf.mxu1  ;;  %377 = vst.msk [vmem:[#allocation2 + $0x90] sm:$0xf] %vm358_vm8, %v14545_v29  ;;  %378 = vst.msk [vmem:[#allocation2 + $0xa0] sm:$0xf] %vm358_vm8, %v14545_v29 }
 0x16c   : > { %v16872_v19 = vadd.f32 %v13774_v9, %v2180_v8  ;;  %v2792_v53 = vpop.f32.mrf.mxu0  ;;  %379 = vst.msk [vmem:[#allocation2 + $0xb0] sm:$0xf] %vm358_vm8, %v14545_v29  ;;  %380 = vst.msk [vmem:[#allocation2 + $0xc0] sm:$0xf] %vm358_vm8, %v14545_v29 }
 0x16d   : > { %v13743_v5 = vpop.f32.mrf.mxu1  ;;  %381 = vst.msk [vmem:[#allocation2 + $0xd0] sm:$0xf] %vm358_vm8, %v14545_v29  ;;  %382 = vst.msk [vmem:[#allocation2 + $0xe0] sm:$0xf] %vm358_vm8, %v14545_v29 }
 0x16e   : > { %v2183_v57 = vadd.f32 %v13743_v5, %v16584_v33  ;;  %v13778_v60 = vpop.f32.mrf.mxu0  ;;  %383 = vst.msk [vmem:[#allocation2 + $0xf0] sm:$0xf] %vm358_vm8, %v14545_v29  ;;  %384 = vst.msk [vmem:[#allocation2 + $0x100] sm:$0xf] %vm358_vm8, %v14545_v29 }
 0x16f   : > { %v2066_v47 = vpop.f32.mrf.mxu1  ;;  %385 = vst.msk [vmem:[#allocation2 + $0x1c] sm:$0xf] %vm358_vm8, %v14545_v29  ;;  %386 = vst.msk [vmem:[#allocation2 + $0x2c] sm:$0xf] %vm358_vm8, %v14545_v29 }
 0x170   : > { %v16875_v45 = vadd.f32 %v13777_v6, %v2183_v57  ;;  %v2181_v24 = vadd.f32 %v2066_v47, %v16591_v62  ;;  %v16878_v42 = vpop.f32.mrf.mxu0  ;;  %387 = vst.msk [vmem:[#allocation2 + $0x3c] sm:$0xf] %vm358_vm8, %v14545_v29  ;;  %388 = vst.msk [vmem:[#allocation2 + $0x4c] sm:$0xf] %vm358_vm8, %v14545_v29 }
 0x171   : > { %v13744_v18 = vpop.f32.mrf.mxu1  ;;  %389 = vst.msk [vmem:[#allocation2 + $0x5c] sm:$0xf] %vm358_vm8, %v14545_v29  ;;  %390 = vst.msk [vmem:[#allocation2 + $0x6c] sm:$0xf] %vm358_vm8, %v14545_v29 }
 0x172   : > { %v16880_v48 = vadd.f32 %v2792_v53, %v2181_v24  ;;  %v2184_v25 = vadd.f32 %v13744_v18, %v16616_v38  ;;  %v13781_v13 = vpop.f32.mrf.mxu0  ;;  %391 = vst.msk [vmem:[#allocation2 + $0x7c] sm:$0xf] %vm358_vm8, %v14545_v29  ;;  %392 = vst.msk [vmem:[#allocation2 + $0x8c] sm:$0xf] %vm358_vm8, %v14545_v29 }
 0x173   : > { %v16883_v10 = vpop.f32.mrf.mxu1  ;;  %393 = vst.msk [vmem:[#allocation2 + $0x9c] sm:$0xf] %vm358_vm8, %v14545_v29  ;;  %394 = vst.msk [vmem:[#allocation2 + $0xac] sm:$0xf] %vm358_vm8, %v14545_v29 }
 0x174   : > { %v16885_v34 = vadd.f32 %v13778_v60, %v2184_v25  ;;  %v2808_v61 = vpop.f32.mrf.mxu0  ;;  %395 = vst.msk [vmem:[#allocation2 + $0xbc] sm:$0xf] %vm358_vm8, %v14545_v29  ;;  %396 = vst.msk [vmem:[#allocation2 + $0xcc] sm:$0xf] %vm358_vm8, %v14545_v29  ;;  %v5256_v60 = vld [vmem:[#allocation2 + $0x4] sm:$0xf] }
 0x175   : > { %v13747_v33 = vpop.f32.mrf.mxu1  ;;  %397 = vst.msk [vmem:[#allocation2 + $0xdc] sm:$0xf] %vm358_vm8, %v14545_v29  ;;  %398 = vst.msk [vmem:[#allocation2 + $0xec] sm:$0xf] %vm358_vm8, %v14545_v29 }
 0x176   : > { %399 = vst.msk [vmem:[#allocation2 + $0xfc] sm:$0xf] %vm358_vm8, %v14545_v29  ;;  %400 = vst.msk [vmem:[#allocation2 + $0x10c] sm:$0xf] %vm358_vm8, %v14545_v29  ;;  %v2187_v62 = vadd.f32 %v13747_v33, %v16651_v11  ;;  %v13782_v38 = vpop.f32.mrf.mxu0 }
 0x177   : > { %v2082_v27 = vpop.f32.mrf.mxu1 }
 0x178   : > { %v16928_v3 = vadd.f32 %v13781_v13, %v2187_v62  ;;  %v2185_v46 = vadd.f32 %v2082_v27, %v16658_v35  ;;  %v16931_v22 = vpop.f32.mrf.mxu0  ;;  %v5257_v35 = vld [vmem:[#allocation2 + $0x8] sm:$0xf] }
 0x179   : > { %v13748_v23 = vpop.f32.mrf.mxu1  ;;  %v12639_v25 = vcombine.low %v5256_v60, %v5257_v35 }
 0x17a   : > { %v16933_v9 = vadd.f32 %v2808_v61, %v2185_v46  ;;  %v2188_v36 = vadd.f32 %v13748_v23, %v16679_v56  ;;  %v13785_v44 = vpop.f32.mrf.mxu0  ;;  %v5321_v46 = vshrl.u32 %v5257_v35, 16 }
 0x17b   : > { %v16936_v30 = vpop.f32.mrf.mxu1  ;;  %13941 = vmatprep.mubr.msk.bf16.mxu1 %vm5749_vm9, %v12639_v25  ;;  %v5255_v25 = vld [vmem:[#allocation2] sm:$0x8] }
 0x17c   : > { %19759 = vst [vmem:[#allocation15_spill] sm:$0xff] %v16933_v9  ;;  %v16938_v8 = vadd.f32 %v13782_v38, %v2188_v36  ;;  %v2824_v6 = vpop.f32.mrf.mxu0  ;;  %v5312_v38 = vshrl.u32 %v5256_v60, 16  ;;  %v5261_v9 = vld [vmem:[#allocation2 + $0x20] sm:$0x8] }
 0x17d   : > { %v13751_v11 = vpop.f32.mrf.mxu1 }
 0x17e   : > { %19760 = vst [vmem:[#allocation5_spill] sm:$0xff] %v16938_v8  ;;  %v2191_v53 = vadd.f32 %v13751_v11, %v16705_v43  ;;  %v13786_v5 = vpop.f32.mrf.mxu0  ;;  %v19793_v8 = vld [vmem:[#allocation8_spill] sm:$0xff] }
 0x17f   : > { %v2098_v57 = vpop.f32.mrf.mxu1 }
 0x180   : > { %v16941_v47 = vadd.f32 %v13785_v44, %v2191_v53  ;;  %v2189_v24 = vadd.f32 %v2098_v57, %v16723_v58  ;;  %v16944_v18 = vpop.f32.mrf.mxu0  ;;  %v14438_v58 = vld [vmem:[%s19564_s3] sm:$0xff]   ;;  %v5314_v53 = vrot.slane %v5312_v38, 7 }
 0x181   : > { %v13752_v56 = vpop.f32.mrf.mxu1  ;;  %13973 = vmatprep.subr.bf16.mxu0 %v14438_v58 }
 0x182   : > { %19761 = vst [vmem:[#allocation17_spill] sm:$0xff] %v16941_v47  ;;  %v16946_v13 = vadd.f32 %v2824_v6, %v2189_v24  ;;  %v2192_v61 = vadd.f32 %v13752_v56, %v16746_v2  ;;  %v13789_v33 = vpop.f32.mrf.mxu0  ;;  %13974 = vmatpush3.bf16.msra.mxu0 %v14438_v58  ;;  %v5323_v24 = vrot.slane %v5321_v46, 7  ;;  %v5324_v56 = vshll.u32 %v5257_v35, 16  ;;  %v16973_v35 = vld [vmem:[%s19564_s3 + $0x10] sm:$0xff]  }
 0x183   : > { %v16949_v29 = vpop.f32.mrf.mxu1  ;;  %v5307_v58 = vshrl.u32 %v5255_v25, 16  ;;  %19767 = vst [vmem:[#allocation28_spill] sm:$0xff] %v16973_v35  ;;  %14007 = vmatprep.subr.bf16.mxu1 %v16973_v35 }
 0x184   : > { %19762 = vst [vmem:[#allocation22_spill] sm:$0xff] %v16946_v13  ;;  %v16952_v43 = vadd.f32 %v13786_v5, %v2192_v61  ;;  %v2840_v62 = vpop.f32.mrf.mxu0  ;;  %v5315_v5 = vshll.u32 %v5256_v60, 16  ;;  %v5326_v46 = vor.u32 %v5324_v56, %v5323_v24 }
 0x185   : > { %v13755_v27 = vpop.f32.mrf.mxu1 }
 0x186   : > { %19763 = vst [vmem:[#allocation12_spill] sm:$0xff] %v16952_v43  ;;  %v2195_v23 = vadd.f32 %v13755_v27, %v16767_v4  ;;  %v13790_v36 = vpop.f32.mrf.mxu0  ;;  %v5317_v38 = vor.u32 %v5315_v5, %v5314_v53 }
 0x187   : > { %v2114_v2 = vpop.f32.mrf.mxu1 }
 0x188   : > { %v16958_v44 = vadd.f32 %v13789_v33, %v2195_v23  ;;  %v2193_v6 = vadd.f32 %v2114_v2, %v16772_v17  ;;  %v16961_v11 = vpop.f32.mrf.mxu0  ;;  %v12621_v2 = vrot.slane %v5307_v58, 11 }
 0x189   : > { %v13756_v57 = vpop.f32.mrf.mxu1 }
 0x18a   : > { %19764 = vst [vmem:[#allocation21_spill] sm:$0xff] %v16958_v44  ;;  %v16963_v61 = vadd.f32 %v2840_v62, %v2193_v6  ;;  %v2196_v4 = vadd.f32 %v13756_v57, %v16784_v37  ;;  %v13793_v27 = vpop.f32.mrf.mxu0  ;;  %v19768_v62 = vmov 0  ;;  %v5319_v37 = vrot.slane %v5314_v53, 4 }
 0x18b   : > { %v16966_v33 = vpop.f32.mrf.mxu1  ;;  %v19769_v62 = vsel %vm16975_vm12, 4294967295, %v19768_v62 }
 0x18c   : > { %19765 = vst [vmem:[#allocation24_spill] sm:$0xff] %v16963_v61  ;;  %v16968_v23 = vadd.f32 %v13790_v36, %v2196_v4  ;;  %v2856_v17 = vpop.f32.mrf.mxu0  ;;  %19770 = vst [vmem:[#allocation7_spill] sm:$0xff] %v19769_v62  ;;  %v5318_v36 = vsel %vm16975_vm12, %v12621_v2, %v5317_v38  ;;  %v5327_v5 = vsel %vm16975_vm12, %v5319_v37, %v5326_v46 }
 0x18d   : > { %v13759_v60 = vpop.f32.mrf.mxu1  ;;  %v12672_v53 = vcombine.low %v5318_v36, %v5327_v5 }
 0x18e   : > { %19766 = vst [vmem:[#allocation26_spill] sm:$0xff] %v16968_v23  ;;  %v2199_v6 = vadd.f32 %v13759_v60, %v16809_v21  ;;  %v13794_v57 = vpop.f32.mrf.mxu0 }
 0x18f   : > { %v2130_v25 = vpop.f32.mrf.mxu1  ;;  %13975 = vmatprep.mubr.msk.bf16.mxu0 %vm5749_vm9, %v12672_v53 }
 0x190   : > { %v16985_v4 = vadd.f32 %v13793_v27, %v2199_v6  ;;  %v2197_v58 = vadd.f32 %v2130_v25, %v16814_v28  ;;  %v16988_v31 = vpop.f32.mrf.mxu0 }
 0x191   : > { %v13760_v24 = vpop.f32.mrf.mxu1 }
 0x192   : > { %v16990_v56 = vadd.f32 %v2856_v17, %v2197_v58  ;;  %v2200_v21 = vadd.f32 %v13760_v24, %v16825_v41  ;;  %v13797_v60 = vpop.f32.mrf.mxu0 }
 0x193   : > { %v16994_v2 = vpop.f32.mrf.mxu1 }
 0x194   : > { %v16996_v38 = vadd.f32 %v13794_v57, %v2200_v21  ;;  %v2872_v37 = vpop.f32.mrf.mxu0 }
 0x195   : > { %v13763_v27 = vpop.f32.mrf.mxu1 }
 0x196   : > { %v2203_v46 = vadd.f32 %v13763_v27, %v16834_v32  ;;  %v13798_v28 = vpop.f32.mrf.mxu0 }
 0x197   : > { %v2146_v6 = vpop.f32.mrf.mxu1 }
 0x198   : > { %v16999_v25 = vadd.f32 %v13797_v60, %v2203_v46  ;;  %v2201_v17 = vadd.f32 %v2146_v6, %v16839_v59  ;;  %v17002_v36 = vpop.f32.mrf.mxu0 }
 0x199   : > { %v13764_v41 = vpop.f32.mrf.mxu1 }
 0x19a   : > { %19771 = vst [vmem:[#allocation6_spill] sm:$0xff] %v16999_v25  ;;  %v17004_v5 = vadd.f32 %v2872_v37, %v2201_v17  ;;  %v2204_v58 = vadd.f32 %v13764_v41, %v16845_v16  ;;  %v13801_v53 = vpop.f32.mrf.mxu0 }
 0x19b   : > { %v17007_v57 = vpop.f32.mrf.mxu1 }
 0x19c   : > { %19772 = vst [vmem:[#allocation9_spill] sm:$0xff] %v17004_v5  ;;  %v17009_v24 = vadd.f32 %v13798_v28, %v2204_v58  ;;  %v2888_v21 = vpop.f32.mrf.mxu0 }
 0x19d   : > { %v13767_v32 = vpop.f32.mrf.mxu1 }
 0x19e   : > { %19773 = vst [vmem:[#allocation10_spill] sm:$0xff] %v17009_v24  ;;  %v2207_v27 = vadd.f32 %v13767_v32, %v16849_v49  ;;  %v13802_v60 = vpop.f32.mrf.mxu0 }
 0x19f   : > { %v2162_v46 = vpop.f32.mrf.mxu1 }
 0x1a0   : > { %v17012_v62 = vadd.f32 %v13801_v53, %v2207_v27  ;;  %v2205_v59 = vadd.f32 %v2162_v46, %v16854_v39  ;;  %v17015_v6 = vpop.f32.mrf.mxu0 }
 0x1a1   : > { %v13768_v37 = vpop.f32.mrf.mxu1 }
 0x1a2   : > { %19774 = vst [vmem:[#allocation13_spill] sm:$0xff] %v17012_v62  ;;  %v17017_v17 = vadd.f32 %v2888_v21, %v2205_v59  ;;  %v2208_v16 = vadd.f32 %v13768_v37, %v16859_v20  ;;  %v17020_v41 = vpop.f32.mrf.mxu0 }
 0x1a3   : > { %v17022_v28 = vpop.f32.mrf.mxu1 }
 0x1a4   : > { %19775 = vst [vmem:[#allocation16_spill] sm:$0xff] %v17017_v17  ;;  %v17024_v58 = vadd.f32 %v13802_v60, %v2208_v16  ;;  %v17026_v49 = vpop.f32.mrf.mxu0 }
 0x1a5   : > { %v17028_v32 = vpop.f32.mrf.mxu1 }
 0x1a6   : > { %19776 = vst [vmem:[#allocation20_spill] sm:$0xff] %v17024_v58  ;;  %v17030_v53 = vpop.f32.mrf.mxu0 }
 0x1a7   : > { %v17032_v39 = vpop.f32.mrf.mxu1 }
 0x1a8   : > { %v17034_v27 = vpop.f32.mrf.mxu0 }
 0x1a9   : > { %v17036_v21 = vpop.f32.mrf.mxu1 }
 0x1aa   : > { %v17038_v46 = vpop.f32.mrf.mxu0 }
 0x1ab   : > { %v17040_v20 = vpop.f32.mrf.mxu1 }
 0x1ac   : > { %v17042_v59 = vpop.f32.mrf.mxu0 }
 0x1ad   : > { %v17044_v60 = vpop.f32.mrf.mxu1 }
 0x1ae   : > { %v17046_v37 = vpop.f32.mrf.mxu0 }
 0x1af   : > { %19777 = vst [vmem:[#allocation23_spill] sm:$0xff] %v17046_v37  ;;  %v17048_v16 = vpop.f32.mrf.mxu1 }
 0x1b0   : > { %v17050_v35 = vpop.f32.mrf.mxu0 }
 0x1b1   : > { %19778 = vst [vmem:[#allocation25_spill] sm:$0xff] %v17050_v35  ;;  %v17052_v58 = vpop.f32.mrf.mxu1 }
 0x1b2   : > { %v17054_v17 = vpop.f32.mrf.mxu0 }
 0x1b3   : > { %19779 = vst [vmem:[#allocation29_spill] sm:$0xff] %v17054_v17  ;;  %v17056_v62 = vpop.f32.mrf.mxu1 }
 0x1b4   : > { %v17058_v23 = vpop.f32.mrf.mxu0 }
 0x1b5   : > { %19780 = vst [vmem:[#allocation30_spill] sm:$0xff] %v17058_v23  ;;  %v17060_v61 = vpop.f32.mrf.mxu1 }
 0x1b6   : > { %v17062_v44 = vpop.f32.mrf.mxu0 }
 0x1b7   : > { %19781 = vst [vmem:[#allocation31_spill] sm:$0xff] %v17062_v44  ;;  %v17064_v24 = vpop.f32.mrf.mxu1 }
 0x1b8   : > { %19782 = vst [vmem:[#allocation32_spill] sm:$0xff] %v17064_v24  ;;  %v17066_v5 = vpop.f32.mrf.mxu0 }
 0x1b9   : > { %19783 = vst [vmem:[#allocation33_spill] sm:$0xff] %v17066_v5  ;;  %v17068_v43 = vpop.f32.mrf.mxu1  ;;  %v1334_v5 = vadd.f32 %v16779_v26, %v19793_v8  ;;  %v1382_v26 = vadd.f32 %v16857_v52, %v16480_v14 }
 0x1ba   : > { %19784 = vst [vmem:[#allocation34_spill] sm:$0xff] %v17068_v43  ;;  %v17070_v13 = vpop.f32.mrf.mxu0 }
 0x1bb   : > { %19785 = vst [vmem:[#allocation35_spill] sm:$0xff] %v17070_v13  ;;  %v17072_v35 = vpop.f32.mrf.mxu1  ;;  %v19795_v13 = vld [vmem:[#allocation18_spill] sm:$0xff] }
 0x1bc   : > { %19786 = vst [vmem:[#allocation36_spill] sm:$0xff] %v17072_v35  ;;  %v17074_v25 = vpop.f32.mrf.mxu0  ;;  %v1350_v35 = vadd.f32 %v16818_v40, %v19795_v13  ;;  %v19801_v13 = vld [vmem:[#allocation14_spill] sm:$0xff] }
 0x1bd   : > { %19787 = vst [vmem:[#allocation37_spill] sm:$0xff] %v17074_v25  ;;  %v17076_v17 = vpop.f32.mrf.mxu1 }
 0x1be   : > { %19788 = vst [vmem:[#allocation38_spill] sm:$0xff] %v17076_v17  ;;  %v17078_v47 = vpop.f32.mrf.mxu0  ;;  %v19798_v17 = vld [vmem:[#allocation27_spill] sm:$0xff]  ;;  %v1839_v40 = vadd.f32 %v16812_v1, %v1350_v35  ;;  %v5351_v35 = vshrl.u32 %v5261_v9, 16 }
 0x1bf   : > { %19789 = vst [vmem:[#allocation39_spill] sm:$0xff] %v17078_v47  ;;  %v17080_v23 = vpop.f32.mrf.mxu1  ;;  %v1366_v47 = vadd.f32 %v16843_v7, %v19798_v17  ;;  %v2186_v7 = vadd.f32 %v16936_v30, %v16695_v63 }
 0x1c0   : > { %19790 = vst [vmem:[#allocation40_spill] sm:$0xff] %v17080_v23  ;;  %v17082_v37 = vpop.f32.mrf.mxu0  ;;  %v2198_v63 = vadd.f32 %v16994_v2, %v1839_v40 }
 0x1c1   : > { %19791 = vst [vmem:[#allocation41_spill] sm:$0xff] %v17082_v37  ;;  %v17084_v44 = vpop.f32.mrf.mxu1  ;;  %v5258_v37 = vld [vmem:[#allocation2 + $0x10] sm:$0x8] }
 0x1c2   : > { %19792 = vst [vmem:[#allocation42_spill] sm:$0xff] %v17084_v44  ;;  %v17088_v43 = vpop.f32.mrf.mxu0  ;;  %v1835_v44 = vadd.f32 %v16770_v50, %v1334_v5  ;;  %v19804_v50 = vld [vmem:[#allocation19_spill] sm:$0xff]  ;;  %v5329_v1 = vshrl.u32 %v5258_v37, 16 }
 0x1c3   : > { %19794 = vst [vmem:[#allocation8_spill] sm:$0xff] %v17088_v43  ;;  %v17092_v24 = vpop.f32.mrf.mxu1  ;;  %v2178_v43 = vadd.f32 %v16870_v0, %v19801_v13  ;;  %v2190_v5 = vadd.f32 %v16949_v29, %v19804_v50  ;;  %v1843_v0 = vadd.f32 %v16837_v55, %v1366_v47  ;;  %v5273_v55 = vld [vmem:[#allocation2 + $0x60] sm:$0x8] }
 0x1c4   : > { %19796 = vst [vmem:[#allocation18_spill] sm:$0xff] %v17092_v24  ;;  %v17094_v25 = vpop.f32.mrf.mxu0  ;;  %v2194_v14 = vadd.f32 %v16966_v33, %v1835_v44  ;;  %v2912_v44 = vadd.f32 %v16931_v22, %v2186_v7  ;;  %v17136_v37 = vrot.slane %v5329_v1, 11  ;;  %v3375_v22 = vadd.f32 %v17028_v32, %v16862_v51 }
 0x1c5   : > { %19797 = vst [vmem:[#allocation43_spill] sm:$0xff] %v17094_v25  ;;  %v17098_v23 = vpop.f32.mrf.mxu1  ;;  %v19802_v25 = vld [vmem:[#allocation11_spill] sm:$0xff]  ;;  %v2202_v33 = vadd.f32 %v17007_v57, %v1843_v0  ;;  %v17131_v47 = vadd.f32 %v16944_v18, %v2190_v5  ;;  %v5439_v7 = vshrl.u32 %v5273_v55, 16  ;;  %v3376_v51 = vadd.f32 %v17036_v21, %v16872_v19 }
 0x1c6   : > { %19799 = vst [vmem:[#allocation27_spill] sm:$0xff] %v17098_v23  ;;  %v17103_v8 = vpop.f32.mrf.mxu0  ;;  %v2182_v24 = vadd.f32 %v16883_v10, %v19802_v25  ;;  %v5267_v23 = vld [vmem:[#allocation2 + $0x40] sm:$0x8]  ;;  %v1847_v10 = vadd.f32 %v16852_v54, %v1382_v26  ;;  %v5264_v25 = vld [vmem:[#allocation2 + $0x30] sm:$0x8]  ;;  %v17134_v54 = vadd.f32 %v16961_v11, %v2194_v14  ;;  %v17170_v19 = vadd.f32 %v17020_v41, %v3375_v22 }
 0x1c7   : > { %19800 = vst [vmem:[#allocation44_spill] sm:$0xff] %v17103_v8  ;;  %v17112_v17 = vpop.f32.mrf.mxu1  ;;  %v5395_v8 = vshrl.u32 %v5267_v23, 16  ;;  %v17138_v23 = vrot.slane %v5351_v35, 11  ;;  %v5373_v18 = vshrl.u32 %v5264_v25, 16  ;;  %v17152_v50 = vadd.f32 %v17002_v36, %v2202_v33  ;;  %v5276_v14 = vld [vmem:[#allocation2 + $0x70] sm:$0x8] }
 0x1c8   : > { %19803 = vst [vmem:[#allocation14_spill] sm:$0xff] %v17112_v17  ;;  %v17117_v52 = vpop.f32.mrf.mxu0  ;;  %v2904_v17 = vadd.f32 %v16865_v15, %v2178_v43  ;;  %v2908_v29 = vadd.f32 %v16878_v42, %v2182_v24  ;;  %v5270_v15 = vld [vmem:[#allocation2 + $0x50] sm:$0x8]  ;;  %v2206_v42 = vadd.f32 %v17022_v28, %v1847_v10  ;;  %v3373_v43 = vadd.f32 %v17032_v39, %v16867_v12 }
 0x1c9   : > { %v17120_v13 = vpop.f32.mrf.mxu1  ;;  %v17146_v24 = vadd.f32 %v16988_v31, %v2198_v63  ;;  %v17149_v40 = vrot.slane %v5395_v8, 11  ;;  %v5417_v32 = vshrl.u32 %v5270_v15, 16  ;;  %v3379_v31 = vadd.f32 %v17044_v60, %v16875_v45  ;;  %v5279_v60 = vld [vmem:[#allocation2 + $0x80] sm:$0x8]  ;;  %v19813_v33 = vld [vmem:[#allocation34_spill] sm:$0xff]  ;;  %v19814_v15 = vld [vmem:[#allocation23_spill] sm:$0xff] }
 0x1ca   : > { %v13861_v30 = vpop.f32.mrf.mxu0  ;;  %v3374_v28 = vadd.f32 %v17040_v20, %v2904_v17  ;;  %v17167_v36 = vadd.f32 %v17015_v6, %v2206_v42  ;;  %v17173_v21 = vadd.f32 %v17026_v49, %v3373_v43  ;;  %v17175_v45 = vrot.slane %v5373_v18, 11  ;;  %v5285_v63 = vld [vmem:[#allocation2 + $0xa0] sm:$0x8]  ;;  %v19816_v43 = vld [vmem:[#allocation17_spill] sm:$0xff] }
 0x1cb   : > { %v17128_v9 = vpop.f32.mrf.mxu1  ;;  %19805 = vst [vmem:[#allocation11_spill] sm:$0xff] %v17149_v40  ;;  %v17182_v6 = vrot.slane %v5439_v7, 11  ;;  %v17185_v41 = vadd.f32 %v17030_v53, %v3376_v51  ;;  %v3378_v1 = vadd.f32 %v17056_v62, %v2908_v29  ;;  %v17193_v0 = vrot.slane %v5417_v32, 11  ;;  %v19811_v62 = vld [vmem:[#allocation32_spill] sm:$0xff]  ;;  %v19812_v29 = vld [vmem:[#allocation5_spill] sm:$0xff]  ;;  %v19820_v51 = vld [vmem:[#allocation22_spill] sm:$0xff] }
 0x1cc   : > { %v3685_v2 = vpop.f32.mrf.mxu0  ;;  %19806 = vst [vmem:[#allocation19_spill] sm:$0xff] %v17175_v45  ;;  %v17188_v49 = vadd.f32 %v17034_v27, %v3374_v28  ;;  %v5483_v53 = vshrl.u32 %v5279_v60, 16  ;;  %v3383_v27 = vadd.f32 %v17060_v61, %v16928_v3  ;;  %v3384_v55 = vadd.f32 %v19813_v33, %v19812_v29  ;;  %v19819_v3 = vld [vmem:[#allocation25_spill] sm:$0xff]  ;;  %v19821_v28 = vld [vmem:[#allocation40_spill] sm:$0xff]  ;;  %v19824_v60 = vld [vmem:[#allocation18_spill] sm:$0xff] }
 0x1cd   : > { %v13827_v57 = vpop.f32.mrf.mxu1  ;;  %19807 = vst [vmem:[#allocation45_spill] sm:$0xff] %v17182_v6  ;;  %19808 = vst [vmem:[#allocation46_spill] sm:$0xff] %v17193_v0  ;;  %v17217_v61 = vadd.f32 %v19819_v3, %v3378_v1  ;;  %v19822_v32 = vld [vmem:[#allocation12_spill] sm:$0xff]  ;;  %v5282_v29 = vld [vmem:[#allocation2 + $0x90] sm:$0x8] }
 0x1ce   : > { %v3395_v11 = vadd.f32 %v13827_v57, %v16985_v4  ;;  %v13862_v26 = vpop.f32.mrf.mxu0  ;;  %v3377_v4 = vadd.f32 %v17048_v16, %v16880_v48  ;;  %v3380_v48 = vadd.f32 %v17052_v58, %v16885_v34  ;;  %v17196_v34 = vadd.f32 %v17038_v46, %v3379_v31  ;;  %v19817_v57 = vld [vmem:[#allocation38_spill] sm:$0xff]  ;;  %v19828_v33 = vld [vmem:[#allocation29_spill] sm:$0xff]  ;;  %v19850_v40 = vld [vmem:[#allocation43_spill] sm:$0xff] }
 0x1cf   : > { %v3326_v12 = vpop.f32.mrf.mxu1  ;;  %v5461_v46 = vshrl.u32 %v5276_v14, 16  ;;  %v3387_v18 = vadd.f32 %v19817_v57, %v19816_v43  ;;  %v19823_v31 = vld [vmem:[#allocation42_spill] sm:$0xff]  ;;  %v19826_v14 = vld [vmem:[#allocation9_spill] sm:$0xff] }
 0x1d0   : > { %v17161_v39 = vadd.f32 %v13861_v30, %v3395_v11  ;;  %v3393_v8 = vadd.f32 %v3326_v12, %v16990_v56  ;;  %v17164_v5 = vpop.f32.mrf.mxu0  ;;  %v19810_v30 = vld [vmem:[#allocation15_spill] sm:$0xff]  ;;  %v17210_v42 = vadd.f32 %v19814_v15, %v3380_v48  ;;  %v19818_v11 = vld [vmem:[#allocation6_spill] sm:$0xff]  ;;  %v3385_v12 = vadd.f32 %v19821_v28, %v19820_v51  ;;  %v19836_v28 = vld [vmem:[#allocation37_spill] sm:$0xff] }
 0x1d1   : > { %v13828_v20 = vpop.f32.mrf.mxu1  ;;  %v3381_v25 = vadd.f32 %v19811_v62, %v19810_v30  ;;  %v3386_v48 = vadd.f32 %v19824_v60, %v17131_v47  ;;  %v17235_v62 = vrot.slane %v5483_v53, 11  ;;  %v17246_v47 = vrot.slane %v5461_v46, 11  ;;  %v19833_v53 = vld [vmem:[#allocation35_spill] sm:$0xff]  ;;  %v5294_v0 = vld [vmem:[#allocation2 + $0xd0] sm:$0x8] }
 0x1d2   : > { %v17179_v16 = vadd.f32 %v3685_v2, %v3393_v8  ;;  %v3396_v56 = vadd.f32 %v13828_v20, %v16996_v38  ;;  %v13865_v17 = vpop.f32.mrf.mxu0  ;;  %v17199_v38 = vadd.f32 %v17042_v59, %v3377_v4  ;;  %v19815_v59 = vld [vmem:[#allocation36_spill] sm:$0xff]  ;;  %v3388_v4 = vadd.f32 %v19823_v31, %v19822_v32  ;;  %v6952_v45 = vld [vmem:[#allocation2 + $0x10] sm:$0x8] }
 0x1d3   : > { %v17191_v35 = vpop.f32.mrf.mxu1  ;;  %v3382_v22 = vadd.f32 %v19815_v59, %v2912_v44  ;;  %v5527_v20 = vshrl.u32 %v5285_v63, 16  ;;  %v17226_v44 = vld [vmem:[%s19564_s3 + $0x18] sm:$0xff]   ;;  %19827 = vst [vmem:[#allocation32_spill] sm:$0xff] %v17235_v62  ;;  %v19829_v63 = vld [vmem:[#allocation30_spill] sm:$0xff]  ;;  %19831 = vst [vmem:[#allocation5_spill] sm:$0xff] %v17246_v47  ;;  %v17259_v32 = vadd.f32 %v19836_v28, %v3385_v12 }
 0x1d4   : > { %v17201_v58 = vadd.f32 %v13862_v26, %v3396_v56  ;;  %v3701_v10 = vpop.f32.mrf.mxu0  ;;  %v17241_v15 = vadd.f32 %v19829_v63, %v3381_v25  ;;  %v19830_v59 = vld [vmem:[#allocation31_spill] sm:$0xff]  ;;  %14041 = vmatprep.subr.bf16.mxu0 %v17226_v44  ;;  %v19845_v62 = vld [vmem:[#allocation26_spill] sm:$0xff] }
 0x1d5   : > { %v13831_v2 = vpop.f32.mrf.mxu1  ;;  %v17244_v43 = vadd.f32 %v19830_v59, %v3384_v55  ;;  %v19837_v55 = vld [vmem:[#allocation39_spill] sm:$0xff]  ;;  %v17264_v60 = vrot.slane %v5527_v20, 11  ;;  %v19842_v59 = vld [vmem:[#allocation24_spill] sm:$0xff] }
 0x1d6   : > { %19809 = vst [vmem:[#allocation47_spill] sm:$0xff] %v17201_v58  ;;  %v3399_v26 = vadd.f32 %v13831_v2, %v19818_v11  ;;  %v13866_v7 = vpop.f32.mrf.mxu0  ;;  %v17238_v2 = vadd.f32 %v19828_v33, %v3383_v27  ;;  %v19835_v27 = vld [vmem:[#allocation10_spill] sm:$0xff]  ;;  %v17262_v31 = vadd.f32 %v19837_v55, %v3388_v4  ;;  %v19839_v33 = vld [vmem:[#allocation41_spill] sm:$0xff]  ;;  %v6222_v4 = vld [vmem:[#allocation2 + $0x4] sm:$0xf] }
 0x1d7   : > { %v3342_v8 = vpop.f32.mrf.mxu1  ;;  %19838 = vst [vmem:[#allocation23_spill] sm:$0xff] %v17264_v60  ;;  %v6274_v20 = vshll.u32 %v6222_v4, 16 }
 0x1d8   : > { %v17230_v56 = vadd.f32 %v13865_v17, %v3399_v26  ;;  %v3397_v1 = vadd.f32 %v3342_v8, %v19826_v14  ;;  %v17233_v30 = vpop.f32.mrf.mxu0  ;;  %v19832_v17 = vld [vmem:[#allocation33_spill] sm:$0xff]  ;;  %v17253_v26 = vadd.f32 %v19833_v53, %v3387_v18  ;;  %v5505_v8 = vshrl.u32 %v5282_v29, 16  ;;  %v5291_v14 = vld [vmem:[#allocation2 + $0xc0] sm:$0x8] }
 0x1d9   : > { %v13832_v57 = vpop.f32.mrf.mxu1  ;;  %v17250_v11 = vadd.f32 %v19832_v17, %v3382_v22  ;;  %v5288_v22 = vld [vmem:[#allocation2 + $0xb0] sm:$0x8]  ;;  %v17267_v18 = vadd.f32 %v19839_v33, %v3386_v48  ;;  %v6271_v29 = vshrl.u32 %v6222_v4, 16  ;;  %v3392_v48 = vadd.f32 %v17120_v13, %v19845_v62  ;;  %v19846_v33 = vld [vmem:[#allocation13_spill] sm:$0xff] }
 0x1da   : > { %19825 = vst [vmem:[#allocation15_spill] sm:$0xff] %v17230_v56  ;;  %v17255_v3 = vadd.f32 %v3701_v10, %v3397_v1  ;;  %v3400_v51 = vadd.f32 %v13832_v57, %v19835_v27  ;;  %v13869_v25 = vpop.f32.mrf.mxu0  ;;  %v19840_v10 = vld [vmem:[#allocation21_spill] sm:$0xff]  ;;  %v19841_v1 = vld [vmem:[#allocation27_spill] sm:$0xff]  ;;  %v19843_v57 = vld [vmem:[#allocation14_spill] sm:$0xff]  ;;  %v3390_v4 = vadd.f32 %v17128_v9, %v17134_v54 }
 0x1db   : > { %v3345_v46 = vpop.f32.mrf.mxu1  ;;  %v3391_v63 = vadd.f32 %v19841_v1, %v19840_v10  ;;  %v3389_v17 = vadd.f32 %v19843_v57, %v19842_v59  ;;  %v6223_v27 = vld [vmem:[#allocation2 + $0x8] sm:$0xf]  ;;  %v5549_v10 = vshrl.u32 %v5288_v22, 16  ;;  %v5571_v1 = vshrl.u32 %v5291_v14, 16  ;;  %v19847_v56 = vld [vmem:[#allocation16_spill] sm:$0xff] }
 0x1dc   : > { %19834 = vst [vmem:[#allocation34_spill] sm:$0xff] %v17255_v3  ;;  %v17273_v12 = vadd.f32 %v13866_v7, %v3400_v51  ;;  %v3717_v53 = vpop.f32.mrf.mxu0  ;;  %v6280_v55 = vshll.u32 %v6223_v27, 16  ;;  %v6284_v60 = vshrl.u32 %v6223_v27, 16  ;;  %v6224_v7 = vld [vmem:[#allocation2 + $0xc] sm:$0x1]  ;;  %v6273_v51 = vrot.slane %v6271_v29, 4 }
 0x1dd   : > { %v13835_v28 = vpop.f32.mrf.mxu1  ;;  %v6276_v57 = vrot.slane %v6274_v20, 5  ;;  %v5297_v22 = vld [vmem:[#allocation2 + $0xe0] sm:$0x8]  ;;  %v17291_v29 = vadd.f32 %v19850_v40, %v3389_v17  ;;  %v17300_v40 = vrot.slane %v5549_v10, 11  ;;  %v17302_v17 = vrot.slane %v5571_v1, 11 }
 0x1de   : > { %19844 = vst [vmem:[#allocation36_spill] sm:$0xff] %v17273_v12  ;;  %v3403_v47 = vadd.f32 %v13835_v28, %v19846_v33  ;;  %v13870_v6 = vpop.f32.mrf.mxu0  ;;  %v17278_v12 = vrot.slane %v6280_v55, 5  ;;  %v6286_v3 = vrot.slane %v6284_v60, 4  ;;  %v17285_v28 = vrot.slane %v5505_v8, 11  ;;  %v19849_v14 = vld [vmem:[#allocation8_spill] sm:$0xff] }
 0x1df   : > { %v3358_v59 = vpop.f32.mrf.mxu1  ;;  %v17288_v33 = vadd.f32 %v19849_v14, %v3391_v63  ;;  %v5593_v55 = vshrl.u32 %v5294_v0, 16  ;;  %v6277_v60 = vor.u32 %v6276_v57, %v6273_v51  ;;  %v19851_v9 = vld [vmem:[#allocation20_spill] sm:$0xff]  ;;  %v6290_v8 = vshll.u32 %v6224_v7, 16  ;;  %19853 = vst [vmem:[#allocation38_spill] sm:$0xff] %v17300_v40  ;;  %19854 = vst [vmem:[#allocation6_spill] sm:$0xff] %v17302_v17 }
 0x1e0   : > { %v17282_v27 = vadd.f32 %v13869_v25, %v3403_v47  ;;  %v3401_v13 = vadd.f32 %v3358_v59, %v19847_v56  ;;  %v3720_v62 = vpop.f32.mrf.mxu0  ;;  %19848 = vst [vmem:[#allocation17_spill] sm:$0xff] %v17285_v28  ;;  %v5300_v56 = vld [vmem:[#allocation2 + $0xf0] sm:$0x8]  ;;  %v6287_v25 = vor.u32 %v6286_v3, %v17278_v12  ;;  %v6955_v59 = vld [vmem:[#allocation2 + $0x20] sm:$0x8]  ;;  %v5615_v0 = vshrl.u32 %v5297_v22, 16 }
 0x1e1   : > { %v13836_v20 = vpop.f32.mrf.mxu1  ;;  %v19852_v28 = vld [vmem:[#allocation44_spill] sm:$0xff]  ;;  %v3394_v51 = vadd.f32 %v17191_v35, %v17146_v24  ;;  %v6227_v7 = vld [vmem:[#allocation2 + $0x1c] sm:$0x1]  ;;  %v5637_v10 = vshrl.u32 %v5300_v56, 16  ;;  %v7023_v1 = vshrl.u32 %v6955_v59, 16  ;;  %v6292_v40 = vrot.slane %v6290_v8, 5 }
 0x1e2   : > { %v17293_v58 = vadd.f32 %v3717_v53, %v3401_v13  ;;  %v3404_v54 = vadd.f32 %v13836_v20, %v19851_v9  ;;  %v13909_v47 = vpop.f32.mrf.mxu0  ;;  %v17298_v63 = vadd.f32 %v19852_v28, %v3392_v48  ;;  %v17305_v53 = vadd.f32 %v17117_v52, %v3390_v4  ;;  %v6230_v20 = vld [vmem:[#allocation2 + $0x2c] sm:$0x1] }
 0x1e3   : > { %v3361_v14 = vpop.f32.mrf.mxu1  ;;  %v7001_v13 = vshrl.u32 %v6952_v45, 16  ;;  %v3398_v48 = vadd.f32 %v3345_v46, %v17152_v50  ;;  %v6278_v9 = vrot.slane %v6277_v60, 4  ;;  %v17313_v52 = vrot.slane %v5593_v55, 11  ;;  %v17319_v45 = vld [vmem:[%s19563_s2] ss:$0 sm:$0xff] }
 0x1e4   : > { %v17309_v57 = vadd.f32 %v13870_v6, %v3404_v54  ;;  %v4801_v3 = vpop.f32.mrf.mxu0  ;;  %v6288_v4 = vrot.slane %v6287_v25, 4  ;;  %v3402_v24 = vadd.f32 %v3361_v14, %v17167_v36  ;;  %v17321_v50 = vrot.slane %v5615_v0, 11  ;;  %v6233_v36 = vld [vmem:[#allocation2 + $0x3c] sm:$0x1] }
 0x1e5   : > { %v13875_v28 = vpop.f32.mrf.mxu1  ;;  %v6314_v35 = vshll.u32 %v6227_v7, 16  ;;  %v6338_v46 = vshll.u32 %v6230_v20, 16  ;;  %v17324_v60 = vadd.f32 %v17164_v5, %v3394_v51  ;;  %v17327_v56 = vrot.slane %v7001_v13, 11  ;;  %v6961_v20 = vld [vmem:[#allocation2 + $0x40] sm:$0x8] }
 0x1e6   : > { %v4460_v22 = vadd.f32 %v13875_v28, %v17170_v19  ;;  %v13910_v17 = vpop.f32.mrf.mxu0  ;;  %v17330_v25 = vadd.f32 %v17233_v30, %v3398_v48  ;;  %v17332_v59 = vrot.slane %v5637_v10, 11  ;;  %v6283_v0 = vsel %vm14674_vm4, %v6278_v9, %v17278_v12  ;;  %v6958_v30 = vld [vmem:[#allocation2 + $0x30] sm:$0x8] }
 0x1e7   : > { %v4331_v6 = vpop.f32.mrf.mxu1  ;;  %v17337_v7 = vrot.slane %v7023_v1, 11  ;;  %v6293_v13 = vsel %vm14674_vm4, %v6288_v4, %v6292_v40  ;;  %v17343_v48 = vadd.f32 %v3720_v62, %v3402_v24  ;;  %v17345_v10 = vrot.slane %v6314_v35, 5 }
 0x1e8   : > { %v4930_v19 = vadd.f32 %v13909_v47, %v4460_v22  ;;  %v4458_v55 = vadd.f32 %v4331_v6, %v17173_v21  ;;  %v4804_v54 = vpop.f32.mrf.mxu0  ;;  %v17347_v22 = vrot.slane %v6338_v46, 5  ;;  %v6362_v12 = vshll.u32 %v6233_v36, 16  ;;  %v6236_v36 = vld [vmem:[#allocation2 + $0x4c] sm:$0x1] }
 0x1e9   : > { %v13876_v8 = vpop.f32.mrf.mxu1  ;;  %v17351_v40 = vcombine.low %v6283_v0, %v6293_v13  ;;  %v7045_v4 = vshrl.u32 %v6958_v30, 16  ;;  %v7067_v62 = vshrl.u32 %v6961_v20, 16 }
 0x1ea   : > { %v4969_v5 = vadd.f32 %v17319_v45, %v4930_v19  ;;  %v4928_v47 = vadd.f32 %v4801_v3, %v4458_v55  ;;  %v4461_v21 = vadd.f32 %v13876_v8, %v17185_v41  ;;  %v13913_v51 = vpop.f32.mrf.mxu0  ;;  %19856 = vst [vmem:[#allocation25_spill] sm:$0xff] %v17347_v22 }
 0x1eb   : > { %v4334_v28 = vpop.f32.mrf.mxu1 }
 0x1ec   : > { %vm5001_vm13 = vcmp.ge.f32.partialorder %v4969_v5, 0.0  ;;  %v5033_v9 = vmul.f32 0.2, %v4969_v5  ;;  %v4967_v3 = vadd.f32 %v17319_v45, %v4928_v47  ;;  %v4931_v1 = vadd.f32 %v13910_v17, %v4461_v21  ;;  %v4817_v41 = vpop.f32.mrf.mxu0 }
 0x1ed   : > { %v4459_v6 = vadd.f32 %v4334_v28, %v17188_v49  ;;  %v13879_v19 = vpop.f32.mrf.mxu1  ;;  %v17355_v21 = vrot.slane %v6362_v12, 5 }
 0x1ee   : > { %v5065_v24 = vsel %vm5001_vm13, %v4969_v5, %v5033_v9  ;;  %vm4999_vm14 = vcmp.ge.f32.partialorder %v4967_v3, 0.0  ;;  %v5031_v35 = vmul.f32 0.2, %v4967_v3  ;;  %v4970_v46 = vadd.f32 %v17319_v45, %v4931_v1  ;;  %v13914_v55 = vpop.f32.mrf.mxu0 }
 0x1ef   : > { %v13150_v8 = vpack.c.bf16 %v5065_v24, %v5065_v24  ;;  %v4929_v22 = vadd.f32 %v4804_v54, %v4459_v6  ;;  %v4464_v47 = vadd.f32 %v13879_v19, %v17196_v34  ;;  %v4347_v17 = vpop.f32.mrf.mxu1  ;;  %v6386_v1 = vshll.u32 %v6236_v36, 16 }
 0x1f0   : > { %v5063_v49 = vsel %vm4999_vm14, %v4967_v3, %v5031_v35  ;;  %vm5002_vm15 = vcmp.ge.f32.partialorder %v4970_v46, 0.0  ;;  %v5034_v0 = vmul.f32 0.2, %v4970_v46  ;;  %v4462_v13 = vadd.f32 %v4347_v17, %v17199_v38  ;;  %v4820_v30 = vpop.f32.mrf.mxu0  ;;  %v17372_v17 = vld [vmem:[#allocation2 + $0x5c] sm:$0x1] }
 0x1f1   : > { %5225 = vst.msk [vmem:[#allocation2 + $0x24] sm:$0xf] %vm358_vm8, %v13150_v8  ;;  %v13148_v5 = vpack.c.bf16 %v5063_v49, %v5063_v49  ;;  %v4968_v20 = vadd.f32 %v17319_v45, %v4929_v22  ;;  %v4934_v28 = vadd.f32 %v13913_v51, %v4464_v47  ;;  %v13880_v9 = vpop.f32.mrf.mxu1  ;;  %v17361_v19 = vrot.slane %v7045_v4, 11 }
 0x1f2   : > { %v5066_v54 = vsel %vm5002_vm15, %v4970_v46, %v5034_v0  ;;  %v4932_v6 = vadd.f32 %v4817_v41, %v4462_v13  ;;  %v4465_v34 = vadd.f32 %v13880_v9, %v17210_v42  ;;  %v13917_v12 = vpop.f32.mrf.mxu0  ;;  %v17367_v41 = vrot.slane %v7067_v62, 11 }
 0x1f3   : > { %5223 = vst.msk [vmem:[#allocation2 + $0x14] sm:$0xf] %vm358_vm8, %v13148_v5  ;;  %v13151_v3 = vpack.c.bf16 %v5066_v54, %v5066_v54  ;;  %vm5000_vm1 = vcmp.ge.f32.partialorder %v4968_v20, 0.0  ;;  %v5032_v38 = vmul.f32 0.2, %v4968_v20  ;;  %v4973_v24 = vadd.f32 %v17319_v45, %v4934_v28  ;;  %v4350_v35 = vpop.f32.mrf.mxu1 }
 0x1f4   : > { %v4971_v22 = vadd.f32 %v17319_v45, %v4932_v6  ;;  %v4935_v51 = vadd.f32 %v13914_v55, %v4465_v34  ;;  %v4463_v36 = vadd.f32 %v4350_v35, %v17217_v61  ;;  %v4833_v46 = vpop.f32.mrf.mxu0  ;;  %v17370_v47 = vrot.slane %v6386_v1, 5 }
 0x1f5   : > { %5226 = vst.msk [vmem:[#allocation2 + $0x28] sm:$0xf] %vm358_vm8, %v13151_v3  ;;  %v5064_v42 = vsel %vm5000_vm1, %v4968_v20, %v5032_v38  ;;  %vm5005_vm2 = vcmp.ge.f32.partialorder %v4973_v24, 0.0  ;;  %v5037_v4 = vmul.f32 0.2, %v4973_v24  ;;  %v13883_v8 = vpop.f32.mrf.mxu1 }
 0x1f6   : > { %v13149_v49 = vpack.c.bf16 %v5064_v42, %v5064_v42  ;;  %vm5003_vm5 = vcmp.ge.f32.partialorder %v4971_v22, 0.0  ;;  %v5035_v0 = vmul.f32 0.2, %v4971_v22  ;;  %v4974_v55 = vadd.f32 %v17319_v45, %v4935_v51  ;;  %v13918_v13 = vpop.f32.mrf.mxu0 }
 0x1f7   : > { %v5069_v61 = vsel %vm5005_vm2, %v4973_v24, %v5037_v4  ;;  %v4933_v5 = vadd.f32 %v4820_v30, %v4463_v36  ;;  %v4468_v62 = vadd.f32 %v13883_v8, %v17238_v2  ;;  %v4363_v28 = vpop.f32.mrf.mxu1 }
 0x1f8   : > { %5224 = vst.msk [vmem:[#allocation2 + $0x18] sm:$0xf] %vm358_vm8, %v13149_v49  ;;  %v13154_v9 = vpack.c.bf16 %v5069_v61, %v5069_v61  ;;  %v5067_v1 = vsel %vm5003_vm5, %v4971_v22, %v5035_v0  ;;  %vm5006_vm6 = vcmp.ge.f32.partialorder %v4974_v55, 0.0  ;;  %v5038_v54 = vmul.f32 0.2, %v4974_v55  ;;  %v4836_v6 = vpop.f32.mrf.mxu0 }
 0x1f9   : > { %v17378_v34 = vld [vmem:[#allocation2 + $0x24] sm:$0xf]  ;;  %v13152_v3 = vpack.c.bf16 %v5067_v1, %v5067_v1  ;;  %v4972_v38 = vadd.f32 %v17319_v45, %v4933_v5  ;;  %v4938_v35 = vadd.f32 %v13917_v12, %v4468_v62  ;;  %v4466_v30 = vadd.f32 %v4363_v28, %v17241_v15  ;;  %v13884_v24 = vpop.f32.mrf.mxu1 }
 0x1fa   : > { %5229 = vst.msk [vmem:[#allocation2 + $0x44] sm:$0xf] %vm358_vm8, %v13154_v9  ;;  %v5070_v2 = vsel %vm5006_vm6, %v4974_v55, %v5038_v54  ;;  %v4469_v51 = vadd.f32 %v13884_v24, %v17244_v43  ;;  %v13921_v36 = vpop.f32.mrf.mxu0  ;;  %v17384_v42 = vld [vmem:[#allocation2 + $0x14] sm:$0xf]  ;;  %v5356_v22 = vshrl.u32 %v17378_v34, 16 }
 0x1fb   : > { %5227 = vst.msk [vmem:[#allocation2 + $0x34] sm:$0xf] %vm358_vm8, %v13152_v3  ;;  %v13155_v8 = vpack.c.bf16 %v5070_v2, %v5070_v2  ;;  %vm5004_vm7 = vcmp.ge.f32.partialorder %v4972_v38, 0.0  ;;  %v5036_v12 = vmul.f32 0.2, %v4972_v38  ;;  %v4977_v15 = vadd.f32 %v17319_v45, %v4938_v35  ;;  %v4366_v49 = vpop.f32.mrf.mxu1 }
 0x1fc   : > { %v4936_v0 = vadd.f32 %v4833_v46, %v4466_v30  ;;  %v4939_v61 = vadd.f32 %v13918_v13, %v4469_v51  ;;  %v4467_v55 = vadd.f32 %v4366_v49, %v17250_v11  ;;  %v4849_v43 = vpop.f32.mrf.mxu0  ;;  %v5334_v5 = vshrl.u32 %v17384_v42, 16 }
 0x1fd   : > { %5230 = vst.msk [vmem:[#allocation2 + $0x48] sm:$0xf] %vm358_vm8, %v13155_v8  ;;  %v5068_v62 = vsel %vm5004_vm7, %v4972_v38, %v5036_v12  ;;  %vm5009_vm10 = vcmp.ge.f32.partialorder %v4977_v15, 0.0  ;;  %v5041_v28 = vmul.f32 0.2, %v4977_v15  ;;  %v13887_v9 = vpop.f32.mrf.mxu1  ;;  %v5337_v1 = vshll.u32 %v17384_v42, 16 }
 0x1fe   : > { %v13153_v54 = vpack.c.bf16 %v5068_v62, %v5068_v62  ;;  %v4975_v3 = vadd.f32 %v17319_v45, %v4936_v0  ;;  %v4978_v35 = vadd.f32 %v17319_v45, %v4939_v61  ;;  %v4937_v46 = vadd.f32 %v4836_v6, %v4467_v55  ;;  %v13922_v13 = vpop.f32.mrf.mxu0 }
 0x1ff   : > { %v5073_v30 = vsel %vm5009_vm10, %v4977_v15, %v5041_v28  ;;  %v4472_v11 = vadd.f32 %v13887_v9, %v17253_v26  ;;  %v4379_v24 = vpop.f32.mrf.mxu1  ;;  %v17397_v2 = vld [vmem:[#allocation2 + $0x18] sm:$0xf]  ;;  %v17399_v51 = vrot.slane %v5334_v5, 7  ;;  %v17401_v38 = vrot.slane %v5356_v22, 7  ;;  %v17410_v28 = vld [vmem:[#allocation2 + $0x28] sm:$0xf] }
 0x200   : > { %5228 = vst.msk [vmem:[#allocation2 + $0x38] sm:$0xf] %vm358_vm8, %v13153_v54  ;;  %v13158_v8 = vpack.c.bf16 %v5073_v30, %v5073_v30  ;;  %vm5007_vm11 = vcmp.ge.f32.partialorder %v4975_v3, 0.0  ;;  %v5039_v12 = vmul.f32 0.2, %v4975_v3  ;;  %vm5010_vm13 = vcmp.ge.f32.partialorder %v4978_v35, 0.0  ;;  %v4852_v49 = vpop.f32.mrf.mxu0 }
 0x201   : > { %v5042_v0 = vmul.f32 0.2, %v4978_v35  ;;  %v4976_v6 = vadd.f32 %v17319_v45, %v4937_v46  ;;  %v4942_v15 = vadd.f32 %v13921_v36, %v4472_v11  ;;  %v4470_v26 = vadd.f32 %v4379_v24, %v17259_v32  ;;  %v13888_v61 = vpop.f32.mrf.mxu1 }
 0x202   : > { %5233 = vst.msk [vmem:[#allocation2 + $0x64] sm:$0xf] %vm358_vm8, %v13158_v8  ;;  %v5071_v55 = vsel %vm5007_vm11, %v4975_v3, %v5039_v12  ;;  %v4473_v22 = vadd.f32 %v13888_v61, %v17262_v31  ;;  %v5343_v5 = vshrl.u32 %v17397_v2, 16  ;;  %v5346_v62 = vshll.u32 %v17397_v2, 16  ;;  %v13925_v9 = vpop.f32.mrf.mxu0 }
 0x203   : > { %v13156_v54 = vpack.c.bf16 %v5071_v55, %v5071_v55  ;;  %v5074_v30 = vsel %vm5010_vm13, %v4978_v35, %v5042_v0  ;;  %vm5008_vm14 = vcmp.ge.f32.partialorder %v4976_v6, 0.0  ;;  %v5040_v46 = vmul.f32 0.2, %v4976_v6  ;;  %v4382_v36 = vpop.f32.mrf.mxu1  ;;  %v17420_v35 = vld [vmem:[%s19564_s3 + $0x20] sm:$0xff]  }
 0x204   : > { %v13159_v11 = vpack.c.bf16 %v5074_v30, %v5074_v30  ;;  %v4981_v32 = vadd.f32 %v17319_v45, %v4942_v15  ;;  %v4940_v24 = vadd.f32 %v4849_v43, %v4470_v26  ;;  %v4943_v8 = vadd.f32 %v13922_v13, %v4473_v22  ;;  %v4865_v3 = vpop.f32.mrf.mxu0 }
 0x205   : > { %5231 = vst.msk [vmem:[#allocation2 + $0x54] sm:$0xf] %vm358_vm8, %v13156_v54  ;;  %v5072_v31 = vsel %vm5008_vm14, %v4976_v6, %v5040_v46  ;;  %v5345_v12 = vrot.slane %v5343_v5, 7  ;;  %v12640_v61 = vcombine.low %v17384_v42, %v17397_v2  ;;  %v5365_v20 = vshrl.u32 %v17410_v28, 16  ;;  %v13891_v55 = vpop.f32.mrf.mxu1 }
 0x206   : > { %5234 = vst.msk [vmem:[#allocation2 + $0x68] sm:$0xf] %vm358_vm8, %v13159_v11  ;;  %v13157_v43 = vpack.c.bf16 %v5072_v31, %v5072_v31  ;;  %vm5013_vm15 = vcmp.ge.f32.partialorder %v4981_v32, 0.0  ;;  %v5045_v13 = vmul.f32 0.2, %v4981_v32  ;;  %v4979_v0 = vadd.f32 %v17319_v45, %v4940_v24  ;;  %v13926_v6 = vpop.f32.mrf.mxu0  ;;  %v19857_v11 = vld [vmem:[#allocation28_spill] sm:$0xff] }
 0x207   : > { %v4982_v15 = vadd.f32 %v17319_v45, %v4943_v8  ;;  %13942 = vmatmul.mubr.msk.bf16.vlgmr.msra.gmra.mxu1 %vm5749_vm9, %v12640_v61  ;;  %v17426_v26 = vrot.slane %v5365_v20, 7  ;;  %v12641_v5 = vcombine.low %v17378_v34, %v17410_v28  ;;  %v4395_v54 = vpop.f32.mrf.mxu1  ;;  %v4471_v24 = vadd.f32 %v4382_v36, %v17267_v18  ;;  %v17443_v36 = vld [vmem:[#allocation2 + $0x34] sm:$0xf] }
 0x208   : > { %5232 = vst.msk [vmem:[#allocation2 + $0x58] sm:$0xf] %vm358_vm8, %v13157_v43  ;;  %v5077_v30 = vsel %vm5013_vm15, %v4981_v32, %v5045_v13  ;;  %vm5011_vm1 = vcmp.ge.f32.partialorder %v4979_v0, 0.0  ;;  %v5043_v46 = vmul.f32 0.2, %v4979_v0  ;;  %14008 = vmatpush3.bf16.msra.mxu1 %v19857_v11  ;;  %v4476_v20 = vadd.f32 %v13891_v55, %v17288_v33  ;;  %v17436_v22 = vpop.f32.mrf.mxu0 }
 0x209   : > { %v13162_v8 = vpack.c.bf16 %v5077_v30, %v5077_v30  ;;  %vm5014_vm2 = vcmp.ge.f32.partialorder %v4982_v15, 0.0  ;;  %v5046_v31 = vmul.f32 0.2, %v4982_v15  ;;  %13945 = vmatprep.mubr.msk.bf16.mxu1 %vm5749_vm9, %v12641_v5  ;;  %v13892_v61 = vpop.f32.mrf.mxu1  ;;  %14075 = vmatprep.subr.bf16.mxu1 %v17420_v35  ;;  %v4941_v32 = vadd.f32 %v4852_v49, %v4471_v24 }
 0x20a   : > { %v5075_v43 = vsel %vm5011_vm1, %v4979_v0, %v5043_v46  ;;  %v4474_v13 = vadd.f32 %v4395_v54, %v17291_v29  ;;  %v5339_v18 = vor.u32 %v5337_v1, %v17399_v51  ;;  %v4946_v33 = vadd.f32 %v13925_v9, %v4476_v20 }
 0x20b   : > { %5237 = vst.msk [vmem:[#allocation2 + $0x84] sm:$0xf] %vm358_vm8, %v13162_v8  ;;  %v13160_v5 = vpack.c.bf16 %v5075_v43, %v5075_v43  ;;  %v5078_v30 = vsel %vm5014_vm2, %v4982_v15, %v5046_v31  ;;  %v5341_v55 = vrot.slane %v17399_v51, 4  ;;  %v17447_v11 = vpop.f32.mrf.mxu1  ;;  %v4980_v49 = vadd.f32 %v17319_v45, %v4941_v32  ;;  %v17459_v46 = vpop.f32.mrf.mxu0 }
 0x20c   : > { %v13163_v4 = vpack.c.bf16 %v5078_v30, %v5078_v30  ;;  %v4944_v0 = vadd.f32 %v4865_v3, %v4474_v13  ;;  %v5340_v42 = vsel %vm16975_vm12, %v17136_v37, %v5339_v18  ;;  %v4985_v1 = vadd.f32 %v17319_v45, %v4946_v33 }
 0x20d   : > { %5235 = vst.msk [vmem:[#allocation2 + $0x74] sm:$0xf] %vm358_vm8, %v13160_v5  ;;  %v5348_v15 = vor.u32 %v5346_v62, %v5345_v12  ;;  %v4477_v9 = vadd.f32 %v13892_v61, %v17298_v63  ;;  %v5378_v51 = vshrl.u32 %v17443_v36, 16  ;;  %v13895_v54 = vpop.f32.mrf.mxu1  ;;  %vm5012_vm5 = vcmp.ge.f32.partialorder %v4980_v49, 0.0  ;;  %v5266_v63 = vld [vmem:[#allocation2 + $0x38] sm:$0xf]  ;;  %v4881_v18 = vpop.f32.mrf.mxu0 }
 0x20e   : > { %5238 = vst.msk [vmem:[#allocation2 + $0x88] sm:$0xf] %vm358_vm8, %v13163_v4  ;;  %v5044_v3 = vmul.f32 0.2, %v4980_v49  ;;  %v4983_v37 = vadd.f32 %v17319_v45, %v4944_v0  ;;  %v5381_v24 = vshll.u32 %v17443_v36, 16  ;;  %vm5017_vm6 = vcmp.ge.f32.partialorder %v4985_v1, 0.0 }
 0x20f   : > { %v5049_v8 = vmul.f32 0.2, %v4985_v1  ;;  %v5349_v2 = vsel %vm16975_vm12, %v5341_v55, %v5348_v15  ;;  %v4947_v62 = vadd.f32 %v13926_v6, %v4477_v9  ;;  %v4411_v12 = vpop.f32.mrf.mxu1  ;;  %v5380_v13 = vrot.slane %v5378_v51, 7  ;;  %v17468_v6 = vld [vmem:[#allocation2 + $0x44] sm:$0xf] }
 0x210   : > { %v5076_v31 = vsel %vm5012_vm5, %v4980_v49, %v5044_v3  ;;  %vm5015_vm7 = vcmp.ge.f32.partialorder %v4983_v37, 0.0  ;;  %v5047_v20 = vmul.f32 0.2, %v4983_v37  ;;  %v12673_v61 = vcombine.low %v5340_v42, %v5349_v2  ;;  %v17470_v15 = vld [vmem:[#allocation2 + $0x48] sm:$0xf] }
 0x211   : > { %v13161_v43 = vpack.c.bf16 %v5076_v31, %v5076_v31  ;;  %v5081_v4 = vsel %vm5017_vm6, %v4985_v1, %v5049_v8  ;;  %v4986_v32 = vadd.f32 %v17319_v45, %v4947_v62  ;;  %v13896_v5 = vpop.f32.mrf.mxu1  ;;  %v5387_v0 = vshrl.u32 %v5266_v63, 16  ;;  %v13930_v31 = vpop.f32.mrf.mxu0 }
 0x212   : > { %v13166_v30 = vpack.c.bf16 %v5081_v4, %v5081_v4  ;;  %v5079_v33 = vsel %vm5015_vm7, %v4983_v37, %v5047_v20  ;;  %13976 = vmatmul.mubr.msk.bf16.vlgmr.msra.gmra.mxu0 %vm5749_vm9, %v12673_v61  ;;  %v5390_v55 = vshll.u32 %v5266_v63, 16  ;;  %v12642_v1 = vcombine.low %v17443_v36, %v5266_v63  ;;  %v17496_v61 = vld [vmem:[#allocation2 + $0x54] sm:$0xf] }
 0x213   : > { %5236 = vst.msk [vmem:[#allocation2 + $0x78] sm:$0xf] %vm358_vm8, %v13161_v43  ;;  %v13164_v49 = vpack.c.bf16 %v5079_v33, %v5079_v33  ;;  %vm5018_vm10 = vcmp.ge.f32.partialorder %v4986_v32, 0.0  ;;  %v5050_v42 = vmul.f32 0.2, %v4986_v32  ;;  %14042 = vmatpush3.bf16.msra.mxu0 %v17226_v44  ;;  %v5389_v9 = vrot.slane %v5387_v0, 7 }
 0x214   : > { %5241 = vst.msk [vmem:[#allocation2 + $0xa4] sm:$0xf] %vm358_vm8, %v13166_v30  ;;  %v19859_v51 = vshll.u32 %v17378_v34, 16  ;;  %v5363_v37 = vrot.slane %v17401_v38, 4  ;;  %v19860_v8 = vshll.u32 %v17410_v28, 16  ;;  %13946 = vmatmul.mubr.msk.bf16.gmra.mxu1 %vm5749_vm9, %v12642_v1  ;;  %v5400_v44 = vshrl.u32 %v17468_v6, 16  ;;  %v17488_v34 = vpop.f32.mrf.mxu1 }
 0x215   : > { %5239 = vst.msk [vmem:[#allocation2 + $0x94] sm:$0xf] %vm358_vm8, %v13164_v49  ;;  %v5082_v62 = vsel %vm5018_vm10, %v4986_v32, %v5050_v42  ;;  %v5403_v36 = vshll.u32 %v17468_v6, 16  ;;  %v5409_v63 = vshrl.u32 %v17470_v15, 16  ;;  %v12643_v30 = vcombine.low %v17468_v6, %v17470_v15 }
 0x216   : > { %v5361_v3 = vor.u32 %v19859_v51, %v17401_v38  ;;  %v5370_v2 = vor.u32 %v19860_v8, %v17426_v26  ;;  %v13167_v20 = vpack.c.bf16 %v5082_v62, %v5082_v62  ;;  %v5412_v26 = vshll.u32 %v17470_v15, 16  ;;  %v19861_v51 = vld [vmem:[#allocation47_spill] sm:$0xff]  ;;  %v13899_v8 = vpop.f32.mrf.mxu1 }
 0x217   : > { %v17498_v4 = vrot.slane %v5400_v44, 7  ;;  %v5411_v32 = vrot.slane %v5409_v63, 7  ;;  %v4475_v33 = vadd.f32 %v17447_v11, %v17305_v53  ;;  %v4478_v0 = vadd.f32 %v4411_v12, %v17179_v16  ;;  %13949 = vmatprep.mubr.msk.bf16.mxu1 %vm5749_vm9, %v12643_v30  ;;  %v19862_v16 = vld [vmem:[#allocation19_spill] sm:$0xff] }
 0x218   : > { %v5362_v38 = vsel %vm16975_vm12, %v17138_v23, %v5361_v3  ;;  %v5371_v28 = vsel %vm16975_vm12, %v5363_v37, %v5370_v2  ;;  %5242 = vst.msk [vmem:[#allocation2 + $0xa8] sm:$0xf] %vm358_vm8, %v13167_v20  ;;  %v4480_v23 = vadd.f32 %v13895_v54, %v17161_v39  ;;  %v5383_v49 = vor.u32 %v5381_v24, %v5380_v13  ;;  %v17511_v37 = vpop.f32.mrf.mxu0  ;;  %v17518_v24 = vld [vmem:[#allocation2 + $0x58] sm:$0xf]  ;;  %v4427_v20 = vpop.f32.mrf.mxu1 }
 0x219   : > { %v12674_v43 = vcombine.low %v5362_v38, %v5371_v28  ;;  %v5385_v42 = vrot.slane %v5380_v13, 4  ;;  %v5392_v1 = vor.u32 %v5390_v55, %v5389_v9  ;;  %v4481_v3 = vadd.f32 %v13896_v5, %v19861_v51  ;;  %v19864_v15 = vld [vmem:[#allocation15_spill] sm:$0xff] }
 0x21a   : > { %v5422_v6 = vshrl.u32 %v17496_v61, 16  ;;  %v4945_v53 = vadd.f32 %v17436_v22, %v4475_v33  ;;  %v4950_v39 = vadd.f32 %v17459_v46, %v4480_v23  ;;  %v4948_v11 = vadd.f32 %v4881_v18, %v4478_v0 }
 0x21b   : > { %13979 = vmatprep.mubr.msk.bf16.mxu0 %vm5749_vm9, %v12674_v43  ;;  %v5384_v54 = vsel %vm16975_vm12, %v19862_v16, %v5383_v49  ;;  %v5393_v12 = vsel %vm16975_vm12, %v5385_v42, %v5392_v1  ;;  %v4951_v13 = vadd.f32 %v13930_v31, %v4481_v3  ;;  %v5425_v55 = vshll.u32 %v17496_v61, 16  ;;  %v13933_v31 = vpop.f32.mrf.mxu0  ;;  %v17538_v42 = vld [vmem:[#allocation2 + $0x68] sm:$0xf] }
 0x21c   : > { %v17522_v5 = vrot.slane %v5422_v6, 7  ;;  %v4984_v9 = vadd.f32 %v17319_v45, %v4945_v53  ;;  %v4989_v22 = vadd.f32 %v17319_v45, %v4950_v39  ;;  %v4987_v46 = vadd.f32 %v17319_v45, %v4948_v11  ;;  %v13900_v39 = vpop.f32.mrf.mxu1 }
 0x21d   : > { %v12675_v18 = vcombine.low %v5384_v54, %v5393_v12  ;;  %v4990_v2 = vadd.f32 %v17319_v45, %v4951_v13  ;;  %v5431_v62 = vshrl.u32 %v17518_v24, 16  ;;  %v5434_v44 = vshll.u32 %v17518_v24, 16  ;;  %v4897_v53 = vpop.f32.mrf.mxu0  ;;  %v19863_v54 = vld [vmem:[#allocation11_spill] sm:$0xff] }
 0x21e   : > { %v12644_v63 = vcombine.low %v17496_v61, %v17518_v24  ;;  %vm5016_vm11 = vcmp.ge.f32.partialorder %v4984_v9, 0.0  ;;  %v5048_v38 = vmul.f32 0.2, %v4984_v9  ;;  %vm5021_vm13 = vcmp.ge.f32.partialorder %v4989_v22, 0.0  ;;  %v17536_v61 = vld [vmem:[#allocation2 + $0x64] sm:$0xf] }
 0x21f   : > { %v5053_v28 = vmul.f32 0.2, %v4989_v22  ;;  %13980 = vmatmul.mubr.msk.bf16.gmra.mxu0 %vm5749_vm9, %v12675_v18  ;;  %vm5019_vm14 = vcmp.ge.f32.partialorder %v4987_v46, 0.0  ;;  %v5051_v43 = vmul.f32 0.2, %v4987_v46  ;;  %vm5022_vm15 = vcmp.ge.f32.partialorder %v4990_v2, 0.0 }
 0x220   : > { %v5054_v30 = vmul.f32 0.2, %v4990_v2  ;;  %13950 = vmatmul.mubr.msk.bf16.gmra.mxu1 %vm5749_vm9, %v12644_v63  ;;  %v5080_v33 = vsel %vm5016_vm11, %v4984_v9, %v5048_v38  ;;  %v5433_v0 = vrot.slane %v5431_v62, 7  ;;  %v5405_v49 = vor.u32 %v5403_v36, %v17498_v4  ;;  %v19865_v63 = vld [vmem:[#allocation34_spill] sm:$0xff] }
 0x221   : > { %v5085_v23 = vsel %vm5021_vm13, %v4989_v22, %v5053_v28  ;;  %v13165_v1 = vpack.c.bf16 %v5080_v33, %v5080_v33  ;;  %v5083_v3 = vsel %vm5019_vm14, %v4987_v46, %v5051_v43  ;;  %v5407_v12 = vrot.slane %v17498_v4, 4  ;;  %v13934_v28 = vpop.f32.mrf.mxu0  ;;  %v17564_v43 = vld [vmem:[#allocation2 + $0x74] sm:$0xf] }
 0x222   : > { %v13170_v51 = vpack.c.bf16 %v5085_v23, %v5085_v23  ;;  %v5086_v6 = vsel %vm5022_vm15, %v4990_v2, %v5054_v30  ;;  %v13168_v11 = vpack.c.bf16 %v5083_v3, %v5083_v3  ;;  %v5406_v24 = vsel %vm16975_vm12, %v19863_v54, %v5405_v49  ;;  %v17566_v30 = vpop.f32.mrf.mxu1 }
 0x223   : > { %v13171_v16 = vpack.c.bf16 %v5086_v6, %v5086_v6  ;;  %5240 = vst.msk [vmem:[#allocation2 + $0x98] sm:$0xf] %vm358_vm8, %v13165_v1  ;;  %v5414_v36 = vor.u32 %v5412_v26, %v5411_v32  ;;  %v5444_v13 = vshrl.u32 %v17536_v61, 16  ;;  %v5447_v9 = vshll.u32 %v17536_v61, 16  ;;  %v19866_v1 = vld [vmem:[#allocation36_spill] sm:$0xff]  ;;  %v19867_v6 = vld [vmem:[#allocation46_spill] sm:$0xff] }
 0x224   : > { %5245 = vst.msk [vmem:[#allocation2 + $0xc4] sm:$0xf] %vm358_vm8, %v13170_v51  ;;  %v5453_v22 = vshrl.u32 %v17538_v42, 16  ;;  %5243 = vst.msk [vmem:[#allocation2 + $0xb4] sm:$0xf] %vm358_vm8, %v13168_v11  ;;  %v5456_v46 = vshll.u32 %v17538_v42, 16  ;;  %v12645_v4 = vcombine.low %v17536_v61, %v17538_v42  ;;  %v4479_v18 = vadd.f32 %v17488_v34, %v17324_v60 }
 0x225   : > { %5246 = vst.msk [vmem:[#allocation2 + $0xc8] sm:$0xf] %vm358_vm8, %v13171_v16  ;;  %v4484_v26 = vadd.f32 %v13899_v8, %v19864_v15  ;;  %v5415_v32 = vsel %vm16975_vm12, %v5407_v12, %v5414_v36  ;;  %v17561_v2 = vrot.slane %v5444_v13, 7  ;;  %v4482_v38 = vadd.f32 %v4427_v20, %v19865_v63  ;;  %v17586_v63 = vld [vmem:[#allocation2 + $0x84] sm:$0xf] }
 0x226   : > { %v5455_v62 = vrot.slane %v5453_v22, 7  ;;  %v12676_v33 = vcombine.low %v5406_v24, %v5415_v32  ;;  %13953 = vmatprep.mubr.msk.bf16.mxu1 %vm5749_vm9, %v12645_v4  ;;  %v4949_v60 = vadd.f32 %v17511_v37, %v4479_v18  ;;  %v5427_v8 = vor.u32 %v5425_v55, %v17522_v5 }
 0x227   : > { %v4954_v34 = vadd.f32 %v13933_v31, %v4484_v26  ;;  %v4952_v23 = vadd.f32 %v4897_v53, %v4482_v38  ;;  %v5429_v49 = vrot.slane %v17522_v5, 4  ;;  %v5436_v42 = vor.u32 %v5434_v44, %v5433_v0  ;;  %v5278_v31 = vld [vmem:[#allocation2 + $0x78] sm:$0xf]  ;;  %v4900_v53 = vpop.f32.mrf.mxu0  ;;  %v17588_v38 = vld [vmem:[#allocation2 + $0x88] sm:$0xf] }
 0x228   : > { %v4485_v51 = vadd.f32 %v13900_v39, %v19866_v1  ;;  %13983 = vmatprep.mubr.msk.bf16.mxu0 %vm5749_vm9, %v12676_v33  ;;  %v4988_v20 = vadd.f32 %v17319_v45, %v4949_v60  ;;  %v5428_v11 = vsel %vm16975_vm12, %v19867_v6, %v5427_v8  ;;  %v5466_v37 = vshrl.u32 %v17564_v43, 16  ;;  %v13903_v39 = vpop.f32.mrf.mxu1 }
 0x229   : > { %v4993_v3 = vadd.f32 %v17319_v45, %v4954_v34  ;;  %v4991_v55 = vadd.f32 %v17319_v45, %v4952_v23  ;;  %v5437_v5 = vsel %vm16975_vm12, %v5429_v49, %v5436_v42  ;;  %v5469_v0 = vshll.u32 %v17564_v43, 16 }
 0x22a   : > { %v4955_v44 = vadd.f32 %v13934_v28, %v4485_v51  ;;  %vm5020_vm1 = vcmp.ge.f32.partialorder %v4988_v20, 0.0  ;;  %v5052_v16 = vmul.f32 0.2, %v4988_v20  ;;  %v12677_v12 = vcombine.low %v5428_v11, %v5437_v5  ;;  %v13937_v28 = vpop.f32.mrf.mxu0  ;;  %v4443_v33 = vpop.f32.mrf.mxu1 }
 0x22b   : > { %vm5025_vm2 = vcmp.ge.f32.partialorder %v4993_v3, 0.0  ;;  %v5057_v54 = vmul.f32 0.2, %v4993_v3  ;;  %vm5023_vm5 = vcmp.ge.f32.partialorder %v4991_v55, 0.0  ;;  %v5055_v24 = vmul.f32 0.2, %v4991_v55 }
 0x22c   : > { %v4994_v36 = vadd.f32 %v17319_v45, %v4955_v44  ;;  %v5084_v13 = vsel %vm5020_vm1, %v4988_v20, %v5052_v16  ;;  %v5468_v4 = vrot.slane %v5466_v37, 7  ;;  %v5475_v18 = vshrl.u32 %v5278_v31, 16  ;;  %13984 = vmatmul.mubr.msk.bf16.gmra.mxu0 %vm5749_vm9, %v12677_v12 }
 0x22d   : > { %v5089_v22 = vsel %vm5025_vm2, %v4993_v3, %v5057_v54  ;;  %v13169_v15 = vpack.c.bf16 %v5084_v13, %v5084_v13  ;;  %v5087_v32 = vsel %vm5023_vm5, %v4991_v55, %v5055_v24  ;;  %v5478_v23 = vshll.u32 %v5278_v31, 16  ;;  %v17609_v55 = vld [vmem:[#allocation2 + $0x94] sm:$0xf] }
 0x22e   : > { %v13174_v26 = vpack.c.bf16 %v5089_v22, %v5089_v22  ;;  %vm5026_vm6 = vcmp.ge.f32.partialorder %v4994_v36, 0.0  ;;  %v13172_v60 = vpack.c.bf16 %v5087_v32, %v5087_v32  ;;  %v5058_v34 = vmul.f32 0.2, %v4994_v36 }
 0x22f   : > { %v5477_v8 = vrot.slane %v5475_v18, 7  ;;  %5244 = vst.msk [vmem:[#allocation2 + $0xb8] sm:$0xf] %vm358_vm8, %v13169_v15  ;;  %v12646_v49 = vcombine.low %v17564_v43, %v5278_v31  ;;  %v5449_v42 = vor.u32 %v5447_v9, %v17561_v2  ;;  %v5451_v1 = vrot.slane %v17561_v2, 4  ;;  %v19868_v43 = vld [vmem:[#allocation45_spill] sm:$0xff]  ;;  %v4913_v2 = vpop.f32.mrf.mxu0 }
 0x230   : > { %5249 = vst.msk [vmem:[#allocation2 + $0xe4] sm:$0xf] %vm358_vm8, %v13174_v26  ;;  %v5458_v51 = vor.u32 %v5456_v46, %v5455_v62  ;;  %5247 = vst.msk [vmem:[#allocation2 + $0xd4] sm:$0xf] %vm358_vm8, %v13172_v60  ;;  %v5090_v20 = vsel %vm5026_vm6, %v4994_v36, %v5058_v34  ;;  %v5488_v3 = vshrl.u32 %v17586_v63, 16  ;;  %v5491_v6 = vshll.u32 %v17586_v63, 16  ;;  %v13904_v62 = vpop.f32.mrf.mxu1 }
 0x231   : > { %v5497_v11 = vshrl.u32 %v17588_v38, 16  ;;  %v13175_v37 = vpack.c.bf16 %v5090_v20, %v5090_v20  ;;  %13954 = vmatmul.mubr.msk.bf16.gmra.mxu1 %vm5749_vm9, %v12646_v49  ;;  %v5450_v61 = vsel %vm16975_vm12, %v19868_v43, %v5449_v42  ;;  %v5500_v46 = vshll.u32 %v17588_v38, 16  ;;  %v19869_v60 = vld [vmem:[#allocation5_spill] sm:$0xff] }
 0x232   : > { %v5459_v9 = vsel %vm16975_vm12, %v5451_v1, %v5458_v51  ;;  %v17611_v44 = vrot.slane %v5488_v3, 7  ;;  %v12647_v16 = vcombine.low %v17586_v63, %v17588_v38  ;;  %v4483_v54 = vadd.f32 %v17566_v30, %v17330_v25  ;;  %v13938_v25 = vpop.f32.mrf.mxu0 }
 0x233   : > { %v12678_v5 = vcombine.low %v5450_v61, %v5459_v9  ;;  %v5499_v31 = vrot.slane %v5497_v11, 7  ;;  %5250 = vst.msk [vmem:[#allocation2 + $0xe8] sm:$0xf] %vm358_vm8, %v13175_v37  ;;  %v4488_v24 = vadd.f32 %v13903_v39, %v17282_v27  ;;  %v4486_v12 = vadd.f32 %v4443_v33, %v17293_v58  ;;  %v5284_v58 = vld [vmem:[#allocation2 + $0x98] sm:$0xf] }
 0x234   : > { %v5471_v36 = vor.u32 %v5469_v0, %v5468_v4  ;;  %13957 = vmatprep.mubr.msk.bf16.mxu1 %vm5749_vm9, %v12647_v16  ;;  %v5473_v13 = vrot.slane %v5468_v4, 4  ;;  %v5480_v22 = vor.u32 %v5478_v23, %v5477_v8  ;;  %v4489_v18 = vadd.f32 %v13904_v62, %v17309_v57  ;;  %v5286_v61 = vld [vmem:[#allocation2 + $0xa4] sm:$0xf]  ;;  %v5287_v9 = vld [vmem:[#allocation2 + $0xa8] sm:$0xf]  ;;  %v4446_v16 = vpop.f32.mrf.mxu1 }
 0x235   : > { %13987 = vmatprep.mubr.msk.bf16.mxu0 %vm5749_vm9, %v12678_v5  ;;  %v5510_v15 = vshrl.u32 %v17609_v55, 16  ;;  %v4953_v26 = vadd.f32 %v4900_v53, %v4483_v54  ;;  %v4958_v32 = vadd.f32 %v13937_v28, %v4488_v24  ;;  %v4956_v63 = vadd.f32 %v4913_v2, %v4486_v12  ;;  %v19870_v12 = vld [vmem:[#allocation32_spill] sm:$0xff] }
 0x236   : > { %v5472_v27 = vsel %vm16975_vm12, %v19869_v60, %v5471_v36  ;;  %v5481_v30 = vsel %vm16975_vm12, %v5473_v13, %v5480_v22  ;;  %v4959_v0 = vadd.f32 %v13938_v25, %v4489_v18  ;;  %v5513_v4 = vshll.u32 %v17609_v55, 16  ;;  %v5289_v60 = vld [vmem:[#allocation2 + $0xb4] sm:$0xf] }
 0x237   : > { %v17629_v39 = vrot.slane %v5510_v15, 7  ;;  %v4992_v57 = vadd.f32 %v17319_v45, %v4953_v26  ;;  %v4997_v53 = vadd.f32 %v17319_v45, %v4958_v32  ;;  %v4995_v28 = vadd.f32 %v17319_v45, %v4956_v63 }
 0x238   : > { %v12679_v33 = vcombine.low %v5472_v27, %v5481_v30  ;;  %v4998_v34 = vadd.f32 %v17319_v45, %v4959_v0  ;;  %v5519_v8 = vshrl.u32 %v5284_v58, 16  ;;  %v5522_v23 = vshll.u32 %v5284_v58, 16  ;;  %v5290_v27 = vld [vmem:[#allocation2 + $0xb8] sm:$0xf] }
 0x239   : > { %v12648_v49 = vcombine.low %v17609_v55, %v5284_v58  ;;  %vm5024_vm7 = vcmp.ge.f32.partialorder %v4992_v57, 0.0  ;;  %v5056_v42 = vmul.f32 0.2, %v4992_v57  ;;  %vm5029_vm10 = vcmp.ge.f32.partialorder %v4997_v53, 0.0 }
 0x23a   : > { %v5061_v1 = vmul.f32 0.2, %v4997_v53  ;;  %13988 = vmatmul.mubr.msk.bf16.gmra.mxu0 %vm5749_vm9, %v12679_v33  ;;  %vm5027_vm11 = vcmp.ge.f32.partialorder %v4995_v28, 0.0  ;;  %v5059_v51 = vmul.f32 0.2, %v4995_v28  ;;  %vm5030_vm13 = vcmp.ge.f32.partialorder %v4998_v34, 0.0 }
 0x23b   : > { %v5062_v20 = vmul.f32 0.2, %v4998_v34  ;;  %13958 = vmatmul.mubr.msk.bf16.gmra.mxu1 %vm5749_vm9, %v12648_v49  ;;  %v5088_v3 = vsel %vm5024_vm7, %v4992_v57, %v5056_v42  ;;  %v5521_v37 = vrot.slane %v5519_v8, 7  ;;  %v5493_v43 = vor.u32 %v5491_v6, %v17611_v44  ;;  %v19871_v57 = vld [vmem:[#allocation17_spill] sm:$0xff] }
 0x23c   : > { %v5093_v11 = vsel %vm5029_vm10, %v4997_v53, %v5061_v1  ;;  %v13173_v2 = vpack.c.bf16 %v5088_v3, %v5088_v3  ;;  %v5091_v55 = vsel %vm5027_vm11, %v4995_v28, %v5059_v51  ;;  %v5495_v13 = vrot.slane %v17611_v44, 4  ;;  %v5292_v1 = vld [vmem:[#allocation2 + $0xc4] sm:$0xf]  ;;  %v5293_v51 = vld [vmem:[#allocation2 + $0xc8] sm:$0xf] }
 0x23d   : > { %v13178_v62 = vpack.c.bf16 %v5093_v11, %v5093_v11  ;;  %v5094_v5 = vsel %vm5030_vm13, %v4998_v34, %v5062_v20  ;;  %v13176_v54 = vpack.c.bf16 %v5091_v55, %v5091_v55  ;;  %v5494_v36 = vsel %vm16975_vm12, %v19870_v12, %v5493_v43 }
 0x23e   : > { %v13179_v24 = vpack.c.bf16 %v5094_v5, %v5094_v5  ;;  %5248 = vst.msk [vmem:[#allocation2 + $0xd8] sm:$0xf] %vm358_vm8, %v13173_v2  ;;  %v5502_v6 = vor.u32 %v5500_v46, %v5499_v31  ;;  %v5532_v22 = vshrl.u32 %v5286_v61, 16  ;;  %v5535_v18 = vshll.u32 %v5286_v61, 16  ;;  %v4916_v31 = vpop.f32.mrf.mxu0  ;;  %v5295_v5 = vld [vmem:[#allocation2 + $0xd4] sm:$0xf] }
 0x23f   : > { %5253 = vst.msk [vmem:[#allocation2 + $0x104] sm:$0xf] %vm358_vm8, %v13178_v62  ;;  %v5541_v15 = vshrl.u32 %v5287_v9, 16  ;;  %5251 = vst.msk [vmem:[#allocation2 + $0xf4] sm:$0xf] %vm358_vm8, %v13176_v54  ;;  %v5544_v26 = vshll.u32 %v5287_v9, 16  ;;  %v12649_v32 = vcombine.low %v5286_v61, %v5287_v9  ;;  %v4487_v63 = vadd.f32 %v4446_v16, %v17343_v48 }
 0x240   : > { %5254 = vst.msk [vmem:[#allocation2 + $0x108] sm:$0xf] %vm358_vm8, %v13179_v24  ;;  %v5515_v44 = vor.u32 %v5513_v4, %v17629_v39  ;;  %v5503_v25 = vsel %vm16975_vm12, %v5495_v13, %v5502_v6  ;;  %v5534_v38 = vrot.slane %v5532_v22, 7  ;;  %v5517_v58 = vrot.slane %v17629_v39, 4 }
 0x241   : > { %v5543_v46 = vrot.slane %v5541_v15, 7  ;;  %v12680_v30 = vcombine.low %v5494_v36, %v5503_v25  ;;  %13961 = vmatprep.mubr.msk.bf16.mxu1 %vm5749_vm9, %v12649_v32  ;;  %v4957_v0 = vadd.f32 %v4916_v31, %v4487_v63  ;;  %v5524_v53 = vor.u32 %v5522_v23, %v5521_v37  ;;  %v19872_v37 = vld [vmem:[#allocation23_spill] sm:$0xff]  ;;  %v19873_v15 = vld [vmem:[#allocation38_spill] sm:$0xff]  ;;  %v5299_v31 = vld [vmem:[#allocation2 + $0xe8] sm:$0xf] }
 0x242   : > { %v5516_v48 = vsel %vm16975_vm12, %v19871_v57, %v5515_v44  ;;  %v5554_v4 = vshrl.u32 %v5289_v60, 16  ;;  %v5557_v28 = vshll.u32 %v5289_v60, 16  ;;  %v5563_v33 = vshrl.u32 %v5290_v27, 16 }
 0x243   : > { %v5566_v34 = vshll.u32 %v5290_v27, 16  ;;  %13991 = vmatprep.mubr.msk.bf16.mxu0 %vm5749_vm9, %v12680_v30  ;;  %v4996_v8 = vadd.f32 %v17319_v45, %v4957_v0  ;;  %v5525_v39 = vsel %vm16975_vm12, %v5517_v58, %v5524_v53  ;;  %v12650_v49 = vcombine.low %v5289_v60, %v5290_v27  ;;  %v5298_v60 = vld [vmem:[#allocation2 + $0xe4] sm:$0xf]  ;;  %v17679_v58 = vld [vmem:[%s19564_s3 + $0x28] sm:$0xff]  }
 0x244   : > { %v5537_v42 = vor.u32 %v5535_v18, %v5534_v38  ;;  %v12681_v20 = vcombine.low %v5516_v48, %v5525_v39  ;;  %v5556_v3 = vrot.slane %v5554_v4, 7  ;;  %v5565_v11 = vrot.slane %v5563_v33, 7  ;;  %14109 = vmatprep.subr.bf16.mxu0 %v17679_v58 }
 0x245   : > { %v5539_v43 = vrot.slane %v5534_v38, 4  ;;  %vm5028_vm14 = vcmp.ge.f32.partialorder %v4996_v8, 0.0  ;;  %v5060_v23 = vmul.f32 0.2, %v4996_v8  ;;  %13962 = vmatmul.mubr.msk.bf16.gmra.mxu1 %vm5749_vm9, %v12650_v49  ;;  %v5546_v45 = vor.u32 %v5544_v26, %v5543_v46  ;;  %v5296_v36 = vld [vmem:[#allocation2 + $0xd8] sm:$0xf] }
 0x246   : > { %v5538_v61 = vsel %vm16975_vm12, %v19872_v37, %v5537_v42  ;;  %13992 = vmatmul.mubr.msk.bf16.gmra.mxu0 %vm5749_vm9, %v12681_v20  ;;  %v5576_v9 = vshrl.u32 %v5292_v1, 16  ;;  %v5579_v2 = vshll.u32 %v5292_v1, 16  ;;  %v5585_v62 = vshrl.u32 %v5293_v51, 16 }
 0x247   : > { %v5588_v55 = vshll.u32 %v5293_v51, 16  ;;  %v5092_v16 = vsel %vm5028_vm14, %v4996_v8, %v5060_v23  ;;  %v5547_v54 = vsel %vm16975_vm12, %v5539_v43, %v5546_v45  ;;  %v12651_v24 = vcombine.low %v5292_v1, %v5293_v51  ;;  %v5301_v1 = vld [vmem:[#allocation2 + $0xf4] sm:$0xf] }
 0x248   : > { %v5559_v12 = vor.u32 %v5557_v28, %v5556_v3  ;;  %v13177_v13 = vpack.c.bf16 %v5092_v16, %v5092_v16  ;;  %v12682_v6 = vcombine.low %v5538_v61, %v5547_v54  ;;  %v5578_v22 = vrot.slane %v5576_v9, 7  ;;  %v6225_v43 = vld [vmem:[#allocation2 + $0x14] sm:$0xf] }
 0x249   : > { %v5587_v18 = vrot.slane %v5585_v62, 7  ;;  %13965 = vmatprep.mubr.msk.bf16.mxu1 %vm5749_vm9, %v12651_v24  ;;  %v5561_v32 = vrot.slane %v5556_v3, 4  ;;  %v5568_v63 = vor.u32 %v5566_v34, %v5565_v11  ;;  %v5598_v44 = vshrl.u32 %v5295_v5, 16  ;;  %v19874_v34 = vld [vmem:[#allocation6_spill] sm:$0xff] }
 0x24a   : > { %v5560_v26 = vsel %vm16975_vm12, %v19873_v15, %v5559_v12  ;;  %5252 = vst.msk [vmem:[#allocation2 + $0xf8] sm:$0xf] %vm358_vm8, %v13177_v13  ;;  %13995 = vmatprep.mubr.msk.bf16.mxu0 %vm5749_vm9, %v12682_v6  ;;  %v5601_v27 = vshll.u32 %v5295_v5, 16  ;;  %v5607_v25 = vshrl.u32 %v5296_v36, 16  ;;  %v5610_v38 = vshll.u32 %v5296_v36, 16 }
 0x24b   : > { %v12652_v46 = vcombine.low %v5295_v5, %v5296_v36  ;;  %v5569_v30 = vsel %vm16975_vm12, %v5561_v32, %v5568_v63  ;;  %v5600_v0 = vrot.slane %v5598_v44, 7  ;;  %v5581_v57 = vor.u32 %v5579_v2, %v5578_v22  ;;  %v6953_v36 = vld [vmem:[#allocation2 + $0x14] sm:$0xf]  ;;  %v6226_v15 = vld [vmem:[#allocation2 + $0x18] sm:$0xf] }
 0x24c   : > { %v5583_v48 = vrot.slane %v5578_v22, 4  ;;  %v12683_v53 = vcombine.low %v5560_v26, %v5569_v30  ;;  %v5609_v4 = vrot.slane %v5607_v25, 7  ;;  %v5590_v28 = vor.u32 %v5588_v55, %v5587_v18  ;;  %v6954_v44 = vld [vmem:[#allocation2 + $0x18] sm:$0xf] }
 0x24d   : > { %v5620_v33 = vshrl.u32 %v5298_v60, 16  ;;  %13966 = vmatmul.mubr.msk.bf16.gmra.mxu1 %vm5749_vm9, %v12652_v46  ;;  %v5582_v8 = vsel %vm16975_vm12, %v19874_v34, %v5581_v57  ;;  %v5623_v39 = vshll.u32 %v5298_v60, 16  ;;  %v5629_v49 = vshrl.u32 %v5299_v31, 16  ;;  %v6228_v57 = vld [vmem:[#allocation2 + $0x24] sm:$0xf] }
 0x24e   : > { %v5632_v42 = vshll.u32 %v5299_v31, 16  ;;  %13996 = vmatmul.mubr.msk.bf16.gmra.mxu0 %vm5749_vm9, %v12683_v53  ;;  %v5591_v51 = vsel %vm16975_vm12, %v5583_v48, %v5590_v28  ;;  %v12653_v3 = vcombine.low %v5298_v60, %v5299_v31  ;;  %v5603_v11 = vor.u32 %v5601_v27, %v5600_v0 }
 0x24f   : > { %v5622_v20 = vrot.slane %v5620_v33, 7  ;;  %v12684_v23 = vcombine.low %v5582_v8, %v5591_v51  ;;  %v5631_v37 = vrot.slane %v5629_v49, 7  ;;  %v5605_v61 = vrot.slane %v5600_v0, 4 }
 0x250   : > { %v5612_v45 = vor.u32 %v5610_v38, %v5609_v4  ;;  %13969 = vmatprep.mubr.msk.bf16.mxu1 %vm5749_vm9, %v12653_v3  ;;  %v5604_v9 = vsel %vm16975_vm12, %v17313_v52, %v5603_v11  ;;  %v5642_v2 = vshrl.u32 %v5301_v1, 16  ;;  %v5645_v62 = vshll.u32 %v5301_v1, 16 }
 0x251   : > { %v5625_v55 = vor.u32 %v5623_v39, %v5622_v20  ;;  %13999 = vmatprep.mubr.msk.bf16.mxu0 %vm5749_vm9, %v12684_v23  ;;  %v5302_v16 = vld [vmem:[#allocation2 + $0xf8] sm:$0xf]  ;;  %v5627_v54 = vrot.slane %v5622_v20, 4  ;;  %v5634_v24 = vor.u32 %v5632_v42, %v5631_v37  ;;  %v6295_v12 = vshrl.u32 %v6225_v43, 16 }
 0x252   : > { %v5613_v5 = vsel %vm16975_vm12, %v5605_v61, %v5612_v45  ;;  %v5644_v6 = vrot.slane %v5642_v2, 7  ;;  %v5651_v22 = vshrl.u32 %v5302_v16, 16  ;;  %v5654_v18 = vshll.u32 %v5302_v16, 16 }
 0x253   : > { %v12685_v13 = vcombine.low %v5604_v9, %v5613_v5  ;;  %v12654_v26 = vcombine.low %v5301_v1, %v5302_v16  ;;  %v5626_v52 = vsel %vm16975_vm12, %v17321_v50, %v5625_v55  ;;  %v5635_v32 = vsel %vm16975_vm12, %v5627_v54, %v5634_v24  ;;  %v6229_v1 = vld [vmem:[#allocation2 + $0x28] sm:$0xf] }
 0x254   : > { %v6297_v63 = vrot.slane %v6295_v12, 4  ;;  %v5653_v60 = vrot.slane %v5651_v22, 7  ;;  %v12686_v27 = vcombine.low %v5626_v52, %v5635_v32  ;;  %v5647_v25 = vor.u32 %v5645_v62, %v5644_v6  ;;  %v6957_v55 = vld [vmem:[#allocation2 + $0x28] sm:$0xf]  ;;  %v6231_v12 = vld [vmem:[#allocation2 + $0x34] sm:$0xf] }
 0x255   : > { %v5649_v38 = vrot.slane %v5644_v6, 4  ;;  %13970 = vmatmul.mubr.msk.bf16.gmra.mxu1 %vm5749_vm9, %v12654_v26  ;;  %v6298_v46 = vshll.u32 %v6225_v43, 16  ;;  %v6304_v31 = vshll.u32 %v6226_v15, 16  ;;  %v6308_v30 = vshrl.u32 %v6226_v15, 16  ;;  %v6232_v52 = vld [vmem:[#allocation2 + $0x38] sm:$0xf] }
 0x256   : > { %v7006_v0 = vshrl.u32 %v6953_v36, 16  ;;  %14000 = vmatmul.mubr.msk.bf16.gmra.mxu0 %vm5749_vm9, %v12685_v13  ;;  %v5648_v50 = vsel %vm16975_vm12, %v17332_v59, %v5647_v25  ;;  %v5656_v48 = vor.u32 %v5654_v18, %v5653_v60  ;;  %14009 = vmatprep.mubr.msk.bf16.mxu1 %vm5749_vm9, %v17351_v40  ;;  %v7009_v53 = vshll.u32 %v6953_v36, 16  ;;  %v6956_v40 = vld [vmem:[#allocation2 + $0x24] sm:$0xf]  ;;  %v14460_v32 = vld [vmem:[%s19564_s3 + $0x30] sm:$0xff]  }
 0x257   : > { %v7015_v4 = vshrl.u32 %v6954_v44, 16  ;;  %14003 = vmatprep.mubr.msk.bf16.mxu0 %vm5749_vm9, %v12686_v27  ;;  %v6300_v28 = vrot.slane %v6298_v46, 5  ;;  %v6306_v33 = vrot.slane %v6304_v31, 5  ;;  %v6310_v34 = vrot.slane %v6308_v30, 4  ;;  %v6959_v31 = vld [vmem:[#allocation2 + $0x34] sm:$0xf] }
 0x258   : > { %v7008_v8 = vrot.slane %v7006_v0, 7  ;;  %v5657_v39 = vsel %vm16975_vm12, %v5649_v38, %v5656_v48  ;;  %v7018_v42 = vshll.u32 %v6954_v44, 16  ;;  %v6319_v51 = vshrl.u32 %v6228_v57, 16 }
 0x259   : > { %v7017_v49 = vrot.slane %v7015_v4, 7  ;;  %v12687_v59 = vcombine.low %v5648_v50, %v5657_v39  ;;  %v6301_v20 = vor.u32 %v6300_v28, %v6297_v63  ;;  %v6311_v3 = vor.u32 %v6310_v34, %v6306_v33 }
 0x25a   : > { %v7011_v11 = vor.u32 %v7009_v53, %v7008_v8  ;;  %v7013_v43 = vrot.slane %v7008_v8, 4  ;;  %v6321_v37 = vrot.slane %v6319_v51, 4  ;;  %v6322_v61 = vshll.u32 %v6228_v57, 16 }
 0x25b   : > { %v7020_v23 = vor.u32 %v7018_v42, %v7017_v49  ;;  %v6302_v45 = vrot.slane %v6301_v20, 4  ;;  %v6312_v9 = vrot.slane %v6311_v3, 4  ;;  %v6328_v62 = vshll.u32 %v6229_v1, 16  ;;  %v6234_v20 = vld [vmem:[#allocation2 + $0x44] sm:$0xf] }
 0x25c   : > { %v7012_v2 = vsel %vm16975_vm12, %v17327_v56, %v7011_v11  ;;  %v6324_v16 = vrot.slane %v6322_v61, 5  ;;  %v6332_v54 = vshrl.u32 %v6229_v1, 16  ;;  %v7028_v24 = vshrl.u32 %v6956_v40, 16 }
 0x25d   : > { %v7021_v5 = vsel %vm16975_vm12, %v7013_v43, %v7020_v23  ;;  %v6307_v36 = vsel %vm14674_vm4, %v6302_v45, %v6306_v33  ;;  %v6317_v13 = vsel %vm14674_vm4, %v6312_v9, %v17345_v10  ;;  %v6330_v22 = vrot.slane %v6328_v62, 5  ;;  %v6960_v33 = vld [vmem:[#allocation2 + $0x38] sm:$0xf]  ;;  %v6235_v23 = vld [vmem:[#allocation2 + $0x48] sm:$0xf] }
 0x25e   : > { %v12758_v6 = vcombine.low %v7012_v2, %v7021_v5  ;;  %14004 = vmatmul.mubr.msk.bf16.gmra.mxu0 %vm5749_vm9, %v12687_v59  ;;  %v12708_v56 = vcombine.low %v6307_v36, %v6317_v13  ;;  %v6325_v18 = vor.u32 %v6324_v16, %v6321_v37  ;;  %v6334_v15 = vrot.slane %v6332_v54, 4  ;;  %v6962_v5 = vld [vmem:[#allocation2 + $0x44] sm:$0xf] }
 0x25f   : > { %v7030_v26 = vrot.slane %v7028_v24, 7  ;;  %v7031_v63 = vshll.u32 %v6956_v40, 16  ;;  %v7037_v44 = vshrl.u32 %v6957_v55, 16  ;;  %v7040_v60 = vshll.u32 %v6957_v55, 16 }
 0x260   : > { %14043 = vmatprep.mubr.msk.bf16.mxu0 %vm5749_vm9, %v12758_v6  ;;  %v6343_v27 = vshrl.u32 %v6231_v12, 16  ;;  %14010 = vmatmul.mubr.msk.bf16.vlgmr.msra.gmra.mxu1 %vm5749_vm9, %v12708_v56  ;;  %v6326_v10 = vrot.slane %v6325_v18, 4  ;;  %v6335_v25 = vor.u32 %v6334_v15, %v6330_v22  ;;  %v6346_v46 = vshll.u32 %v6231_v12, 16  ;;  %v6963_v56 = vld [vmem:[#allocation2 + $0x48] sm:$0xf] }
 0x261   : > { %v7035_v38 = vrot.slane %v7030_v26, 4  ;;  %14076 = vmatpush3.bf16.msra.mxu1 %v17420_v35  ;;  %v7033_v30 = vor.u32 %v7031_v63, %v7030_v26  ;;  %v7039_v0 = vrot.slane %v7037_v44, 7  ;;  %v6352_v50 = vshll.u32 %v6232_v52, 16  ;;  %v19875_v35 = vld [vmem:[#allocation25_spill] sm:$0xff] }
 0x262   : > { %v6345_v57 = vrot.slane %v6343_v27, 4  ;;  %v6331_v48 = vsel %vm14674_vm4, %v6326_v10, %v6330_v22  ;;  %v6336_v53 = vrot.slane %v6335_v25, 4  ;;  %v6348_v4 = vrot.slane %v6346_v46, 5  ;;  %14143 = vmatprep.subr.bf16.mxu1 %v14460_v32  ;;  %v6237_v32 = vld [vmem:[#allocation2 + $0x54] sm:$0xf] }
 0x263   : > { %v6356_v28 = vshrl.u32 %v6232_v52, 16  ;;  %v7034_v34 = vsel %vm16975_vm12, %v17337_v7, %v7033_v30  ;;  %v7042_v8 = vor.u32 %v7040_v60, %v7039_v0  ;;  %v6354_v39 = vrot.slane %v6352_v50, 5  ;;  %v6238_v46 = vld [vmem:[#allocation2 + $0x58] sm:$0xf] }
 0x264   : > { %v7050_v49 = vshrl.u32 %v6959_v31, 16  ;;  %v6341_v42 = vsel %vm14674_vm4, %v6336_v53, %v19875_v35  ;;  %v6349_v1 = vor.u32 %v6348_v4, %v6345_v57  ;;  %v7053_v59 = vshll.u32 %v6959_v31, 16 }
 0x265   : > { %v6358_v51 = vrot.slane %v6356_v28, 4  ;;  %v12709_v3 = vcombine.low %v6331_v48, %v6341_v42  ;;  %v7043_v11 = vsel %vm16975_vm12, %v7035_v38, %v7042_v8  ;;  %v7059_v43 = vshrl.u32 %v6960_v33, 16  ;;  %v17760_v42 = vld [vmem:[#allocation2 + $0x54] sm:$0xf] }
 0x266   : > { %v7052_v40 = vrot.slane %v7050_v49, 7  ;;  %v12759_v37 = vcombine.low %v7034_v34, %v7043_v11  ;;  %v6350_v7 = vrot.slane %v6349_v1, 4  ;;  %v7062_v45 = vshll.u32 %v6960_v33, 16  ;;  %v6964_v34 = vld [vmem:[#allocation2 + $0x50] sm:$0x8] }
 0x267   : > { %v6359_v61 = vor.u32 %v6358_v51, %v6354_v39  ;;  %14013 = vmatprep.mubr.msk.bf16.mxu1 %vm5749_vm9, %v12709_v3  ;;  %v7061_v62 = vrot.slane %v7059_v43, 7  ;;  %v6367_v55 = vshrl.u32 %v6234_v20, 16  ;;  %v6370_v24 = vshll.u32 %v6234_v20, 16  ;;  %v17767_v11 = vld [vmem:[#allocation2 + $0x58] sm:$0xf] }
 0x268   : > { %v7055_v9 = vor.u32 %v7053_v59, %v7052_v40  ;;  %v7057_v2 = vrot.slane %v7052_v40, 4  ;;  %14044 = vmatmul.mubr.msk.bf16.vlgmr.msra.gmra.mxu0 %vm5749_vm9, %v12759_v37  ;;  %v6355_v16 = vsel %vm14674_vm4, %v6350_v7, %v6354_v39  ;;  %v6376_v12 = vshll.u32 %v6235_v23, 16  ;;  %v6240_v37 = vld [vmem:[#allocation2 + $0x64] sm:$0xf] }
 0x269   : > { %v6360_v54 = vrot.slane %v6359_v61, 4  ;;  %v7064_v13 = vor.u32 %v7062_v45, %v7061_v62  ;;  %v6369_v6 = vrot.slane %v6367_v55, 4  ;;  %v6380_v22 = vshrl.u32 %v6235_v23, 16  ;;  %14110 = vmatpush3.bf16.msra.mxu0 %v17679_v58 }
 0x26a   : > { %v7056_v36 = vsel %vm16975_vm12, %v17361_v19, %v7055_v9  ;;  %v6372_v15 = vrot.slane %v6370_v24, 5  ;;  %v6378_v26 = vrot.slane %v6376_v12, 5  ;;  %v7072_v52 = vshrl.u32 %v6962_v5, 16  ;;  %v6241_v9 = vld [vmem:[#allocation2 + $0x68] sm:$0xf] }
 0x26b   : > { %v6365_v18 = vsel %vm14674_vm4, %v6360_v54, %v17355_v21  ;;  %v7065_v44 = vsel %vm16975_vm12, %v7057_v2, %v7064_v13  ;;  %v6382_v60 = vrot.slane %v6380_v22, 4  ;;  %v7075_v19 = vshll.u32 %v6962_v5, 16  ;;  %v6967_v12 = vld [vmem:[#allocation2 + $0x60] sm:$0x8] }
 0x26c   : > { %v12710_v63 = vcombine.low %v6355_v16, %v6365_v18  ;;  %v12760_v27 = vcombine.low %v7056_v36, %v7065_v44  ;;  %v6373_v10 = vor.u32 %v6372_v15, %v6369_v6  ;;  %v7074_v25 = vrot.slane %v7072_v52, 7  ;;  %v6242_v6 = vld [vmem:[#allocation2 + $0x6c] sm:$0x1] }
 0x26d   : > { %v7081_v38 = vshrl.u32 %v6963_v56, 16  ;;  %v6383_v58 = vor.u32 %v6382_v60, %v6378_v26  ;;  %v7084_v31 = vshll.u32 %v6963_v56, 16  ;;  %v6391_v21 = vshrl.u32 %v6237_v32, 16 }
 0x26e   : > { %14014 = vmatmul.mubr.msk.bf16.gmra.mxu1 %vm5749_vm9, %v12710_v63  ;;  %v6394_v30 = vshll.u32 %v6237_v32, 16  ;;  %14047 = vmatprep.mubr.msk.bf16.mxu0 %vm5749_vm9, %v12760_v27  ;;  %v6374_v0 = vrot.slane %v6373_v10, 4  ;;  %v7077_v57 = vor.u32 %v7075_v19, %v7074_v25  ;;  %v7079_v50 = vrot.slane %v7074_v25, 4  ;;  %v17779_v32 = vld [vmem:[#allocation2 + $0x64] sm:$0xf] }
 0x26f   : > { %v7083_v48 = vrot.slane %v7081_v38, 7  ;;  %v6384_v53 = vrot.slane %v6383_v58, 4  ;;  %v6393_v4 = vrot.slane %v6391_v21, 4  ;;  %v6400_v33 = vshll.u32 %v6238_v46, 16 }
 0x270   : > { %v6396_v28 = vrot.slane %v6394_v30, 5  ;;  %v6379_v8 = vsel %vm14674_vm4, %v6374_v0, %v6378_v26  ;;  %v7078_v39 = vsel %vm16975_vm12, %v17367_v41, %v7077_v57  ;;  %v6404_v35 = vshrl.u32 %v6238_v46, 16  ;;  %v17785_v46 = vld [vmem:[#allocation2 + $0x68] sm:$0xf]  ;;  %v6243_v0 = vld [vmem:[#allocation2 + $0x74] sm:$0xf] }
 0x271   : > { %v7086_v49 = vor.u32 %v7084_v31, %v7083_v48  ;;  %v6389_v1 = vsel %vm14674_vm4, %v6384_v53, %v17370_v47  ;;  %v6402_v59 = vrot.slane %v6400_v33, 5  ;;  %v19876_v20 = vshll.u32 %v17372_v17, 16 }
 0x272   : > { %v6397_v51 = vor.u32 %v6396_v28, %v6393_v4  ;;  %v12711_v40 = vcombine.low %v6379_v8, %v6389_v1  ;;  %v6406_v41 = vrot.slane %v6404_v35, 4  ;;  %v7089_v23 = vshrl.u32 %v6964_v34, 16  ;;  %v6244_v8 = vld [vmem:[#allocation2 + $0x78] sm:$0xf]  ;;  %v6245_v35 = vld [vmem:[#allocation2 + $0x7c] sm:$0x1] }
 0x273   : > { %v6412_v3 = vrot.slane %v19876_v20, 5  ;;  %v7087_v43 = vsel %vm16975_vm12, %v7079_v50, %v7086_v49  ;;  %v7094_v45 = vshrl.u32 %v17760_v42, 16  ;;  %v7097_v47 = vshll.u32 %v17760_v42, 16 }
 0x274   : > { %v12761_v7 = vcombine.low %v7078_v39, %v7087_v43  ;;  %v6398_v61 = vrot.slane %v6397_v51, 4  ;;  %14017 = vmatprep.mubr.msk.bf16.mxu1 %vm5749_vm9, %v12711_v40  ;;  %v6407_v17 = vor.u32 %v6406_v41, %v6402_v59  ;;  %v12744_v2 = vrot.slane %v7089_v23, 11  ;;  %v6970_v43 = vld [vmem:[#allocation2 + $0x70] sm:$0x8]  ;;  %v17799_v41 = vld [vmem:[#allocation2 + $0x74] sm:$0xf] }
 0x275   : > { %v7103_v62 = vshrl.u32 %v17767_v11, 16  ;;  %v7106_v55 = vshll.u32 %v17767_v11, 16  ;;  %v7096_v16 = vrot.slane %v7094_v45, 7  ;;  %v6415_v54 = vshrl.u32 %v6240_v37, 16 }
 0x276   : > { %14048 = vmatmul.mubr.msk.bf16.gmra.mxu0 %vm5749_vm9, %v12761_v7  ;;  %v6403_v5 = vsel %vm14674_vm4, %v6398_v61, %v6402_v59  ;;  %v6418_v24 = vshll.u32 %v6240_v37, 16  ;;  %v6408_v36 = vrot.slane %v6407_v17, 4  ;;  %v6424_v22 = vshll.u32 %v6241_v9, 16 }
 0x277   : > { %v7105_v13 = vrot.slane %v7103_v62, 7  ;;  %v6428_v56 = vshrl.u32 %v6241_v9, 16  ;;  %v7099_v18 = vor.u32 %v7097_v47, %v7096_v16  ;;  %v7101_v15 = vrot.slane %v7096_v16, 4 }
 0x278   : > { %v6417_v26 = vrot.slane %v6415_v54, 4  ;;  %v6420_v52 = vrot.slane %v6418_v24, 5  ;;  %v6413_v63 = vsel %vm14674_vm4, %v6408_v36, %v6412_v3  ;;  %v6426_v60 = vrot.slane %v6424_v22, 5 }
 0x279   : > { %v7108_v44 = vor.u32 %v7106_v55, %v7105_v13  ;;  %v6430_v19 = vrot.slane %v6428_v56, 4  ;;  %v12712_v27 = vcombine.low %v6403_v5, %v6413_v63  ;;  %v7100_v10 = vsel %vm16975_vm12, %v12744_v2, %v7099_v18  ;;  %v6246_v2 = vld [vmem:[#allocation2 + $0x84] sm:$0xf]  ;;  %v17804_v5 = vld [vmem:[#allocation2 + $0x78] sm:$0xf] }
 0x27a   : > { %v6421_v25 = vor.u32 %v6420_v52, %v6417_v26  ;;  %v6434_v38 = vshll.u32 %v6242_v6, 16  ;;  %v7111_v21 = vshrl.u32 %v6967_v12, 16  ;;  %v7116_v30 = vshrl.u32 %v17779_v32, 16 }
 0x27b   : > { %v7109_v58 = vsel %vm16975_vm12, %v7101_v15, %v7108_v44  ;;  %v6431_v31 = vor.u32 %v6430_v19, %v6426_v60  ;;  %14018 = vmatmul.mubr.msk.bf16.gmra.mxu1 %vm5749_vm9, %v12712_v27  ;;  %v7119_v53 = vshll.u32 %v17779_v32, 16  ;;  %v7125_v34 = vshrl.u32 %v17785_v46, 16  ;;  %v6247_v15 = vld [vmem:[#allocation2 + $0x88] sm:$0xf]  ;;  %v6248_v44 = vld [vmem:[#allocation2 + $0x8c] sm:$0x1] }
 0x27c   : > { %v12762_v57 = vcombine.low %v7100_v10, %v7109_v58  ;;  %v6422_v50 = vrot.slane %v6421_v25, 4  ;;  %v6436_v48 = vrot.slane %v6434_v38, 5  ;;  %v12745_v28 = vrot.slane %v7111_v21, 11  ;;  %v6973_v38 = vld [vmem:[#allocation2 + $0x80] sm:$0x8] }
 0x27d   : > { %v6432_v4 = vrot.slane %v6431_v31, 4  ;;  %v7118_v33 = vrot.slane %v7116_v30, 7  ;;  %v7128_v49 = vshll.u32 %v17785_v46, 16  ;;  %v6439_v1 = vshrl.u32 %v6243_v0, 16 }
 0x27e   : > { %14051 = vmatprep.mubr.msk.bf16.mxu0 %vm5749_vm9, %v12762_v57  ;;  %v6427_v39 = vsel %vm14674_vm4, %v6422_v50, %v6426_v60  ;;  %v6442_v51 = vshll.u32 %v6243_v0, 16  ;;  %v7127_v40 = vrot.slane %v7125_v34, 7  ;;  %v6448_v61 = vshll.u32 %v6244_v8, 16  ;;  %v17821_v34 = vld [vmem:[#allocation2 + $0x88] sm:$0xf] }
 0x27f   : > { %v6437_v59 = vsel %vm14674_vm4, %v6432_v4, %v6436_v48  ;;  %v7121_v20 = vor.u32 %v7119_v53, %v7118_v33  ;;  %v7123_v3 = vrot.slane %v7118_v33, 4  ;;  %v6441_v37 = vrot.slane %v6439_v1, 4  ;;  %v17817_v53 = vld [vmem:[#allocation2 + $0x84] sm:$0xf] }
 0x280   : > { %v12713_v23 = vcombine.low %v6427_v39, %v6437_v59  ;;  %v6444_v7 = vrot.slane %v6442_v51, 5  ;;  %v7130_v47 = vor.u32 %v7128_v49, %v7127_v40  ;;  %v6452_v9 = vshrl.u32 %v6244_v8, 16  ;;  %v6249_v51 = vld [vmem:[#allocation2 + $0x94] sm:$0xf] }
 0x281   : > { %v7122_v45 = vsel %vm16975_vm12, %v12745_v28, %v7121_v20  ;;  %v6458_v17 = vshll.u32 %v6245_v35, 16  ;;  %v6450_v55 = vrot.slane %v6448_v61, 5  ;;  %v7133_v16 = vshrl.u32 %v6970_v43, 16  ;;  %v6250_v43 = vld [vmem:[#allocation2 + $0x98] sm:$0xf] }
 0x282   : > { %14021 = vmatprep.mubr.msk.bf16.mxu1 %vm5749_vm9, %v12713_v23  ;;  %v6445_v62 = vor.u32 %v6444_v7, %v6441_v37  ;;  %v7138_v54 = vshrl.u32 %v17799_v41, 16  ;;  %v7131_v24 = vsel %vm16975_vm12, %v7123_v3, %v7130_v47  ;;  %v6454_v12 = vrot.slane %v6452_v9, 4  ;;  %v6251_v9 = vld [vmem:[#allocation2 + $0x9c] sm:$0x1] }
 0x283   : > { %v6460_v36 = vrot.slane %v6458_v17, 5  ;;  %v7141_v13 = vshll.u32 %v17799_v41, 16  ;;  %v12763_v6 = vcombine.low %v7122_v45, %v7131_v24  ;;  %v12746_v56 = vrot.slane %v7133_v16, 11  ;;  %v6976_v24 = vld [vmem:[#allocation2 + $0x90] sm:$0x8] }
 0x284   : > { %v6446_v22 = vrot.slane %v6445_v62, 4  ;;  %v7140_v18 = vrot.slane %v7138_v54, 7  ;;  %v6455_v26 = vor.u32 %v6454_v12, %v6450_v55  ;;  %v7147_v52 = vshrl.u32 %v17804_v5, 16 }
 0x285   : > { %v7150_v63 = vshll.u32 %v17804_v5, 16  ;;  %v6463_v60 = vshrl.u32 %v6246_v2, 16  ;;  %14052 = vmatmul.mubr.msk.bf16.gmra.mxu0 %vm5749_vm9, %v12763_v6  ;;  %v6466_v25 = vshll.u32 %v6246_v2, 16  ;;  %v6472_v30 = vshll.u32 %v6247_v15, 16 }
 0x286   : > { %v6451_v19 = vsel %vm14674_vm4, %v6446_v22, %v6450_v55  ;;  %v7143_v27 = vor.u32 %v7141_v13, %v7140_v18  ;;  %v7145_v10 = vrot.slane %v7140_v18, 4  ;;  %v6456_v58 = vrot.slane %v6455_v26, 4  ;;  %v17833_v22 = vld [vmem:[#allocation2 + $0x94] sm:$0xf] }
 0x287   : > { %v7149_v31 = vrot.slane %v7147_v52, 7  ;;  %v6465_v21 = vrot.slane %v6463_v60, 4  ;;  %v6468_v57 = vrot.slane %v6466_v25, 5  ;;  %v6476_v50 = vshrl.u32 %v6247_v15, 16 }
 0x288   : > { %v7144_v0 = vsel %vm16975_vm12, %v12746_v56, %v7143_v27  ;;  %v6482_v48 = vshll.u32 %v6248_v44, 16  ;;  %v6461_v4 = vsel %vm14674_vm4, %v6456_v58, %v6460_v36  ;;  %v6474_v33 = vrot.slane %v6472_v30, 5  ;;  %v6252_v58 = vld [vmem:[#allocation2 + $0xa4] sm:$0xf] }
 0x289   : > { %v7152_v28 = vor.u32 %v7150_v63, %v7149_v31  ;;  %v7155_v8 = vshrl.u32 %v6973_v38, 16  ;;  %v12714_v39 = vcombine.low %v6451_v19, %v6461_v4  ;;  %v6469_v49 = vor.u32 %v6468_v57, %v6465_v21  ;;  %v17839_v19 = vld [vmem:[#allocation2 + $0x98] sm:$0xf] }
 0x28a   : > { %v6478_v35 = vrot.slane %v6476_v50, 4  ;;  %v6484_v1 = vrot.slane %v6482_v48, 5  ;;  %v7160_v3 = vshrl.u32 %v17817_v53, 16  ;;  %v7163_v40 = vshll.u32 %v17817_v53, 16 }
 0x28b   : > { %v7153_v59 = vsel %vm16975_vm12, %v7145_v10, %v7152_v28  ;;  %v12747_v20 = vrot.slane %v7155_v8, 11  ;;  %14022 = vmatmul.mubr.msk.bf16.gmra.mxu1 %vm5749_vm9, %v12714_v39  ;;  %v6470_v37 = vrot.slane %v6469_v49, 4  ;;  %v7169_v61 = vshrl.u32 %v17821_v34, 16  ;;  %v6253_v28 = vld [vmem:[#allocation2 + $0xa8] sm:$0xf] }
 0x28c   : > { %v12764_v23 = vcombine.low %v7144_v0, %v7153_v59  ;;  %v6479_v7 = vor.u32 %v6478_v35, %v6474_v33  ;;  %v7162_v45 = vrot.slane %v7160_v3, 7  ;;  %v7172_v47 = vshll.u32 %v17821_v34, 16  ;;  %v6254_v39 = vld [vmem:[#allocation2 + $0xac] sm:$0x1] }
 0x28d   : > { %v6487_v17 = vshrl.u32 %v6249_v51, 16  ;;  %v6490_v2 = vshll.u32 %v6249_v51, 16  ;;  %v6475_v62 = vsel %vm14674_vm4, %v6470_v37, %v6474_v33  ;;  %v7171_v16 = vrot.slane %v7169_v61, 7  ;;  %v17856_v61 = vld [vmem:[%s19564_s3 + $0x38] sm:$0xff]  }
 0x28e   : > { %14055 = vmatprep.mubr.msk.bf16.mxu0 %vm5749_vm9, %v12764_v23  ;;  %v6480_v55 = vrot.slane %v6479_v7, 4  ;;  %v6496_v54 = vshll.u32 %v6250_v43, 16  ;;  %v7165_v12 = vor.u32 %v7163_v40, %v7162_v45  ;;  %v7167_v36 = vrot.slane %v7162_v45, 4  ;;  %v17851_v40 = vld [vmem:[#allocation2 + $0xa4] sm:$0xf]  ;;  %14177 = vmatprep.subr.bf16.mxu0 %v17856_v61 }
 0x28f   : > { %v6489_v13 = vrot.slane %v6487_v17, 4  ;;  %v6492_v6 = vrot.slane %v6490_v2, 5  ;;  %v7174_v18 = vor.u32 %v7172_v47, %v7171_v16  ;;  %v6500_v26 = vshrl.u32 %v6250_v43, 16 }
 0x290   : > { %v6485_v56 = vsel %vm14674_vm4, %v6480_v55, %v6484_v1  ;;  %v6498_v15 = vrot.slane %v6496_v54, 5  ;;  %v7166_v63 = vsel %vm16975_vm12, %v12747_v20, %v7165_v12  ;;  %v6506_v60 = vshll.u32 %v6251_v9, 16  ;;  %v6979_v1 = vld [vmem:[#allocation2 + $0xa0] sm:$0x8]  ;;  %v17862_v54 = vld [vmem:[#allocation2 + $0xa8] sm:$0xf] }
 0x291   : > { %v12715_v52 = vcombine.low %v6475_v62, %v6485_v56  ;;  %v6493_v44 = vor.u32 %v6492_v6, %v6489_v13  ;;  %v7175_v27 = vsel %vm16975_vm12, %v7167_v36, %v7174_v18  ;;  %v6502_v10 = vrot.slane %v6500_v26, 4  ;;  %v6255_v6 = vld [vmem:[#allocation2 + $0xb4] sm:$0xf] }
 0x292   : > { %v7177_v25 = vshrl.u32 %v6976_v24, 16  ;;  %v7182_v38 = vshrl.u32 %v17833_v22, 16  ;;  %v12765_v31 = vcombine.low %v7166_v63, %v7175_v27  ;;  %v6508_v30 = vrot.slane %v6506_v60, 5 }
 0x293   : > { %14025 = vmatprep.mubr.msk.bf16.mxu1 %vm5749_vm9, %v12715_v52  ;;  %v6494_v21 = vrot.slane %v6493_v44, 4  ;;  %v7185_v0 = vshll.u32 %v17833_v22, 16  ;;  %v6503_v57 = vor.u32 %v6502_v10, %v6498_v15  ;;  %v7191_v4 = vshrl.u32 %v17839_v19, 16  ;;  %v6256_v52 = vld [vmem:[#allocation2 + $0xb8] sm:$0xf] }
 0x294   : > { %v12748_v50 = vrot.slane %v7177_v25, 11  ;;  %v7184_v48 = vrot.slane %v7182_v38, 7  ;;  %14056 = vmatmul.mubr.msk.bf16.gmra.mxu0 %vm5749_vm9, %v12765_v31  ;;  %v7194_v8 = vshll.u32 %v17839_v19, 16  ;;  %v6511_v49 = vshrl.u32 %v6252_v58, 16  ;;  %v6257_v10 = vld [vmem:[#allocation2 + $0xbc] sm:$0x1] }
 0x295   : > { %v6499_v33 = vsel %vm14674_vm4, %v6494_v21, %v6498_v15  ;;  %v6514_v35 = vshll.u32 %v6252_v58, 16  ;;  %v6504_v51 = vrot.slane %v6503_v57, 4  ;;  %v7193_v3 = vrot.slane %v7191_v4, 7  ;;  %v6982_v21 = vld [vmem:[#allocation2 + $0xb0] sm:$0x8] }
 0x296   : > { %v7187_v59 = vor.u32 %v7185_v0, %v7184_v48  ;;  %v7189_v20 = vrot.slane %v7184_v48, 4  ;;  %v6513_v43 = vrot.slane %v6511_v49, 4  ;;  %v6520_v37 = vshll.u32 %v6253_v28, 16  ;;  %v17875_v48 = vld [vmem:[#allocation2 + $0xb4] sm:$0xf] }
 0x297   : > { %v6516_v23 = vrot.slane %v6514_v35, 5  ;;  %v6524_v7 = vshrl.u32 %v6253_v28, 16  ;;  %v6509_v45 = vsel %vm14674_vm4, %v6504_v51, %v6508_v30  ;;  %v7196_v9 = vor.u32 %v7194_v8, %v7193_v3 }
 0x298   : > { %v7188_v47 = vsel %vm16975_vm12, %v12748_v50, %v7187_v59  ;;  %v6530_v17 = vshll.u32 %v6254_v39, 16  ;;  %v12716_v2 = vcombine.low %v6499_v33, %v6509_v45  ;;  %v6522_v55 = vrot.slane %v6520_v37, 5  ;;  %v17879_v39 = vld [vmem:[#allocation2 + $0xb8] sm:$0xf] }
 0x299   : > { %v6517_v62 = vor.u32 %v6516_v23, %v6513_v43  ;;  %v6526_v16 = vrot.slane %v6524_v7, 4  ;;  %v7197_v24 = vsel %vm16975_vm12, %v7189_v20, %v7196_v9  ;;  %v7199_v36 = vshrl.u32 %v6979_v1, 16 }
 0x29a   : > { %v6532_v12 = vrot.slane %v6530_v17, 5  ;;  %v7204_v13 = vshrl.u32 %v17851_v40, 16  ;;  %14026 = vmatmul.mubr.msk.bf16.gmra.mxu1 %vm5749_vm9, %v12716_v2  ;;  %v12766_v56 = vcombine.low %v7188_v47, %v7197_v24  ;;  %v7207_v26 = vshll.u32 %v17851_v40, 16  ;;  %v6258_v47 = vld [vmem:[#allocation2 + $0xc4] sm:$0xf] }
 0x29b   : > { %v6518_v18 = vrot.slane %v6517_v62, 4  ;;  %v6527_v15 = vor.u32 %v6526_v16, %v6522_v55  ;;  %v12749_v63 = vrot.slane %v7199_v36, 11  ;;  %v7213_v60 = vshrl.u32 %v17862_v54, 16 }
 0x29c   : > { %v7206_v44 = vrot.slane %v7204_v13, 7  ;;  %v7216_v27 = vshll.u32 %v17862_v54, 16  ;;  %14059 = vmatprep.mubr.msk.bf16.mxu0 %vm5749_vm9, %v12766_v56  ;;  %v6535_v58 = vshrl.u32 %v6255_v6, 16  ;;  %v6538_v31 = vshll.u32 %v6255_v6, 16 }
 0x29d   : > { %v6523_v25 = vsel %vm14674_vm4, %v6518_v18, %v6522_v55  ;;  %v6528_v38 = vrot.slane %v6527_v15, 4  ;;  %v7215_v57 = vrot.slane %v7213_v60, 7  ;;  %v6544_v50 = vshll.u32 %v6256_v52, 16  ;;  %v6259_v55 = vld [vmem:[#allocation2 + $0xc8] sm:$0xf] }
 0x29e   : > { %v7209_v30 = vor.u32 %v7207_v26, %v7206_v44  ;;  %v7211_v0 = vrot.slane %v7206_v44, 4  ;;  %v6537_v28 = vrot.slane %v6535_v58, 4  ;;  %v6540_v33 = vrot.slane %v6538_v31, 5  ;;  %v6985_v15 = vld [vmem:[#allocation2 + $0xc0] sm:$0x8] }
 0x29f   : > { %v6533_v4 = vsel %vm14674_vm4, %v6528_v38, %v6532_v12  ;;  %v6548_v8 = vshrl.u32 %v6256_v52, 16  ;;  %v7218_v1 = vor.u32 %v7216_v27, %v7215_v57  ;;  %v6546_v51 = vrot.slane %v6544_v50, 5  ;;  %v6260_v44 = vld [vmem:[#allocation2 + $0xcc] sm:$0x1]  ;;  %v17893_v27 = vld [vmem:[#allocation2 + $0xc4] sm:$0xf] }
 0x2a0   : > { %v12717_v49 = vcombine.low %v6523_v25, %v6533_v4  ;;  %v7210_v35 = vsel %vm16975_vm12, %v12749_v63, %v7209_v30  ;;  %v6541_v59 = vor.u32 %v6540_v33, %v6537_v28  ;;  %v6554_v3 = vshll.u32 %v6257_v10, 16  ;;  %v17897_v31 = vld [vmem:[#allocation2 + $0xc8] sm:$0xf] }
 0x2a1   : > { %v6550_v20 = vrot.slane %v6548_v8, 4  ;;  %v7221_v43 = vshrl.u32 %v6982_v21, 16  ;;  %v7219_v23 = vsel %vm16975_vm12, %v7211_v0, %v7218_v1  ;;  %v7226_v37 = vshrl.u32 %v17875_v48, 16  ;;  %v6261_v8 = vld [vmem:[#allocation2 + $0xd4] sm:$0xf] }
 0x2a2   : > { %14029 = vmatprep.mubr.msk.bf16.mxu1 %vm5749_vm9, %v12717_v49  ;;  %v7229_v7 = vshll.u32 %v17875_v48, 16  ;;  %v7235_v45 = vshrl.u32 %v17879_v39, 16  ;;  %v12767_v9 = vcombine.low %v7210_v35, %v7219_v23  ;;  %v6542_v17 = vrot.slane %v6541_v59, 4  ;;  %v6262_v59 = vld [vmem:[#allocation2 + $0xd8] sm:$0xf] }
 0x2a3   : > { %v6551_v2 = vor.u32 %v6550_v20, %v6546_v51  ;;  %v6556_v62 = vrot.slane %v6554_v3, 5  ;;  %v12750_v16 = vrot.slane %v7221_v43, 11  ;;  %v7228_v24 = vrot.slane %v7226_v37, 7 }
 0x2a4   : > { %v7237_v12 = vrot.slane %v7235_v45, 7  ;;  %v7238_v36 = vshll.u32 %v17879_v39, 16  ;;  %14060 = vmatmul.mubr.msk.bf16.gmra.mxu0 %vm5749_vm9, %v12767_v9  ;;  %v6547_v13 = vsel %vm14674_vm4, %v6542_v17, %v6546_v51  ;;  %v6559_v56 = vshrl.u32 %v6258_v47, 16 }
 0x2a5   : > { %v6552_v6 = vrot.slane %v6551_v2, 4  ;;  %v6562_v18 = vshll.u32 %v6258_v47, 16  ;;  %v7231_v26 = vor.u32 %v7229_v7, %v7228_v24  ;;  %v7233_v52 = vrot.slane %v7228_v24, 4  ;;  %v6263_v2 = vld [vmem:[#allocation2 + $0xdc] sm:$0x1] }
 0x2a6   : > { %v7240_v63 = vor.u32 %v7238_v36, %v7237_v12  ;;  %v6568_v60 = vshll.u32 %v6259_v55, 16  ;;  %v6561_v25 = vrot.slane %v6559_v56, 4  ;;  %v6572_v58 = vshrl.u32 %v6259_v55, 16 }
 0x2a7   : > { %v6557_v10 = vsel %vm14674_vm4, %v6552_v6, %v6556_v62  ;;  %v6564_v38 = vrot.slane %v6562_v18, 5  ;;  %v7232_v30 = vsel %vm16975_vm12, %v12750_v16, %v7231_v26  ;;  %v6578_v33 = vshll.u32 %v6260_v44, 16  ;;  %v17911_v6 = vld [vmem:[#allocation2 + $0xd4] sm:$0xf] }
 0x2a8   : > { %v12718_v21 = vcombine.low %v6547_v13, %v6557_v10  ;;  %v7241_v0 = vsel %vm16975_vm12, %v7233_v52, %v7240_v63  ;;  %v6570_v57 = vrot.slane %v6568_v60, 5  ;;  %v6574_v28 = vrot.slane %v6572_v58, 4  ;;  %v6988_v13 = vld [vmem:[#allocation2 + $0xd0] sm:$0x8]  ;;  %v17915_v52 = vld [vmem:[#allocation2 + $0xd8] sm:$0xf] }
 0x2a9   : > { %v12768_v50 = vcombine.low %v7232_v30, %v7241_v0  ;;  %v6565_v4 = vor.u32 %v6564_v38, %v6561_v25  ;;  %v7243_v49 = vshrl.u32 %v6985_v15, 16  ;;  %v7248_v35 = vshrl.u32 %v17893_v27, 16  ;;  %v6264_v30 = vld [vmem:[#allocation2 + $0xe4] sm:$0xf] }
 0x2aa   : > { %14030 = vmatmul.mubr.msk.bf16.gmra.mxu1 %vm5749_vm9, %v12718_v21  ;;  %v7251_v1 = vshll.u32 %v17893_v27, 16  ;;  %v7257_v51 = vshrl.u32 %v17897_v31, 16  ;;  %v6575_v3 = vor.u32 %v6574_v28, %v6570_v57  ;;  %v6580_v43 = vrot.slane %v6578_v33, 5  ;;  %v6265_v28 = vld [vmem:[#allocation2 + $0xe8] sm:$0xf] }
 0x2ab   : > { %14063 = vmatprep.mubr.msk.bf16.mxu0 %vm5749_vm9, %v12768_v50  ;;  %v6566_v20 = vrot.slane %v6565_v4, 4  ;;  %v7260_v23 = vshll.u32 %v17897_v31, 16  ;;  %v12751_v37 = vrot.slane %v7243_v49, 11  ;;  %v7250_v7 = vrot.slane %v7248_v35, 7 }
 0x2ac   : > { %v7259_v45 = vrot.slane %v7257_v51, 7  ;;  %v6583_v47 = vshrl.u32 %v6261_v8, 16  ;;  %v6576_v17 = vrot.slane %v6575_v3, 4  ;;  %v6586_v62 = vshll.u32 %v6261_v8, 16 }
 0x2ad   : > { %v6571_v9 = vsel %vm14674_vm4, %v6566_v20, %v6570_v57  ;;  %v6592_v55 = vshll.u32 %v6262_v59, 16  ;;  %v7253_v16 = vor.u32 %v7251_v1, %v7250_v7  ;;  %v7255_v24 = vrot.slane %v7250_v7, 4 }
 0x2ae   : > { %v7262_v12 = vor.u32 %v7260_v23, %v7259_v45  ;;  %v6585_v36 = vrot.slane %v6583_v47, 4  ;;  %v6581_v56 = vsel %vm14674_vm4, %v6576_v17, %v6580_v43  ;;  %v6588_v18 = vrot.slane %v6586_v62, 5  ;;  %v6266_v23 = vld [vmem:[#allocation2 + $0xec] sm:$0x1]  ;;  %v17929_v62 = vld [vmem:[#allocation2 + $0xe4] sm:$0xf] }
 0x2af   : > { %v6594_v15 = vrot.slane %v6592_v55, 5  ;;  %v6596_v26 = vshrl.u32 %v6262_v59, 16  ;;  %v12719_v63 = vcombine.low %v6571_v9, %v6581_v56  ;;  %v7254_v44 = vsel %vm16975_vm12, %v12751_v37, %v7253_v16 }
 0x2b0   : > { %v7263_v60 = vsel %vm16975_vm12, %v7255_v24, %v7262_v12  ;;  %v6602_v10 = vshll.u32 %v6263_v2, 16  ;;  %v6589_v38 = vor.u32 %v6588_v18, %v6585_v36  ;;  %v7265_v21 = vshrl.u32 %v6988_v13, 16  ;;  %v6991_v2 = vld [vmem:[#allocation2 + $0xe0] sm:$0x8]  ;;  %v17933_v36 = vld [vmem:[#allocation2 + $0xe8] sm:$0xf] }
 0x2b1   : > { %v12769_v25 = vcombine.low %v7254_v44, %v7263_v60  ;;  %v6598_v58 = vrot.slane %v6596_v26, 4  ;;  %14033 = vmatprep.mubr.msk.bf16.mxu1 %vm5749_vm9, %v12719_v63  ;;  %v7270_v57 = vshrl.u32 %v17911_v6, 16  ;;  %v7273_v50 = vshll.u32 %v17911_v6, 16 }
 0x2b2   : > { %v6604_v0 = vrot.slane %v6602_v10, 5  ;;  %v7279_v4 = vshrl.u32 %v17915_v52, 16  ;;  %v6590_v33 = vrot.slane %v6589_v38, 4  ;;  %v12752_v49 = vrot.slane %v7265_v21, 11  ;;  %v6267_v10 = vld [vmem:[#allocation2 + $0xf4] sm:$0xf] }
 0x2b3   : > { %14064 = vmatmul.mubr.msk.bf16.gmra.mxu0 %vm5749_vm9, %v12769_v25  ;;  %v6599_v8 = vor.u32 %v6598_v58, %v6594_v15  ;;  %v7282_v35 = vshll.u32 %v17915_v52, 16  ;;  %v7272_v1 = vrot.slane %v7270_v57, 7  ;;  %v6607_v59 = vshrl.u32 %v6264_v30, 16 }
 0x2b4   : > { %v7281_v51 = vrot.slane %v7279_v4, 7  ;;  %v6610_v20 = vshll.u32 %v6264_v30, 16  ;;  %v6595_v3 = vsel %vm14674_vm4, %v6590_v33, %v6594_v15  ;;  %v6616_v37 = vshll.u32 %v6265_v28, 16  ;;  %v6268_v30 = vld [vmem:[#allocation2 + $0xf8] sm:$0xf] }
 0x2b5   : > { %v6600_v43 = vrot.slane %v6599_v8, 4  ;;  %v6620_v7 = vshrl.u32 %v6265_v28, 16  ;;  %v7275_v45 = vor.u32 %v7273_v50, %v7272_v1  ;;  %v7277_v47 = vrot.slane %v7272_v1, 4 }
 0x2b6   : > { %v7284_v9 = vor.u32 %v7282_v35, %v7281_v51  ;;  %v6609_v17 = vrot.slane %v6607_v59, 4  ;;  %v6612_v16 = vrot.slane %v6610_v20, 5  ;;  %v6618_v24 = vrot.slane %v6616_v37, 5  ;;  %v6269_v51 = vld [vmem:[#allocation2 + $0xfc] sm:$0x1] }
 0x2b7   : > { %v6605_v55 = vsel %vm14674_vm4, %v6600_v43, %v6604_v0  ;;  %v6622_v12 = vrot.slane %v6620_v7, 4  ;;  %v7276_v56 = vsel %vm16975_vm12, %v12752_v49, %v7275_v45  ;;  %v6626_v15 = vshll.u32 %v6266_v23, 16  ;;  %v17949_v45 = vld [vmem:[#allocation2 + $0xf4] sm:$0xf] }
 0x2b8   : > { %v12720_v13 = vcombine.low %v6595_v3, %v6605_v55  ;;  %v7285_v18 = vsel %vm16975_vm12, %v7277_v47, %v7284_v9  ;;  %v6613_v63 = vor.u32 %v6612_v16, %v6609_v17  ;;  %v7287_v60 = vshrl.u32 %v6991_v2, 16  ;;  %v6994_v3 = vld [vmem:[#allocation2 + $0xf0] sm:$0x8]  ;;  %v17951_v55 = vld [vmem:[#allocation2 + $0xf8] sm:$0xf] }
 0x2b9   : > { %v12770_v26 = vcombine.low %v7276_v56, %v7285_v18  ;;  %v6623_v44 = vor.u32 %v6622_v12, %v6618_v24  ;;  %v6628_v25 = vrot.slane %v6626_v15, 5  ;;  %v7292_v38 = vshrl.u32 %v17929_v62, 16 }
 0x2ba   : > { %14034 = vmatmul.mubr.msk.bf16.gmra.mxu1 %vm5749_vm9, %v12720_v13  ;;  %v7295_v58 = vshll.u32 %v17929_v62, 16  ;;  %v7301_v21 = vshrl.u32 %v17933_v36, 16  ;;  %v6614_v0 = vrot.slane %v6613_v63, 4  ;;  %v12753_v50 = vrot.slane %v7287_v60, 11  ;;  %v6997_v63 = vld [vmem:[#allocation2 + $0x100] sm:$0x8] }
 0x2bb   : > { %14067 = vmatprep.mubr.msk.bf16.mxu0 %vm5749_vm9, %v12770_v26  ;;  %v6624_v57 = vrot.slane %v6623_v44, 4  ;;  %v7304_v4 = vshll.u32 %v17933_v36, 16  ;;  %v7294_v28 = vrot.slane %v7292_v38, 7  ;;  %v6631_v8 = vshrl.u32 %v6267_v10, 16  ;;  %v17959_v44 = vld [vmem:[#allocation2 + $0x104] sm:$0xf] }
 0x2bc   : > { %v7303_v33 = vrot.slane %v7301_v21, 7  ;;  %v6634_v49 = vshll.u32 %v6267_v10, 16  ;;  %v6619_v35 = vsel %vm14674_vm4, %v6614_v0, %v6618_v24  ;;  %v6640_v59 = vshll.u32 %v6268_v30, 16 }
 0x2bd   : > { %v6629_v1 = vsel %vm14674_vm4, %v6624_v57, %v6628_v25  ;;  %v6644_v20 = vshrl.u32 %v6268_v30, 16  ;;  %v7297_v23 = vor.u32 %v7295_v58, %v7294_v28  ;;  %v7299_v37 = vrot.slane %v7294_v28, 4 }
 0x2be   : > { %v12721_v43 = vcombine.low %v6619_v35, %v6629_v1  ;;  %v7306_v7 = vor.u32 %v7304_v4, %v7303_v33  ;;  %v6633_v47 = vrot.slane %v6631_v8, 4  ;;  %v6636_v9 = vrot.slane %v6634_v49, 5  ;;  %v14513_v4 = vld [vmem:[#allocation2 + $0x18] sm:$0xf]  ;;  %v17965_v33 = vld [vmem:[#allocation2 + $0x108] sm:$0xf] }
 0x2bf   : > { %v6642_v17 = vrot.slane %v6640_v59, 5  ;;  %v6646_v2 = vrot.slane %v6644_v20, 4  ;;  %v7298_v16 = vsel %vm16975_vm12, %v12753_v50, %v7297_v23  ;;  %v6650_v12 = vshll.u32 %v6269_v51, 16  ;;  %v14512_v50 = vld [vmem:[#allocation2 + $0x14] sm:$0xf] }
 0x2c0   : > { %14037 = vmatprep.mubr.msk.bf16.mxu1 %vm5749_vm9, %v12721_v43  ;;  %v7307_v24 = vsel %vm16975_vm12, %v7299_v37, %v7306_v7  ;;  %v7309_v13 = vshrl.u32 %v6994_v3, 16  ;;  %v6637_v18 = vor.u32 %v6636_v9, %v6633_v47  ;;  %v7314_v26 = vshrl.u32 %v17949_v45, 16  ;;  %v7980_v20 = vld [vmem:[#allocation2 + $0x14] sm:$0xf]  ;;  %v7981_v7 = vld [vmem:[#allocation2 + $0x18] sm:$0xf] }
 0x2c1   : > { %v12771_v56 = vcombine.low %v7298_v16, %v7307_v24  ;;  %v6647_v15 = vor.u32 %v6646_v2, %v6642_v17  ;;  %v6652_v60 = vrot.slane %v6650_v12, 5  ;;  %v7317_v25 = vshll.u32 %v17949_v45, 16  ;;  %v7982_v16 = vld [vmem:[#allocation2 + $0x1c] sm:$0x1] }
 0x2c2   : > { %v12754_v10 = vrot.slane %v7309_v13, 11  ;;  %v7323_v38 = vshrl.u32 %v17951_v55, 16  ;;  %v6638_v58 = vrot.slane %v6637_v18, 4  ;;  %v7316_v30 = vrot.slane %v7314_v26, 7  ;;  %v14514_v13 = vld [vmem:[#allocation2 + $0x24] sm:$0xf] }
 0x2c3   : > { %14068 = vmatmul.mubr.msk.bf16.gmra.mxu0 %vm5749_vm9, %v12771_v56  ;;  %v6648_v21 = vrot.slane %v6647_v15, 4  ;;  %v7326_v0 = vshll.u32 %v17951_v55, 16  ;;  %v12793_v28 = vcombine.low %v14512_v50, %v14513_v4  ;;  %v7331_v8 = vshrl.u32 %v6997_v63, 16  ;;  %v14515_v56 = vld [vmem:[#allocation2 + $0x28] sm:$0xf] }
 0x2c4   : > { %v7325_v57 = vrot.slane %v7323_v38, 7  ;;  %v7336_v49 = vshrl.u32 %v17959_v44, 16  ;;  %v6643_v35 = vsel %vm14674_vm4, %v6638_v58, %v6642_v17  ;;  %v7319_v51 = vor.u32 %v7317_v25, %v7316_v30  ;;  %v7983_v38 = vld [vmem:[#allocation2 + $0x24] sm:$0xf] }
 0x2c5   : > { %v6653_v1 = vsel %vm14674_vm4, %v6648_v21, %v6652_v60  ;;  %v7321_v59 = vrot.slane %v7316_v30, 4  ;;  %v12755_v23 = vrot.slane %v7331_v8, 11  ;;  %v7339_v9 = vshll.u32 %v17959_v44, 16 }
 0x2c6   : > { %v12722_v3 = vcombine.low %v6643_v35, %v6653_v1  ;;  %v7328_v43 = vor.u32 %v7326_v0, %v7325_v57  ;;  %v7338_v37 = vrot.slane %v7336_v49, 7  ;;  %v7320_v47 = vsel %vm16975_vm12, %v12754_v10, %v7319_v51  ;;  %v7984_v57 = vld [vmem:[#allocation2 + $0x28] sm:$0xf]  ;;  %v14516_v35 = vld [vmem:[#allocation2 + $0x34] sm:$0xf] }
 0x2c7   : > { %v7345_v2 = vshrl.u32 %v17965_v33, 16  ;;  %v7348_v17 = vshll.u32 %v17965_v33, 16  ;;  %v12794_v18 = vcombine.low %v14514_v13, %v14515_v56  ;;  %v8029_v15 = vshrl.u32 %v7980_v20, 16  ;;  %v17980_v26 = vpop.f32.mrf.mxu1  ;;  %v17993_v13 = vld [vmem:[%s19564_s3 + $0x40] sm:$0xff]  }
 0x2c8   : > { %14038 = vmatmul.mubr.msk.bf16.gmra.mxu1 %vm5749_vm9, %v12722_v3  ;;  %v7329_v24 = vsel %vm16975_vm12, %v7321_v59, %v7328_v43  ;;  %v7343_v12 = vrot.slane %v7338_v37, 4  ;;  %v7341_v60 = vor.u32 %v7339_v9, %v7338_v37  ;;  %v8032_v25 = vshll.u32 %v7980_v20, 16  ;;  %v7985_v3 = vld [vmem:[#allocation2 + $0x2c] sm:$0x1] }
 0x2c9   : > { %v12772_v63 = vcombine.low %v7320_v47, %v7329_v24  ;;  %14077 = vmatprep.mubr.msk.bf16.mxu1 %vm5749_vm9, %v12793_v28  ;;  %v7347_v10 = vrot.slane %v7345_v2, 7  ;;  %v8031_v58 = vrot.slane %v8029_v15, 4  ;;  %v8038_v21 = vshll.u32 %v7981_v7, 16  ;;  %v17983_v50 = vpop.f32.mrf.mxu1  ;;  %v14517_v28 = vld [vmem:[#allocation2 + $0x38] sm:$0xf] }
 0x2ca   : > { %v8042_v30 = vshrl.u32 %v7981_v7, 16  ;;  %v8048_v0 = vshll.u32 %v7982_v16, 16  ;;  %v7342_v4 = vsel %vm16975_vm12, %v12755_v23, %v7341_v60  ;;  %v8034_v49 = vrot.slane %v8032_v25, 5  ;;  %v7986_v2 = vld [vmem:[#allocation2 + $0x34] sm:$0xf] }
 0x2cb   : > { %14071 = vmatprep.mubr.msk.bf16.mxu0 %vm5749_vm9, %v12772_v63  ;;  %v7350_v8 = vor.u32 %v7348_v17, %v7347_v10  ;;  %v12795_v1 = vcombine.low %v14516_v35, %v14517_v28  ;;  %v8040_v51 = vrot.slane %v8038_v21, 5  ;;  %v8053_v43 = vshrl.u32 %v7983_v38, 16  ;;  %v17995_v56 = vpop.f32.mrf.mxu1  ;;  %v14519_v21 = vld [vmem:[#allocation2 + $0x48] sm:$0xf]  ;;  %v7988_v35 = vld [vmem:[#allocation2 + $0x3c] sm:$0x1] }
 0x2cc   : > { %v8044_v59 = vrot.slane %v8042_v30, 4  ;;  %v8050_v20 = vrot.slane %v8048_v0, 5  ;;  %v8035_v7 = vor.u32 %v8034_v49, %v8031_v58  ;;  %v8056_v47 = vshll.u32 %v7983_v38, 16  ;;  %v14518_v58 = vld [vmem:[#allocation2 + $0x44] sm:$0xf] }
 0x2cd   : > { %v7351_v37 = vsel %vm16975_vm12, %v7343_v12, %v7350_v8  ;;  %v8062_v9 = vshll.u32 %v7984_v57, 16  ;;  %v8055_v23 = vrot.slane %v8053_v43, 4  ;;  %v8066_v17 = vshrl.u32 %v7984_v57, 16  ;;  %v7987_v12 = vld [vmem:[#allocation2 + $0x38] sm:$0xf] }
 0x2ce   : > { %v12773_v16 = vcombine.low %v7342_v4, %v7351_v37  ;;  %v8045_v24 = vor.u32 %v8044_v59, %v8040_v51  ;;  %v8036_v15 = vrot.slane %v8035_v7, 4  ;;  %v8058_v63 = vrot.slane %v8056_v47, 5  ;;  %v14520_v4 = vld [vmem:[%s19564_s3 + $0x30] sm:$0xff]   ;;  %v7989_v37 = vld [vmem:[#allocation2 + $0x44] sm:$0xf] }
 0x2cf   : > { %v8064_v60 = vrot.slane %v8062_v9, 5  ;;  %v8072_v10 = vshll.u32 %v7985_v3, 16  ;;  %v8068_v38 = vrot.slane %v8066_v17, 4  ;;  %v12796_v30 = vcombine.low %v14518_v58, %v14519_v21 }
 0x2d0   : > { %14072 = vmatmul.mubr.msk.bf16.gmra.mxu0 %vm5749_vm9, %v12773_v16  ;;  %14078 = vmatmul.mubr.msk.bf16.vlgmr.msra.gmra.mxu1 %vm5749_vm9, %v12794_v18  ;;  %v8046_v25 = vrot.slane %v8045_v24, 4  ;;  %v8077_v0 = vshrl.u32 %v7986_v2, 16  ;;  %v8041_v57 = vsel %vm14674_vm4, %v8036_v15, %v8040_v51  ;;  %v8059_v8 = vor.u32 %v8058_v63, %v8055_v23  ;;  %v18008_v51 = vpop.f32.mrf.mxu1 }
 0x2d1   : > { %14144 = vmatpush3.bf16.msra.mxu1 %v14520_v4  ;;  %14081 = vmatprep.mubr.msk.bf16.mxu1 %vm5749_vm9, %v12795_v1  ;;  %v8074_v49 = vrot.slane %v8072_v10, 5  ;;  %v8080_v18 = vshll.u32 %v7986_v2, 16  ;;  %v8069_v59 = vor.u32 %v8068_v38, %v8064_v60  ;;  %v8086_v43 = vshll.u32 %v7987_v12, 16  ;;  %19877 = vst [vmem:[#allocation22_spill] sm:$0xff] %v18008_v51  ;;  %v7990_v1 = vld [vmem:[#allocation2 + $0x48] sm:$0xf] }
 0x2d2   : > { %v8051_v28 = vsel %vm14674_vm4, %v8046_v25, %v8050_v20  ;;  %v8079_v3 = vrot.slane %v8077_v0, 4  ;;  %14211 = vmatprep.subr.bf16.mxu1 %v17993_v13  ;;  %v8060_v47 = vrot.slane %v8059_v8, 4  ;;  %v8090_v16 = vshrl.u32 %v7987_v12, 16  ;;  %v18010_v24 = vpop.f32.mrf.mxu0  ;;  %v7991_v25 = vld [vmem:[#allocation2 + $0x4c] sm:$0x1] }
 0x2d3   : > { %v12828_v7 = vcombine.low %v8041_v57, %v8051_v28  ;;  %v8082_v9 = vrot.slane %v8080_v18, 5  ;;  %v8070_v23 = vrot.slane %v8069_v59, 4  ;;  %v8088_v2 = vrot.slane %v8086_v43, 5  ;;  %v7992_v4 = vld [vmem:[#allocation2 + $0x54] sm:$0xf] }
 0x2d4   : > { %v8096_v17 = vshll.u32 %v7988_v35, 16  ;;  %v12797_v20 = vcombine.low %v17760_v42, %v17767_v11  ;;  %v8065_v15 = vsel %vm14674_vm4, %v8060_v47, %v8064_v60  ;;  %v8092_v10 = vrot.slane %v8090_v16, 4  ;;  %v18017_v58 = vpop.f32.mrf.mxu0  ;;  %v18021_v8 = vpop.f32.mrf.mxu1 }
 0x2d5   : > { %14111 = vmatprep.mubr.msk.bf16.mxu0 %vm5749_vm9, %v12828_v7  ;;  %v8083_v63 = vor.u32 %v8082_v9, %v8079_v3  ;;  %v8101_v38 = vshrl.u32 %v7989_v37, 16  ;;  %v8075_v12 = vsel %vm14674_vm4, %v8070_v23, %v8074_v49  ;;  %v8104_v0 = vshll.u32 %v7989_v37, 16  ;;  %v7993_v7 = vld [vmem:[#allocation2 + $0x58] sm:$0xf] }
 0x2d6   : > { %v8098_v21 = vrot.slane %v8096_v17, 5  ;;  %v8110_v57 = vshll.u32 %v7990_v1, 16  ;;  %v12829_v42 = vcombine.low %v8065_v15, %v8075_v12  ;;  %v8093_v35 = vor.u32 %v8092_v10, %v8088_v2  ;;  %v18023_v60 = vpop.f32.mrf.mxu0  ;;  %v18026_v49 = vpop.f32.mrf.mxu1 }
 0x2d7   : > { %v8084_v11 = vrot.slane %v8083_v63, 4  ;;  %v8103_v18 = vrot.slane %v8101_v38, 4  ;;  %v8106_v28 = vrot.slane %v8104_v0, 5  ;;  %v8114_v3 = vshrl.u32 %v7990_v1, 16  ;;  %v7994_v1 = vld [vmem:[#allocation2 + $0x5c] sm:$0x1] }
 0x2d8   : > { %14082 = vmatmul.mubr.msk.bf16.gmra.mxu1 %vm5749_vm9, %v12796_v30  ;;  %v8112_v59 = vrot.slane %v8110_v57, 5  ;;  %v8120_v43 = vshll.u32 %v7991_v25, 16  ;;  %14112 = vmatmul.mubr.msk.bf16.vlgmr.msra.gmra.mxu0 %vm5749_vm9, %v12829_v42  ;;  %v8094_v47 = vrot.slane %v8093_v35, 4  ;;  %v12798_v9 = vcombine.low %v17779_v32, %v17785_v46  ;;  %v18035_v63 = vpop.f32.mrf.mxu1  ;;  %v18039_v12 = vpop.f32.mrf.mxu0  ;;  %v7996_v42 = vld [vmem:[#allocation2 + $0x68] sm:$0xf] }
 0x2d9   : > { %v8089_v37 = vsel %vm14674_vm4, %v8084_v11, %v8088_v2  ;;  %14085 = vmatprep.mubr.msk.bf16.mxu1 %vm5749_vm9, %v12797_v20  ;;  %v8125_v16 = vshrl.u32 %v7992_v4, 16  ;;  %v8107_v30 = vor.u32 %v8106_v28, %v8103_v18  ;;  %v8116_v23 = vrot.slane %v8114_v3, 4  ;;  %14178 = vmatpush3.bf16.msra.mxu0 %v17856_v61  ;;  %v7995_v20 = vld [vmem:[#allocation2 + $0x64] sm:$0xf]  ;;  %19878 = vst [vmem:[#allocation40_spill] sm:$0xff] %v18039_v12 }
 0x2da   : > { %v8122_v17 = vrot.slane %v8120_v43, 5  ;;  %v8128_v15 = vshll.u32 %v7992_v4, 16  ;;  %v8099_v10 = vsel %vm14674_vm4, %v8094_v47, %v8098_v21  ;;  %v8134_v25 = vshll.u32 %v7993_v7, 16  ;;  %v18046_v43 = vpop.f32.mrf.mxu1  ;;  %v7997_v47 = vld [vmem:[#allocation2 + $0x6c] sm:$0x1] }
 0x2db   : > { %v8127_v2 = vrot.slane %v8125_v16, 4  ;;  %v8138_v38 = vshrl.u32 %v7993_v7, 16  ;;  %v12830_v32 = vcombine.low %v8089_v37, %v8099_v10  ;;  %v8108_v46 = vrot.slane %v8107_v30, 4  ;;  %19879 = vst [vmem:[#allocation12_spill] sm:$0xff] %v18046_v43  ;;  %v8027_v12 = vld [vmem:[#allocation2 + $0x10c] sm:$0x1] }
 0x2dc   : > { %v8117_v0 = vor.u32 %v8116_v23, %v8112_v59  ;;  %v8130_v57 = vrot.slane %v8128_v15, 5  ;;  %v8136_v11 = vrot.slane %v8134_v25, 5  ;;  %v8144_v35 = vshll.u32 %v7994_v1, 16  ;;  %v7998_v15 = vld [vmem:[#allocation2 + $0x74] sm:$0xf] }
 0x2dd   : > { %v8140_v4 = vrot.slane %v8138_v38, 4  ;;  %v12799_v61 = vcombine.low %v17799_v41, %v17804_v5  ;;  %14115 = vmatprep.mubr.msk.bf16.mxu0 %vm5749_vm9, %v12830_v32  ;;  %v8113_v21 = vsel %vm14674_vm4, %v8108_v46, %v8112_v59  ;;  %v8149_v3 = vshrl.u32 %v7995_v20, 16  ;;  %v7999_v32 = vld [vmem:[#allocation2 + $0x78] sm:$0xf] }
 0x2de   : > { %v8118_v18 = vrot.slane %v8117_v0, 4  ;;  %v8131_v28 = vor.u32 %v8130_v57, %v8127_v2  ;;  %v8146_v37 = vrot.slane %v8144_v35, 5  ;;  %v8152_v16 = vshll.u32 %v7995_v20, 16  ;;  %v8000_v35 = vld [vmem:[#allocation2 + $0x7c] sm:$0x1] }
 0x2df   : > { %v8141_v7 = vor.u32 %v8140_v4, %v8136_v11  ;;  %v8158_v30 = vshll.u32 %v7996_v42, 16  ;;  %v18048_v23 = vpop.f32.mrf.mxu0  ;;  %v8151_v1 = vrot.slane %v8149_v3, 4  ;;  %v8162_v59 = vshrl.u32 %v7996_v42, 16 }
 0x2e0   : > { %v8123_v41 = vsel %vm14674_vm4, %v8118_v18, %v8122_v17  ;;  %14086 = vmatmul.mubr.msk.bf16.gmra.mxu1 %vm5749_vm9, %v12798_v9  ;;  %v8132_v5 = vrot.slane %v8131_v28, 4  ;;  %v8154_v25 = vrot.slane %v8152_v16, 5  ;;  %v8168_v0 = vshll.u32 %v7997_v47, 16  ;;  %v18058_v9 = vpop.f32.mrf.mxu1 }
 0x2e1   : > { %v12831_v10 = vcombine.low %v8113_v21, %v8123_v41  ;;  %v8142_v2 = vrot.slane %v8141_v7, 4  ;;  %14089 = vmatprep.mubr.msk.bf16.mxu1 %vm5749_vm9, %v12799_v61  ;;  %v8160_v38 = vrot.slane %v8158_v30, 5  ;;  %v8164_v46 = vrot.slane %v8162_v59, 4  ;;  %v18060_v57 = vpop.f32.mrf.mxu0  ;;  %v8001_v7 = vld [vmem:[#allocation2 + $0x84] sm:$0xf] }
 0x2e2   : > { %v8137_v20 = vsel %vm14674_vm4, %v8132_v5, %v8136_v11  ;;  %v12800_v17 = vcombine.low %v17817_v53, %v17821_v34  ;;  %v8155_v4 = vor.u32 %v8154_v25, %v8151_v1  ;;  %v8173_v61 = vshrl.u32 %v7998_v15, 16  ;;  %v8002_v30 = vld [vmem:[#allocation2 + $0x88] sm:$0xf]  ;;  %v18068_v1 = vpop.f32.mrf.mxu1 }
 0x2e3   : > { %14116 = vmatmul.mubr.msk.bf16.gmra.mxu0 %vm5749_vm9, %v12831_v10  ;;  %v8147_v42 = vsel %vm14674_vm4, %v8142_v2, %v8146_v37  ;;  %v8176_v21 = vshll.u32 %v7998_v15, 16  ;;  %v8165_v11 = vor.u32 %v8164_v46, %v8160_v38  ;;  %v8170_v28 = vrot.slane %v8168_v0, 5  ;;  %19880 = vst [vmem:[#allocation42_spill] sm:$0xff] %v18068_v1  ;;  %v18070_v15 = vpop.f32.mrf.mxu0 }
 0x2e4   : > { %v12832_v18 = vcombine.low %v8137_v20, %v8147_v42  ;;  %v8182_v3 = vshll.u32 %v7999_v32, 16  ;;  %v8156_v47 = vrot.slane %v8155_v4, 4  ;;  %v8175_v53 = vrot.slane %v8173_v61, 4  ;;  %v8003_v20 = vld [vmem:[#allocation2 + $0x8c] sm:$0x1] }
 0x2e5   : > { %v8178_v34 = vrot.slane %v8176_v21, 5  ;;  %v8186_v16 = vshrl.u32 %v7999_v32, 16  ;;  %v8166_v41 = vrot.slane %v8165_v11, 4  ;;  %v8192_v59 = vshll.u32 %v8000_v35, 16 }
 0x2e6   : > { %14119 = vmatprep.mubr.msk.bf16.mxu0 %vm5749_vm9, %v12832_v18  ;;  %v8184_v5 = vrot.slane %v8182_v3, 5  ;;  %v12801_v37 = vcombine.low %v17833_v22, %v17839_v19  ;;  %v8161_v10 = vsel %vm14674_vm4, %v8156_v47, %v8160_v38  ;;  %v8197_v32 = vshrl.u32 %v8001_v7, 16  ;;  %v8004_v22 = vld [vmem:[#allocation2 + $0x94] sm:$0xf]  ;;  %v8005_v47 = vld [vmem:[#allocation2 + $0x98] sm:$0xf] }
 0x2e7   : > { %v8179_v2 = vor.u32 %v8178_v34, %v8175_v53  ;;  %v8188_v25 = vrot.slane %v8186_v16, 4  ;;  %v8171_v46 = vsel %vm14674_vm4, %v8166_v41, %v8170_v28  ;;  %v8194_v0 = vrot.slane %v8192_v59, 5  ;;  %v18078_v53 = vpop.f32.mrf.mxu1  ;;  %v18080_v28 = vpop.f32.mrf.mxu0 }
 0x2e8   : > { %14090 = vmatmul.mubr.msk.bf16.gmra.mxu1 %vm5749_vm9, %v12800_v17  ;;  %v8200_v42 = vshll.u32 %v8001_v7, 16  ;;  %v8206_v4 = vshll.u32 %v8002_v30, 16  ;;  %v12833_v19 = vcombine.low %v8161_v10, %v8171_v46  ;;  %v8199_v21 = vrot.slane %v8197_v32, 4  ;;  %19881 = vst [vmem:[#allocation18_spill] sm:$0xff] %v18078_v53  ;;  %19882 = vst [vmem:[#allocation9_spill] sm:$0xff] %v18080_v28 }
 0x2e9   : > { %v8180_v35 = vrot.slane %v8179_v2, 4  ;;  %v8189_v61 = vor.u32 %v8188_v25, %v8184_v5  ;;  %14093 = vmatprep.mubr.msk.bf16.mxu1 %vm5749_vm9, %v12801_v37  ;;  %v8210_v11 = vshrl.u32 %v8002_v30, 16  ;;  %v8216_v3 = vshll.u32 %v8003_v20, 16  ;;  %v8006_v30 = vld [vmem:[#allocation2 + $0x9c] sm:$0x1] }
 0x2ea   : > { %v8202_v38 = vrot.slane %v8200_v42, 5  ;;  %v8208_v18 = vrot.slane %v8206_v4, 5  ;;  %v12802_v34 = vcombine.low %v17851_v40, %v17862_v54  ;;  %v8221_v16 = vshrl.u32 %v8004_v22, 16  ;;  %v8007_v46 = vld [vmem:[#allocation2 + $0xa4] sm:$0xf] }
 0x2eb   : > { %14120 = vmatmul.mubr.msk.bf16.gmra.mxu0 %vm5749_vm9, %v12833_v19  ;;  %v8185_v17 = vsel %vm14674_vm4, %v8180_v35, %v8184_v5  ;;  %v8190_v7 = vrot.slane %v8189_v61, 4  ;;  %v8212_v59 = vrot.slane %v8210_v11, 4  ;;  %v8218_v37 = vrot.slane %v8216_v3, 5  ;;  %v8008_v35 = vld [vmem:[#allocation2 + $0xa8] sm:$0xf]  ;;  %v18089_v61 = vpop.f32.mrf.mxu1 }
 0x2ec   : > { %v8203_v41 = vor.u32 %v8202_v38, %v8199_v21  ;;  %v8224_v10 = vshll.u32 %v8004_v22, 16  ;;  %v8223_v25 = vrot.slane %v8221_v16, 4  ;;  %v8230_v20 = vshll.u32 %v8005_v47, 16  ;;  %19883 = vst [vmem:[#allocation29_spill] sm:$0xff] %v18089_v61  ;;  %v18091_v40 = vpop.f32.mrf.mxu0 }
 0x2ed   : > { %v8195_v2 = vsel %vm14674_vm4, %v8190_v7, %v8194_v0  ;;  %v8234_v32 = vshrl.u32 %v8005_v47, 16  ;;  %v8213_v5 = vor.u32 %v8212_v59, %v8208_v18  ;;  %v8240_v38 = vshll.u32 %v8006_v30, 16 }
 0x2ee   : > { %v12834_v42 = vcombine.low %v8185_v17, %v8195_v2  ;;  %v8204_v4 = vrot.slane %v8203_v41, 4  ;;  %v8226_v19 = vrot.slane %v8224_v10, 5  ;;  %v8232_v54 = vrot.slane %v8230_v20, 5  ;;  %v18099_v17 = vpop.f32.mrf.mxu0  ;;  %v8009_v41 = vld [vmem:[#allocation2 + $0xac] sm:$0x1] }
 0x2ef   : > { %v8236_v21 = vrot.slane %v8234_v32, 4  ;;  %v12803_v22 = vcombine.low %v17875_v48, %v17879_v39  ;;  %v8214_v11 = vrot.slane %v8213_v5, 4  ;;  %v8245_v47 = vshrl.u32 %v8007_v46, 16  ;;  %19884 = vst [vmem:[#allocation30_spill] sm:$0xff] %v18099_v17  ;;  %v8010_v2 = vld [vmem:[#allocation2 + $0xb4] sm:$0xf] }
 0x2f0   : > { %14123 = vmatprep.mubr.msk.bf16.mxu0 %vm5749_vm9, %v12834_v42  ;;  %v8209_v0 = vsel %vm14674_vm4, %v8204_v4, %v8208_v18  ;;  %14094 = vmatmul.mubr.msk.bf16.gmra.mxu1 %vm5749_vm9, %v12802_v34  ;;  %v8227_v3 = vor.u32 %v8226_v19, %v8223_v25  ;;  %v8242_v16 = vrot.slane %v8240_v38, 5  ;;  %v8248_v59 = vshll.u32 %v8007_v46, 16  ;;  %v18106_v34 = vpop.f32.mrf.mxu0  ;;  %v8011_v5 = vld [vmem:[#allocation2 + $0xb8] sm:$0xf] }
 0x2f1   : > { %v8237_v7 = vor.u32 %v8236_v21, %v8232_v54  ;;  %14097 = vmatprep.mubr.msk.bf16.mxu1 %vm5749_vm9, %v12803_v22  ;;  %v8254_v30 = vshll.u32 %v8008_v35, 16  ;;  %v8219_v48 = vsel %vm14674_vm4, %v8214_v11, %v8218_v37  ;;  %v8247_v10 = vrot.slane %v8245_v47, 4  ;;  %v18104_v20 = vpop.f32.mrf.mxu1  ;;  %19885 = vst [vmem:[#allocation31_spill] sm:$0xff] %v18106_v34  ;;  %v18262_v34 = vld [vmem:[#allocation2 + $0x58] sm:$0xf] }
 0x2f2   : > { %v8228_v39 = vrot.slane %v8227_v3, 4  ;;  %v8258_v18 = vshrl.u32 %v8008_v35, 16  ;;  %v12835_v25 = vcombine.low %v8209_v0, %v8219_v48  ;;  %v8250_v42 = vrot.slane %v8248_v59, 5  ;;  %v8012_v0 = vld [vmem:[#allocation2 + $0xbc] sm:$0x1]  ;;  %v18119_v48 = vpop.f32.mrf.mxu0 }
 0x2f3   : > { %v8238_v32 = vrot.slane %v8237_v7, 4  ;;  %v8256_v4 = vrot.slane %v8254_v30, 5  ;;  %v8264_v21 = vshll.u32 %v8009_v41, 16  ;;  %v12804_v37 = vcombine.low %v17893_v27, %v17897_v31  ;;  %v18112_v38 = vpop.f32.mrf.mxu1  ;;  %v8013_v30 = vld [vmem:[#allocation2 + $0xc4] sm:$0xf]  ;;  %19888 = vst [vmem:[#allocation10_spill] sm:$0xff] %v18119_v48 }
 0x2f4   : > { %v8233_v46 = vsel %vm14674_vm4, %v8228_v39, %v8232_v54  ;;  %v8260_v19 = vrot.slane %v8258_v18, 4  ;;  %19886 = vst [vmem:[#allocation33_spill] sm:$0xff] %v18112_v38  ;;  %14124 = vmatmul.mubr.msk.bf16.gmra.mxu0 %vm5749_vm9, %v12835_v25  ;;  %v8251_v22 = vor.u32 %v8250_v42, %v8247_v10  ;;  %v8269_v11 = vshrl.u32 %v8010_v2, 16  ;;  %v8014_v25 = vld [vmem:[#allocation2 + $0xc8] sm:$0xf] }
 0x2f5   : > { %v8243_v35 = vsel %vm14674_vm4, %v8238_v32, %v8242_v16  ;;  %v8272_v3 = vshll.u32 %v8010_v2, 16  ;;  %v8266_v59 = vrot.slane %v8264_v21, 5  ;;  %v8278_v54 = vshll.u32 %v8011_v5, 16  ;;  %v18117_v41 = vpop.f32.mrf.mxu1  ;;  %v8019_v48 = vld [vmem:[#allocation2 + $0xe4] sm:$0xf] }
 0x2f6   : > { %v12836_v47 = vcombine.low %v8233_v46, %v8243_v35  ;;  %v8261_v7 = vor.u32 %v8260_v19, %v8256_v4  ;;  %19887 = vst [vmem:[#allocation35_spill] sm:$0xff] %v18117_v41  ;;  %v8252_v27 = vrot.slane %v8251_v22, 4  ;;  %v8271_v31 = vrot.slane %v8269_v11, 4  ;;  %v8015_v35 = vld [vmem:[#allocation2 + $0xcc] sm:$0x1] }
 0x2f7   : > { %v8274_v39 = vrot.slane %v8272_v3, 5  ;;  %v8282_v18 = vshrl.u32 %v8011_v5, 16  ;;  %v8280_v10 = vrot.slane %v8278_v54, 5  ;;  %v8288_v2 = vshll.u32 %v8012_v0, 16  ;;  %v18125_v42 = vpop.f32.mrf.mxu1  ;;  %v8016_v3 = vld [vmem:[#allocation2 + $0xd4] sm:$0xf] }
 0x2f8   : > { %14127 = vmatprep.mubr.msk.bf16.mxu0 %vm5749_vm9, %v12836_v47  ;;  %v8262_v16 = vrot.slane %v8261_v7, 4  ;;  %14098 = vmatmul.mubr.msk.bf16.gmra.mxu1 %vm5749_vm9, %v12804_v37  ;;  %v12805_v32 = vcombine.low %v17911_v6, %v17915_v52  ;;  %19889 = vst [vmem:[#allocation37_spill] sm:$0xff] %v18125_v42  ;;  %v8257_v46 = vsel %vm14674_vm4, %v8252_v27, %v8256_v4  ;;  %v8293_v5 = vshrl.u32 %v8013_v30, 16  ;;  %v8017_v42 = vld [vmem:[#allocation2 + $0xd8] sm:$0xf] }
 0x2f9   : > { %v8275_v19 = vor.u32 %v8274_v39, %v8271_v31  ;;  %v8284_v21 = vrot.slane %v8282_v18, 4  ;;  %v8290_v11 = vrot.slane %v8288_v2, 5  ;;  %v8296_v37 = vshll.u32 %v8013_v30, 16 }
 0x2fa   : > { %v8267_v22 = vsel %vm14674_vm4, %v8262_v16, %v8266_v59  ;;  %14101 = vmatprep.mubr.msk.bf16.mxu1 %vm5749_vm9, %v12805_v32  ;;  %v8302_v0 = vshll.u32 %v8014_v25, 16  ;;  %v18132_v47 = vpop.f32.mrf.mxu0  ;;  %v8295_v54 = vrot.slane %v8293_v5, 4  ;;  %v8306_v39 = vshrl.u32 %v8014_v25, 16  ;;  %v8018_v25 = vld [vmem:[#allocation2 + $0xdc] sm:$0x1] }
 0x2fb   : > { %v12837_v6 = vcombine.low %v8257_v46, %v8267_v22  ;;  %v8276_v52 = vrot.slane %v8275_v19, 4  ;;  %v8285_v7 = vor.u32 %v8284_v21, %v8280_v10  ;;  %v18134_v4 = vpop.f32.mrf.mxu1  ;;  %v8298_v27 = vrot.slane %v8296_v37, 5 }
 0x2fc   : > { %v8304_v31 = vrot.slane %v8302_v0, 5  ;;  %v8312_v18 = vshll.u32 %v8015_v35, 16  ;;  %v18136_v59 = vpop.f32.mrf.mxu0  ;;  %v12806_v2 = vcombine.low %v17929_v62, %v17933_v36  ;;  %v8317_v32 = vshrl.u32 %v8016_v3, 16 }
 0x2fd   : > { %19890 = vst [vmem:[#allocation39_spill] sm:$0xff] %v18136_v59  ;;  %14128 = vmatmul.mubr.msk.bf16.gmra.mxu0 %vm5749_vm9, %v12837_v6  ;;  %v8281_v30 = vsel %vm14674_vm4, %v8276_v52, %v8280_v10  ;;  %v8286_v16 = vrot.slane %v8285_v7, 4  ;;  %v18143_v46 = vpop.f32.mrf.mxu1  ;;  %v8299_v19 = vor.u32 %v8298_v27, %v8295_v54  ;;  %v8308_v21 = vrot.slane %v8306_v39, 4  ;;  %v8020_v27 = vld [vmem:[#allocation2 + $0xe8] sm:$0xf] }
 0x2fe   : > { %19891 = vst [vmem:[#allocation41_spill] sm:$0xff] %v18143_v46  ;;  %v8314_v5 = vrot.slane %v8312_v18, 5  ;;  %v8320_v35 = vshll.u32 %v8016_v3, 16  ;;  %v8319_v37 = vrot.slane %v8317_v32, 4  ;;  %v8326_v0 = vshll.u32 %v8017_v42, 16  ;;  %v18147_v10 = vpop.f32.mrf.mxu0 }
 0x2ff   : > { %v8291_v22 = vsel %vm14674_vm4, %v8286_v16, %v8290_v11  ;;  %v8330_v6 = vshrl.u32 %v8017_v42, 16  ;;  %19892 = vst [vmem:[#allocation21_spill] sm:$0xff] %v18147_v10  ;;  %v18149_v52 = vpop.f32.mrf.mxu1  ;;  %v8300_v36 = vrot.slane %v8299_v19, 4  ;;  %v8309_v7 = vor.u32 %v8308_v21, %v8304_v31 }
 0x300   : > { %19893 = vst [vmem:[#allocation27_spill] sm:$0xff] %v18149_v52  ;;  %v12838_v62 = vcombine.low %v8281_v30, %v8291_v22  ;;  %14102 = vmatmul.mubr.msk.bf16.gmra.mxu1 %vm5749_vm9, %v12806_v2  ;;  %v8322_v54 = vrot.slane %v8320_v35, 5  ;;  %v8328_v39 = vrot.slane %v8326_v0, 5  ;;  %v8336_v18 = vshll.u32 %v8018_v25, 16  ;;  %v8021_v35 = vld [vmem:[#allocation2 + $0xec] sm:$0x1]  ;;  %v18160_v0 = vpop.f32.mrf.mxu0 }
 0x301   : > { %v8332_v3 = vrot.slane %v8330_v6, 4  ;;  %v12807_v11 = vcombine.low %v17949_v45, %v17951_v55  ;;  %v8305_v42 = vsel %vm14674_vm4, %v8300_v36, %v8304_v31  ;;  %v8310_v16 = vrot.slane %v8309_v7, 4  ;;  %v18157_v19 = vpop.f32.mrf.mxu1  ;;  %19895 = vst [vmem:[#allocation14_spill] sm:$0xff] %v18160_v0 }
 0x302   : > { %14131 = vmatprep.mubr.msk.bf16.mxu0 %vm5749_vm9, %v12838_v62  ;;  %v8323_v32 = vor.u32 %v8322_v54, %v8319_v37  ;;  %v8341_v30 = vshrl.u32 %v8019_v48, 16  ;;  %19894 = vst [vmem:[#allocation24_spill] sm:$0xff] %v18157_v19  ;;  %v8338_v2 = vrot.slane %v8336_v18, 5  ;;  %v8344_v22 = vshll.u32 %v8019_v48, 16  ;;  %v8022_v62 = vld [vmem:[#allocation2 + $0xf4] sm:$0xf] }
 0x303   : > { %v8333_v21 = vor.u32 %v8332_v3, %v8328_v39  ;;  %14105 = vmatprep.mubr.msk.bf16.mxu1 %vm5749_vm9, %v12807_v11  ;;  %v8350_v25 = vshll.u32 %v8020_v27, 16  ;;  %v8315_v45 = vsel %vm14674_vm4, %v8310_v16, %v8314_v5  ;;  %v8354_v31 = vshrl.u32 %v8020_v27, 16  ;;  %v8023_v3 = vld [vmem:[#allocation2 + $0xf8] sm:$0xf] }
 0x304   : > { %v8324_v55 = vrot.slane %v8323_v32, 4  ;;  %v8343_v6 = vrot.slane %v8341_v30, 4  ;;  %v12839_v37 = vcombine.low %v8305_v42, %v8315_v45  ;;  %v8346_v7 = vrot.slane %v8344_v22, 5  ;;  %v8024_v42 = vld [vmem:[#allocation2 + $0xfc] sm:$0x1] }
 0x305   : > { %v8334_v36 = vrot.slane %v8333_v21, 4  ;;  %v8352_v54 = vrot.slane %v8350_v25, 5  ;;  %v8356_v11 = vrot.slane %v8354_v31, 4  ;;  %v8360_v48 = vshll.u32 %v8021_v35, 16  ;;  %v18168_v61 = vpop.f32.mrf.mxu1  ;;  %v8711_v30 = vld [vmem:[#allocation2 + $0x20] sm:$0x8] }
 0x306   : > { %v8329_v18 = vsel %vm14674_vm4, %v8324_v55, %v8328_v39  ;;  %v12808_v0 = vcombine.low %v17959_v44, %v17965_v33  ;;  %14132 = vmatmul.mubr.msk.bf16.gmra.mxu0 %vm5749_vm9, %v12839_v37  ;;  %v8347_v27 = vor.u32 %v8346_v7, %v8343_v6  ;;  %v8365_v16 = vshrl.u32 %v8022_v62, 16  ;;  %v18173_v21 = vpop.f32.mrf.mxu0  ;;  %v18176_v33 = vld [vmem:[#allocation2 + $0x24] sm:$0xf] }
 0x307   : > { %v8339_v5 = vsel %vm14674_vm4, %v8334_v36, %v8338_v2  ;;  %v8368_v32 = vshll.u32 %v8022_v62, 16  ;;  %v8357_v22 = vor.u32 %v8356_v11, %v8352_v54  ;;  %v8362_v35 = vrot.slane %v8360_v48, 5  ;;  %v18178_v25 = vpop.f32.mrf.mxu1 }
 0x308   : > { %v12840_v39 = vcombine.low %v8329_v18, %v8339_v5  ;;  %14106 = vmatmul.mubr.msk.bf16.gmra.mxu1 %vm5749_vm9, %v12808_v0  ;;  %v8374_v44 = vshll.u32 %v8023_v3, 16  ;;  %v8348_v45 = vrot.slane %v8347_v27, 4  ;;  %v8367_v55 = vrot.slane %v8365_v16, 4  ;;  %v18180_v31 = vpop.f32.mrf.mxu0  ;;  %v18187_v5 = vld [vmem:[#allocation2 + $0x28] sm:$0xf] }
 0x309   : > { %v8370_v2 = vrot.slane %v8368_v32, 5  ;;  %v8378_v6 = vshrl.u32 %v8023_v3, 16  ;;  %19896 = vst [vmem:[#allocation26_spill] sm:$0xff] %v18180_v31  ;;  %v8358_v62 = vrot.slane %v8357_v22, 4  ;;  %v8384_v36 = vshll.u32 %v8024_v42, 16  ;;  %v18183_v18 = vpop.f32.mrf.mxu1 }
 0x30a   : > { %14135 = vmatprep.mubr.msk.bf16.mxu0 %vm5749_vm9, %v12840_v39  ;;  %v8376_v37 = vrot.slane %v8374_v44, 5  ;;  %v8760_v7 = vshrl.u32 %v8711_v30, 16  ;;  %v8353_v0 = vsel %vm14674_vm4, %v8348_v45, %v8352_v54  ;;  %v8765_v27 = vshrl.u32 %v18176_v33, 16  ;;  %v8025_v3 = vld [vmem:[#allocation2 + $0x104] sm:$0xf]  ;;  %v18190_v16 = vpop.f32.mrf.mxu0 }
 0x30b   : > { %v8371_v11 = vor.u32 %v8370_v2, %v8367_v55  ;;  %v8380_v48 = vrot.slane %v8378_v6, 4  ;;  %19897 = vst [vmem:[#allocation13_spill] sm:$0xff] %v18190_v16  ;;  %v8363_v32 = vsel %vm14674_vm4, %v8358_v62, %v8362_v35  ;;  %v8386_v39 = vrot.slane %v8384_v36, 5  ;;  %v18195_v22 = vpop.f32.mrf.mxu1  ;;  %v8026_v2 = vld [vmem:[#allocation2 + $0x108] sm:$0xf] }
 0x30c   : > { %v12861_v42 = vrot.slane %v8760_v7, 11  ;;  %v8768_v30 = vshll.u32 %v18176_v33, 16  ;;  %19898 = vst [vmem:[#allocation16_spill] sm:$0xff] %v18195_v22  ;;  %v12841_v44 = vcombine.low %v8353_v0, %v8363_v32  ;;  %v8767_v55 = vrot.slane %v8765_v27, 7  ;;  %v18197_v6 = vpop.f32.mrf.mxu0  ;;  %v8714_v16 = vld [vmem:[#allocation2 + $0x30] sm:$0x8] }
 0x30d   : > { %v8372_v54 = vrot.slane %v8371_v11, 4  ;;  %v8381_v45 = vor.u32 %v8380_v48, %v8376_v37  ;;  %19899 = vst [vmem:[#allocation8_spill] sm:$0xff] %v18197_v6  ;;  %v8774_v28 = vshrl.u32 %v18187_v5, 16  ;;  %v8777_v43 = vshll.u32 %v18187_v5, 16  ;;  %v18201_v62 = vpop.f32.mrf.mxu1  ;;  %v18206_v48 = vld [vmem:[#allocation2 + $0x34] sm:$0xf] }
 0x30e   : > { %v8389_v51 = vshrl.u32 %v8025_v3, 16  ;;  %v8392_v35 = vshll.u32 %v8025_v3, 16  ;;  %14136 = vmatmul.mubr.msk.bf16.gmra.mxu0 %vm5749_vm9, %v12841_v44  ;;  %v8770_v0 = vor.u32 %v8768_v30, %v8767_v55  ;;  %v8772_v11 = vrot.slane %v8767_v55, 4  ;;  %v18208_v27 = vpop.f32.mrf.mxu0 }
 0x30f   : > { %v8377_v36 = vsel %vm14674_vm4, %v8372_v54, %v8376_v37  ;;  %v8382_v7 = vrot.slane %v8381_v45, 4  ;;  %v8776_v32 = vrot.slane %v8774_v28, 7  ;;  %v8398_v19 = vshll.u32 %v8026_v2, 16  ;;  %v18210_v3 = vpop.f32.mrf.mxu1  ;;  %v18216_v45 = vld [vmem:[#allocation2 + $0x38] sm:$0xf] }
 0x310   : > { %v8391_v22 = vrot.slane %v8389_v51, 4  ;;  %v8394_v6 = vrot.slane %v8392_v35, 5  ;;  %v8771_v37 = vsel %vm16975_vm12, %v12861_v42, %v8770_v0  ;;  %v8402_v54 = vshrl.u32 %v8026_v2, 16  ;;  %v18218_v55 = vpop.f32.mrf.mxu0 }
 0x311   : > { %v8387_v44 = vsel %vm14674_vm4, %v8382_v7, %v8386_v39  ;;  %v8408_v30 = vshll.u32 %v8027_v12, 16  ;;  %v8779_v28 = vor.u32 %v8777_v43, %v8776_v32  ;;  %v8400_v35 = vrot.slane %v8398_v19, 5  ;;  %v18220_v31 = vpop.f32.mrf.mxu1  ;;  %v8717_v19 = vld [vmem:[#allocation2 + $0x40] sm:$0x8]  ;;  %v18232_v32 = vld [vmem:[#allocation2 + $0x44] sm:$0xf] }
 0x312   : > { %v12842_v52 = vcombine.low %v8377_v36, %v8387_v44  ;;  %v8395_v51 = vor.u32 %v8394_v6, %v8391_v22  ;;  %19900 = vst [vmem:[#allocation43_spill] sm:$0xff] %v18220_v31  ;;  %v8404_v46 = vrot.slane %v8402_v54, 4  ;;  %v8782_v41 = vshrl.u32 %v8714_v16, 16  ;;  %v18223_v7 = vpop.f32.mrf.mxu0  ;;  %v18234_v44 = vld [vmem:[#allocation2 + $0x48] sm:$0xf] }
 0x313   : > { %v8410_v10 = vrot.slane %v8408_v30, 5  ;;  %v8787_v39 = vshrl.u32 %v18206_v48, 16  ;;  %v8780_v12 = vsel %vm16975_vm12, %v8772_v11, %v8779_v28  ;;  %v8790_v2 = vshll.u32 %v18206_v48, 16  ;;  %v18230_v22 = vpop.f32.mrf.mxu1 }
 0x314   : > { %14139 = vmatprep.mubr.msk.bf16.mxu0 %vm5749_vm9, %v12842_v52  ;;  %v8396_v42 = vrot.slane %v8395_v51, 4  ;;  %v8796_v43 = vshrl.u32 %v18216_v45, 16  ;;  %19901 = vst [vmem:[#allocation20_spill] sm:$0xff] %v18230_v22  ;;  %v12879_v6 = vcombine.low %v8771_v37, %v8780_v12  ;;  %v8405_v36 = vor.u32 %v8404_v46, %v8400_v35  ;;  %v18236_v52 = vpop.f32.mrf.mxu0 }
 0x315   : > { %v12862_v16 = vrot.slane %v8782_v41, 11  ;;  %v8789_v0 = vrot.slane %v8787_v39, 7  ;;  %19902 = vst [vmem:[#allocation44_spill] sm:$0xff] %v18236_v52  ;;  %v8799_v30 = vshll.u32 %v18216_v45, 16  ;;  %v18241_v28 = vpop.f32.mrf.mxu1  ;;  %v8804_v51 = vshrl.u32 %v8717_v19, 16 }
 0x316   : > { %v8401_v11 = vsel %vm14674_vm4, %v8396_v42, %v8400_v35  ;;  %v8798_v54 = vrot.slane %v8796_v43, 7  ;;  %14145 = vmatprep.mubr.msk.bf16.mxu1 %vm5749_vm9, %v12879_v6  ;;  %v8406_v37 = vrot.slane %v8405_v36, 4  ;;  %v18244_v39 = vpop.f32.mrf.mxu0  ;;  %v8809_v22 = vshrl.u32 %v18232_v32, 16  ;;  %v8720_v42 = vld [vmem:[#allocation2 + $0x50] sm:$0x8] }
 0x317   : > { %v8792_v46 = vor.u32 %v8790_v2, %v8789_v0  ;;  %v8794_v41 = vrot.slane %v8789_v0, 4  ;;  %v8812_v52 = vshll.u32 %v18232_v32, 16  ;;  %v8818_v35 = vshrl.u32 %v18234_v44, 16  ;;  %v18249_v43 = vpop.f32.mrf.mxu1  ;;  %v18256_v36 = vld [vmem:[#allocation2 + $0x54] sm:$0xf] }
 0x318   : > { %v8801_v12 = vor.u32 %v8799_v30, %v8798_v54  ;;  %v8411_v31 = vsel %vm14674_vm4, %v8406_v37, %v8410_v10  ;;  %v12863_v6 = vrot.slane %v8804_v51, 11  ;;  %v8821_v19 = vshll.u32 %v18234_v44, 16  ;;  %v18258_v0 = vpop.f32.mrf.mxu0 }
 0x319   : > { %v8793_v2 = vsel %vm16975_vm12, %v12862_v16, %v8792_v46  ;;  %v12843_v54 = vcombine.low %v8401_v11, %v8411_v31  ;;  %v8811_v59 = vrot.slane %v8809_v22, 7  ;;  %v8820_v38 = vrot.slane %v8818_v35, 7  ;;  %v18264_v53 = vpop.f32.mrf.mxu1  ;;  %v8723_v22 = vld [vmem:[#allocation2 + $0x60] sm:$0x8] }
 0x31a   : > { %v8802_v30 = vsel %vm16975_vm12, %v8794_v41, %v8801_v12  ;;  %19903 = vst [vmem:[#allocation4_spill] sm:$0xff] %v18264_v53  ;;  %v12914_v16 = vcombine.low %v18176_v33, %v18187_v5  ;;  %v8826_v37 = vshrl.u32 %v8720_v42, 16  ;;  %v18268_v46 = vpop.f32.mrf.mxu0  ;;  %v8831_v41 = vshrl.u32 %v18256_v36, 16  ;;  %v18306_v53 = vld [vmem:[#allocation2 + $0x78] sm:$0xf] }
 0x31b   : > { %v12880_v10 = vcombine.low %v8793_v2, %v8802_v30  ;;  %19904 = vst [vmem:[#allocation28_spill] sm:$0xff] %v18268_v46  ;;  %14140 = vmatmul.mubr.msk.bf16.gmra.mxu0 %vm5749_vm9, %v12843_v54  ;;  %v8814_v51 = vor.u32 %v8812_v52, %v8811_v59  ;;  %v8816_v31 = vrot.slane %v8811_v59, 4  ;;  %v8823_v11 = vor.u32 %v8821_v19, %v8820_v38  ;;  %v18275_v2 = vld [vmem:[#allocation2 + $0x64] sm:$0xf]  ;;  %v18279_v5 = vpop.f32.mrf.mxu1  ;;  %v18287_v19 = vld [vmem:[#allocation2 + $0x68] sm:$0xf] }
 0x31c   : > { %14179 = vmatprep.mubr.msk.bf16.mxu0 %vm5749_vm9, %v12914_v16  ;;  %v12864_v12 = vrot.slane %v8826_v37, 11  ;;  %v8840_v35 = vshrl.u32 %v18262_v34, 16  ;;  %v18277_v33 = vpop.f32.mrf.mxu0  ;;  %19906 = vst [vmem:[#allocation47_spill] sm:$0xff] %v18279_v5  ;;  %v8833_v52 = vrot.slane %v8831_v41, 7  ;;  %v8834_v42 = vshll.u32 %v18256_v36, 16 }
 0x31d   : > { %14146 = vmatmul.mubr.msk.bf16.vlgmr.msra.gmra.mxu1 %vm5749_vm9, %v12880_v10  ;;  %19905 = vst [vmem:[#allocation7_spill] sm:$0xff] %v18277_v33  ;;  %v8815_v38 = vsel %vm16975_vm12, %v12863_v6, %v8814_v51  ;;  %v8824_v59 = vsel %vm16975_vm12, %v8816_v31, %v8823_v11  ;;  %v8843_v10 = vshll.u32 %v18262_v34, 16  ;;  %v8848_v16 = vshrl.u32 %v8723_v22, 16  ;;  %v8726_v41 = vld [vmem:[#allocation2 + $0x70] sm:$0x8] }
 0x31e   : > { %14212 = vmatpush3.bf16.msra.mxu1 %v17993_v13  ;;  %v12881_v54 = vcombine.low %v8815_v38, %v8824_v59  ;;  %v8842_v30 = vrot.slane %v8840_v35, 7  ;;  %v18290_v37 = vpop.f32.mrf.mxu0  ;;  %v8836_v5 = vor.u32 %v8834_v42, %v8833_v52  ;;  %v8853_v13 = vshrl.u32 %v18275_v2, 16  ;;  %v18297_v38 = vld [vmem:[#allocation2 + $0x74] sm:$0xf] }
 0x31f   : > { %v12915_v6 = vcombine.low %v18206_v48, %v18216_v45  ;;  %v8838_v51 = vrot.slane %v8833_v52, 4  ;;  %v8862_v11 = vshrl.u32 %v18287_v19, 16  ;;  %v12916_v59 = vcombine.low %v18232_v32, %v18234_v44 }
 0x320   : > { %14149 = vmatprep.mubr.msk.bf16.mxu1 %vm5749_vm9, %v12881_v54  ;;  %v8845_v31 = vor.u32 %v8843_v10, %v8842_v30  ;;  %v18299_v35 = vpop.f32.mrf.mxu1  ;;  %v18301_v22 = vpop.f32.mrf.mxu0  ;;  %v12865_v42 = vrot.slane %v8848_v16, 11  ;;  %v8855_v33 = vrot.slane %v8853_v13, 7  ;;  %v8856_v54 = vshll.u32 %v18275_v2, 16  ;;  %v18318_v13 = vld [vmem:[#allocation2 + $0x84] sm:$0xf] }
 0x321   : > { %19907 = vst [vmem:[#allocation19_spill] sm:$0xff] %v18299_v35  ;;  %v8837_v48 = vsel %vm16975_vm12, %v12864_v12, %v8836_v5  ;;  %v8864_v52 = vrot.slane %v8862_v11, 7  ;;  %v8865_v30 = vshll.u32 %v18287_v19, 16  ;;  %v8870_v16 = vshrl.u32 %v8726_v41, 16  ;;  %v8729_v11 = vld [vmem:[#allocation2 + $0x80] sm:$0x8] }
 0x322   : > { %v8846_v45 = vsel %vm16975_vm12, %v8838_v51, %v8845_v31  ;;  %v18313_v10 = vpop.f32.mrf.mxu1  ;;  %v18315_v46 = vpop.f32.mrf.mxu0  ;;  %v8858_v44 = vor.u32 %v8856_v54, %v8855_v33  ;;  %v8860_v12 = vrot.slane %v8855_v33, 4  ;;  %v8875_v51 = vshrl.u32 %v18297_v38, 16 }
 0x323   : > { %19908 = vst [vmem:[#allocation11_spill] sm:$0xff] %v18313_v10  ;;  %19909 = vst [vmem:[#allocation15_spill] sm:$0xff] %v18315_v46  ;;  %14180 = vmatmul.mubr.msk.bf16.vlgmr.msra.gmra.mxu0 %vm5749_vm9, %v12915_v6  ;;  %v12882_v32 = vcombine.low %v8837_v48, %v8846_v45  ;;  %v8867_v5 = vor.u32 %v8865_v30, %v8864_v52  ;;  %v8884_v31 = vshrl.u32 %v18306_v53, 16  ;;  %v12866_v54 = vrot.slane %v8870_v16, 11  ;;  %v18329_v48 = vld [vmem:[#allocation2 + $0x88] sm:$0xf] }
 0x324   : > { %14183 = vmatprep.mubr.msk.bf16.mxu0 %vm5749_vm9, %v12916_v59  ;;  %v18323_v35 = vpop.f32.mrf.mxu0  ;;  %v8859_v6 = vsel %vm16975_vm12, %v12865_v42, %v8858_v44  ;;  %v8878_v41 = vshll.u32 %v18297_v38, 16  ;;  %v18331_v59 = vpop.f32.mrf.mxu1  ;;  %v8877_v45 = vrot.slane %v8875_v51, 7  ;;  %v8887_v30 = vshll.u32 %v18306_v53, 16 }
 0x325   : > { %19910 = vst [vmem:[#allocation34_spill] sm:$0xff] %v18323_v35  ;;  %14150 = vmatmul.mubr.msk.bf16.gmra.mxu1 %vm5749_vm9, %v12882_v32  ;;  %19911 = vst [vmem:[#allocation36_spill] sm:$0xff] %v18331_v59  ;;  %v8868_v33 = vsel %vm16975_vm12, %v8860_v12, %v8867_v5  ;;  %v8886_v52 = vrot.slane %v8884_v31, 7  ;;  %v12917_v32 = vcombine.low %v18256_v36, %v18262_v34  ;;  %v8892_v46 = vshrl.u32 %v8729_v11, 16  ;;  %v18340_v59 = vld [vmem:[#allocation2 + $0x94] sm:$0xf] }
 0x326   : > { %v12883_v35 = vcombine.low %v8859_v6, %v8868_v33  ;;  %v8897_v42 = vshrl.u32 %v18318_v13, 16  ;;  %v8880_v44 = vor.u32 %v8878_v41, %v8877_v45  ;;  %v8882_v16 = vrot.slane %v8877_v45, 4  ;;  %v8732_v36 = vld [vmem:[#allocation2 + $0x90] sm:$0x8]  ;;  %v18348_v31 = vpop.f32.mrf.mxu1 }
 0x327   : > { %v8889_v10 = vor.u32 %v8887_v30, %v8886_v52  ;;  %v8906_v17 = vshrl.u32 %v18329_v48, 16  ;;  %v12918_v12 = vcombine.low %v18275_v2, %v18287_v19  ;;  %v12867_v5 = vrot.slane %v8892_v46, 11  ;;  %19912 = vst [vmem:[#allocation46_spill] sm:$0xff] %v18348_v31 }
 0x328   : > { %v18342_v1 = vpop.f32.mrf.mxu0  ;;  %14153 = vmatprep.mubr.msk.bf16.mxu1 %vm5749_vm9, %v12883_v35  ;;  %v8899_v51 = vrot.slane %v8897_v42, 7  ;;  %v8900_v34 = vshll.u32 %v18318_v13, 16  ;;  %v8881_v11 = vsel %vm16975_vm12, %v12866_v54, %v8880_v44  ;;  %v8909_v33 = vshll.u32 %v18329_v48, 16  ;;  %v18355_v35 = vld [vmem:[#allocation2 + $0x98] sm:$0xf] }
 0x329   : > { %v8890_v6 = vsel %vm16975_vm12, %v8882_v16, %v8889_v10  ;;  %v8908_v41 = vrot.slane %v8906_v17, 7  ;;  %v8914_v30 = vshrl.u32 %v8732_v36, 16  ;;  %v8919_v54 = vshrl.u32 %v18340_v59, 16  ;;  %v8735_v42 = vld [vmem:[#allocation2 + $0xa0] sm:$0x8] }
 0x32a   : > { %v18357_v45 = vpop.f32.mrf.mxu0  ;;  %v12884_v46 = vcombine.low %v8881_v11, %v8890_v6  ;;  %v8902_v2 = vor.u32 %v8900_v34, %v8899_v51  ;;  %v8904_v19 = vrot.slane %v8899_v51, 4  ;;  %v8928_v10 = vshrl.u32 %v18355_v35, 16  ;;  %v18366_v44 = vld [vmem:[#allocation2 + $0xa4] sm:$0xf]  ;;  %v18376_v11 = vld [vmem:[#allocation2 + $0xa8] sm:$0xf] }
 0x32b   : > { %14184 = vmatmul.mubr.msk.bf16.gmra.mxu0 %vm5749_vm9, %v12917_v32  ;;  %v8911_v52 = vor.u32 %v8909_v33, %v8908_v41  ;;  %v8921_v51 = vrot.slane %v8919_v54, 7  ;;  %v8922_v34 = vshll.u32 %v18340_v59, 16  ;;  %v8931_v36 = vshll.u32 %v18355_v35, 16 }
 0x32c   : > { %14187 = vmatprep.mubr.msk.bf16.mxu0 %vm5749_vm9, %v12918_v12  ;;  %v8903_v17 = vsel %vm16975_vm12, %v12867_v5, %v8902_v2  ;;  %v18370_v16 = vpop.f32.mrf.mxu0  ;;  %v12868_v5 = vrot.slane %v8914_v30, 11  ;;  %v8930_v41 = vrot.slane %v8928_v10, 7  ;;  %v8936_v33 = vshrl.u32 %v8735_v42, 16  ;;  %v8738_v30 = vld [vmem:[#allocation2 + $0xb0] sm:$0x8] }
 0x32d   : > { %14154 = vmatmul.mubr.msk.bf16.gmra.mxu1 %vm5749_vm9, %v12884_v46  ;;  %19914 = vst [vmem:[#allocation5_spill] sm:$0xff] %v18370_v16  ;;  %v8912_v12 = vsel %vm16975_vm12, %v8904_v19, %v8911_v52  ;;  %v12919_v2 = vcombine.low %v18297_v38, %v18306_v53  ;;  %v8924_v31 = vor.u32 %v8922_v34, %v8921_v51  ;;  %v8941_v16 = vshrl.u32 %v18366_v44, 16  ;;  %v18387_v10 = vld [vmem:[#allocation2 + $0xb4] sm:$0xf]  ;;  %v18393_v34 = vld [vmem:[#allocation2 + $0xb8] sm:$0xf] }
 0x32e   : > { %v18368_v32 = vpop.f32.mrf.mxu1  ;;  %v12885_v6 = vcombine.low %v8903_v17, %v8912_v12  ;;  %v8926_v19 = vrot.slane %v8921_v51, 4  ;;  %v8933_v52 = vor.u32 %v8931_v36, %v8930_v41  ;;  %v12920_v54 = vcombine.low %v18318_v13, %v18329_v48  ;;  %v18389_v42 = vpop.f32.mrf.mxu0 }
 0x32f   : > { %19913 = vst [vmem:[#allocation45_spill] sm:$0xff] %v18368_v32  ;;  %v8950_v17 = vshrl.u32 %v18376_v11, 16  ;;  %19916 = vst [vmem:[#allocation17_spill] sm:$0xff] %v18389_v42  ;;  %v12869_v12 = vrot.slane %v8936_v33, 11  ;;  %v8944_v53 = vshll.u32 %v18366_v44, 16  ;;  %v8953_v38 = vshll.u32 %v18376_v11, 16 }
 0x330   : > { %v18378_v46 = vpop.f32.mrf.mxu1  ;;  %14157 = vmatprep.mubr.msk.bf16.mxu1 %vm5749_vm9, %v12885_v6  ;;  %v8925_v13 = vsel %vm16975_vm12, %v12868_v5, %v8924_v31  ;;  %v8934_v48 = vsel %vm16975_vm12, %v8926_v19, %v8933_v52  ;;  %v18402_v36 = vadd.f32 %v18132_v47, %v18104_v20  ;;  %v8958_v33 = vshrl.u32 %v8738_v30, 16  ;;  %v18407_v42 = vld [vmem:[#allocation2 + $0xc4] sm:$0xf]  ;;  %v8741_v19 = vld [vmem:[#allocation2 + $0xc0] sm:$0x8] }
 0x331   : > { %19915 = vst [vmem:[#allocation32_spill] sm:$0xff] %v18378_v46  ;;  %v8943_v46 = vrot.slane %v8941_v16, 7  ;;  %v8952_v51 = vrot.slane %v8950_v17, 7  ;;  %v12886_v6 = vcombine.low %v8925_v13, %v8934_v48  ;;  %v8963_v31 = vshrl.u32 %v18387_v10, 16  ;;  %v18417_v17 = vld [vmem:[#allocation2 + $0xc8] sm:$0xf] }
 0x332   : > { %19917 = vst [vmem:[#allocation23_spill] sm:$0xff] %v18402_v36  ;;  %v18404_v16 = vpop.f32.mrf.mxu1  ;;  %v8972_v5 = vshrl.u32 %v18393_v34, 16  ;;  %v12870_v47 = vrot.slane %v8958_v33, 11 }
 0x333   : > { %14188 = vmatmul.mubr.msk.bf16.gmra.mxu0 %vm5749_vm9, %v12919_v2  ;;  %19918 = vst [vmem:[#allocation38_spill] sm:$0xff] %v18404_v16  ;;  %v8946_v41 = vor.u32 %v8944_v53, %v8943_v46  ;;  %v8948_v2 = vrot.slane %v8943_v46, 4  ;;  %v8955_v32 = vor.u32 %v8953_v38, %v8952_v51  ;;  %v8965_v30 = vrot.slane %v8963_v31, 7  ;;  %v8744_v16 = vld [vmem:[#allocation2 + $0xd0] sm:$0x8] }
 0x334   : > { %14191 = vmatprep.mubr.msk.bf16.mxu0 %vm5749_vm9, %v12920_v54  ;;  %v8966_v54 = vshll.u32 %v18387_v10, 16  ;;  %v8974_v53 = vrot.slane %v8972_v5, 7  ;;  %v8975_v38 = vshll.u32 %v18393_v34, 16  ;;  %v18422_v13 = vpop.f32.mrf.mxu1  ;;  %v12921_v51 = vcombine.low %v18340_v59, %v18355_v35  ;;  %v18434_v35 = vld [vmem:[#allocation2 + $0xd4] sm:$0xf] }
 0x335   : > { %14158 = vmatmul.mubr.msk.bf16.gmra.mxu1 %vm5749_vm9, %v12886_v6  ;;  %v8947_v20 = vsel %vm16975_vm12, %v12869_v12, %v8946_v41  ;;  %v8956_v46 = vsel %vm16975_vm12, %v8948_v2, %v8955_v32  ;;  %19920 = vst [vmem:[#allocation25_spill] sm:$0xff] %v18422_v13  ;;  %v8980_v6 = vshrl.u32 %v8741_v19, 16  ;;  %v8985_v12 = vshrl.u32 %v18407_v42, 16 }
 0x336   : > { %v18411_v52 = vpop.f32.mrf.mxu0  ;;  %v12887_v48 = vcombine.low %v8947_v20, %v8956_v46  ;;  %v8968_v41 = vor.u32 %v8966_v54, %v8965_v30  ;;  %v8970_v33 = vrot.slane %v8965_v30, 4  ;;  %v8977_v36 = vor.u32 %v8975_v38, %v8974_v53  ;;  %v18442_v30 = vld [vmem:[#allocation2 + $0xd8] sm:$0xf] }
 0x337   : > { %19919 = vst [vmem:[#allocation6_spill] sm:$0xff] %v18411_v52  ;;  %v8994_v52 = vshrl.u32 %v18417_v17, 16  ;;  %v12922_v2 = vcombine.low %v18366_v44, %v18376_v11  ;;  %v12871_v31 = vrot.slane %v8980_v6, 11  ;;  %v8987_v5 = vrot.slane %v8985_v12, 7 }
 0x338   : > { %v18428_v32 = vpop.f32.mrf.mxu0  ;;  %14161 = vmatprep.mubr.msk.bf16.mxu1 %vm5749_vm9, %v12887_v48  ;;  %v8988_v59 = vshll.u32 %v18407_v42, 16  ;;  %v8969_v19 = vsel %vm16975_vm12, %v12870_v47, %v8968_v41  ;;  %v8978_v20 = vsel %vm16975_vm12, %v8970_v33, %v8977_v36  ;;  %v8997_v46 = vshll.u32 %v18417_v17, 16 }
 0x339   : > { %v8996_v54 = vrot.slane %v8994_v52, 7  ;;  %v12888_v11 = vcombine.low %v8969_v19, %v8978_v20  ;;  %v18449_v38 = vadd.f32 %v18173_v21, %v18134_v4  ;;  %v8992_v48 = vrot.slane %v8987_v5, 4  ;;  %v8747_v52 = vld [vmem:[#allocation2 + $0xe0] sm:$0x8]  ;;  %v18462_v21 = vld [vmem:[#allocation2 + $0xe4] sm:$0xf] }
 0x33a   : > { %v8990_v53 = vor.u32 %v8988_v59, %v8987_v5  ;;  %v9007_v36 = vshrl.u32 %v18434_v35, 16  ;;  %v18452_v6 = vpop.f32.mrf.mxu0  ;;  %v18456_v12 = vadd.f32 %v18010_v24, %v17980_v26  ;;  %v9016_v4 = vshrl.u32 %v18442_v30, 16  ;;  %v18468_v59 = vld [vmem:[#allocation2 + $0xe8] sm:$0xf] }
 0x33b   : > { %14192 = vmatmul.mubr.msk.bf16.gmra.mxu0 %vm5749_vm9, %v12921_v51  ;;  %v18444_v44 = vpop.f32.mrf.mxu1  ;;  %v8999_v47 = vor.u32 %v8997_v46, %v8996_v54  ;;  %v9002_v51 = vshrl.u32 %v8744_v16, 16  ;;  %v9019_v5 = vshll.u32 %v18442_v30, 16  ;;  %v18474_v54 = vadd.f32 %v18017_v58, %v17983_v50  ;;  %v18485_v50 = vld [vmem:[#allocation2 + $0xf4] sm:$0xf] }
 0x33c   : > { %14195 = vmatprep.mubr.msk.bf16.mxu0 %vm5749_vm9, %v12922_v2  ;;  %v8991_v41 = vsel %vm16975_vm12, %v12871_v31, %v8990_v53  ;;  %v9009_v33 = vrot.slane %v9007_v36, 7  ;;  %v9010_v2 = vshll.u32 %v18434_v35, 16  ;;  %v9018_v20 = vrot.slane %v9016_v4, 7 }
 0x33d   : > { %14162 = vmatmul.mubr.msk.bf16.gmra.mxu1 %vm5749_vm9, %v12888_v11  ;;  %v9000_v16 = vsel %vm16975_vm12, %v8992_v48, %v8999_v47  ;;  %v18470_v26 = vpop.f32.mrf.mxu1  ;;  %v12872_v19 = vrot.slane %v9002_v51, 11  ;;  %v9024_v31 = vshrl.u32 %v8747_v52, 16  ;;  %v12923_v46 = vcombine.low %v18387_v10, %v18393_v34  ;;  %v18479_v48 = vpop.f32.mrf.mxu0 }
 0x33e   : > { %v12889_v24 = vcombine.low %v8991_v41, %v9000_v16  ;;  %v9012_v11 = vor.u32 %v9010_v2, %v9009_v33  ;;  %v9029_v53 = vshrl.u32 %v18462_v21, 16  ;;  %19921 = vst [vmem:[#allocation48_spill] sm:$0xff] %v18479_v48  ;;  %v9014_v47 = vrot.slane %v9009_v33, 4  ;;  %v8750_v41 = vld [vmem:[#allocation2 + $0xf0] sm:$0x8] }
 0x33f   : > { %v9021_v36 = vor.u32 %v9019_v5, %v9018_v20  ;;  %v12924_v51 = vcombine.low %v18407_v42, %v18417_v17  ;;  %v9038_v52 = vshrl.u32 %v18468_v59, 16  ;;  %v12873_v58 = vrot.slane %v9024_v31, 11  ;;  %v18490_v16 = vld [vmem:[#allocation2 + $0xf8] sm:$0xf]  ;;  %v18492_v33 = vpop.f32.mrf.mxu1 }
 0x340   : > { %14165 = vmatprep.mubr.msk.bf16.mxu1 %vm5749_vm9, %v12889_v24  ;;  %v9031_v10 = vrot.slane %v9029_v53, 7  ;;  %v9032_v34 = vshll.u32 %v18462_v21, 16  ;;  %v9041_v4 = vshll.u32 %v18468_v59, 16  ;;  %v9013_v42 = vsel %vm16975_vm12, %v12872_v19, %v9012_v11  ;;  %v18505_v53 = vld [vmem:[#allocation2 + $0x104] sm:$0xf] }
 0x341   : > { %v9022_v17 = vsel %vm16975_vm12, %v9014_v47, %v9021_v36  ;;  %v9040_v2 = vrot.slane %v9038_v52, 7  ;;  %v18501_v5 = vadd.f32 %v18208_v27, %v18168_v61  ;;  %v12925_v31 = vcombine.low %v18434_v35, %v18442_v30  ;;  %v18516_v52 = vld [vmem:[#allocation2 + $0x108] sm:$0xf] }
 0x342   : > { %v12890_v24 = vcombine.low %v9013_v42, %v9022_v17  ;;  %v9034_v20 = vor.u32 %v9032_v34, %v9031_v10  ;;  %v9036_v19 = vrot.slane %v9031_v10, 4  ;;  %v9051_v47 = vshrl.u32 %v18485_v50, 16 }
 0x343   : > { %14196 = vmatmul.mubr.msk.bf16.gmra.mxu0 %vm5749_vm9, %v12923_v46  ;;  %v9046_v46 = vshrl.u32 %v8750_v41, 16  ;;  %v9043_v11 = vor.u32 %v9041_v4, %v9040_v2  ;;  %v9060_v36 = vshrl.u32 %v18490_v16, 16  ;;  %v9054_v35 = vshll.u32 %v18485_v50, 16  ;;  %v18518_v41 = vpop.f32.mrf.mxu1 }
 0x344   : > { %14199 = vmatprep.mubr.msk.bf16.mxu0 %vm5749_vm9, %v12924_v51  ;;  %v8753_v51 = vld [vmem:[#allocation2 + $0x100] sm:$0x8]  ;;  %v9035_v61 = vsel %vm16975_vm12, %v12873_v58, %v9034_v20  ;;  %v9063_v30 = vshll.u32 %v18490_v16, 16  ;;  %19922 = vst [vmem:[#allocation49_spill] sm:$0xff] %v18518_v41  ;;  %v9053_v34 = vrot.slane %v9051_v47, 7  ;;  %v18524_v42 = vadd.f32 %v18218_v55, %v18178_v25 }
 0x345   : > { %v18507_v48 = vpop.f32.mrf.mxu0  ;;  %14166 = vmatmul.mubr.msk.bf16.gmra.mxu1 %vm5749_vm9, %v12890_v24  ;;  %v12874_v27 = vrot.slane %v9046_v46, 11  ;;  %v9044_v10 = vsel %vm16975_vm12, %v9036_v19, %v9043_v11  ;;  %v9062_v4 = vrot.slane %v9060_v36, 7  ;;  %v12926_v2 = vcombine.low %v18462_v21, %v18468_v59  ;;  %v8756_v11 = vld [vmem:[#allocation2 + $0x110] sm:$0x8]  ;;  %v18539_v59 = vld [vmem:[#allocation2 + $0x114] sm:$0xf] }
 0x346   : > { %v12891_v58 = vcombine.low %v9035_v61, %v9044_v10  ;;  %v9068_v24 = vshrl.u32 %v8753_v51, 16  ;;  %v9073_v20 = vshrl.u32 %v18505_v53, 16  ;;  %v9056_v46 = vor.u32 %v9054_v35, %v9053_v34 }
 0x347   : > { %v18526_v17 = vpop.f32.mrf.mxu0  ;;  %v9058_v41 = vrot.slane %v9053_v34, 4  ;;  %v9065_v13 = vor.u32 %v9063_v30, %v9062_v4  ;;  %v9082_v19 = vshrl.u32 %v18516_v52, 16  ;;  %v9076_v47 = vshll.u32 %v18505_v53, 16  ;;  %v18549_v30 = vld [vmem:[#allocation2 + $0x118] sm:$0xf] }
 0x348   : > { %14169 = vmatprep.mubr.msk.bf16.mxu1 %vm5749_vm9, %v12891_v58  ;;  %v12875_v25 = vrot.slane %v9068_v24, 11  ;;  %v9075_v55 = vrot.slane %v9073_v20, 7  ;;  %v18537_v21 = vadd.f32 %v18223_v7, %v18183_v18  ;;  %v9057_v51 = vsel %vm16975_vm12, %v12874_v27, %v9056_v46 }
 0x349   : > { %v9066_v61 = vsel %vm16975_vm12, %v9058_v41, %v9065_v13  ;;  %v9085_v35 = vshll.u32 %v18516_v52, 16  ;;  %v18551_v10 = vpop.f32.mrf.mxu0  ;;  %v18555_v4 = vadd.f32 %v18244_v39, %v18201_v62  ;;  %v12927_v13 = vcombine.low %v18485_v50, %v18490_v16 }
 0x34a   : > { %19923 = vst [vmem:[#allocation50_spill] sm:$0xff] %v18537_v21  ;;  %v12892_v18 = vcombine.low %v9057_v51, %v9066_v61  ;;  %v9078_v7 = vor.u32 %v9076_v47, %v9075_v55  ;;  %v9080_v34 = vrot.slane %v9075_v55, 4  ;;  %v9090_v41 = vshrl.u32 %v8756_v11, 16  ;;  %v9741_v47 = vld [vmem:[#allocation2 + $0x2c] sm:$0x1] }
 0x34b   : > { %14200 = vmatmul.mubr.msk.bf16.gmra.mxu0 %vm5749_vm9, %v12925_v31  ;;  %v18541_v36 = vpop.f32.mrf.mxu1  ;;  %v9084_v31 = vrot.slane %v9082_v19, 7  ;;  %19924 = vst [vmem:[#allocation51_spill] sm:$0xff] %v18555_v4  ;;  %v9095_v58 = vshrl.u32 %v18539_v59, 16  ;;  %v9098_v46 = vshll.u32 %v18539_v59, 16  ;;  %v9104_v62 = vshrl.u32 %v18549_v30, 16  ;;  %v18572_v51 = vpop.f32.mrf.mxu0 }
 0x34c   : > { %14203 = vmatprep.mubr.msk.bf16.mxu0 %vm5749_vm9, %v12926_v2  ;;  %v9739_v2 = vld [vmem:[#allocation2 + $0x24] sm:$0xf]  ;;  %v9079_v20 = vsel %vm16975_vm12, %v12875_v25, %v9078_v7  ;;  %v9107_v39 = vshll.u32 %v18549_v30, 16  ;;  %v9740_v19 = vld [vmem:[#allocation2 + $0x28] sm:$0xf]  ;;  %v12876_v16 = vrot.slane %v9090_v41, 11  ;;  %v12928_v55 = vcombine.low %v18505_v53, %v18516_v52 }
 0x34d   : > { %v9087_v27 = vor.u32 %v9085_v35, %v9084_v31  ;;  %v18560_v24 = vpop.f32.mrf.mxu1  ;;  %14170 = vmatmul.mubr.msk.bf16.gmra.mxu1 %vm5749_vm9, %v12892_v18  ;;  %v9097_v11 = vrot.slane %v9095_v58, 7  ;;  %19925 = vst [vmem:[#allocation52_spill] sm:$0xff] %v18572_v51  ;;  %v9106_v25 = vrot.slane %v9104_v62, 7  ;;  %v18576_v31 = vadd.f32 %v18258_v0, %v18210_v3 }
 0x34e   : > { %v9788_v35 = vshrl.u32 %v9739_v2, 16  ;;  %v9791_v4 = vshll.u32 %v9739_v2, 16  ;;  %v9797_v21 = vshll.u32 %v9740_v19, 16  ;;  %v9807_v41 = vshll.u32 %v9741_v47, 16 }
 0x34f   : > { %v9088_v50 = vsel %vm16975_vm12, %v9080_v34, %v9087_v27  ;;  %v9100_v18 = vor.u32 %v9098_v46, %v9097_v11  ;;  %v9102_v7 = vrot.slane %v9097_v11, 4  ;;  %v18578_v34 = vpop.f32.mrf.mxu1  ;;  %v9109_v53 = vor.u32 %v9107_v39, %v9106_v25  ;;  %v9743_v39 = vld [vmem:[#allocation2 + $0x38] sm:$0xf]  ;;  %v9745_v25 = vld [vmem:[#allocation2 + $0x44] sm:$0xf] }
 0x350   : > { %v12893_v61 = vcombine.low %v9079_v20, %v9088_v50  ;;  %v9790_v52 = vrot.slane %v9788_v35, 4  ;;  %v9801_v27 = vshrl.u32 %v9740_v19, 16  ;;  %v18584_v58 = vadd.f32 %v18023_v60, %v17995_v56  ;;  %v9742_v20 = vld [vmem:[#allocation2 + $0x34] sm:$0xf]  ;;  %v9744_v19 = vld [vmem:[#allocation2 + $0x3c] sm:$0x1] }
 0x351   : > { %v9101_v3 = vsel %vm16975_vm12, %v12876_v16, %v9100_v18  ;;  %v9793_v0 = vrot.slane %v9791_v4, 5  ;;  %v9799_v2 = vrot.slane %v9797_v21, 5  ;;  %v18597_v62 = vadd.f32 %v18060_v57, %v18026_v49  ;;  %v18605_v11 = vpop.f32.mrf.mxu1 }
 0x352   : > { %14173 = vmatprep.mubr.msk.bf16.mxu1 %vm5749_vm9, %v12893_v61  ;;  %v9110_v56 = vsel %vm16975_vm12, %v9102_v7, %v9109_v53  ;;  %v9803_v60 = vrot.slane %v9801_v27, 4  ;;  %v9809_v21 = vrot.slane %v9807_v41, 5  ;;  %v18603_v16 = vadd.f32 %v18290_v37, %v18241_v28  ;;  %19926 = vst [vmem:[#allocation53_spill] sm:$0xff] %v18605_v11  ;;  %v9746_v53 = vld [vmem:[#allocation2 + $0x48] sm:$0xf] }
 0x353   : > { %14204 = vmatmul.mubr.msk.bf16.gmra.mxu0 %vm5749_vm9, %v12927_v13  ;;  %v18593_v13 = vadd.f32 %v18048_v23, %v18021_v8  ;;  %v12894_v50 = vcombine.low %v9101_v3, %v9110_v56  ;;  %v9794_v4 = vor.u32 %v9793_v0, %v9790_v52  ;;  %v12929_v49 = vcombine.low %v18539_v59, %v18549_v30  ;;  %v9747_v41 = vld [vmem:[#allocation2 + $0x4c] sm:$0x1]  ;;  %v9757_v11 = vld [vmem:[#allocation2 + $0x84] sm:$0xf] }
 0x354   : > { %14207 = vmatprep.mubr.msk.bf16.mxu0 %vm5749_vm9, %v12928_v55  ;;  %v18589_v46 = vpop.f32.mrf.mxu0  ;;  %v9804_v8 = vor.u32 %v9803_v60, %v9799_v2  ;;  %v9812_v23 = vshrl.u32 %v9742_v20, 16  ;;  %v9815_v57 = vshll.u32 %v9742_v20, 16  ;;  %v9821_v55 = vshll.u32 %v9743_v39, 16 }
 0x355   : > { %14174 = vmatmul.mubr.msk.bf16.gmra.mxu1 %vm5749_vm9, %v12894_v50  ;;  %v9795_v29 = vrot.slane %v9794_v4, 4  ;;  %v9825_v47 = vshrl.u32 %v9743_v39, 16  ;;  %v9831_v61 = vshll.u32 %v9744_v19, 16  ;;  %v18614_v7 = vadd.f32 %v18301_v22, %v18249_v43 }
 0x356   : > { %v18610_v35 = vpop.f32.mrf.mxu0  ;;  %v9805_v18 = vrot.slane %v9804_v8, 4  ;;  %v9814_v28 = vrot.slane %v9812_v23, 4  ;;  %v9817_v37 = vrot.slane %v9815_v57, 5  ;;  %v9823_v30 = vrot.slane %v9821_v55, 5 }
 0x357   : > { %v9800_v59 = vsel %vm14674_vm4, %v9795_v29, %v9799_v2  ;;  %v9827_v52 = vrot.slane %v9825_v47, 4  ;;  %v9833_v27 = vrot.slane %v9831_v61, 5  ;;  %v9836_v56 = vshrl.u32 %v9745_v25, 16  ;;  %v19927_v61 = vld [vmem:[#allocation42_spill] sm:$0xff] }
 0x358   : > { %v9810_v0 = vsel %vm14674_vm4, %v9805_v18, %v9809_v21  ;;  %v9818_v20 = vor.u32 %v9817_v37, %v9814_v28  ;;  %v9839_v60 = vshll.u32 %v9745_v25, 16  ;;  %v9845_v39 = vshll.u32 %v9746_v53, 16  ;;  %v18623_v50 = vpop.f32.mrf.mxu0  ;;  %v19928_v25 = vld [vmem:[#allocation30_spill] sm:$0xff]  ;;  %v19929_v28 = vld [vmem:[#allocation19_spill] sm:$0xff] }
 0x359   : > { %v12949_v43 = vcombine.low %v9800_v59, %v9810_v0  ;;  %v9828_v22 = vor.u32 %v9827_v52, %v9823_v30  ;;  %v9849_v19 = vshrl.u32 %v9746_v53, 16  ;;  %v9838_v4 = vrot.slane %v9836_v56, 4  ;;  %v9748_v59 = vld [vmem:[#allocation2 + $0x54] sm:$0xf]  ;;  %v9749_v0 = vld [vmem:[#allocation2 + $0x58] sm:$0xf] }
 0x35a   : > { %v18618_v3 = vpop.f32.mrf.mxu1  ;;  %v9819_v2 = vrot.slane %v9818_v20, 4  ;;  %v9841_v8 = vrot.slane %v9839_v60, 5  ;;  %v9855_v23 = vshll.u32 %v9747_v41, 16  ;;  %v18629_v21 = vadd.f32 %v18070_v15, %v18035_v63  ;;  %v19931_v20 = vld [vmem:[#allocation18_spill] sm:$0xff]  ;;  %v19932_v56 = vld [vmem:[#allocation31_spill] sm:$0xff] }
 0x35b   : > { %14208 = vmatmul.mubr.msk.bf16.gmra.mxu0 %vm5749_vm9, %v12929_v49  ;;  %14213 = vmatprep.mubr.msk.bf16.mxu1 %vm5749_vm9, %v12949_v43  ;;  %v9829_v49 = vrot.slane %v9828_v22, 4  ;;  %v9847_v29 = vrot.slane %v9845_v39, 5  ;;  %v9851_v55 = vrot.slane %v9849_v19, 4  ;;  %v18634_v47 = vadd.f32 %v18091_v40, %v18058_v9  ;;  %v9750_v9 = vld [vmem:[#allocation2 + $0x5c] sm:$0x1]  ;;  %v18646_v40 = vpop.f32.mrf.mxu0 }
 0x35c   : > { %v18625_v57 = vpop.f32.mrf.mxu1  ;;  %v18638_v18 = vadd.f32 %v19928_v25, %v19927_v61  ;;  %v6922_v37 = vadd.f32 %v19929_v28, %v18456_v12  ;;  %v9842_v53 = vor.u32 %v9841_v8, %v9838_v4  ;;  %v9824_v63 = vsel %vm14674_vm4, %v9819_v2, %v9823_v30  ;;  %19930 = vst [vmem:[#allocation42_spill] sm:$0xff] %v18646_v40  ;;  %v9751_v8 = vld [vmem:[#allocation2 + $0x64] sm:$0xf]  ;;  %v9752_v25 = vld [vmem:[#allocation2 + $0x68] sm:$0xf] }
 0x35d   : > { %v9834_v15 = vsel %vm14674_vm4, %v9829_v49, %v9833_v27  ;;  %v9852_v52 = vor.u32 %v9851_v55, %v9847_v29  ;;  %v9857_v41 = vrot.slane %v9855_v23, 5  ;;  %v18650_v60 = vadd.f32 %v19932_v56, %v19931_v20  ;;  %v19933_v27 = vld [vmem:[#allocation11_spill] sm:$0xff] }
 0x35e   : > { %v12950_v43 = vcombine.low %v9824_v63, %v9834_v15  ;;  %v9843_v12 = vrot.slane %v9842_v53, 4  ;;  %v18653_v22 = vadd.f32 %v18342_v1, %v6922_v37  ;;  %v18655_v39 = vpop.f32.mrf.mxu1  ;;  %v6920_v19 = vadd.f32 %v19933_v27, %v18474_v54  ;;  %v9753_v54 = vld [vmem:[#allocation2 + $0x6c] sm:$0x1]  ;;  %v19934_v15 = vld [vmem:[#allocation36_spill] sm:$0xff] }
 0x35f   : > { %v9853_v30 = vrot.slane %v9852_v52, 4  ;;  %v9860_v2 = vshrl.u32 %v9748_v59, 16  ;;  %v9863_v4 = vshll.u32 %v9748_v59, 16  ;;  %v9869_v49 = vshll.u32 %v9749_v0, 16 }
 0x360   : > { %14214 = vmatmul.mubr.msk.bf16.vlgmr.msra.gmra.mxu1 %vm5749_vm9, %v12950_v43  ;;  %v9848_v23 = vsel %vm14674_vm4, %v9843_v12, %v9847_v29  ;;  %v9873_v55 = vshrl.u32 %v9749_v0, 16  ;;  %v9879_v61 = vshll.u32 %v9750_v9, 16  ;;  %v18665_v53 = vadd.f32 %v18357_v45, %v6920_v19  ;;  %v18671_v0 = vpop.f32.mrf.mxu1 }
 0x361   : > { %v9858_v1 = vsel %vm14674_vm4, %v9853_v30, %v9857_v41  ;;  %v9862_v28 = vrot.slane %v9860_v2, 4  ;;  %v9865_v37 = vrot.slane %v9863_v4, 5  ;;  %v6923_v52 = vadd.f32 %v19934_v15, %v18584_v58  ;;  %19935 = vst [vmem:[#allocation30_spill] sm:$0xff] %v18671_v0  ;;  %v9754_v15 = vld [vmem:[#allocation2 + $0x74] sm:$0xf] }
 0x362   : > { %v12951_v63 = vcombine.low %v9848_v23, %v9858_v1  ;;  %v9871_v29 = vrot.slane %v9869_v49, 5  ;;  %v9875_v20 = vrot.slane %v9873_v55, 4  ;;  %v9884_v56 = vshrl.u32 %v9751_v8, 16  ;;  %v19936_v49 = vld [vmem:[#allocation45_spill] sm:$0xff] }
 0x363   : > { %v9866_v9 = vor.u32 %v9865_v37, %v9862_v28  ;;  %v9887_v43 = vshll.u32 %v9751_v8, 16  ;;  %v9893_v41 = vshll.u32 %v9752_v25, 16  ;;  %v9881_v30 = vrot.slane %v9879_v61, 5  ;;  %v19937_v37 = vld [vmem:[#allocation5_spill] sm:$0xff] }
 0x364   : > { %v18667_v59 = vpop.f32.mrf.mxu0  ;;  %14217 = vmatprep.mubr.msk.bf16.mxu1 %vm5749_vm9, %v12951_v63  ;;  %v9876_v45 = vor.u32 %v9875_v20, %v9871_v29  ;;  %v9897_v27 = vshrl.u32 %v9752_v25, 16  ;;  %v9903_v19 = vshll.u32 %v9753_v54, 16  ;;  %v9886_v4 = vrot.slane %v9884_v56, 4  ;;  %v19938_v63 = vld [vmem:[#allocation32_spill] sm:$0xff] }
 0x365   : > { %v9867_v2 = vrot.slane %v9866_v9, 4  ;;  %v9889_v23 = vrot.slane %v9887_v43, 5  ;;  %v9895_v58 = vrot.slane %v9893_v41, 5  ;;  %v6926_v55 = vadd.f32 %v19936_v49, %v18593_v13  ;;  %v9755_v9 = vld [vmem:[#allocation2 + $0x78] sm:$0xf] }
 0x366   : > { %v18673_v12 = vpop.f32.mrf.mxu0  ;;  %v9877_v1 = vrot.slane %v9876_v45, 4  ;;  %v9899_v28 = vrot.slane %v9897_v27, 4  ;;  %v18679_v8 = vadd.f32 %v19937_v37, %v6923_v52  ;;  %v9905_v54 = vrot.slane %v9903_v19, 5  ;;  %v19939_v52 = vld [vmem:[#allocation38_spill] sm:$0xff]  ;;  %v9756_v49 = vld [vmem:[#allocation2 + $0x7c] sm:$0x1] }
 0x367   : > { %v9872_v61 = vsel %vm14674_vm4, %v9867_v2, %v9871_v29  ;;  %v9890_v25 = vor.u32 %v9889_v23, %v9886_v4  ;;  %v6924_v20 = vadd.f32 %v19938_v63, %v18597_v62  ;;  %v6927_v41 = vadd.f32 %v19939_v52, %v18629_v21  ;;  %v19940_v45 = vld [vmem:[#allocation6_spill] sm:$0xff] }
 0x368   : > { %v18687_v56 = vpop.f32.mrf.mxu0  ;;  %v9882_v13 = vsel %vm14674_vm4, %v9877_v1, %v9881_v30  ;;  %v9900_v43 = vor.u32 %v9899_v28, %v9895_v58  ;;  %v18694_v27 = vadd.f32 %v19940_v45, %v6926_v55  ;;  %v6930_v19 = vadd.f32 %v18444_v44, %v18634_v47 }
 0x369   : > { %v12952_v29 = vcombine.low %v9872_v61, %v9882_v13  ;;  %v9891_v2 = vrot.slane %v9890_v25, 4  ;;  %v9908_v62 = vshrl.u32 %v9754_v15, 16  ;;  %v9911_v23 = vshll.u32 %v9754_v15, 16  ;;  %v9758_v61 = vld [vmem:[#allocation2 + $0x88] sm:$0xf] }
 0x36a   : > { %v18681_v40 = vpop.f32.mrf.mxu1  ;;  %v9901_v4 = vrot.slane %v9900_v43, 4  ;;  %v9917_v37 = vshll.u32 %v9755_v9, 16  ;;  %v9921_v63 = vshrl.u32 %v9755_v9, 16  ;;  %v9927_v1 = vshll.u32 %v9756_v49, 16  ;;  %v18706_v44 = vpop.f32.mrf.mxu0  ;;  %v9759_v13 = vld [vmem:[#allocation2 + $0x8c] sm:$0x1] }
 0x36b   : > { %14218 = vmatmul.mubr.msk.bf16.gmra.mxu1 %vm5749_vm9, %v12952_v29  ;;  %v9896_v21 = vsel %vm14674_vm4, %v9891_v2, %v9895_v58  ;;  %v9910_v55 = vrot.slane %v9908_v62, 4  ;;  %v18704_v28 = vadd.f32 %v18428_v32, %v6924_v20  ;;  %19941 = vst [vmem:[#allocation19_spill] sm:$0xff] %v18706_v44  ;;  %v9913_v15 = vrot.slane %v9911_v23, 5 }
 0x36c   : > { %v18698_v30 = vpop.f32.mrf.mxu1  ;;  %v9906_v47 = vsel %vm14674_vm4, %v9901_v4, %v9905_v54  ;;  %v9919_v25 = vrot.slane %v9917_v37, 5  ;;  %v9923_v9 = vrot.slane %v9921_v63, 4  ;;  %v9929_v52 = vrot.slane %v9927_v1, 5 }
 0x36d   : > { %v12953_v43 = vcombine.low %v9896_v21, %v9906_v47  ;;  %v9932_v45 = vshrl.u32 %v9757_v11, 16  ;;  %v9935_v29 = vshll.u32 %v9757_v11, 16  ;;  %v9914_v58 = vor.u32 %v9913_v15, %v9910_v55  ;;  %v19942_v21 = vld [vmem:[#allocation33_spill] sm:$0xff]  ;;  %v19943_v55 = vld [vmem:[#allocation39_spill] sm:$0xff] }
 0x36e   : > { %v9924_v2 = vor.u32 %v9923_v9, %v9919_v25  ;;  %v9941_v49 = vshll.u32 %v9758_v61, 16  ;;  %v9945_v62 = vshrl.u32 %v9758_v61, 16  ;;  %v18710_v32 = vpop.f32.mrf.mxu1  ;;  %v9951_v44 = vshll.u32 %v9759_v13, 16  ;;  %v9760_v9 = vld [vmem:[#allocation2 + $0x94] sm:$0xf] }
 0x36f   : > { %14221 = vmatprep.mubr.msk.bf16.mxu1 %vm5749_vm9, %v12953_v43  ;;  %v9934_v20 = vrot.slane %v9932_v45, 4  ;;  %v9937_v51 = vrot.slane %v9935_v29, 5  ;;  %v6928_v54 = vadd.f32 %v18470_v26, %v18638_v18  ;;  %v9915_v23 = vrot.slane %v9914_v58, 4  ;;  %v18727_v26 = vld [vmem:[%s19566_s5] sm:$0x3] }
 0x370   : > { %v9925_v37 = vrot.slane %v9924_v2, 4  ;;  %v9943_v63 = vrot.slane %v9941_v49, 5  ;;  %v9947_v11 = vrot.slane %v9945_v62, 4  ;;  %v6144_v1 = vadd.f32 %v19943_v55, %v19942_v21  ;;  %19944 = vst [vmem:[#allocation18_spill] sm:$0xff] %v18727_v26  ;;  %v9761_v45 = vld [vmem:[#allocation2 + $0x98] sm:$0xf]  ;;  %14359 = vmatprep.subr.msk.bf16.mxu0 %vm936_vm0, %v18727_v26 }
 0x371   : > { %v9938_v61 = vor.u32 %v9937_v51, %v9934_v20  ;;  %v18720_v47 = vadd.f32 %v18452_v6, %v6927_v41  ;;  %v6931_v15 = vadd.f32 %v18492_v33, %v18650_v60  ;;  %v9920_v18 = vsel %vm14674_vm4, %v9915_v23, %v9919_v25  ;;  %v9762_v6 = vld [vmem:[#allocation2 + $0x9c] sm:$0x1]  ;;  %v18733_v41 = vpop.f32.mrf.mxu1  ;;  %v19947_v60 = vld [vmem:[#allocation21_spill] sm:$0xff]  ;;  %v9766_v26 = vld [vmem:[#allocation2 + $0xb4] sm:$0xf] }
 0x372   : > { %v9930_v13 = vsel %vm14674_vm4, %v9925_v37, %v9929_v52  ;;  %v9948_v43 = vor.u32 %v9947_v11, %v9943_v63  ;;  %v9953_v51 = vrot.slane %v9951_v44, 5  ;;  %19945 = vst [vmem:[#allocation31_spill] sm:$0xff] %v18733_v41  ;;  %v19946_v33 = vld [vmem:[#allocation35_spill] sm:$0xff]  ;;  %v18740_v49 = vadd.f32 %v18507_v48, %v6930_v19  ;;  %v9763_v37 = vld [vmem:[#allocation2 + $0xa4] sm:$0xf] }
 0x373   : > { %v18715_v4 = vpop.f32.mrf.mxu0  ;;  %v6155_v29 = vadd.f32 %v19947_v60, %v19946_v33  ;;  %v12954_v58 = vcombine.low %v9920_v18, %v9930_v13  ;;  %v9939_v2 = vrot.slane %v9938_v61, 4  ;;  %v19948_v62 = vld [vmem:[#allocation23_spill] sm:$0xff]  ;;  %v9956_v20 = vshrl.u32 %v9760_v9, 16  ;;  %v9764_v18 = vld [vmem:[#allocation2 + $0xa8] sm:$0xf] }
 0x374   : > { %v9949_v52 = vrot.slane %v9948_v43, 4  ;;  %v6934_v44 = vadd.f32 %v18541_v36, %v19948_v62  ;;  %v9959_v23 = vshll.u32 %v9760_v9, 16  ;;  %v9965_v21 = vshll.u32 %v9761_v45, 16  ;;  %v9765_v36 = vld [vmem:[#allocation2 + $0xac] sm:$0x1] }
 0x375   : > { %v18742_v25 = vpop.f32.mrf.mxu0  ;;  %14222 = vmatmul.mubr.msk.bf16.gmra.mxu1 %vm5749_vm9, %v12954_v58  ;;  %v9944_v11 = vsel %vm14674_vm4, %v9939_v2, %v9943_v63  ;;  %v9969_v55 = vshrl.u32 %v9761_v45, 16  ;;  %v9975_v61 = vshll.u32 %v9762_v6, 16  ;;  %v9958_v19 = vrot.slane %v9956_v20, 4 }
 0x376   : > { %v9954_v48 = vsel %vm14674_vm4, %v9949_v52, %v9953_v51  ;;  %v9961_v13 = vrot.slane %v9959_v23, 5  ;;  %v18752_v43 = vadd.f32 %v18526_v17, %v6928_v54  ;;  %v9967_v60 = vrot.slane %v9965_v21, 5 }
 0x377   : > { %v12955_v33 = vcombine.low %v9944_v11, %v9954_v48  ;;  %v9971_v58 = vrot.slane %v9969_v55, 4  ;;  %v9977_v62 = vrot.slane %v9975_v61, 5  ;;  %v18756_v63 = vpop.f32.mrf.mxu0  ;;  %v9980_v6 = vshrl.u32 %v9763_v37, 16  ;;  %v19950_v55 = vld [vmem:[#allocation41_spill] sm:$0xff]  ;;  %v19951_v61 = vld [vmem:[#allocation26_spill] sm:$0xff] }
 0x378   : > { %19949 = vst [vmem:[#allocation11_spill] sm:$0xff] %v18752_v43  ;;  %v9962_v45 = vor.u32 %v9961_v13, %v9958_v19  ;;  %v9983_v2 = vshll.u32 %v9763_v37, 16  ;;  %v9989_v41 = vshll.u32 %v9764_v18, 16  ;;  %v9993_v17 = vshrl.u32 %v9764_v18, 16  ;;  %v19954_v18 = vld [vmem:[#allocation13_spill] sm:$0xff] }
 0x379   : > { %14225 = vmatprep.mubr.msk.bf16.mxu1 %vm5749_vm9, %v12955_v33  ;;  %v9972_v51 = vor.u32 %v9971_v58, %v9967_v60  ;;  %v9999_v54 = vshll.u32 %v9765_v36, 16  ;;  %v6932_v52 = vadd.f32 %v18560_v24, %v6144_v1  ;;  %v9982_v23 = vrot.slane %v9980_v6, 4  ;;  %v18767_v43 = vpop.f32.mrf.mxu0  ;;  %v19953_v33 = vld [vmem:[#allocation27_spill] sm:$0xff] }
 0x37a   : > { %v18754_v9 = vpop.f32.mrf.mxu1  ;;  %v9963_v20 = vrot.slane %v9962_v45, 4  ;;  %v9985_v11 = vrot.slane %v9983_v2, 5  ;;  %v9991_v21 = vrot.slane %v9989_v41, 5  ;;  %v6160_v48 = vadd.f32 %v19951_v61, %v19950_v55  ;;  %19952 = vst [vmem:[#allocation36_spill] sm:$0xff] %v18767_v43  ;;  %v9767_v45 = vld [vmem:[#allocation2 + $0xb8] sm:$0xf] }
 0x37b   : > { %v9973_v19 = vrot.slane %v9972_v51, 4  ;;  %v9995_v13 = vrot.slane %v9993_v17, 4  ;;  %v18765_v37 = vadd.f32 %v18551_v10, %v6931_v15  ;;  %v6171_v36 = vadd.f32 %v19954_v18, %v19953_v33  ;;  %v9768_v51 = vld [vmem:[#allocation2 + $0xbc] sm:$0x1]  ;;  %v9769_v33 = vld [vmem:[#allocation2 + $0xc4] sm:$0xf] }
 0x37c   : > { %v18758_v0 = vpop.f32.mrf.mxu1  ;;  %v9986_v58 = vor.u32 %v9985_v11, %v9982_v23  ;;  %v10001_v24 = vrot.slane %v9999_v54, 5  ;;  %v6935_v1 = vadd.f32 %v18578_v34, %v6155_v29  ;;  %v9968_v6 = vsel %vm14674_vm4, %v9963_v20, %v9967_v60 }
 0x37d   : > { %v9978_v10 = vsel %vm14674_vm4, %v9973_v19, %v9977_v62  ;;  %v9996_v15 = vor.u32 %v9995_v13, %v9991_v21  ;;  %v18779_v2 = vadd.f32 %v18589_v46, %v6934_v44  ;;  %v6938_v54 = vadd.f32 %v18618_v3, %v18449_v38  ;;  %v9770_v19 = vld [vmem:[#allocation2 + $0xc8] sm:$0xf] }
 0x37e   : > { %v18772_v41 = vpop.f32.mrf.mxu1  ;;  %v12956_v17 = vcombine.low %v9968_v6, %v9978_v10  ;;  %v9987_v55 = vrot.slane %v9986_v58, 4  ;;  %v10004_v34 = vshrl.u32 %v9766_v26, 16  ;;  %v10007_v23 = vshll.u32 %v9766_v26, 16  ;;  %v9771_v58 = vld [vmem:[#allocation2 + $0xcc] sm:$0x1] }
 0x37f   : > { %v9997_v29 = vrot.slane %v9996_v15, 4  ;;  %v10013_v11 = vshll.u32 %v9767_v45, 16  ;;  %v10017_v61 = vshrl.u32 %v9767_v45, 16  ;;  %v10023_v62 = vshll.u32 %v9768_v51, 16 }
 0x380   : > { %14226 = vmatmul.mubr.msk.bf16.gmra.mxu1 %vm5749_vm9, %v12956_v17  ;;  %v9992_v46 = vsel %vm14674_vm4, %v9987_v55, %v9991_v21  ;;  %v10006_v44 = vrot.slane %v10004_v34, 4  ;;  %v18789_v20 = vadd.f32 %v18610_v35, %v6932_v52  ;;  %v18791_v38 = vpop.f32.mrf.mxu1  ;;  %v10009_v26 = vrot.slane %v10007_v23, 5 }
 0x381   : > { %19955 = vst [vmem:[#allocation45_spill] sm:$0xff] %v18791_v38  ;;  %v10002_v3 = vsel %vm14674_vm4, %v9997_v29, %v10001_v24  ;;  %v10015_v13 = vrot.slane %v10013_v11, 5  ;;  %v10019_v18 = vrot.slane %v10017_v61, 4  ;;  %v10025_v10 = vrot.slane %v10023_v62, 5 }
 0x382   : > { %v12957_v6 = vcombine.low %v9992_v46, %v10002_v3  ;;  %v10028_v21 = vshrl.u32 %v9769_v33, 16  ;;  %v10031_v15 = vshll.u32 %v9769_v33, 16  ;;  %v10010_v51 = vor.u32 %v10009_v26, %v10006_v44  ;;  %v9772_v3 = vld [vmem:[#allocation2 + $0xd4] sm:$0xf] }
 0x383   : > { %v18783_v60 = vpop.f32.mrf.mxu0  ;;  %v10020_v17 = vor.u32 %v10019_v18, %v10015_v13  ;;  %v10037_v35 = vshll.u32 %v9770_v19, 16  ;;  %v10041_v52 = vshrl.u32 %v9770_v19, 16  ;;  %v10047_v38 = vshll.u32 %v9771_v58, 16 }
 0x384   : > { %14229 = vmatprep.mubr.msk.bf16.mxu1 %vm5749_vm9, %v12957_v6  ;;  %v10030_v55 = vrot.slane %v10028_v21, 4  ;;  %v10033_v34 = vrot.slane %v10031_v15, 5  ;;  %v6936_v24 = vadd.f32 %v18625_v57, %v6160_v48  ;;  %v10011_v11 = vrot.slane %v10010_v51, 4  ;;  %v9773_v6 = vld [vmem:[#allocation2 + $0xd8] sm:$0xf] }
 0x385   : > { %v18795_v45 = vpop.f32.mrf.mxu0  ;;  %v10021_v61 = vrot.slane %v10020_v17, 4  ;;  %v10039_v46 = vrot.slane %v10037_v35, 5  ;;  %v10043_v62 = vrot.slane %v10041_v52, 4  ;;  %v18804_v44 = vadd.f32 %v18623_v50, %v6935_v1  ;;  %v9774_v21 = vld [vmem:[#allocation2 + $0xdc] sm:$0x1] }
 0x386   : > { %v10034_v33 = vor.u32 %v10033_v34, %v10030_v55  ;;  %v6939_v19 = vadd.f32 %v18655_v39, %v6171_v36  ;;  %v10016_v57 = vsel %vm14674_vm4, %v10011_v11, %v10015_v13  ;;  %v10049_v58 = vrot.slane %v10047_v38, 5 }
 0x387   : > { %v18801_v23 = vpop.f32.mrf.mxu0  ;;  %v10026_v48 = vsel %vm14674_vm4, %v10021_v61, %v10025_v10  ;;  %v10044_v18 = vor.u32 %v10043_v62, %v10039_v46  ;;  %v18814_v50 = vadd.f32 %v18667_v59, %v6938_v54  ;;  %v6942_v13 = vadd.f32 %v18681_v40, %v18501_v5  ;;  %v9775_v10 = vld [vmem:[#allocation2 + $0xe4] sm:$0xf]  ;;  %v9776_v54 = vld [vmem:[#allocation2 + $0xe8] sm:$0xf]  ;;  %v9777_v40 = vld [vmem:[#allocation2 + $0xec] sm:$0x1] }
 0x388   : > { %v18799_v29 = vpop.f32.mrf.mxu1  ;;  %v12958_v15 = vcombine.low %v10016_v57, %v10026_v48  ;;  %v10035_v51 = vrot.slane %v10034_v33, 4  ;;  %v10052_v17 = vshrl.u32 %v9772_v3, 16  ;;  %v10055_v35 = vshll.u32 %v9772_v3, 16 }
 0x389   : > { %v18818_v39 = vpop.f32.mrf.mxu0  ;;  %v10045_v36 = vrot.slane %v10044_v18, 4  ;;  %v10061_v52 = vshll.u32 %v9773_v6, 16  ;;  %v10065_v55 = vshrl.u32 %v9773_v6, 16  ;;  %v10071_v59 = vshll.u32 %v9774_v21, 16 }
 0x38a   : > { %v18807_v26 = vpop.f32.mrf.mxu1  ;;  %19956 = vst [vmem:[#allocation5_spill] sm:$0xff] %v18818_v39  ;;  %14230 = vmatmul.mubr.msk.bf16.gmra.mxu1 %vm5749_vm9, %v12958_v15  ;;  %v10040_v38 = vsel %vm14674_vm4, %v10035_v51, %v10039_v46  ;;  %v10054_v61 = vrot.slane %v10052_v17, 4  ;;  %v10057_v62 = vrot.slane %v10055_v35, 5  ;;  %v18830_v5 = vadd.f32 %v18673_v12, %v6936_v24  ;;  %v19960_v39 = vld [vmem:[#allocation50_spill] sm:$0xff] }
 0x38b   : > { %v10050_v11 = vsel %vm14674_vm4, %v10045_v36, %v10049_v58  ;;  %v10063_v3 = vrot.slane %v10061_v52, 5  ;;  %v10067_v57 = vrot.slane %v10065_v55, 4  ;;  %v10073_v48 = vrot.slane %v10071_v59, 5 }
 0x38c   : > { %v18816_v1 = vpop.f32.mrf.mxu1  ;;  %v12959_v33 = vcombine.low %v10040_v38, %v10050_v11  ;;  %v10058_v6 = vor.u32 %v10057_v62, %v10054_v61  ;;  %v10076_v21 = vshrl.u32 %v9775_v10, 16  ;;  %v10079_v15 = vshll.u32 %v9775_v10, 16  ;;  %v9778_v62 = vld [vmem:[#allocation2 + $0xf4] sm:$0xf] }
 0x38d   : > { %v10085_v51 = vshll.u32 %v9776_v54, 16  ;;  %v10068_v58 = vor.u32 %v10067_v57, %v10063_v3  ;;  %v10089_v36 = vshrl.u32 %v9776_v54, 16  ;;  %v10095_v17 = vshll.u32 %v9777_v40, 16  ;;  %v19958_v40 = vld [vmem:[#allocation43_spill] sm:$0xff] }
 0x38e   : > { %v18825_v34 = vpop.f32.mrf.mxu1  ;;  %14233 = vmatprep.mubr.msk.bf16.mxu1 %vm5749_vm9, %v12959_v33  ;;  %v6940_v12 = vadd.f32 %v18698_v30, %v18524_v42  ;;  %v10059_v38 = vrot.slane %v10058_v6, 4  ;;  %v10078_v52 = vrot.slane %v10076_v21, 4  ;;  %v10081_v55 = vrot.slane %v10079_v15, 5  ;;  %v19959_v42 = vld [vmem:[#allocation28_spill] sm:$0xff]  ;;  %v9779_v21 = vld [vmem:[#allocation2 + $0xf8] sm:$0xf] }
 0x38f   : > { %19957 = vst [vmem:[#allocation32_spill] sm:$0xff] %v18825_v34  ;;  %v10087_v59 = vrot.slane %v10085_v51, 5  ;;  %v10069_v11 = vrot.slane %v10068_v58, 4  ;;  %v10091_v61 = vrot.slane %v10089_v36, 4  ;;  %v18844_v10 = vadd.f32 %v18687_v56, %v6939_v19  ;;  %v9780_v58 = vld [vmem:[#allocation2 + $0xfc] sm:$0x1] }
 0x390   : > { %v18832_v46 = vpop.f32.mrf.mxu0  ;;  %v18834_v18 = vpop.f32.mrf.mxu1  ;;  %v6203_v30 = vadd.f32 %v19959_v42, %v19958_v40  ;;  %v10082_v57 = vor.u32 %v10081_v55, %v10078_v52  ;;  %v10097_v34 = vrot.slane %v10095_v17, 5  ;;  %v6943_v6 = vadd.f32 %v18710_v32, %v19960_v39  ;;  %v19963_v55 = vld [vmem:[#allocation51_spill] sm:$0xff] }
 0x391   : > { %v10064_v15 = vsel %vm14674_vm4, %v10059_v38, %v10063_v3  ;;  %v10074_v56 = vsel %vm14674_vm4, %v10069_v11, %v10073_v48  ;;  %v10092_v19 = vor.u32 %v10091_v61, %v10087_v59  ;;  %v18859_v51 = vadd.f32 %v18715_v4, %v6942_v13  ;;  %v9781_v48 = vld [vmem:[#allocation2 + $0x104] sm:$0xf] }
 0x392   : > { %v18839_v24 = vpop.f32.mrf.mxu0  ;;  %v18841_v35 = vpop.f32.mrf.mxu1  ;;  %v12960_v17 = vcombine.low %v10064_v15, %v10074_v56  ;;  %v10083_v52 = vrot.slane %v10082_v57, 4  ;;  %v6946_v32 = vadd.f32 %v18754_v9, %v19963_v55  ;;  %v10100_v39 = vshrl.u32 %v9778_v62, 16  ;;  %v9782_v15 = vld [vmem:[#allocation2 + $0x108] sm:$0xf]  ;;  %v9783_v55 = vld [vmem:[#allocation2 + $0x10c] sm:$0x1] }
 0x393   : > { %v10093_v42 = vrot.slane %v10092_v19, 4  ;;  %v10103_v3 = vshll.u32 %v9778_v62, 16  ;;  %v10109_v38 = vshll.u32 %v9779_v21, 16  ;;  %v10113_v43 = vshrl.u32 %v9779_v21, 16 }
 0x394   : > { %v18846_v33 = vpop.f32.mrf.mxu0  ;;  %v18848_v54 = vpop.f32.mrf.mxu1  ;;  %14234 = vmatmul.mubr.msk.bf16.gmra.mxu1 %vm5749_vm9, %v12960_v17  ;;  %v10088_v4 = vsel %vm14674_vm4, %v10083_v52, %v10087_v59  ;;  %v10102_v13 = vrot.slane %v10100_v39, 4  ;;  %v10119_v61 = vshll.u32 %v9780_v58, 16  ;;  %v18873_v57 = vadd.f32 %v18742_v25, %v6940_v12 }
 0x395   : > { %v10098_v62 = vsel %vm14674_vm4, %v10093_v42, %v10097_v34  ;;  %v10105_v21 = vrot.slane %v10103_v3, 5  ;;  %v10111_v56 = vrot.slane %v10109_v38, 5  ;;  %v10115_v19 = vrot.slane %v10113_v43, 4 }
 0x396   : > { %v18861_v36 = vpop.f32.mrf.mxu0  ;;  %v18863_v40 = vpop.f32.mrf.mxu1  ;;  %19964 = vst [vmem:[#allocation33_spill] sm:$0xff] %v18873_v57  ;;  %v12961_v17 = vcombine.low %v10088_v4, %v10098_v62  ;;  %v10124_v59 = vshrl.u32 %v9781_v48, 16  ;;  %v10127_v52 = vshll.u32 %v9781_v48, 16  ;;  %v10133_v39 = vshll.u32 %v9782_v15, 16 }
 0x397   : > { %19961 = vst [vmem:[#allocation38_spill] sm:$0xff] %v18861_v36  ;;  %19962 = vst [vmem:[#allocation6_spill] sm:$0xff] %v18863_v40  ;;  %v10121_v36 = vrot.slane %v10119_v61, 5  ;;  %v10106_v25 = vor.u32 %v10105_v21, %v10102_v13  ;;  %v10116_v12 = vor.u32 %v10115_v19, %v10111_v56  ;;  %v10137_v57 = vshrl.u32 %v9782_v15, 16 }
 0x398   : > { %v18867_v11 = vpop.f32.mrf.mxu1  ;;  %v18875_v9 = vpop.f32.mrf.mxu0  ;;  %14237 = vmatprep.mubr.msk.bf16.mxu1 %vm5749_vm9, %v12961_v17  ;;  %v10126_v34 = vrot.slane %v10124_v59, 4  ;;  %v10129_v42 = vrot.slane %v10127_v52, 5  ;;  %v10143_v43 = vshll.u32 %v9783_v55, 16  ;;  %v6944_v3 = vadd.f32 %v18758_v0, %v18576_v31  ;;  %v9784_v17 = vld [vmem:[#allocation2 + $0x114] sm:$0xf] }
 0x399   : > { %19965 = vst [vmem:[#allocation39_spill] sm:$0xff] %v18875_v9  ;;  %v10107_v4 = vrot.slane %v10106_v25, 4  ;;  %v10117_v48 = vrot.slane %v10116_v12, 4  ;;  %v10135_v61 = vrot.slane %v10133_v39, 5  ;;  %v10139_v62 = vrot.slane %v10137_v57, 4  ;;  %v19967_v39 = vld [vmem:[#allocation4_spill] sm:$0xff] }
 0x39a   : > { %v18879_v40 = vpop.f32.mrf.mxu1  ;;  %v18881_v58 = vpop.f32.mrf.mxu0  ;;  %v10130_v21 = vor.u32 %v10129_v42, %v10126_v34  ;;  %v18893_v15 = vadd.f32 %v18756_v63, %v6943_v6  ;;  %v6947_v19 = vadd.f32 %v18772_v41, %v6203_v30  ;;  %v10145_v52 = vrot.slane %v10143_v43, 5  ;;  %v9785_v57 = vld [vmem:[#allocation2 + $0x118] sm:$0xf]  ;;  %v9786_v25 = vld [vmem:[#allocation2 + $0x11c] sm:$0x1] }
 0x39b   : > { %v10112_v31 = vsel %vm14674_vm4, %v10107_v4, %v10111_v56  ;;  %v10122_v0 = vsel %vm14674_vm4, %v10117_v48, %v10121_v36  ;;  %v10140_v55 = vor.u32 %v10139_v62, %v10135_v61  ;;  %v19968_v34 = vld [vmem:[#allocation15_spill] sm:$0xff]  ;;  %v18905_v41 = vadd.f32 %v18783_v60, %v6946_v32 }
 0x39c   : > { %v18883_v9 = vpop.f32.mrf.mxu1  ;;  %v18888_v38 = vpop.f32.mrf.mxu0  ;;  %v6219_v63 = vadd.f32 %v19968_v34, %v19967_v39  ;;  %v12962_v6 = vcombine.low %v10112_v31, %v10122_v0  ;;  %v10131_v42 = vrot.slane %v10130_v21, 4  ;;  %v6950_v56 = vadd.f32 %v18799_v29, %v18603_v16 }
 0x39d   : > { %v10141_v30 = vrot.slane %v10140_v55, 4  ;;  %v10148_v4 = vshrl.u32 %v9784_v17, 16  ;;  %v10157_v48 = vshll.u32 %v9785_v57, 16  ;;  %v10161_v62 = vshrl.u32 %v9785_v57, 16 }
 0x39e   : > { %v18890_v13 = vpop.f32.mrf.mxu1  ;;  %v18896_v59 = vpop.f32.mrf.mxu0  ;;  %14238 = vmatmul.mubr.msk.bf16.gmra.mxu1 %vm5749_vm9, %v12962_v6  ;;  %v10136_v43 = vsel %vm14674_vm4, %v10131_v42, %v10135_v61  ;;  %v10167_v39 = vshll.u32 %v9786_v25, 16  ;;  %v18917_v16 = vadd.f32 %v18795_v45, %v6944_v3  ;;  %v6948_v57 = vadd.f32 %v18807_v26, %v18614_v7 }
 0x39f   : > { %19966 = vst [vmem:[#allocation35_spill] sm:$0xff] %v18890_v13  ;;  %v10151_v13 = vshll.u32 %v9784_v17, 16  ;;  %v10146_v60 = vsel %vm14674_vm4, %v10141_v30, %v10145_v52  ;;  %v10150_v32 = vrot.slane %v10148_v4, 4  ;;  %v10159_v0 = vrot.slane %v10157_v48, 5  ;;  %v19969_v48 = vld [vmem:[#allocation11_spill] sm:$0xff] }
 0x3a0   : > { %v14087_v12 = vpop.f32.mrf.mxu1  ;;  %v12963_v17 = vcombine.low %v10136_v43, %v10146_v60  ;;  %v10163_v55 = vrot.slane %v10161_v62, 4  ;;  %v18924_v25 = vadd.f32 %v18801_v23, %v6947_v19  ;;  %v6951_v52 = vadd.f32 %v18816_v1, %v6219_v63 }
 0x3a1   : > { %v10153_v21 = vrot.slane %v10151_v13, 5  ;;  %v10169_v3 = vrot.slane %v10167_v39, 5  ;;  %v18931_v13 = vadd.f32 %v18832_v46, %v6950_v56  ;;  %v18937_v7 = vadd.f32 %v18834_v18, %v18653_v22 }
 0x3a2   : > { %v7853_v36 = vpop.f32.mrf.mxu1  ;;  %14241 = vmatprep.mubr.msk.bf16.mxu1 %vm5749_vm9, %v12963_v17  ;;  %v10164_v45 = vor.u32 %v10163_v55, %v10159_v0  ;;  %v18940_v23 = vadd.f32 %v18839_v24, %v6948_v57  ;;  %v18944_v26 = vadd.f32 %v18841_v35, %v18665_v53  ;;  %v18947_v63 = vadd.f32 %v18846_v33, %v6951_v52 }
 0x3a3   : > { %v18912_v31 = vpop.f32.mrf.mxu0  ;;  %v10154_v61 = vor.u32 %v10153_v21, %v10150_v32  ;;  %v18951_v46 = vadd.f32 %v18848_v54, %v18679_v8  ;;  %v18959_v18 = vadd.f32 %v18867_v11, %v18694_v27  ;;  %v18965_v35 = vadd.f32 %v18879_v40, %v18704_v28 }
 0x3a4   : > { %v14088_v29 = vpop.f32.mrf.mxu1  ;;  %v10165_v19 = vrot.slane %v10164_v45, 4  ;;  %v18969_v54 = vadd.f32 %v18883_v9, %v18720_v47  ;;  %v7958_v43 = vadd.f32 %v14087_v12, %v18740_v49  ;;  %v7956_v27 = vadd.f32 %v7853_v36, %v19969_v48  ;;  %v19970_v36 = vld [vmem:[#allocation18_spill] sm:$0xff] }
 0x3a5   : > { %v18919_v34 = vpop.f32.mrf.mxu0  ;;  %v10155_v30 = vrot.slane %v10154_v61, 4  ;;  %v7959_v14 = vadd.f32 %v14088_v29, %v18765_v37  ;;  %v10838_v32 = vsel %vm936_vm0, %v19970_v36, 0 }
 0x3a6   : > { %v18927_v6 = vpop.f32.mrf.mxu1  ;;  %v10170_v24 = vsel %vm14674_vm4, %v10165_v19, %v10169_v3  ;;  %14246 = vmatpush3.bf16.msra.mxu0 %v10838_v32 }
 0x3a7   : > { %v18933_v42 = vpop.f32.mrf.mxu0  ;;  %v10160_v22 = vsel %vm14674_vm4, %v10155_v30, %v10159_v0  ;;  %vm10636_vm4 = vcmask 27648  }
 0x3a8   : > { %v14091_v1 = vpop.f32.mrf.mxu1  ;;  %v12964_v8 = vcombine.low %v10160_v22, %v10170_v24  ;;  %v19972_v22 = vld [vmem:[#allocation24_spill] sm:$0xff] }
 0x3a9   : > { %v18953_v56 = vpop.f32.mrf.mxu0  ;;  %v7962_v40 = vadd.f32 %v14091_v1, %v18779_v2 }
 0x3aa   : > { %v7869_v53 = vpop.f32.mrf.mxu1  ;;  %14242 = vmatmul.mubr.msk.bf16.gmra.mxu1 %vm5749_vm9, %v12964_v8 }
 0x3ab   : > { %v14121_v33 = vpop.f32.mrf.mxu0  ;;  %v7960_v47 = vadd.f32 %v7869_v53, %v18789_v20  ;;  %v19973_v53 = vld [vmem:[#allocation8_spill] sm:$0xff] }
 0x3ac   : > { %v14092_v4 = vpop.f32.mrf.mxu1  ;;  %v18977_v28 = vadd.f32 %v14121_v33, %v7958_v43 }
 0x3ad   : > { %v8583_v11 = vpop.f32.mrf.mxu0  ;;  %v7963_v49 = vadd.f32 %v14092_v4, %v18804_v44  ;;  %v19974_v4 = vld [vmem:[#allocation30_spill] sm:$0xff] }
 0x3ae   : > { %v18975_v62 = vpop.f32.mrf.mxu1  ;;  %v18980_v39 = vadd.f32 %v8583_v11, %v7956_v27  ;;  %v19975_v11 = vld [vmem:[#allocation19_spill] sm:$0xff] }
 0x3af   : > { %v14122_v9 = vpop.f32.mrf.mxu0 }
 0x3b0   : > { %v18983_v60 = vadd.f32 %v14122_v9, %v7959_v14  ;;  %v14095_v12 = vpop.f32.mrf.mxu1 }
 0x3b1   : > { %v18988_v37 = vpop.f32.mrf.mxu0  ;;  %v7966_v21 = vadd.f32 %v14095_v12, %v18814_v50 }
 0x3b2   : > { %v7885_v29 = vpop.f32.mrf.mxu1 }
 0x3b3   : > { %v7964_v2 = vadd.f32 %v7885_v29, %v18830_v5  ;;  %v19971_v5 = vld [vmem:[#allocation33_spill] sm:$0xff] }
 0x3b4   : > { %v14096_v17 = vpop.f32.mrf.mxu1  ;;  %v14125_v0 = vpop.f32.mrf.mxu0 }
 0x3b5   : > { %v7967_v20 = vadd.f32 %v14096_v17, %v18844_v10  ;;  %v18993_v55 = vadd.f32 %v14125_v0, %v7962_v40  ;;  %v6163_v10 = vadd.f32 %v19973_v53, %v19972_v22 }
 0x3b6   : > { %v7888_v61 = vpop.f32.mrf.mxu1  ;;  %v8599_v44 = vpop.f32.mrf.mxu0 }
 0x3b7   : > { %v18995_v57 = vadd.f32 %v8599_v44, %v7960_v47  ;;  %v6937_v43 = vadd.f32 %v19974_v4, %v6163_v10  ;;  %v19976_v44 = vld [vmem:[#allocation16_spill] sm:$0xff] }
 0x3b8   : > { %v14099_v52 = vpop.f32.mrf.mxu1  ;;  %v14126_v45 = vpop.f32.mrf.mxu0  ;;  %v19979_v10 = vld [vmem:[#allocation36_spill] sm:$0xff] }
 0x3b9   : > { %v7970_v3 = vadd.f32 %v14099_v52, %v18859_v51  ;;  %v18998_v30 = vadd.f32 %v14126_v45, %v7963_v49  ;;  %v7635_v14 = vadd.f32 %v19975_v11, %v6937_v43  ;;  %v19977_v52 = vld [vmem:[#allocation44_spill] sm:$0xff] }
 0x3ba   : > { %v7901_v50 = vpop.f32.mrf.mxu1  ;;  %v19000_v1 = vpop.f32.mrf.mxu0 }
 0x3bb   : > { %v7968_v19 = vadd.f32 %v7901_v50, %v19971_v5  ;;  %v7965_v12 = vadd.f32 %v7888_v61, %v7635_v14  ;;  %v19978_v5 = vld [vmem:[#allocation31_spill] sm:$0xff] }
 0x3bc   : > { %v14100_v24 = vpop.f32.mrf.mxu1 }
 0x3bd   : > { %v14129_v33 = vpop.f32.mrf.mxu0  ;;  %v7971_v8 = vadd.f32 %v14100_v24, %v18893_v15 }
 0x3be   : > { %v19007_v48 = vadd.f32 %v14129_v33, %v7966_v21  ;;  %v7904_v27 = vpop.f32.mrf.mxu1 }
 0x3bf   : > { %v8615_v51 = vpop.f32.mrf.mxu0 }
 0x3c0   : > { %v19010_v40 = vadd.f32 %v8615_v51, %v7964_v2  ;;  %v14103_v47 = vpop.f32.mrf.mxu1  ;;  %v6179_v2 = vadd.f32 %v19977_v52, %v19976_v44  ;;  %v19983_v52 = vld [vmem:[#allocation5_spill] sm:$0xff] }
 0x3c1   : > { %v14130_v9 = vpop.f32.mrf.mxu0  ;;  %v7974_v49 = vadd.f32 %v14103_v47, %v18905_v41  ;;  %v19980_v47 = vld [vmem:[#allocation20_spill] sm:$0xff] }
 0x3c2   : > { %v19013_v36 = vadd.f32 %v14130_v9, %v7967_v20  ;;  %v7917_v32 = vpop.f32.mrf.mxu1  ;;  %v6941_v22 = vadd.f32 %v19978_v5, %v6179_v2  ;;  %v19981_v9 = vld [vmem:[#allocation7_spill] sm:$0xff] }
 0x3c3   : > { %v8618_v29 = vpop.f32.mrf.mxu0  ;;  %v7972_v15 = vadd.f32 %v7917_v32, %v18917_v16 }
 0x3c4   : > { %v19016_v17 = vadd.f32 %v8618_v29, %v7965_v12  ;;  %v14104_v21 = vpop.f32.mrf.mxu1  ;;  %v7639_v16 = vadd.f32 %v19979_v10, %v6941_v22  ;;  %v6195_v12 = vadd.f32 %v19981_v9, %v19980_v47  ;;  %v19982_v29 = vld [vmem:[#allocation45_spill] sm:$0xff] }
 0x3c5   : > { %v7975_v0 = vadd.f32 %v14104_v21, %v18924_v25 }
 0x3c6   : > { %v7920_v45 = vpop.f32.mrf.mxu1  ;;  %v14133_v50 = vpop.f32.mrf.mxu0  ;;  %v7969_v43 = vadd.f32 %v7904_v27, %v7639_v16 }
 0x3c7   : > { %v19022_v41 = vadd.f32 %v14133_v50, %v7970_v3 }
 0x3c8   : > { %v14107_v20 = vpop.f32.mrf.mxu1  ;;  %v8631_v61 = vpop.f32.mrf.mxu0 }
 0x3c9   : > { %v7978_v53 = vadd.f32 %v14107_v20, %v18931_v13  ;;  %v19026_v24 = vadd.f32 %v8631_v61, %v7968_v19  ;;  %v6945_v19 = vadd.f32 %v19982_v29, %v6195_v12  ;;  %v19984_v20 = vld [vmem:[#allocation47_spill] sm:$0xff]  ;;  %v19985_v61 = vld [vmem:[#allocation34_spill] sm:$0xff] }
 0x3ca   : > { %v7933_v33 = vpop.f32.mrf.mxu1  ;;  %v14134_v4 = vpop.f32.mrf.mxu0  ;;  %v6211_v10 = vadd.f32 %v19985_v61, %v19984_v20 }
 0x3cb   : > { %v7976_v25 = vadd.f32 %v7933_v33, %v18940_v23  ;;  %v19029_v51 = vadd.f32 %v14134_v4, %v7971_v8  ;;  %v7643_v23 = vadd.f32 %v19983_v52, %v6945_v19  ;;  %v19986_v33 = vld [vmem:[#allocation32_spill] sm:$0xff] }
 0x3cc   : > { %v14108_v11 = vpop.f32.mrf.mxu1  ;;  %v8634_v14 = vpop.f32.mrf.mxu0 }
 0x3cd   : > { %v7979_v3 = vadd.f32 %v14108_v11, %v18947_v63  ;;  %v19034_v32 = vadd.f32 %v8634_v14, %v7969_v43  ;;  %v7973_v2 = vadd.f32 %v7920_v45, %v7643_v23  ;;  %v19987_v11 = vld [vmem:[#allocation38_spill] sm:$0xff] }
 0x3ce   : > { %v14137_v13 = vpop.f32.mrf.mxu0  ;;  %v7936_v22 = vpop.f32.mrf.mxu1 }
 0x3cf   : > { %v19037_v21 = vadd.f32 %v14137_v13, %v7974_v49  ;;  %v6949_v49 = vadd.f32 %v19986_v33, %v6211_v10 }
 0x3d0   : > { %v8647_v44 = vpop.f32.mrf.mxu0 }
 0x3d1   : > { %v19040_v27 = vadd.f32 %v8647_v44, %v7972_v15  ;;  %v7647_v14 = vadd.f32 %v19987_v11, %v6949_v49 }
 0x3d2   : > { %v14138_v8 = vpop.f32.mrf.mxu0 }
 0x3d3   : > { %v19042_v50 = vadd.f32 %v14138_v8, %v7975_v0  ;;  %v7977_v9 = vadd.f32 %v7936_v22, %v7647_v14 }
 0x3d4   : > { %v8650_v63 = vpop.f32.mrf.mxu0 }
 0x3d5   : > { %v19044_v5 = vadd.f32 %v8650_v63, %v7973_v2 }
 0x3db   : > { %v14141_v16 = vpop.f32.mrf.mxu0 }
 0x3dc   : > { %v19049_v4 = vadd.f32 %v14141_v16, %v7978_v53 }
 0x3dd   : > { %v19051_v43 = vpop.f32.mrf.mxu1  ;;  %v8663_v15 = vpop.f32.mrf.mxu0 }
 0x3de   : > { %v19054_v45 = vadd.f32 %v8663_v15, %v7976_v25 }
 0x3df   : > { %v19056_v0 = vpop.f32.mrf.mxu1  ;;  %v14142_v47 = vpop.f32.mrf.mxu0 }
 0x3e0   : > { %v19058_v12 = vadd.f32 %v14142_v47, %v7979_v3 }
 0x3e1   : > { %v19060_v13 = vpop.f32.mrf.mxu1  ;;  %v8666_v29 = vpop.f32.mrf.mxu0 }
 0x3e2   : > { %v19062_v19 = vadd.f32 %v8666_v29, %v7977_v9 }
 0x3e3   : > { %v19064_v53 = vpop.f32.mrf.mxu1  ;;  %v14181_v61 = vpop.f32.mrf.mxu0 }
 0x3e5   : > { %v19066_v44 = vpop.f32.mrf.mxu1  ;;  %v19085_v33 = vpop.f32.mrf.mxu0 }
 0x3e7   : > { %v19068_v52 = vpop.f32.mrf.mxu1 }
 0x3e9   : > { %v19070_v23 = vpop.f32.mrf.mxu1 }
 0x3eb   : > { %v19072_v25 = vpop.f32.mrf.mxu1 }
 0x3ed   : > { %v14155_v8 = vpop.f32.mrf.mxu1 }
 0x3ee   : > { %v19075_v2 = vadd.f32 %v14155_v8, %v18977_v28 }
 0x3ef   : > { %v9282_v3 = vpop.f32.mrf.mxu1 }
 0x3f0   : > { %v19078_v63 = vadd.f32 %v9282_v3, %v18980_v39  ;;  %v19093_v39 = vpop.f32.mrf.mxu0 }
 0x3f1   : > { %v14156_v22 = vpop.f32.mrf.mxu1 }
 0x3f2   : > { %v19081_v20 = vadd.f32 %v14156_v22, %v18983_v60  ;;  %v19100_v9 = vpop.f32.mrf.mxu0 }
 0x3f3   : > { %v19083_v10 = vpop.f32.mrf.mxu1 }
 0x3f4   : > { %v19108_v3 = vpop.f32.mrf.mxu0 }
 0x3f5   : > { %v14159_v16 = vpop.f32.mrf.mxu1 }
 0x3f6   : > { %v19088_v49 = vadd.f32 %v14159_v16, %v18993_v55 }
 0x3f7   : > { %v9298_v15 = vpop.f32.mrf.mxu1 }
 0x3f8   : > { %v19091_v28 = vadd.f32 %v9298_v15, %v18995_v57  ;;  %v19116_v15 = vpop.f32.mrf.mxu0 }
 0x3f9   : > { %v14160_v11 = vpop.f32.mrf.mxu1 }
 0x3fa   : > { %v19096_v14 = vadd.f32 %v14160_v11, %v18998_v30 }
 0x3fb   : > { %v19098_v60 = vpop.f32.mrf.mxu1 }
 0x3fd   : > { %v14163_v47 = vpop.f32.mrf.mxu1 }
 0x3fe   : > { %v19103_v29 = vadd.f32 %v14163_v47, %v19007_v48 }
 0x3ff   : > { %v9314_v55 = vpop.f32.mrf.mxu1 }
 0x400   : > { %v19106_v8 = vadd.f32 %v9314_v55, %v19010_v40  ;;  %v19124_v55 = vpop.f32.mrf.mxu0 }
 0x401   : > { %v14164_v57 = vpop.f32.mrf.mxu1 }
 0x402   : > { %19988 = vst [vmem:[#allocation21_spill] sm:$0xff] %v19106_v8  ;;  %v19111_v22 = vadd.f32 %v14164_v57, %v19013_v36 }
 0x403   : > { %v9317_v30 = vpop.f32.mrf.mxu1 }
 0x404   : > { %v19114_v16 = vadd.f32 %v9317_v30, %v19016_v17  ;;  %v19132_v30 = vpop.f32.mrf.mxu0 }
 0x405   : > { %v14167_v11 = vpop.f32.mrf.mxu1 }
 0x406   : > { %19989 = vst [vmem:[#allocation23_spill] sm:$0xff] %v19114_v16  ;;  %v19119_v48 = vadd.f32 %v14167_v11, %v19022_v41 }
 0x407   : > { %v9330_v47 = vpop.f32.mrf.mxu1 }
 0x408   : > { %v19122_v40 = vadd.f32 %v9330_v47, %v19026_v24  ;;  %v19140_v47 = vpop.f32.mrf.mxu0 }
 0x409   : > { %v14168_v8 = vpop.f32.mrf.mxu1 }
 0x40a   : > { %19990 = vst [vmem:[#allocation41_spill] sm:$0xff] %v19122_v40  ;;  %v19127_v36 = vadd.f32 %v14168_v8, %v19029_v51 }
 0x40b   : > { %v9333_v57 = vpop.f32.mrf.mxu1 }
 0x40c   : > { %19991 = vst [vmem:[#allocation26_spill] sm:$0xff] %v19127_v36  ;;  %v19130_v17 = vadd.f32 %v9333_v57, %v19034_v32  ;;  %v19148_v57 = vpop.f32.mrf.mxu0 }
 0x40d   : > { %v14171_v16 = vpop.f32.mrf.mxu1 }
 0x40e   : > { %19992 = vst [vmem:[#allocation27_spill] sm:$0xff] %v19130_v17  ;;  %v19135_v41 = vadd.f32 %v14171_v16, %v19037_v21 }
 0x40f   : > { %v9346_v11 = vpop.f32.mrf.mxu1 }
 0x410   : > { %19993 = vst [vmem:[#allocation13_spill] sm:$0xff] %v19135_v41  ;;  %v19138_v24 = vadd.f32 %v9346_v11, %v19040_v27  ;;  %v19153_v41 = vpop.f32.mrf.mxu0  ;;  %v19998_v11 = vld [vmem:[#allocation22_spill] sm:$0xff] }
 0x411   : > { %v14172_v40 = vpop.f32.mrf.mxu1 }
 0x412   : > { %19994 = vst [vmem:[#allocation43_spill] sm:$0xff] %v19138_v24  ;;  %v19143_v51 = vadd.f32 %v14172_v40, %v19042_v50  ;;  %v19999_v24 = vld [vmem:[#allocation40_spill] sm:$0xff] }
 0x413   : > { %v9349_v8 = vpop.f32.mrf.mxu1  ;;  %v6099_v50 = vadd.f32 %v19999_v24, %v19998_v11  ;;  %v8678_v24 = vadd.f32 %v18881_v58, %v18944_v26 }
 0x414   : > { %19995 = vst [vmem:[#allocation28_spill] sm:$0xff] %v19143_v51  ;;  %v19146_v32 = vadd.f32 %v9349_v8, %v19044_v5  ;;  %v20001_v5 = vld [vmem:[#allocation46_spill] sm:$0xff] }
 0x415   : > { %v14175_v17 = vpop.f32.mrf.mxu1  ;;  %v6921_v8 = vadd.f32 %v20001_v5, %v6099_v50  ;;  %v8681_v50 = vadd.f32 %v18888_v38, %v18951_v46 }
 0x416   : > { %19996 = vst [vmem:[#allocation50_spill] sm:$0xff] %v19146_v32  ;;  %v19151_v21 = vadd.f32 %v14175_v17, %v19049_v4  ;;  %v20002_v32 = vld [vmem:[#allocation39_spill] sm:$0xff]  ;;  %v19166_v17 = vpop.f32.mrf.mxu0 }
 0x417   : > { %v9362_v16 = vpop.f32.mrf.mxu1  ;;  %v8680_v36 = vadd.f32 %v20002_v32, %v18937_v7  ;;  %v9377_v7 = vadd.f32 %v19056_v0, %v8678_v24  ;;  %v9380_v26 = vadd.f32 %v19060_v13, %v8681_v50 }
 0x418   : > { %19997 = vst [vmem:[#allocation51_spill] sm:$0xff] %v19151_v21  ;;  %v19156_v27 = vadd.f32 %v9362_v16, %v19054_v45  ;;  %v20003_v45 = vld [vmem:[#allocation17_spill] sm:$0xff]  ;;  %v19179_v5 = vpop.f32.mrf.mxu0 }
 0x419   : > { %v14176_v40 = vpop.f32.mrf.mxu1  ;;  %v7619_v16 = vadd.f32 %v20003_v45, %v6921_v8  ;;  %v9379_v11 = vadd.f32 %v19051_v43, %v8680_v36  ;;  %v9707_v43 = vadd.f32 %v19085_v33, %v9377_v7  ;;  %v9710_v46 = vadd.f32 %v19093_v39, %v9380_v26  ;;  %v20006_v45 = vld [vmem:[#allocation9_spill] sm:$0xff] }
 0x41a   : > { %v19161_v51 = vadd.f32 %v14176_v40, %v19058_v12  ;;  %v20004_v12 = vld [vmem:[#allocation6_spill] sm:$0xff]  ;;  %v19194_v24 = vpop.f32.mrf.mxu0  ;;  %v8684_v39 = vadd.f32 %v18912_v31, %v18959_v18  ;;  %v20009_v18 = vld [vmem:[#allocation35_spill] sm:$0xff] }
 0x41b   : > { %v9365_v4 = vpop.f32.mrf.mxu1  ;;  %v7949_v40 = vadd.f32 %v20004_v12, %v7619_v16  ;;  %v9709_v32 = vadd.f32 %v14181_v61, %v9379_v11  ;;  %v20007_v12 = vld [vmem:[#allocation25_spill] sm:$0xff] }
 0x41c   : > { %20000 = vst [vmem:[#allocation4_spill] sm:$0xff] %v19161_v51  ;;  %v19169_v21 = vadd.f32 %v9365_v4, %v19062_v19  ;;  %v19184_v19 = vld [vmem:[%s19565_s4] ss:$0 sm:$0xff] }
 0x41d   : > { %v8679_v58 = vadd.f32 %v18896_v59, %v7949_v40  ;;  %v20005_v4 = vld [vmem:[#allocation12_spill] sm:$0xff] }
 0x41e   : > { %v6115_v16 = vadd.f32 %v20006_v45, %v20005_v4 }
 0x41f   : > { %v9378_v38 = vadd.f32 %v19064_v53, %v8679_v58  ;;  %v20008_v58 = vld [vmem:[#allocation48_spill] sm:$0xff] }
 0x420   : > { %v14215_v51 = vpop.f32.mrf.mxu1  ;;  %v6925_v53 = vadd.f32 %v20007_v12, %v6115_v16 }
 0x421   : > { %v10439_v36 = vadd.f32 %v14215_v51, %v9709_v32  ;;  %v9708_v13 = vadd.f32 %v19100_v9, %v9378_v38  ;;  %v8682_v9 = vadd.f32 %v18919_v34, %v18965_v35 }
 0x422   : > { %v10310_v8 = vpop.f32.mrf.mxu1  ;;  %v7623_v26 = vadd.f32 %v20008_v58, %v6925_v53 }
 0x423   : > { %v10478_v0 = vadd.f32 %v19184_v19, %v10439_v36  ;;  %v10437_v61 = vadd.f32 %v10310_v8, %v9707_v43  ;;  %v9383_v43 = vadd.f32 %v19066_v44, %v8684_v39  ;;  %v19207_v36 = vpop.f32.mrf.mxu0 }
 0x424   : > { %v14216_v59 = vpop.f32.mrf.mxu1  ;;  %v7953_v38 = vadd.f32 %v20009_v18, %v7623_v26 }
 0x425   : > { %v13182_v11 = vpack.c.bf16 %v10478_v0, %v10478_v0  ;;  %v10476_v33 = vadd.f32 %v19184_v19, %v10437_v61  ;;  %v10440_v51 = vadd.f32 %v14216_v59, %v9710_v46  ;;  %v8685_v46 = vadd.f32 %v18933_v42, %v18969_v54  ;;  %v19220_v16 = vpop.f32.mrf.mxu0 }
 0x426   : > { %v10313_v40 = vpop.f32.mrf.mxu1  ;;  %v9381_v0 = vadd.f32 %v19068_v52, %v8682_v9  ;;  %v9713_v61 = vadd.f32 %v19108_v3, %v9383_v43  ;;  %v8683_v44 = vadd.f32 %v18953_v56, %v7953_v38 }
 0x427   : > { %10639 = vst.msk [vmem:[#allocation3 + $0x8] sm:$0xf] %vm10636_vm4, %v13182_v11  ;;  %v13180_v50 = vpack.c.bf16 %v10476_v33, %v10476_v33  ;;  %v10479_v7 = vadd.f32 %v19184_v19, %v10440_v51  ;;  %v10438_v32 = vadd.f32 %v10313_v40, %v9708_v13  ;;  %v9384_v4 = vadd.f32 %v19070_v23, %v8685_v46  ;;  %v20010_v13 = vld [vmem:[#allocation29_spill] sm:$0xff]  ;;  %v20011_v11 = vld [vmem:[#allocation10_spill] sm:$0xff]  ;;  %v19230_v53 = vpop.f32.mrf.mxu0 }
 0x428   : > { %v9711_v45 = vadd.f32 %v19116_v15, %v9381_v0  ;;  %v6131_v42 = vadd.f32 %v20011_v11, %v20010_v13  ;;  %v9382_v52 = vadd.f32 %v19072_v25, %v8683_v44  ;;  %v20012_v51 = vld [vmem:[#allocation49_spill] sm:$0xff] }
 0x429   : > { %10637 = vst.msk [vmem:[#allocation3] sm:$0xf] %vm10636_vm4, %v13180_v50  ;;  %v13183_v8 = vpack.c.bf16 %v10479_v7, %v10479_v7  ;;  %v10477_v31 = vadd.f32 %v19184_v19, %v10438_v32  ;;  %v9714_v3 = vadd.f32 %v19124_v55, %v9384_v4  ;;  %v20013_v32 = vld [vmem:[#allocation52_spill] sm:$0xff]  ;;  %v19239_v43 = vpop.f32.mrf.mxu0  ;;  %v20015_v4 = vld [vmem:[#allocation14_spill] sm:$0xff] }
 0x42a   : > { %v6929_v23 = vadd.f32 %v20012_v51, %v6131_v42  ;;  %v9712_v15 = vadd.f32 %v19132_v30, %v9382_v52  ;;  %v9717_v30 = vadd.f32 %v19140_v47, %v19075_v2  ;;  %v20017_v51 = vld [vmem:[#allocation42_spill] sm:$0xff] }
 0x42b   : > { %10640 = vst.msk [vmem:[#allocation3 + $0xc] sm:$0xf] %vm10636_vm4, %v13183_v8  ;;  %v13181_v34 = vpack.c.bf16 %v10477_v31, %v10477_v31  ;;  %v14219_v35 = vpop.f32.mrf.mxu1  ;;  %v19252_v44 = vpop.f32.mrf.mxu0 }
 0x42c   : > { %v10443_v59 = vadd.f32 %v14219_v35, %v9713_v61  ;;  %v7627_v58 = vadd.f32 %v20013_v32, %v6929_v23  ;;  %v9715_v61 = vadd.f32 %v19148_v57, %v19078_v63  ;;  %v9718_v35 = vadd.f32 %v19153_v41, %v19081_v20  ;;  %v20014_v57 = vld [vmem:[#allocation37_spill] sm:$0xff] }
 0x42d   : > { %10638 = vst.msk [vmem:[#allocation3 + $0x4] sm:$0xf] %vm10636_vm4, %v13181_v34  ;;  %v10326_v54 = vpop.f32.mrf.mxu1  ;;  %v9647_v41 = vpop.f32.mrf.mxu0 }
 0x42e   : > { %v10482_v33 = vadd.f32 %v19184_v19, %v10443_v59  ;;  %v10441_v56 = vadd.f32 %v10326_v54, %v9711_v45  ;;  %v7957_v9 = vadd.f32 %v18927_v6, %v7627_v58  ;;  %v6147_v45 = vadd.f32 %v20015_v4, %v20014_v57  ;;  %v20016_v54 = vld [vmem:[#allocation53_spill] sm:$0xff] }
 0x42f   : > { %v14220_v12 = vpop.f32.mrf.mxu1 }
 0x430   : > { %v13186_v39 = vpack.c.bf16 %v10482_v33, %v10482_v33  ;;  %v10480_v40 = vadd.f32 %v19184_v19, %v10441_v56  ;;  %v10444_v50 = vadd.f32 %v14220_v12, %v9714_v3  ;;  %v8687_v0 = vadd.f32 %v18988_v37, %v7957_v9 }
 0x431   : > { %v10329_v7 = vpop.f32.mrf.mxu1  ;;  %v6933_v52 = vadd.f32 %v20016_v54, %v6147_v45 }
 0x432   : > { %10643 = vst.msk [vmem:[#allocation3 + $0x18] sm:$0xf] %vm10636_vm4, %v13186_v39  ;;  %v13184_v25 = vpack.c.bf16 %v10480_v40, %v10480_v40  ;;  %v10483_v55 = vadd.f32 %v19184_v19, %v10444_v50  ;;  %v10442_v26 = vadd.f32 %v10329_v7, %v9712_v15  ;;  %v14495_v46 = vld [vmem:[#allocation3 + $0x8] sm:$0xff]   ;;  %v9386_v47 = vadd.f32 %v19083_v10, %v8687_v0  ;;  %v14201_v50 = vpop.f32.mrf.mxu0 }
 0x433   : > { %v7631_v23 = vadd.f32 %v20017_v51, %v6933_v52  ;;  %v9721_v39 = vadd.f32 %v19179_v5, %v19088_v49  ;;  %v9722_v5 = vadd.f32 %v19207_v36, %v19096_v14  ;;  %v9725_v14 = vadd.f32 %v19230_v53, %v19103_v29 }
 0x434   : > { %10641 = vst.msk [vmem:[#allocation3 + $0x10] sm:$0xf] %vm10636_vm4, %v13184_v25  ;;  %v13187_v8 = vpack.c.bf16 %v10483_v55, %v10483_v55  ;;  %v10481_v31 = vadd.f32 %v19184_v19, %v10442_v26  ;;  %v14494_v18 = vld [vmem:[#allocation3] sm:$0xff]   ;;  %v9716_v13 = vadd.f32 %v19166_v17, %v9386_v47  ;;  %v9719_v55 = vadd.f32 %v19194_v24, %v19091_v28  ;;  %v20018_v47 = vld [vmem:[#allocation21_spill] sm:$0xff] }
 0x435   : > { %v14223_v38 = vpop.f32.mrf.mxu1  ;;  %14247 = vmatprep.mubr.msk.bf16.mxu0 %vm887_vm3, %v14494_v18  ;;  %v7961_v15 = vadd.f32 %v18975_v62, %v7631_v23  ;;  %v9726_v29 = vadd.f32 %v19252_v44, %v19111_v22 }
 0x436   : > { %10644 = vst.msk [vmem:[#allocation3 + $0x1c] sm:$0xf] %vm10636_vm4, %v13187_v8  ;;  %v13185_v6 = vpack.c.bf16 %v10481_v31, %v10481_v31  ;;  %v10447_v34 = vadd.f32 %v14223_v38, %v9717_v30  ;;  %14248 = vmatmul.mubr.msk.bf16.vlgmr.msra.gmra.mxu0 %vm887_vm3, %v14495_v46 }
 0x437   : > { %v10342_v2 = vpop.f32.mrf.mxu1  ;;  %v8691_v25 = vadd.f32 %v19000_v1, %v7961_v15  ;;  %v9660_v1 = vpop.f32.mrf.mxu0  ;;  %v20020_v15 = vld [vmem:[#allocation41_spill] sm:$0xff] }
 0x438   : > { %10642 = vst.msk [vmem:[#allocation3 + $0x14] sm:$0xf] %vm10636_vm4, %v13185_v6  ;;  %v10486_v37 = vadd.f32 %v19184_v19, %v10447_v34  ;;  %v10445_v63 = vadd.f32 %v10342_v2, %v9715_v61 }
 0x439   : > { %v14224_v59 = vpop.f32.mrf.mxu1  ;;  %v9390_v49 = vadd.f32 %v19098_v60, %v8691_v25  ;;  %v14202_v61 = vpop.f32.mrf.mxu0 }
 0x43a   : > { %v13190_v11 = vpack.c.bf16 %v10486_v37, %v10486_v37  ;;  %v10484_v42 = vadd.f32 %v19184_v19, %v10445_v63  ;;  %v10448_v10 = vadd.f32 %v14224_v59, %v9718_v35  ;;  %v9723_v35 = vadd.f32 %v19239_v43, %v20018_v47  ;;  %v20019_v43 = vld [vmem:[#allocation23_spill] sm:$0xff]  ;;  %v20025_v47 = vld [vmem:[#allocation28_spill] sm:$0xff] }
 0x43b   : > { %v10345_v20 = vpop.f32.mrf.mxu1  ;;  %v9720_v28 = vadd.f32 %v19220_v16, %v9390_v49  ;;  %v9663_v57 = vpop.f32.mrf.mxu0 }
 0x43c   : > { %10647 = vst.msk [vmem:[#allocation3 + $0x28] sm:$0xf] %vm10636_vm4, %v13190_v11  ;;  %v13188_v3 = vpack.c.bf16 %v10484_v42, %v10484_v42  ;;  %v10487_v33 = vadd.f32 %v19184_v19, %v10448_v10  ;;  %v10446_v56 = vadd.f32 %v10345_v20, %v9716_v13  ;;  %v9724_v13 = vadd.f32 %v9647_v41, %v20019_v43 }
 0x43d   : > { %v14497_v58 = vld [vmem:[#allocation3 + $0x18] sm:$0xff]   ;;  %v14205_v54 = vpop.f32.mrf.mxu0 }
 0x43e   : > { %10645 = vst.msk [vmem:[#allocation3 + $0x20] sm:$0xf] %vm10636_vm4, %v13188_v3  ;;  %v13191_v12 = vpack.c.bf16 %v10487_v33, %v10487_v33  ;;  %v10485_v17 = vadd.f32 %v19184_v19, %v10446_v56  ;;  %v9729_v56 = vadd.f32 %v14201_v50, %v19119_v48 }
 0x43f   : > { %v14496_v40 = vld [vmem:[#allocation3 + $0x10] sm:$0xff]   ;;  %v9676_v41 = vpop.f32.mrf.mxu0 }
 0x440   : > { %10648 = vst.msk [vmem:[#allocation3 + $0x2c] sm:$0xf] %vm10636_vm4, %v13191_v12  ;;  %v13189_v7 = vpack.c.bf16 %v10485_v17, %v10485_v17  ;;  %v14227_v32 = vpop.f32.mrf.mxu1  ;;  %14251 = vmatprep.mubr.msk.bf16.mxu0 %vm887_vm3, %v14496_v40 }
 0x441   : > { %v10451_v26 = vadd.f32 %v14227_v32, %v9721_v39  ;;  %14252 = vmatmul.mubr.msk.bf16.gmra.mxu0 %vm887_vm3, %v14497_v58  ;;  %v9727_v39 = vadd.f32 %v9660_v1, %v20020_v15  ;;  %v20021_v32 = vld [vmem:[#allocation26_spill] sm:$0xff]  ;;  %v14206_v48 = vpop.f32.mrf.mxu0  ;;  %v20028_v15 = vld [vmem:[#allocation4_spill] sm:$0xff] }
 0x442   : > { %10646 = vst.msk [vmem:[#allocation3 + $0x24] sm:$0xf] %vm10636_vm4, %v13189_v7  ;;  %v10358_v62 = vpop.f32.mrf.mxu1  ;;  %v9730_v58 = vadd.f32 %v14202_v61, %v20021_v32 }
 0x443   : > { %v10490_v9 = vadd.f32 %v19184_v19, %v10451_v26  ;;  %v10449_v30 = vadd.f32 %v10358_v62, %v9719_v55  ;;  %v20022_v26 = vld [vmem:[#allocation27_spill] sm:$0xff]  ;;  %v9679_v1 = vpop.f32.mrf.mxu0 }
 0x444   : > { %v14228_v8 = vpop.f32.mrf.mxu1  ;;  %v9728_v62 = vadd.f32 %v9663_v57, %v20022_v26 }
 0x445   : > { %v13194_v24 = vpack.c.bf16 %v10490_v9, %v10490_v9  ;;  %v10488_v31 = vadd.f32 %v19184_v19, %v10449_v30  ;;  %v10452_v18 = vadd.f32 %v14228_v8, %v9722_v5 }
 0x446   : > { %v10361_v38 = vpop.f32.mrf.mxu1 }
 0x447   : > { %10651 = vst.msk [vmem:[#allocation3 + $0x38] sm:$0xf] %vm10636_vm4, %v13194_v24  ;;  %v13192_v46 = vpack.c.bf16 %v10488_v31, %v10488_v31  ;;  %v10491_v60 = vadd.f32 %v19184_v19, %v10452_v18  ;;  %v10450_v0 = vadd.f32 %v10361_v38, %v9720_v28  ;;  %v14499_v2 = vld [vmem:[#allocation3 + $0x28] sm:$0xff]  }
 0x448   : > { %v20023_v31 = vld [vmem:[#allocation13_spill] sm:$0xff] }
 0x449   : > { %10649 = vst.msk [vmem:[#allocation3 + $0x30] sm:$0xf] %vm10636_vm4, %v13192_v46  ;;  %v13195_v36 = vpack.c.bf16 %v10491_v60, %v10491_v60  ;;  %v10489_v16 = vadd.f32 %v19184_v19, %v10450_v0  ;;  %v14498_v6 = vld [vmem:[#allocation3 + $0x20] sm:$0xff]   ;;  %v9733_v18 = vadd.f32 %v14205_v54, %v20023_v31 }
 0x44a   : > { %v14231_v34 = vpop.f32.mrf.mxu1  ;;  %14255 = vmatprep.mubr.msk.bf16.mxu0 %vm887_vm3, %v14498_v6 }
 0x44b   : > { %10652 = vst.msk [vmem:[#allocation3 + $0x3c] sm:$0xf] %vm10636_vm4, %v13195_v36  ;;  %v13193_v37 = vpack.c.bf16 %v10489_v16, %v10489_v16  ;;  %v10455_v63 = vadd.f32 %v14231_v34, %v9725_v14  ;;  %14256 = vmatmul.mubr.msk.bf16.gmra.mxu0 %vm887_vm3, %v14499_v2  ;;  %v20024_v14 = vld [vmem:[#allocation43_spill] sm:$0xff]  ;;  %v14209_v16 = vpop.f32.mrf.mxu0 }
 0x44c   : > { %v10374_v4 = vpop.f32.mrf.mxu1  ;;  %v9731_v36 = vadd.f32 %v9676_v41, %v20024_v14 }
 0x44d   : > { %10650 = vst.msk [vmem:[#allocation3 + $0x34] sm:$0xf] %vm10636_vm4, %v13193_v37  ;;  %v10494_v53 = vadd.f32 %v19184_v19, %v10455_v63  ;;  %v10453_v45 = vadd.f32 %v10374_v4, %v9723_v35  ;;  %v9734_v35 = vadd.f32 %v14206_v48, %v20025_v47  ;;  %v20026_v4 = vld [vmem:[#allocation50_spill] sm:$0xff] }
 0x44e   : > { %v14232_v59 = vpop.f32.mrf.mxu1 }
 0x44f   : > { %v13198_v11 = vpack.c.bf16 %v10494_v53, %v10494_v53  ;;  %v10492_v42 = vadd.f32 %v19184_v19, %v10453_v45  ;;  %v10456_v10 = vadd.f32 %v14232_v59, %v9726_v29  ;;  %v9732_v29 = vadd.f32 %v9679_v1, %v20026_v4  ;;  %v9692_v53 = vpop.f32.mrf.mxu0 }
 0x450   : > { %v10377_v52 = vpop.f32.mrf.mxu1 }
 0x451   : > { %10655 = vst.msk [vmem:[#allocation3 + $0x48] sm:$0xf] %vm10636_vm4, %v13198_v11  ;;  %v13196_v20 = vpack.c.bf16 %v10492_v42, %v10492_v42  ;;  %v10495_v3 = vadd.f32 %v19184_v19, %v10456_v10  ;;  %v10454_v22 = vadd.f32 %v10377_v52, %v9724_v13  ;;  %v14210_v54 = vpop.f32.mrf.mxu0 }
 0x452   : > { %v14501_v17 = vld [vmem:[#allocation3 + $0x38] sm:$0xff]  }
 0x453   : > { %10653 = vst.msk [vmem:[#allocation3 + $0x40] sm:$0xf] %vm10636_vm4, %v13196_v20  ;;  %v13199_v44 = vpack.c.bf16 %v10495_v3, %v10495_v3  ;;  %v10493_v33 = vadd.f32 %v19184_v19, %v10454_v22  ;;  %v20027_v3 = vld [vmem:[#allocation51_spill] sm:$0xff] }
 0x454   : > { %v14500_v51 = vld [vmem:[#allocation3 + $0x30] sm:$0xff]   ;;  %v14235_v12 = vpop.f32.mrf.mxu1  ;;  %v9737_v22 = vadd.f32 %v14209_v16, %v20027_v3 }
 0x455   : > { %10656 = vst.msk [vmem:[#allocation3 + $0x4c] sm:$0xf] %vm10636_vm4, %v13199_v44  ;;  %v13197_v23 = vpack.c.bf16 %v10493_v33, %v10493_v33  ;;  %v10459_v40 = vadd.f32 %v14235_v12, %v9729_v56  ;;  %14259 = vmatprep.mubr.msk.bf16.mxu0 %vm887_vm3, %v14500_v51  ;;  %v9735_v51 = vadd.f32 %v9692_v53, %v19156_v27  ;;  %v9695_v12 = vpop.f32.mrf.mxu0 }
 0x456   : > { %v10390_v7 = vpop.f32.mrf.mxu1  ;;  %14260 = vmatmul.mubr.msk.bf16.gmra.mxu0 %vm887_vm3, %v14501_v17 }
 0x457   : > { %10654 = vst.msk [vmem:[#allocation3 + $0x44] sm:$0xf] %vm10636_vm4, %v13197_v23  ;;  %v10498_v50 = vadd.f32 %v19184_v19, %v10459_v40  ;;  %v10457_v25 = vadd.f32 %v10390_v7, %v9727_v39  ;;  %v9738_v39 = vadd.f32 %v14210_v54, %v20028_v15 }
 0x458   : > { %v14236_v55 = vpop.f32.mrf.mxu1 }
 0x459   : > { %v13202_v49 = vpack.c.bf16 %v10498_v50, %v10498_v50  ;;  %v10496_v5 = vadd.f32 %v19184_v19, %v10457_v25  ;;  %v10460_v9 = vadd.f32 %v14236_v55, %v9730_v58  ;;  %v9736_v58 = vadd.f32 %v9695_v12, %v19169_v21 }
 0x45a   : > { %v10393_v30 = vpop.f32.mrf.mxu1 }
 0x45b   : > { %10659 = vst.msk [vmem:[#allocation3 + $0x58] sm:$0xf] %vm10636_vm4, %v13202_v49  ;;  %v13200_v8 = vpack.c.bf16 %v10496_v5, %v10496_v5  ;;  %v10499_v28 = vadd.f32 %v19184_v19, %v10460_v9  ;;  %v10458_v24 = vadd.f32 %v10393_v30, %v9728_v62 }
 0x45c   : > { %v14503_v61 = vld [vmem:[#allocation3 + $0x48] sm:$0xff]  }
 0x45d   : > { %10657 = vst.msk [vmem:[#allocation3 + $0x50] sm:$0xf] %vm10636_vm4, %v13200_v8  ;;  %v13203_v38 = vpack.c.bf16 %v10499_v28, %v10499_v28  ;;  %v10497_v46 = vadd.f32 %v19184_v19, %v10458_v24  ;;  %v13095_v24 = vld [vmem:[%s19567_s6 + $0x2] sm:$0x3] }
 0x45e   : > { %v14502_v60 = vld [vmem:[#allocation3 + $0x40] sm:$0xff]   ;;  %v14239_v0 = vpop.f32.mrf.mxu1  ;;  %14361 = vmatprep.subr.msk.bf16.mxu0 %vm936_vm0, %v13095_v24  ;;  %v11586_v31 = vsel %vm936_vm0, %v13095_v24, 0 }
 0x45f   : > { %10660 = vst.msk [vmem:[#allocation3 + $0x5c] sm:$0xf] %vm10636_vm4, %v13203_v38  ;;  %v13201_v6 = vpack.c.bf16 %v10497_v46, %v10497_v46  ;;  %v10463_v34 = vadd.f32 %v14239_v0, %v9733_v18  ;;  %14263 = vmatprep.mubr.msk.bf16.mxu0 %vm887_vm3, %v14502_v60  ;;  %14314 = vmatpush3.bf16.msra.mxu0 %v11586_v31 }
 0x460   : > { %v10406_v2 = vpop.f32.mrf.mxu1  ;;  %14264 = vmatmul.mubr.msk.bf16.gmra.mxu0 %vm887_vm3, %v14503_v61 }
 0x461   : > { %10658 = vst.msk [vmem:[#allocation3 + $0x54] sm:$0xf] %vm10636_vm4, %v13201_v6  ;;  %v10502_v37 = vadd.f32 %v19184_v19, %v10463_v34  ;;  %v10461_v63 = vadd.f32 %v10406_v2, %v9731_v36 }
 0x462   : > { %v14240_v57 = vpop.f32.mrf.mxu1 }
 0x463   : > { %v13206_v45 = vpack.c.bf16 %v10502_v37, %v10502_v37  ;;  %v10500_v59 = vadd.f32 %v19184_v19, %v10461_v63  ;;  %v10464_v43 = vadd.f32 %v14240_v57, %v9734_v35 }
 0x464   : > { %v10409_v13 = vpop.f32.mrf.mxu1 }
 0x465   : > { %10663 = vst.msk [vmem:[#allocation3 + $0x68] sm:$0xf] %vm10636_vm4, %v13206_v45  ;;  %v13204_v11 = vpack.c.bf16 %v10500_v59, %v10500_v59  ;;  %v10503_v42 = vadd.f32 %v19184_v19, %v10464_v43  ;;  %v10462_v10 = vadd.f32 %v10409_v13, %v9732_v29 }
 0x466   : > { %v14505_v41 = vld [vmem:[#allocation3 + $0x58] sm:$0xff]  }
 0x467   : > { %10661 = vst.msk [vmem:[#allocation3 + $0x60] sm:$0xf] %vm10636_vm4, %v13204_v11  ;;  %v13207_v52 = vpack.c.bf16 %v10503_v42, %v10503_v42  ;;  %v10501_v20 = vadd.f32 %v19184_v19, %v10462_v10 }
 0x468   : > { %v14504_v44 = vld [vmem:[#allocation3 + $0x50] sm:$0xff]  }
 0x469   : > { %10664 = vst.msk [vmem:[#allocation3 + $0x6c] sm:$0xf] %vm10636_vm4, %v13207_v52  ;;  %v13205_v33 = vpack.c.bf16 %v10501_v20, %v10501_v20  ;;  %14267 = vmatprep.mubr.msk.bf16.mxu0 %vm887_vm3, %v14504_v44 }
 0x46a   : > { %v14243_v56 = vpop.f32.mrf.mxu1  ;;  %14268 = vmatmul.mubr.msk.bf16.gmra.mxu0 %vm887_vm3, %v14505_v41 }
 0x46b   : > { %v10467_v23 = vadd.f32 %v14243_v56, %v9737_v22  ;;  %10662 = vst.msk [vmem:[#allocation3 + $0x64] sm:$0xf] %vm10636_vm4, %v13205_v33 }
 0x46c   : > { %v10422_v17 = vpop.f32.mrf.mxu1 }
 0x46d   : > { %v10506_v40 = vadd.f32 %v19184_v19, %v10467_v23  ;;  %v10465_v7 = vadd.f32 %v10422_v17, %v9735_v51 }
 0x46e   : > { %v14244_v32 = vpop.f32.mrf.mxu1 }
 0x46f   : > { %v13210_v48 = vpack.c.bf16 %v10506_v40, %v10506_v40  ;;  %v10504_v27 = vadd.f32 %v19184_v19, %v10465_v7  ;;  %v10468_v50 = vadd.f32 %v14244_v32, %v9738_v39 }
 0x470   : > { %v10425_v25 = vpop.f32.mrf.mxu1  ;;  %v14507_v30 = vld [vmem:[#allocation3 + $0x68] sm:$0xff]  }
 0x471   : > { %10667 = vst.msk [vmem:[#allocation3 + $0x78] sm:$0xf] %vm10636_vm4, %v13210_v48  ;;  %v13208_v55 = vpack.c.bf16 %v10504_v27, %v10504_v27  ;;  %v10507_v26 = vadd.f32 %v19184_v19, %v10468_v50  ;;  %v10466_v62 = vadd.f32 %v10425_v25, %v9736_v58 }
 0x472   : > { %v14506_v9 = vld [vmem:[#allocation3 + $0x60] sm:$0xff]  }
 0x473   : > { %10665 = vst.msk [vmem:[#allocation3 + $0x70] sm:$0xf] %vm10636_vm4, %v13208_v55  ;;  %v13211_v49 = vpack.c.bf16 %v10507_v26, %v10507_v26  ;;  %v10505_v5 = vadd.f32 %v19184_v19, %v10466_v62  ;;  %14271 = vmatprep.mubr.msk.bf16.mxu0 %vm887_vm3, %v14506_v9  ;;  %v11113_v19 = vld [vmem:[%s19567_s6] sm:$0x3] }
 0x474   : > { %14272 = vmatmul.mubr.msk.bf16.gmra.mxu0 %vm887_vm3, %v14507_v30  ;;  %14360 = vmatprep.subr.msk.bf16.mxu1 %vm936_vm0, %v11113_v19  ;;  %v11163_v28 = vsel %vm936_vm0, %v11113_v19, 0 }
 0x475   : > { %10668 = vst.msk [vmem:[#allocation3 + $0x7c] sm:$0xf] %vm10636_vm4, %v13211_v49  ;;  %v13209_v21 = vpack.c.bf16 %v10505_v5, %v10505_v5  ;;  %14280 = vmatpush3.bf16.msra.mxu1 %v11163_v28 }
 0x477   : > { %10666 = vst.msk [vmem:[#allocation3 + $0x74] sm:$0xf] %vm10636_vm4, %v13209_v21 }
 0x47c   : > { %v14509_v8 = vld [vmem:[#allocation3 + $0x78] sm:$0xff]  }
 0x47e   : > { %v14508_v1 = vld [vmem:[#allocation3 + $0x70] sm:$0xff]  }
 0x47f   : > { %14275 = vmatprep.mubr.msk.bf16.mxu0 %vm887_vm3, %v14508_v1 }
 0x480   : > { %14276 = vmatmul.mubr.msk.bf16.gmra.mxu0 %vm887_vm3, %v14509_v8 }
 0x4f6   : > { %v14249_v18 = vpop.f32.mrf.mxu0 }
 0x4f7   : > { %v11035_v61 = vmul.f32 0.2, %v14249_v18  ;;  %vm11003_vm12 = vcmp.ge.f32.partialorder %v14249_v18, 0.0 }
 0x4f8   : > { %v10874_v38 = vpop.f32.mrf.mxu0 }
 0x4f9   : > { %v11033_v60 = vmul.f32 0.2, %v10874_v38  ;;  %vm11001_vm9 = vcmp.ge.f32.partialorder %v10874_v38, 0.0  ;;  %v11067_v2 = vsel %vm11003_vm12, %v14249_v18, %v11035_v61 }
 0x4fa   : > { %v14250_v46 = vpop.f32.mrf.mxu0 }
 0x4fb   : > { %vm11004_vm8 = vcmp.ge.f32.partialorder %v14250_v46, 0.0  ;;  %v11036_v0 = vmul.f32 0.2, %v14250_v46  ;;  %v11065_v6 = vsel %vm11001_vm9, %v10874_v38, %v11033_v60 }
 0x4fc   : > { %v10877_v14 = vpop.f32.mrf.mxu0 }
 0x4fd   : > { %vm11002_vm15 = vcmp.ge.f32.partialorder %v10877_v14, 0.0  ;;  %v11034_v36 = vmul.f32 0.2, %v10877_v14  ;;  %v11068_v16 = vsel %vm11004_vm8, %v14250_v46, %v11036_v0 }
 0x4fe   : > { %v11098_v35 = vpack.c.bf16 %v11068_v16, %v11067_v2 }
 0x4ff   : > { %v11066_v34 = vsel %vm11002_vm15, %v10877_v14, %v11034_v36 }
 0x500   : > { %v11097_v47 = vpack.c.bf16 %v11066_v34, %v11065_v6 }
 0x501   : > { %v14253_v37 = vpop.f32.mrf.mxu0 }
 0x502   : > { %11505 = vrot.lane.b32.xlu0 %v11097_v47, %s14546_s25  ;;  %14281 = vmatprep.mubr.msk.bf16.mxu1 %vm887_vm3, %v11097_v47  ;;  %v11039_v53 = vmul.f32 0.2, %v14253_v37  ;;  %vm11007_vm2 = vcmp.ge.f32.partialorder %v14253_v37, 0.0 }
 0x503   : > { %v10890_v63 = vpop.f32.mrf.mxu0  ;;  %14282 = vmatmul.mubr.msk.bf16.vlgmr.msra.gmra.mxu1 %vm887_vm3, %v11098_v35 }
 0x504   : > { %v11037_v4 = vmul.f32 0.2, %v10890_v63  ;;  %vm11005_vm1 = vcmp.ge.f32.partialorder %v10890_v63, 0.0  ;;  %v11071_v42 = vsel %vm11007_vm2, %v14253_v37, %v11039_v53 }
 0x505   : > { %v14254_v57 = vpop.f32.mrf.mxu0 }
 0x506   : > { %vm11008_vm0 = vcmp.ge.f32.partialorder %v14254_v57, 0.0  ;;  %v11040_v29 = vmul.f32 0.2, %v14254_v57  ;;  %11507 = vrot.lane.b32.xlu0 %v11098_v35, %s14546_s25  ;;  %v11069_v13 = vsel %vm11005_vm1, %v10890_v63, %v11037_v4 }
 0x507   : > { %v10893_v45 = vpop.f32.mrf.mxu0 }
 0x508   : > { %vm11006_vm5 = vcmp.ge.f32.partialorder %v10893_v45, 0.0  ;;  %v11038_v59 = vmul.f32 0.2, %v10893_v45  ;;  %v11072_v43 = vsel %vm11008_vm0, %v14254_v57, %v11040_v29 }
 0x509   : > { %v11100_v52 = vpack.c.bf16 %v11072_v43, %v11071_v42 }
 0x50a   : > { %v11070_v11 = vsel %vm11006_vm5, %v10893_v45, %v11038_v59 }
 0x50b   : > { %v14257_v10 = vpop.f32.mrf.mxu0  ;;  %v11099_v54 = vpack.c.bf16 %v11070_v11, %v11069_v13 }
 0x50c   : > { %v11043_v3 = vmul.f32 0.2, %v14257_v10  ;;  %vm11011_vm6 = vcmp.ge.f32.partialorder %v14257_v10, 0.0 }
 0x50d   : > { %v10906_v20 = vpop.f32.mrf.mxu0  ;;  %11509 = vrot.lane.b32.xlu1 %v11099_v54, %s14546_s25  ;;  %14285 = vmatprep.mubr.msk.bf16.mxu1 %vm887_vm3, %v11099_v54 }
 0x50e   : > { %14286 = vmatmul.mubr.msk.bf16.gmra.mxu1 %vm887_vm3, %v11100_v52  ;;  %v11041_v44 = vmul.f32 0.2, %v10906_v20  ;;  %vm11009_vm10 = vcmp.ge.f32.partialorder %v10906_v20, 0.0  ;;  %v11075_v41 = vsel %vm11011_vm6, %v14257_v10, %v11043_v3 }
 0x50f   : > { %v14258_v22 = vpop.f32.mrf.mxu0 }
 0x510   : > { %vm11012_vm7 = vcmp.ge.f32.partialorder %v14258_v22, 0.0  ;;  %v11044_v33 = vmul.f32 0.2, %v14258_v22  ;;  %v11073_v17 = vsel %vm11009_vm10, %v10906_v20, %v11041_v44 }
 0x511   : > { %v10909_v56 = vpop.f32.mrf.mxu0  ;;  %11511 = vrot.lane.b32.xlu1 %v11100_v52, %s14546_s25 }
 0x512   : > { %v11076_v51 = vsel %vm11012_vm7, %v14258_v22, %v11044_v33  ;;  %vm11010_vm11 = vcmp.ge.f32.partialorder %v10909_v56, 0.0  ;;  %v11042_v23 = vmul.f32 0.2, %v10909_v56 }
 0x513   : > { %v11102_v12 = vpack.c.bf16 %v11076_v51, %v11075_v41 }
 0x514   : > { %v11074_v15 = vsel %vm11010_vm11, %v10909_v56, %v11042_v23 }
 0x515   : > { %11515 = vrot.lane.b32.xlu1 %v11102_v12, %s14546_s25  ;;  %v11101_v39 = vpack.c.bf16 %v11074_v15, %v11073_v17 }
 0x516   : > { %v14261_v40 = vpop.f32.mrf.mxu0 }
 0x517   : > { %11513 = vrot.lane.b32.xlu0 %v11101_v39, %s14546_s25  ;;  %14289 = vmatprep.mubr.msk.bf16.mxu1 %vm887_vm3, %v11101_v39  ;;  %v11047_v32 = vmul.f32 0.2, %v14261_v40  ;;  %vm11015_vm13 = vcmp.ge.f32.partialorder %v14261_v40, 0.0 }
 0x518   : > { %v10922_v7 = vpop.f32.mrf.mxu0  ;;  %14290 = vmatmul.mubr.msk.bf16.gmra.mxu1 %vm887_vm3, %v11102_v12 }
 0x519   : > { %v11045_v48 = vmul.f32 0.2, %v10922_v7  ;;  %vm11013_vm4 = vcmp.ge.f32.partialorder %v10922_v7, 0.0  ;;  %v11079_v25 = vsel %vm11015_vm13, %v14261_v40, %v11047_v32 }
 0x51a   : > { %v14262_v58 = vpop.f32.mrf.mxu0 }
 0x51b   : > { %vm11016_vm14 = vcmp.ge.f32.partialorder %v14262_v58, 0.0  ;;  %v11048_v27 = vmul.f32 0.2, %v14262_v58  ;;  %v11077_v49 = vsel %vm11013_vm4, %v10922_v7, %v11045_v48 }
 0x51c   : > { %v10925_v50 = vpop.f32.mrf.mxu0 }
 0x51d   : > { %v11080_v55 = vsel %vm11016_vm14, %v14262_v58, %v11048_v27  ;;  %vm11014_vm8 = vcmp.ge.f32.partialorder %v10925_v50, 0.0  ;;  %v11046_v26 = vmul.f32 0.2, %v10925_v50 }
 0x51e   : > { %v11104_v62 = vpack.c.bf16 %v11080_v55, %v11079_v25 }
 0x51f   : > { %v11078_v5 = vsel %vm11014_vm8, %v10925_v50, %v11046_v26 }
 0x520   : > { %v14265_v9 = vpop.f32.mrf.mxu0  ;;  %11519 = vrot.lane.b32.xlu1 %v11104_v62, %s14546_s25  ;;  %v11103_v30 = vpack.c.bf16 %v11078_v5, %v11077_v49 }
 0x521   : > { %v11051_v1 = vmul.f32 0.2, %v14265_v9  ;;  %vm11019_vm9 = vcmp.ge.f32.partialorder %v14265_v9, 0.0 }
 0x522   : > { %v10938_v21 = vpop.f32.mrf.mxu0  ;;  %11517 = vrot.lane.b32.xlu0 %v11103_v30, %s14546_s25  ;;  %14293 = vmatprep.mubr.msk.bf16.mxu1 %vm887_vm3, %v11103_v30 }
 0x523   : > { %14294 = vmatmul.mubr.msk.bf16.gmra.mxu1 %vm887_vm3, %v11104_v62  ;;  %v11049_v19 = vmul.f32 0.2, %v10938_v21  ;;  %vm11017_vm15 = vcmp.ge.f32.partialorder %v10938_v21, 0.0  ;;  %v11083_v31 = vsel %vm11019_vm9, %v14265_v9, %v11051_v1 }
 0x524   : > { %v14266_v8 = vpop.f32.mrf.mxu0 }
 0x525   : > { %vm11020_vm12 = vcmp.ge.f32.partialorder %v14266_v8, 0.0  ;;  %v11052_v28 = vmul.f32 0.2, %v14266_v8  ;;  %v11081_v60 = vsel %vm11017_vm15, %v10938_v21, %v11049_v19 }
 0x526   : > { %v10941_v24 = vpop.f32.mrf.mxu0 }
 0x527   : > { %v11084_v18 = vsel %vm11020_vm12, %v14266_v8, %v11052_v28  ;;  %vm11018_vm0 = vcmp.ge.f32.partialorder %v10941_v24, 0.0  ;;  %v11050_v38 = vmul.f32 0.2, %v10941_v24  ;;  %vm11454_vm12 = vcmask 257024  }
 0x528   : > { %v11106_v46 = vpack.c.bf16 %v11084_v18, %v11083_v31 }
 0x529   : > { %v11082_v0 = vsel %vm11018_vm0, %v10941_v24, %v11050_v38 }
 0x52a   : > { %11523 = vrot.lane.b32.xlu1 %v11106_v46, %s14546_s25  ;;  %v11105_v61 = vpack.c.bf16 %v11082_v0, %v11081_v60  ;;  %v14269_v14 = vpop.f32.mrf.mxu0 }
 0x52b   : > { %v11055_v16 = vmul.f32 0.2, %v14269_v14  ;;  %vm11023_vm1 = vcmp.ge.f32.partialorder %v14269_v14, 0.0 }
 0x52c   : > { %11521 = vrot.lane.b32.xlu0 %v11105_v61, %s14546_s25  ;;  %14297 = vmatprep.mubr.msk.bf16.mxu1 %vm887_vm3, %v11105_v61  ;;  %v10954_v36 = vpop.f32.mrf.mxu0 }
 0x52d   : > { %14298 = vmatmul.mubr.msk.bf16.gmra.mxu1 %vm887_vm3, %v11106_v46  ;;  %v11053_v34 = vmul.f32 0.2, %v10954_v36  ;;  %vm11021_vm5 = vcmp.ge.f32.partialorder %v10954_v36, 0.0  ;;  %v11087_v35 = vsel %vm11023_vm1, %v14269_v14, %v11055_v16 }
 0x52e   : > { %v14270_v6 = vpop.f32.mrf.mxu0 }
 0x52f   : > { %vm11024_vm2 = vcmp.ge.f32.partialorder %v14270_v6, 0.0  ;;  %v11056_v2 = vmul.f32 0.2, %v14270_v6  ;;  %v11085_v4 = vsel %vm11021_vm5, %v10954_v36, %v11053_v34 }
 0x530   : > { %v10957_v47 = vpop.f32.mrf.mxu0 }
 0x531   : > { %v11088_v37 = vsel %vm11024_vm2, %v14270_v6, %v11056_v2  ;;  %vm11022_vm6 = vcmp.ge.f32.partialorder %v10957_v47, 0.0  ;;  %v11054_v63 = vmul.f32 0.2, %v10957_v47 }
 0x532   : > { %v11108_v57 = vpack.c.bf16 %v11088_v37, %v11087_v35 }
 0x533   : > { %v11086_v29 = vsel %vm11022_vm6, %v10957_v47, %v11054_v63 }
 0x534   : > { %v14273_v53 = vpop.f32.mrf.mxu0  ;;  %11527 = vrot.lane.b32.xlu1 %v11108_v57, %s14546_s25  ;;  %v11107_v45 = vpack.c.bf16 %v11086_v29, %v11085_v4 }
 0x535   : > { %v11059_v43 = vmul.f32 0.2, %v14273_v53  ;;  %vm11027_vm7 = vcmp.ge.f32.partialorder %v14273_v53, 0.0 }
 0x536   : > { %v10970_v59 = vpop.f32.mrf.mxu0  ;;  %11525 = vrot.lane.b32.xlu0 %v11107_v45, %s14546_s25  ;;  %14301 = vmatprep.mubr.msk.bf16.mxu1 %vm887_vm3, %v11107_v45 }
 0x537   : > { %14302 = vmatmul.mubr.msk.bf16.gmra.mxu1 %vm887_vm3, %v11108_v57  ;;  %v11057_v11 = vmul.f32 0.2, %v10970_v59  ;;  %vm11025_vm11 = vcmp.ge.f32.partialorder %v10970_v59, 0.0  ;;  %v11091_v54 = vsel %vm11027_vm7, %v14273_v53, %v11059_v43 }
 0x538   : > { %v14274_v13 = vpop.f32.mrf.mxu0 }
 0x539   : > { %vm11028_vm10 = vcmp.ge.f32.partialorder %v14274_v13, 0.0  ;;  %v11060_v42 = vmul.f32 0.2, %v14274_v13  ;;  %v11089_v22 = vsel %vm11025_vm11, %v10970_v59, %v11057_v11 }
 0x53a   : > { %v10973_v10 = vpop.f32.mrf.mxu0 }
 0x53b   : > { %v11092_v52 = vsel %vm11028_vm10, %v14274_v13, %v11060_v42  ;;  %vm11026_vm13 = vcmp.ge.f32.partialorder %v10973_v10, 0.0  ;;  %v11058_v20 = vmul.f32 0.2, %v10973_v10 }
 0x53c   : > { %v11110_v3 = vpack.c.bf16 %v11092_v52, %v11091_v54 }
 0x53d   : > { %v11090_v44 = vsel %vm11026_vm13, %v10973_v10, %v11058_v20 }
 0x53e   : > { %11531 = vrot.lane.b32.xlu1 %v11110_v3, %s14546_s25  ;;  %v11109_v33 = vpack.c.bf16 %v11090_v44, %v11089_v22 }
 0x540   : > { %v14277_v56 = vpop.f32.mrf.mxu0  ;;  %11529 = vrot.lane.b32.xlu0 %v11109_v33, %s14546_s25  ;;  %14305 = vmatprep.mubr.msk.bf16.mxu1 %vm887_vm3, %v11109_v33 }
 0x541   : > { %14306 = vmatmul.mubr.msk.bf16.gmra.mxu1 %vm887_vm3, %v11110_v3  ;;  %v11063_v51 = vmul.f32 0.2, %v14277_v56  ;;  %vm11031_vm14 = vcmp.ge.f32.partialorder %v14277_v56, 0.0 }
 0x542   : > { %v10986_v41 = vpop.f32.mrf.mxu0 }
 0x543   : > { %v11061_v12 = vmul.f32 0.2, %v10986_v41  ;;  %vm11029_vm8 = vcmp.ge.f32.partialorder %v10986_v41, 0.0  ;;  %v11095_v39 = vsel %vm11031_vm14, %v14277_v56, %v11063_v51 }
 0x544   : > { %v14278_v23 = vpop.f32.mrf.mxu0 }
 0x545   : > { %vm11032_vm4 = vcmp.ge.f32.partialorder %v14278_v23, 0.0  ;;  %v11064_v17 = vmul.f32 0.2, %v14278_v23  ;;  %v11093_v58 = vsel %vm11029_vm8, %v10986_v41, %v11061_v12 }
 0x546   : > { %v10989_v15 = vpop.f32.mrf.mxu0 }
 0x547   : > { %v11096_v40 = vsel %vm11032_vm4, %v14278_v23, %v11064_v17  ;;  %vm11030_vm9 = vcmp.ge.f32.partialorder %v10989_v15, 0.0  ;;  %v11062_v7 = vmul.f32 0.2, %v10989_v15 }
 0x548   : > { %v11112_v32 = vpack.c.bf16 %v11096_v40, %v11095_v39 }
 0x549   : > { %v11094_v48 = vsel %vm11030_vm9, %v10989_v15, %v11062_v7 }
 0x54a   : > { %11535 = vrot.lane.b32.xlu1 %v11112_v32, %s14546_s25  ;;  %v11111_v27 = vpack.c.bf16 %v11094_v48, %v11093_v58 }
 0x54c   : > { %11533 = vrot.lane.b32.xlu0 %v11111_v27, %s14546_s25  ;;  %14309 = vmatprep.mubr.msk.bf16.mxu1 %vm887_vm3, %v11111_v27 }
 0x54d   : > { %14310 = vmatmul.mubr.msk.bf16.gmra.mxu1 %vm887_vm3, %v11112_v32 }
 0x574   : > { %v11506_v50 = vpop.permute.xlu0 %11505 }
 0x575   : > { %14315 = vmatprep.mubr.msk.bf16.mxu0 %vm887_vm3, %v11506_v50 }
 0x578   : > { %v11508_v25 = vpop.permute.xlu0 %11507 }
 0x579   : > { %14316 = vmatmul.mubr.msk.bf16.vlgmr.msra.gmra.mxu0 %vm887_vm3, %v11508_v25 }
 0x57f   : > { %v11510_v55 = vpop.permute.xlu1 %11509 }
 0x580   : > { %14319 = vmatprep.mubr.msk.bf16.mxu0 %vm887_vm3, %v11510_v55 }
 0x583   : > { %v11512_v26 = vpop.permute.xlu1 %11511 }
 0x584   : > { %14320 = vmatmul.mubr.msk.bf16.gmra.mxu0 %vm887_vm3, %v11512_v26 }
 0x587   : > { %v11516_v49 = vpop.permute.xlu1 %11515 }
 0x589   : > { %v11514_v62 = vpop.permute.xlu0 %11513 }
 0x58a   : > { %14323 = vmatprep.mubr.msk.bf16.mxu0 %vm887_vm3, %v11514_v62 }
 0x58c   : > { %14324 = vmatmul.mubr.msk.bf16.gmra.mxu0 %vm887_vm3, %v11516_v49 }
 0x592   : > { %v11520_v9 = vpop.permute.xlu1 %11519 }
 0x594   : > { %v11518_v5 = vpop.permute.xlu0 %11517 }
 0x595   : > { %14327 = vmatprep.mubr.msk.bf16.mxu0 %vm887_vm3, %v11518_v5 }
 0x596   : > { %14328 = vmatmul.mubr.msk.bf16.gmra.mxu0 %vm887_vm3, %v11520_v9 }
 0x59c   : > { %v11524_v21 = vpop.permute.xlu1 %11523 }
 0x59e   : > { %v11522_v30 = vpop.permute.xlu0 %11521 }
 0x59f   : > { %14331 = vmatprep.mubr.msk.bf16.mxu0 %vm887_vm3, %v11522_v30 }
 0x5a0   : > { %14332 = vmatmul.mubr.msk.bf16.gmra.mxu0 %vm887_vm3, %v11524_v21 }
 0x5a6   : > { %v11528_v8 = vpop.permute.xlu1 %11527 }
 0x5a8   : > { %v11526_v1 = vpop.permute.xlu0 %11525 }
 0x5a9   : > { %14335 = vmatprep.mubr.msk.bf16.mxu0 %vm887_vm3, %v11526_v1 }
 0x5aa   : > { %14336 = vmatmul.mubr.msk.bf16.gmra.mxu0 %vm887_vm3, %v11528_v8 }
 0x5b0   : > { %v11532_v28 = vpop.permute.xlu1 %11531 }
 0x5b2   : > { %v11530_v19 = vpop.permute.xlu0 %11529 }
 0x5b3   : > { %14339 = vmatprep.mubr.msk.bf16.mxu0 %vm887_vm3, %v11530_v19 }
 0x5b4   : > { %14340 = vmatmul.mubr.msk.bf16.gmra.mxu0 %vm887_vm3, %v11532_v28 }
 0x5bc   : > { %v11536_v31 = vpop.permute.xlu1 %11535 }
 0x5be   : > { %v11534_v24 = vpop.permute.xlu0 %11533 }
 0x5bf   : > { %14343 = vmatprep.mubr.msk.bf16.mxu0 %vm887_vm3, %v11534_v24 }
 0x5c0   : > { %14344 = vmatmul.mubr.msk.bf16.gmra.mxu0 %vm887_vm3, %v11536_v31 }
 0x5c3   : > { %v14283_v18 = vpop.f32.mrf.mxu1 }
 0x5c4   : > { %v13214_v38 = vpack.c.bf16 %v14283_v18, %v14283_v18 }
 0x5c5   : > { %v11199_v46 = vpop.f32.mrf.mxu1 }
 0x5c6   : > { %11457 = vst.msk [vmem:[%s19415_s11 + $0x8] sm:$0xf] %vm11454_vm12, %v13214_v38  ;;  %v13212_v60 = vpack.c.bf16 %v11199_v46, %v11199_v46 }
 0x5c7   : > { %v14284_v0 = vpop.f32.mrf.mxu1 }
 0x5c8   : > { %11455 = vst.msk [vmem:[%s19415_s11] sm:$0xf] %vm11454_vm12, %v13212_v60  ;;  %v13215_v61 = vpack.c.bf16 %v14284_v0, %v14284_v0 }
 0x5c9   : > { %v11202_v14 = vpop.f32.mrf.mxu1 }
 0x5ca   : > { %11458 = vst.msk [vmem:[%s19415_s11 + $0xc] sm:$0xf] %vm11454_vm12, %v13215_v61  ;;  %v13213_v36 = vpack.c.bf16 %v11202_v14, %v11202_v14 }
 0x5cc   : > { %11456 = vst.msk [vmem:[%s19415_s11 + $0x4] sm:$0xf] %vm11454_vm12, %v13213_v36 }
 0x5ce   : > { %v14287_v16 = vpop.f32.mrf.mxu1 }
 0x5cf   : > { %v13218_v6 = vpack.c.bf16 %v14287_v16, %v14287_v16 }
 0x5d0   : > { %v11215_v34 = vpop.f32.mrf.mxu1 }
 0x5d1   : > { %11461 = vst.msk [vmem:[%s19415_s11 + $0x18] sm:$0xf] %vm11454_vm12, %v13218_v6  ;;  %v13216_v2 = vpack.c.bf16 %v11215_v34, %v11215_v34 }
 0x5d2   : > { %v14288_v47 = vpop.f32.mrf.mxu1 }
 0x5d3   : > { %11459 = vst.msk [vmem:[%s19415_s11 + $0x10] sm:$0xf] %vm11454_vm12, %v13216_v2  ;;  %v13219_v35 = vpack.c.bf16 %v14288_v47, %v14288_v47 }
 0x5d4   : > { %v11218_v37 = vpop.f32.mrf.mxu1 }
 0x5d5   : > { %11462 = vst.msk [vmem:[%s19415_s11 + $0x1c] sm:$0xf] %vm11454_vm12, %v13219_v35  ;;  %v13217_v63 = vpack.c.bf16 %v11218_v37, %v11218_v37 }
 0x5d7   : > { %11460 = vst.msk [vmem:[%s19415_s11 + $0x14] sm:$0xf] %vm11454_vm12, %v13217_v63 }
 0x5d8   : > { %v14291_v57 = vpop.f32.mrf.mxu1 }
 0x5d9   : > { %v13222_v4 = vpack.c.bf16 %v14291_v57, %v14291_v57 }
 0x5da   : > { %v11231_v29 = vpop.f32.mrf.mxu1 }
 0x5db   : > { %11465 = vst.msk [vmem:[%s19415_s11 + $0x28] sm:$0xf] %vm11454_vm12, %v13222_v4  ;;  %v13220_v53 = vpack.c.bf16 %v11231_v29, %v11231_v29 }
 0x5dc   : > { %v14292_v45 = vpop.f32.mrf.mxu1 }
 0x5dd   : > { %11463 = vst.msk [vmem:[%s19415_s11 + $0x20] sm:$0xf] %vm11454_vm12, %v13220_v53  ;;  %v13223_v59 = vpack.c.bf16 %v14292_v45, %v14292_v45 }
 0x5de   : > { %v11234_v43 = vpop.f32.mrf.mxu1 }
 0x5df   : > { %11466 = vst.msk [vmem:[%s19415_s11 + $0x2c] sm:$0xf] %vm11454_vm12, %v13223_v59  ;;  %v13221_v13 = vpack.c.bf16 %v11234_v43, %v11234_v43 }
 0x5e1   : > { %11464 = vst.msk [vmem:[%s19415_s11 + $0x24] sm:$0xf] %vm11454_vm12, %v13221_v13 }
 0x5e3   : > { %v14295_v11 = vpop.f32.mrf.mxu1 }
 0x5e4   : > { %v13226_v42 = vpack.c.bf16 %v14295_v11, %v14295_v11 }
 0x5e5   : > { %v11247_v10 = vpop.f32.mrf.mxu1 }
 0x5e6   : > { %11469 = vst.msk [vmem:[%s19415_s11 + $0x38] sm:$0xf] %vm11454_vm12, %v13226_v42  ;;  %v13224_v54 = vpack.c.bf16 %v11247_v10, %v11247_v10 }
 0x5e7   : > { %v14296_v52 = vpop.f32.mrf.mxu1 }
 0x5e8   : > { %11467 = vst.msk [vmem:[%s19415_s11 + $0x30] sm:$0xf] %vm11454_vm12, %v13224_v54  ;;  %v13227_v20 = vpack.c.bf16 %v14296_v52, %v14296_v52 }
 0x5e9   : > { %v11250_v3 = vpop.f32.mrf.mxu1 }
 0x5ea   : > { %11470 = vst.msk [vmem:[%s19415_s11 + $0x3c] sm:$0xf] %vm11454_vm12, %v13227_v20  ;;  %v13225_v22 = vpack.c.bf16 %v11250_v3, %v11250_v3 }
 0x5ec   : > { %11468 = vst.msk [vmem:[%s19415_s11 + $0x34] sm:$0xf] %vm11454_vm12, %v13225_v22 }
 0x5ed   : > { %v14299_v44 = vpop.f32.mrf.mxu1 }
 0x5ee   : > { %v13230_v33 = vpack.c.bf16 %v14299_v44, %v14299_v44 }
 0x5ef   : > { %v11263_v56 = vpop.f32.mrf.mxu1 }
 0x5f0   : > { %11473 = vst.msk [vmem:[%s19415_s11 + $0x48] sm:$0xf] %vm11454_vm12, %v13230_v33  ;;  %v13228_v41 = vpack.c.bf16 %v11263_v56, %v11263_v56 }
 0x5f1   : > { %v14300_v51 = vpop.f32.mrf.mxu1 }
 0x5f2   : > { %11471 = vst.msk [vmem:[%s19415_s11 + $0x40] sm:$0xf] %vm11454_vm12, %v13228_v41  ;;  %v13231_v23 = vpack.c.bf16 %v14300_v51, %v14300_v51 }
 0x5f3   : > { %v11266_v12 = vpop.f32.mrf.mxu1 }
 0x5f4   : > { %11474 = vst.msk [vmem:[%s19415_s11 + $0x4c] sm:$0xf] %vm11454_vm12, %v13231_v23  ;;  %v13229_v17 = vpack.c.bf16 %v11266_v12, %v11266_v12 }
 0x5f6   : > { %11472 = vst.msk [vmem:[%s19415_s11 + $0x44] sm:$0xf] %vm11454_vm12, %v13229_v17 }
 0x5f7   : > { %v14303_v15 = vpop.f32.mrf.mxu1 }
 0x5f8   : > { %v13234_v39 = vpack.c.bf16 %v14303_v15, %v14303_v15 }
 0x5f9   : > { %v11279_v40 = vpop.f32.mrf.mxu1 }
 0x5fa   : > { %11477 = vst.msk [vmem:[%s19415_s11 + $0x58] sm:$0xf] %vm11454_vm12, %v13234_v39  ;;  %v13232_v7 = vpack.c.bf16 %v11279_v40, %v11279_v40 }
 0x5fb   : > { %v14304_v32 = vpop.f32.mrf.mxu1 }
 0x5fc   : > { %11475 = vst.msk [vmem:[%s19415_s11 + $0x50] sm:$0xf] %vm11454_vm12, %v13232_v7  ;;  %v13235_v58 = vpack.c.bf16 %v14304_v32, %v14304_v32 }
 0x5fd   : > { %v11282_v48 = vpop.f32.mrf.mxu1 }
 0x5fe   : > { %11478 = vst.msk [vmem:[%s19415_s11 + $0x5c] sm:$0xf] %vm11454_vm12, %v13235_v58  ;;  %v13233_v27 = vpack.c.bf16 %v11282_v48, %v11282_v48 }
 0x600   : > { %11476 = vst.msk [vmem:[%s19415_s11 + $0x54] sm:$0xf] %vm11454_vm12, %v13233_v27 }
 0x601   : > { %v14307_v50 = vpop.f32.mrf.mxu1 }
 0x602   : > { %v13238_v25 = vpack.c.bf16 %v14307_v50, %v14307_v50 }
 0x603   : > { %v11295_v55 = vpop.f32.mrf.mxu1 }
 0x604   : > { %11481 = vst.msk [vmem:[%s19415_s11 + $0x68] sm:$0xf] %vm11454_vm12, %v13238_v25  ;;  %v13236_v26 = vpack.c.bf16 %v11295_v55, %v11295_v55 }
 0x605   : > { %v14308_v62 = vpop.f32.mrf.mxu1 }
 0x606   : > { %11479 = vst.msk [vmem:[%s19415_s11 + $0x60] sm:$0xf] %vm11454_vm12, %v13236_v26  ;;  %v13239_v49 = vpack.c.bf16 %v14308_v62, %v14308_v62 }
 0x607   : > { %v11298_v5 = vpop.f32.mrf.mxu1 }
 0x608   : > { %11482 = vst.msk [vmem:[%s19415_s11 + $0x6c] sm:$0xf] %vm11454_vm12, %v13239_v49  ;;  %v13237_v9 = vpack.c.bf16 %v11298_v5, %v11298_v5 }
 0x60a   : > { %11480 = vst.msk [vmem:[%s19415_s11 + $0x64] sm:$0xf] %vm11454_vm12, %v13237_v9 }
 0x60d   : > { %v14311_v30 = vpop.f32.mrf.mxu1 }
 0x60e   : > { %v13242_v21 = vpack.c.bf16 %v14311_v30, %v14311_v30 }
 0x60f   : > { %v11311_v1 = vpop.f32.mrf.mxu1 }
 0x610   : > { %11485 = vst.msk [vmem:[%s19415_s11 + $0x78] sm:$0xf] %vm11454_vm12, %v13242_v21  ;;  %v13240_v8 = vpack.c.bf16 %v11311_v1, %v11311_v1 }
 0x611   : > { %v14312_v19 = vpop.f32.mrf.mxu1 }
 0x612   : > { %11483 = vst.msk [vmem:[%s19415_s11 + $0x70] sm:$0xf] %vm11454_vm12, %v13240_v8  ;;  %v13243_v28 = vpack.c.bf16 %v14312_v19, %v14312_v19 }
 0x613   : > { %v11314_v24 = vpop.f32.mrf.mxu1 }
 0x614   : > { %11486 = vst.msk [vmem:[%s19415_s11 + $0x7c] sm:$0xf] %vm11454_vm12, %v13243_v28  ;;  %v13241_v31 = vpack.c.bf16 %v11314_v24, %v11314_v24 }
 0x616   : > { %11484 = vst.msk [vmem:[%s19415_s11 + $0x74] sm:$0xf] %vm11454_vm12, %v13241_v31 }
 0x639   : > { %v14317_v18 = vpop.f32.mrf.mxu0 }
 0x63a   : > { %v13246_v38 = vpack.c.bf16 %v14317_v18, %v14317_v18 }
 0x63b   : > { %v11622_v46 = vpop.f32.mrf.mxu0 }
 0x63c   : > { %11879 = vst.msk [vmem:[%s19486_s14 + $0x8] sm:$0xf] %vm11454_vm12, %v13246_v38  ;;  %v13244_v60 = vpack.c.bf16 %v11622_v46, %v11622_v46 }
 0x63d   : > { %v14318_v0 = vpop.f32.mrf.mxu0 }
 0x63e   : > { %11877 = vst.msk [vmem:[%s19486_s14] sm:$0xf] %vm11454_vm12, %v13244_v60  ;;  %v13247_v61 = vpack.c.bf16 %v14318_v0, %v14318_v0 }
 0x63f   : > { %v11625_v14 = vpop.f32.mrf.mxu0 }
 0x640   : > { %11880 = vst.msk [vmem:[%s19486_s14 + $0xc] sm:$0xf] %vm11454_vm12, %v13247_v61  ;;  %v13245_v36 = vpack.c.bf16 %v11625_v14, %v11625_v14 }
 0x642   : > { %11878 = vst.msk [vmem:[%s19486_s14 + $0x4] sm:$0xf] %vm11454_vm12, %v13245_v36 }
 0x644   : > { %v14321_v16 = vpop.f32.mrf.mxu0 }
 0x645   : > { %v13250_v6 = vpack.c.bf16 %v14321_v16, %v14321_v16 }
 0x646   : > { %v11638_v34 = vpop.f32.mrf.mxu0 }
 0x647   : > { %11883 = vst.msk [vmem:[%s19486_s14 + $0x18] sm:$0xf] %vm11454_vm12, %v13250_v6  ;;  %v13248_v2 = vpack.c.bf16 %v11638_v34, %v11638_v34 }
 0x648   : > { %v14322_v47 = vpop.f32.mrf.mxu0 }
 0x649   : > { %11881 = vst.msk [vmem:[%s19486_s14 + $0x10] sm:$0xf] %vm11454_vm12, %v13248_v2  ;;  %v13251_v35 = vpack.c.bf16 %v14322_v47, %v14322_v47 }
 0x64a   : > { %v11641_v37 = vpop.f32.mrf.mxu0 }
 0x64b   : > { %11884 = vst.msk [vmem:[%s19486_s14 + $0x1c] sm:$0xf] %vm11454_vm12, %v13251_v35  ;;  %v13249_v63 = vpack.c.bf16 %v11641_v37, %v11641_v37 }
 0x64c   : > { %v14325_v57 = vpop.f32.mrf.mxu0 }
 0x64d   : > { %11882 = vst.msk [vmem:[%s19486_s14 + $0x14] sm:$0xf] %vm11454_vm12, %v13249_v63  ;;  %v13254_v4 = vpack.c.bf16 %v14325_v57, %v14325_v57 }
 0x64e   : > { %v11654_v29 = vpop.f32.mrf.mxu0 }
 0x64f   : > { %11887 = vst.msk [vmem:[%s19486_s14 + $0x28] sm:$0xf] %vm11454_vm12, %v13254_v4  ;;  %v13252_v53 = vpack.c.bf16 %v11654_v29, %v11654_v29 }
 0x650   : > { %v14326_v45 = vpop.f32.mrf.mxu0 }
 0x651   : > { %11885 = vst.msk [vmem:[%s19486_s14 + $0x20] sm:$0xf] %vm11454_vm12, %v13252_v53  ;;  %v13255_v59 = vpack.c.bf16 %v14326_v45, %v14326_v45 }
 0x652   : > { %v11657_v43 = vpop.f32.mrf.mxu0 }
 0x653   : > { %11888 = vst.msk [vmem:[%s19486_s14 + $0x2c] sm:$0xf] %vm11454_vm12, %v13255_v59  ;;  %v13253_v13 = vpack.c.bf16 %v11657_v43, %v11657_v43 }
 0x655   : > { %11886 = vst.msk [vmem:[%s19486_s14 + $0x24] sm:$0xf] %vm11454_vm12, %v13253_v13 }
 0x656   : > { %v14329_v11 = vpop.f32.mrf.mxu0 }
 0x657   : > { %v13258_v42 = vpack.c.bf16 %v14329_v11, %v14329_v11 }
 0x658   : > { %v11670_v10 = vpop.f32.mrf.mxu0 }
 0x659   : > { %11891 = vst.msk [vmem:[%s19486_s14 + $0x38] sm:$0xf] %vm11454_vm12, %v13258_v42  ;;  %v13256_v54 = vpack.c.bf16 %v11670_v10, %v11670_v10 }
 0x65a   : > { %v14330_v52 = vpop.f32.mrf.mxu0 }
 0x65b   : > { %11889 = vst.msk [vmem:[%s19486_s14 + $0x30] sm:$0xf] %vm11454_vm12, %v13256_v54  ;;  %v13259_v20 = vpack.c.bf16 %v14330_v52, %v14330_v52 }
 0x65c   : > { %v11673_v3 = vpop.f32.mrf.mxu0 }
 0x65d   : > { %11892 = vst.msk [vmem:[%s19486_s14 + $0x3c] sm:$0xf] %vm11454_vm12, %v13259_v20  ;;  %v13257_v22 = vpack.c.bf16 %v11673_v3, %v11673_v3 }
 0x65f   : > { %11890 = vst.msk [vmem:[%s19486_s14 + $0x34] sm:$0xf] %vm11454_vm12, %v13257_v22 }
 0x660   : > { %v14333_v44 = vpop.f32.mrf.mxu0 }
 0x661   : > { %v13262_v33 = vpack.c.bf16 %v14333_v44, %v14333_v44 }
 0x662   : > { %v11686_v56 = vpop.f32.mrf.mxu0 }
 0x663   : > { %11895 = vst.msk [vmem:[%s19486_s14 + $0x48] sm:$0xf] %vm11454_vm12, %v13262_v33  ;;  %v13260_v41 = vpack.c.bf16 %v11686_v56, %v11686_v56 }
 0x664   : > { %v14334_v51 = vpop.f32.mrf.mxu0 }
 0x665   : > { %11893 = vst.msk [vmem:[%s19486_s14 + $0x40] sm:$0xf] %vm11454_vm12, %v13260_v41  ;;  %v13263_v23 = vpack.c.bf16 %v14334_v51, %v14334_v51 }
 0x666   : > { %v11689_v12 = vpop.f32.mrf.mxu0 }
 0x667   : > { %11896 = vst.msk [vmem:[%s19486_s14 + $0x4c] sm:$0xf] %vm11454_vm12, %v13263_v23  ;;  %v13261_v17 = vpack.c.bf16 %v11689_v12, %v11689_v12 }
 0x669   : > { %11894 = vst.msk [vmem:[%s19486_s14 + $0x44] sm:$0xf] %vm11454_vm12, %v13261_v17 }
 0x66a   : > { %v14337_v15 = vpop.f32.mrf.mxu0 }
 0x66b   : > { %v13266_v39 = vpack.c.bf16 %v14337_v15, %v14337_v15 }
 0x66c   : > { %v11702_v40 = vpop.f32.mrf.mxu0 }
 0x66d   : > { %11899 = vst.msk [vmem:[%s19486_s14 + $0x58] sm:$0xf] %vm11454_vm12, %v13266_v39  ;;  %v13264_v7 = vpack.c.bf16 %v11702_v40, %v11702_v40 }
 0x66e   : > { %v14338_v32 = vpop.f32.mrf.mxu0 }
 0x66f   : > { %11897 = vst.msk [vmem:[%s19486_s14 + $0x50] sm:$0xf] %vm11454_vm12, %v13264_v7  ;;  %v13267_v58 = vpack.c.bf16 %v14338_v32, %v14338_v32 }
 0x670   : > { %v11705_v48 = vpop.f32.mrf.mxu0 }
 0x671   : > { %11900 = vst.msk [vmem:[%s19486_s14 + $0x5c] sm:$0xf] %vm11454_vm12, %v13267_v58  ;;  %v13265_v27 = vpack.c.bf16 %v11705_v48, %v11705_v48 }
 0x673   : > { %11898 = vst.msk [vmem:[%s19486_s14 + $0x54] sm:$0xf] %vm11454_vm12, %v13265_v27 }
 0x674   : > { %v14341_v50 = vpop.f32.mrf.mxu0 }
 0x675   : > { %v13270_v25 = vpack.c.bf16 %v14341_v50, %v14341_v50 }
 0x676   : > { %v11718_v55 = vpop.f32.mrf.mxu0 }
 0x677   : > { %11903 = vst.msk [vmem:[%s19486_s14 + $0x68] sm:$0xf] %vm11454_vm12, %v13270_v25  ;;  %v13268_v26 = vpack.c.bf16 %v11718_v55, %v11718_v55 }
 0x678   : > { %v14342_v62 = vpop.f32.mrf.mxu0 }
 0x679   : > { %11901 = vst.msk [vmem:[%s19486_s14 + $0x60] sm:$0xf] %vm11454_vm12, %v13268_v26  ;;  %v13271_v49 = vpack.c.bf16 %v14342_v62, %v14342_v62 }
 0x67a   : > { %v11721_v5 = vpop.f32.mrf.mxu0 }
 0x67b   : > { %11904 = vst.msk [vmem:[%s19486_s14 + $0x6c] sm:$0xf] %vm11454_vm12, %v13271_v49  ;;  %v13269_v9 = vpack.c.bf16 %v11721_v5, %v11721_v5 }
 0x67d   : > { %11902 = vst.msk [vmem:[%s19486_s14 + $0x64] sm:$0xf] %vm11454_vm12, %v13269_v9 }
 0x680   : > { %v14345_v30 = vpop.f32.mrf.mxu0 }
 0x681   : > { %v13274_v21 = vpack.c.bf16 %v14345_v30, %v14345_v30 }
 0x682   : > { %v11734_v1 = vpop.f32.mrf.mxu0 }
 0x683   : > { %11907 = vst.msk [vmem:[%s19486_s14 + $0x78] sm:$0xf] %vm11454_vm12, %v13274_v21  ;;  %v13272_v8 = vpack.c.bf16 %v11734_v1, %v11734_v1 }
 0x684   : > { %v14346_v19 = vpop.f32.mrf.mxu0 }
 0x685   : > { %11905 = vst.msk [vmem:[%s19486_s14 + $0x70] sm:$0xf] %vm11454_vm12, %v13272_v8  ;;  %v13275_v28 = vpack.c.bf16 %v14346_v19, %v14346_v19 }
 0x686   : > { %v11737_v24 = vpop.f32.mrf.mxu0 }
 0x687   : > { %11908 = vst.msk [vmem:[%s19486_s14 + $0x7c] sm:$0xf] %vm11454_vm12, %v13275_v28  ;;  %v13273_v31 = vpack.c.bf16 %v11737_v24, %v11737_v24 }
 0x689   : > { %11906 = vst.msk [vmem:[%s19486_s14 + $0x74] sm:$0xf] %vm11454_vm12, %v13273_v31 }
 0x68a PF: > { %s19_s29 = sadd.s32 1, %s14543_s29   ;;  %s20029_s27 = smov %s14539_s28 }
 0x68b   : > { %p16_p5 = scmp.ge.s32.totalorder %s19_s29, 4   ;;  %s20030_s28 = smov %s20032_s30 }
 0x68d   :  { %18 = sbr.rel (!%p16_p5) target bundleno = 2 (0x2), region = 117 }

</bundles_post_ra>
